<compile_context>
chip_gen: v5e
topology: v5e:2x2
jax: 0.10.0
libtpu: 0.0.40
codegen_flags: <defaults>
</compile_context>

<pallas_src>
import jax
import jax.numpy as jnp
from jax.experimental import pallas as pl
from jax.experimental.pallas import tpu as pltpu

LANE = 128
SUBLANE = 8


def _round_up(v, m):
    return ((v + m - 1) // m) * m


def _pick_row_tile(h, w, target_elems=1024):
    """Largest divisor TH of h with TH*w <= target_elems (at least 1)."""
    best = 1
    for th in range(1, h + 1):
        if h % th == 0 and th * w <= target_elems:
            best = th
    return best


def _fold_bn(gamma, beta, mean, var, eps=1e-5):
    scale = gamma / jnp.sqrt(var + eps)
    bias = beta - mean * scale
    return scale, bias


def prepare_params(params, compute_dtype=jnp.bfloat16):
    """Fold BN and pack conv weights ONCE, outside the hot path.

    Weight layout: (3 /*kh*/, Cin_p, 3*Cout_p) with the kw tap major over Cout
    in the last dim, so one dot per kh produces all three kw contributions.
    """
    w1, w2 = params["w1"], params["w2"]
    c_mid, c_in = w1.shape[0], w1.shape[1]
    c_out = w2.shape[0]
    assert c_in == c_out, "shortcut Bottleneck requires c1 == c2"
    c_in_p, c_mid_p, c_out_p = (_round_up(c_in, LANE), _round_up(c_mid, LANE),
                                _round_up(c_out, LANE))

    def pack_w(w, cin, cout, cin_p, cout_p):
        wt = jnp.transpose(w, (2, 3, 1, 0))                       # (3,3,Cin,Cout) [kh,kw,ci,co]
        wt = jnp.pad(wt, ((0, 0), (0, 0), (0, cin_p - cin), (0, cout_p - cout)))
        wt = jnp.transpose(wt, (0, 2, 1, 3))                      # (3,Cin_p,3,Cout_p)
        return wt.reshape(3, cin_p, 3 * cout_p).astype(compute_dtype)

    def pack_affine(scale, bias, cout, cout_p):
        scale = jnp.pad(scale, (0, cout_p - cout)).reshape(1, cout_p).astype(jnp.float32)
        bias = jnp.pad(bias, (0, cout_p - cout)).reshape(1, cout_p).astype(jnp.float32)
        return scale, bias

    s1, b1 = _fold_bn(params["bn1_gamma"], params["bn1_beta"],
                      params["bn1_mean"], params["bn1_var"])
    s2, b2 = _fold_bn(params["bn2_gamma"], params["bn2_beta"],
                      params["bn2_mean"], params["bn2_var"])
    s1, b1 = pack_affine(s1, b1, c_mid, c_mid_p)
    s2, b2 = pack_affine(s2, b2, c_out, c_out_p)
    return {"w1": pack_w(w1, c_in, c_mid, c_in_p, c_mid_p), "s1": s1, "b1": b1,
            "w2": pack_w(w2, c_mid, c_out, c_mid_p, c_out_p), "s2": s2, "b2": b2}


# ----------------------------------------------------------------------------
# Fused Pallas kernel: cv1 -> cv2 -> residual add, one row tile per grid step.
# ----------------------------------------------------------------------------
def _make_fused_kernel(H, W, TH, HT, C1, C2, C1p, Cmp, C2p, Wxp, Whb, cdt):
    M1 = (TH + 2) * Wxp    # cv1 band positions (incl. 1-row halo, padded cols)
    M2 = TH * Whb          # cv2 band positions

    def kernel(x_ref, w1_ref, s1_ref, b1_ref, w2_ref, s2_ref, b2_ref,
               o_ref, xpad_ref, hbuf_ref):
        i = pl.program_id(1)

        # Stage the zero-bordered, channel-padded input once per batch element.
        # xpad row = global row + 2 ; xpad col = global col + 2.
        @pl.when(i == 0)
        def _():
            xpad_ref[...] = jnp.zeros_like(xpad_ref)
            hbuf_ref[...] = jnp.zeros_like(hbuf_ref)
            xpad_ref[2:2 + H, 2:2 + W, :C1] = x_ref[0].astype(cdt)

        r0 = pl.multiple_of(i * TH, TH)

        # ---------------- cv1: 3 dots (one per kh), kw via shifted adds -------
        # h is produced for rows a in [0, TH+2) = global rows [r0-1, r0+TH+1).
        acc1 = jnp.zeros((TH + 2, W + 2, Cmp), jnp.float32)
        for kh in range(3):
            band = xpad_ref[pl.ds(r0 + kh, TH + 2), :, :]          # (TH+2, Wxp, C1p)
            t = jnp.dot(band.reshape(M1, C1p), w1_ref[kh],
                        preferred_element_type=jnp.float32)        # (M1, 3*Cmp)
            t = t.reshape(TH + 2, Wxp, 3 * Cmp)
            for kw in range(3):
                acc1 = acc1 + t[:, kw:kw + W + 2, kw * Cmp:(kw + 1) * Cmp]
        y1 = acc1 * s1_ref[0] + b1_ref[0]          # folded BatchNorm (f32, VPU)
        y1 = y1 * jax.nn.sigmoid(y1)               # SiLU (f32, EUP)

        # hbuf col = h col + 1.  Border h positions (outside the real feature
        # map) must be exactly zero: explicit strip zeroing, no iota/where mask.
        hbuf_ref[:, 0:W + 2, :] = y1.astype(cdt)
        zcol = jnp.zeros((TH + 2, 1, Cmp), cdt)
        hbuf_ref[:, 0:1, :] = zcol
        hbuf_ref[:, W + 1:W + 2, :] = zcol

        @pl.when(i == 0)
        def _():
            hbuf_ref[0:1, :, :] = jnp.zeros((1, Whb, Cmp), cdt)

        @pl.when(i == HT - 1)
        def _():
            hbuf_ref[TH + 1:TH + 2, :, :] = jnp.zeros((1, Whb, Cmp), cdt)

        # ---------------- cv2: same structure over the h tile -----------------
        acc2 = jnp.zeros((TH, W, C2p), jnp.float32)
        for kh in range(3):
            band = hbuf_ref[kh:kh + TH, :, :]                      # (TH, Whb, Cmp)
            t = jnp.dot(band.reshape(M2, Cmp), w2_ref[kh],
                        preferred_element_type=jnp.float32)        # (M2, 3*C2p)
            t = t.reshape(TH, Whb, 3 * C2p)
            for kw in range(3):
                acc2 = acc2 + t[:, kw:kw + W, kw * C2p:(kw + 1) * C2p]
        y2 = acc2 * s2_ref[0] + b2_ref[0]
        y2 = y2 * jax.nn.sigmoid(y2)

        # -------- shortcut add (c1 == c2): exact f32 read of the x block ------
        res = x_ref[0, pl.ds(r0, TH), :, :].astype(jnp.float32)    # (TH, W, C1)
        out = y2[:, :, :C2] + res
        o_ref[...] = out.reshape(1, TH, W, C2).astype(o_ref.dtype)

    return kernel


def _fused_bottleneck(x_nhwc, p):
    N, H, W, C1 = x_nhwc.shape
    w1, s1, b1 = p["w1"], p["s1"], p["b1"]
    w2, s2, b2 = p["w2"], p["s2"], p["b2"]
    C1p = w1.shape[1]
    Cmp = w1.shape[2] // 3
    C2p = w2.shape[2] // 3
    C2 = C1                                  # shortcut branch requires c1 == c2
    cdt = w1.dtype

    TH = _pick_row_tile(H, W)
    HT = H // TH
    Wxp = _round_up(W + 4, SUBLANE)          # xpad width  (2-px border + pad cols)
    Whb = _round_up(W + 2, SUBLANE)          # hbuf width  (1-px border + pad cols)
    M1 = (TH + 2) * Wxp
    M2 = TH * Whb

    kernel = _make_fused_kernel(H, W, TH, HT, C1, C2, C1p, Cmp, C2p, Wxp, Whb, cdt)

    item_c = jnp.dtype(cdt).itemsize
    item_x = jnp.dtype(x_nhwc.dtype).itemsize

    # VMEM budget from actual sizes (scratch + double-buffered blocks + temps).
    scratch_bytes = ((H + 4) * Wxp * C1p + (TH + 2) * Whb * Cmp) * item_c
    block_bytes = 2 * (H * W * C1 * item_x + TH * W * C2 * item_x
                       + 3 * C1p * 3 * Cmp * item_c + 3 * Cmp * 3 * C2p * item_c
                       + 4 * 2 * (Cmp + C2p))
    temp_bytes = 4 * (M1 * 3 * Cmp + (TH + 2) * (W + 2) * Cmp
                      + M2 * 3 * C2p + TH * W * C2p)
    vmem_limit = int(min(100 * 2**20,
                         max(32 * 2**20, (scratch_bytes + block_bytes + temp_bytes) * 3 // 2)))

    cost = pl.CostEstimate(
        flops=2 * N * HT * (M1 * C1p * 3 * Cmp + M2 * Cmp * 3 * C2p),
        transcendentals=N * HT * ((TH + 2) * (W + 2) * Cmp + TH * W * C2p),
        bytes_accessed=(2 * x_nhwc.size * item_x
                        + (w1.size + w2.size) * item_c
                        + 4 * (s1.size + b1.size + s2.size + b2.size)),
    )

    grid_spec = pltpu.PrefetchScalarGridSpec(
        num_scalar_prefetch=0,
        grid=(N, HT),
        in_specs=[
            pl.BlockSpec((1, H, W, C1), lambda n, i: (n, 0, 0, 0)),     # x (resident per n)
            pl.BlockSpec((3, C1p, 3 * Cmp), lambda n, i: (0, 0, 0)),    # packed w1
            pl.BlockSpec((1, Cmp), lambda n, i: (0, 0)),                # bn1 scale
            pl.BlockSpec((1, Cmp), lambda n, i: (0, 0)),                # bn1 bias
            pl.BlockSpec((3, Cmp, 3 * C2p), lambda n, i: (0, 0, 0)),    # packed w2
            pl.BlockSpec((1, C2p), lambda n, i: (0, 0)),                # bn2 scale
            pl.BlockSpec((1, C2p), lambda n, i: (0, 0)),                # bn2 bias
        ],
        out_specs=pl.BlockSpec((1, TH, W, C2), lambda n, i: (n, i, 0, 0)),
        scratch_shapes=[
            pltpu.VMEM((H + 4, Wxp, C1p), cdt),      # zero-bordered input image
            pltpu.VMEM((TH + 2, Whb, Cmp), cdt),     # cv1 output tile + 1-row halo
        ],
    )

    return pl.pallas_call(
        kernel,
        out_shape=jax.ShapeDtypeStruct((N, H, W, C2), x_nhwc.dtype),
        grid_spec=grid_spec,
        compiler_params=pltpu.CompilerParams(
            dimension_semantics=("parallel", "arbitrary"),
            vmem_limit_bytes=vmem_limit),
        cost_estimate=cost,
    )(x_nhwc, w1, s1, b1, w2, s2, b2)


@jax.jit
def bottleneck_forward(x_nchw, prepped_params):
    """PyTorch-compatible entry: NCHW in, NCHW out."""
    x = jnp.transpose(x_nchw, (0, 2, 3, 1))          # -> NHWC (lane dim = C)
    y = _fused_bottleneck(x, prepped_params)
    return jnp.transpose(y, (0, 3, 1, 2))            # -> NCHW


# ----------------------------------------------------------------------------
# Pure-JAX reference (for correctness check)
# ----------------------------------------------------------------------------
def _ref_forward(x_nchw, params):
    def conv_bn_silu(x, w, g, bt, m, v):
        y = jax.lax.conv_general_dilated(
            x, w, window_strides=(1, 1), padding=((1, 1), (1, 1)),
            dimension_numbers=("NCHW", "OIHW", "NCHW"))
        scale = g / jnp.sqrt(v + 1e-5)
        bias = bt - m * scale
        y = y * scale[None, :, None, None] + bias[None, :, None, None]
        return y * jax.nn.sigmoid(y)

    h = conv_bn_silu(x_nchw, params["w1"], params["bn1_gamma"], params["bn1_beta"],
                     params["bn1_mean"], params["bn1_var"])
    y = conv_bn_silu(h, params["w2"], params["bn2_gamma"], params["bn2_beta"],
                     params["bn2_mean"], params["bn2_var"])
    return x_nchw + y


# ----------------------------------------------------------------------------
# Main
# ----------------------------------------------------------------------------
if __name__ == "__main__":
    key = jax.random.PRNGKey(0)
    N, C1, H, W = 2, 4, 16, 16
    C2 = C1               # shortcut requires c1 == c2
    C_ = int(C2 * 0.5)    # hidden channels = 2

    ks = jax.random.split(key, 9)
    params = {
        "w1": 0.1 * jax.random.normal(ks[0], (C_, C1, 3, 3), jnp.float32),
        "w2": 0.1 * jax.random.normal(ks[1], (C2, C_, 3, 3), jnp.float32),
        "bn1_gamma": 1.0 + 0.1 * jax.random.normal(ks[2], (C_,), jnp.float32),
        "bn1_beta": 0.1 * jax.random.normal(ks[3], (C_,), jnp.float32),
        "bn1_mean": 0.05 * jax.random.normal(ks[4], (C_,), jnp.float32),
        "bn1_var": jnp.abs(1.0 + 0.1 * jax.random.normal(ks[5], (C_,), jnp.float32)),
        "bn2_gamma": 1.0 + 0.1 * jax.random.normal(ks[6], (C2,), jnp.float32),
        "bn2_beta": 0.1 * jax.random.normal(ks[7], (C2,), jnp.float32),
        "bn2_mean": jnp.zeros((C2,), jnp.float32),
        "bn2_var": jnp.ones((C2,), jnp.float32),
    }
    x = jax.random.normal(ks[8], (N, C1, H, W), jnp.float32)

    ref = _ref_forward(x, params)

    # f32 compute path (tight numerical check).
    prepped_f32 = prepare_params(params, jnp.float32)
    out_f32 = jax.block_until_ready(bottleneck_forward(x, prepped_f32))
    assert out_f32.shape == (N, C2, H, W)
    assert jnp.allclose(out_f32, ref, atol=1e-4, rtol=1e-4), "f32 mismatch vs reference"

    # bf16 MXU-operand path (recommended on v5e/v6e/v7x); accumulation, BN/SiLU
    # and the residual add stay f32.  Note: staged activations (xpad/hbuf) are
    # bf16, so conv inputs are quantized; the residual read is exact f32.
    prepped_bf16 = prepare_params(params, jnp.bfloat16)
    out_bf16 = jax.block_until_ready(bottleneck_forward(x, prepped_bf16))
    assert out_bf16.shape == (N, C2, H, W)
    assert jnp.allclose(out_bf16, ref, atol=5e-2, rtol=5e-2), "bf16 mismatch vs reference"

    print("KERNEL_OK")
</pallas_src>

<mosaic_0001>
module attributes {stable_mosaic.version = 11 : i64} {
  func.func @kernel(%arg0: i32, %arg1: i32, %arg2: memref<1x16x16x4xf32, #tpu.memory_space<vmem>>, %arg3: memref<3x128x384xf32, #tpu.memory_space<vmem>>, %arg4: memref<1x128xf32, #tpu.memory_space<vmem>>, %arg5: memref<1x128xf32, #tpu.memory_space<vmem>>, %arg6: memref<3x128x384xf32, #tpu.memory_space<vmem>>, %arg7: memref<1x128xf32, #tpu.memory_space<vmem>>, %arg8: memref<1x128xf32, #tpu.memory_space<vmem>>, %arg9: memref<1x16x16x4xf32, #tpu.memory_space<vmem>>, %arg10: memref<20x24x128xf32, #tpu.memory_space<vmem>>, %arg11: memref<18x24x128xf32, #tpu.memory_space<vmem>>) attributes {dimension_semantics = [#tpu.dimension_semantics<parallel>, #tpu.dimension_semantics<arbitrary>], iteration_bounds = array<i64: 2, 1>, scalar_prefetch = 0 : i64, scratch_operands = 2 : i64, tpu.core_type = #tpu.core_type<tc>, window_params = [{transform_indices = @transform_0, window_bounds = array<i64: 1, 16, 16, 4>}, {pipeline_mode = #tpu.pipeline_mode<synchronous>, transform_indices = @transform_1, window_bounds = array<i64: 3, 128, 384>}, {pipeline_mode = #tpu.pipeline_mode<synchronous>, transform_indices = @transform_2, window_bounds = array<i64: 1, 128>}, {pipeline_mode = #tpu.pipeline_mode<synchronous>, transform_indices = @transform_3, window_bounds = array<i64: 1, 128>}, {pipeline_mode = #tpu.pipeline_mode<synchronous>, transform_indices = @transform_4, window_bounds = array<i64: 3, 128, 384>}, {pipeline_mode = #tpu.pipeline_mode<synchronous>, transform_indices = @transform_5, window_bounds = array<i64: 1, 128>}, {pipeline_mode = #tpu.pipeline_mode<synchronous>, transform_indices = @transform_6, window_bounds = array<i64: 1, 128>}, {transform_indices = @transform_7, window_bounds = array<i64: 1, 16, 16, 4>}]} {
    %c0_i32 = arith.constant 0 : i32
    %0 = arith.cmpi eq, %arg1, %c0_i32 : i32
    %1 = arith.extui %0 : i1 to i32
    %c0_i32_0 = arith.constant 0 : i32
    %2 = arith.cmpi ne, %1, %c0_i32_0 : i32
    scf.if %2 {
      %cst_69 = arith.constant 0.000000e+00 : f32
      %134 = vector.broadcast %cst_69 : f32 to vector<20x24x128xf32>
      %c0_70 = arith.constant 0 : index
      %c0_71 = arith.constant 0 : index
      %c0_72 = arith.constant 0 : index
      %135 = vector.load %arg10[%c0_70, %c0_71, %c0_72] : memref<20x24x128xf32, #tpu.memory_space<vmem>>, vector<20x24x128xf32>
      tpu.vector_store %arg10[%c0_70, %c0_71, %c0_72], %134 {strides = array<i32>} : memref<20x24x128xf32, #tpu.memory_space<vmem>>, vector<20x24x128xf32>,
      %cst_73 = arith.constant 0.000000e+00 : f32
      %136 = vector.broadcast %cst_73 : f32 to vector<18x24x128xf32>
      %c0_74 = arith.constant 0 : index
      %c0_75 = arith.constant 0 : index
      %c0_76 = arith.constant 0 : index
      %137 = vector.load %arg11[%c0_74, %c0_75, %c0_76] : memref<18x24x128xf32, #tpu.memory_space<vmem>>, vector<18x24x128xf32>
      tpu.vector_store %arg11[%c0_74, %c0_75, %c0_76], %136 {strides = array<i32>} : memref<18x24x128xf32, #tpu.memory_space<vmem>>, vector<18x24x128xf32>,
      %c0_77 = arith.constant 0 : index
      %c0_78 = arith.constant 0 : index
      %c0_79 = arith.constant 0 : index
      %c0_80 = arith.constant 0 : index
      %138 = vector.load %arg2[%c0_77, %c0_78, %c0_79, %c0_80] : memref<1x16x16x4xf32, #tpu.memory_space<vmem>>, vector<1x16x16x4xf32>
      %139 = vector.shape_cast %138 : vector<1x16x16x4xf32> to vector<16x16x4xf32>
      %c2_81 = arith.constant 2 : index
      %c2_82 = arith.constant 2 : index
      %c0_83 = arith.constant 0 : index
      %140 = vector.load %arg10[%c2_81, %c2_82, %c0_83] : memref<20x24x128xf32, #tpu.memory_space<vmem>>, vector<16x16x4xf32>
      tpu.vector_store %arg10[%c2_81, %c2_82, %c0_83], %139 {strides = array<i32>} : memref<20x24x128xf32, #tpu.memory_space<vmem>>, vector<16x16x4xf32>,
    } else {
    }
    %c16_i32 = arith.constant 16 : i32
    %3 = arith.muli %arg1, %c16_i32 : i32
    %4 = tpu.assume_multiple %3, 16 : i32
    %cst = arith.constant 0.000000e+00 : f32
    %5 = vector.broadcast %cst : f32 to vector<18x18x128xf32>
    %c0_i32_1 = arith.constant 0 : i32
    %6 = arith.addi %4, %c0_i32_1 : i32
    %7 = arith.index_cast %6 : i32 to index
    %c0 = arith.constant 0 : index
    %c0_2 = arith.constant 0 : index
    %8 = vector.load %arg10[%7, %c0, %c0_2] : memref<20x24x128xf32, #tpu.memory_space<vmem>>, vector<18x24x128xf32>
    %9 = vector.shape_cast %8 : vector<18x24x128xf32> to vector<432x128xf32>
    %c0_3 = arith.constant 0 : index
    %c0_4 = arith.constant 0 : index
    %c0_5 = arith.constant 0 : index
    %10 = vector.load %arg3[%c0_3, %c0_4, %c0_5] : memref<3x128x384xf32, #tpu.memory_space<vmem>>, vector<1x128x384xf32>
    %11 = vector.shape_cast %10 : vector<1x128x384xf32> to vector<128x384xf32>
    %cst_6 = arith.constant dense<0.000000e+00> : vector<432x384xf32>
    %12 = tpu.matmul %9, %11, %cst_6 {dimension_numbers = #tpu.dot_dimension_numbers<[1], [0], [0], [1], [0, 0, 1, 1], [], []>} : vector<432x128xf32>, vector<128x384xf32>, vector<432x384xf32> -> vector<432x384xf32>
    %13 = vector.shape_cast %12 : vector<432x384xf32> to vector<18x24x384xf32>
    %14 = vector.extract_strided_slice %13 {offsets = [0, 0, 0], sizes = [18, 18, 128], strides = [1, 1, 1]} : vector<18x24x384xf32> to vector<18x18x128xf32>
    %15 = arith.addf %5, %14 : vector<18x18x128xf32>
    %16 = vector.extract_strided_slice %13 {offsets = [0, 1, 128], sizes = [18, 18, 128], strides = [1, 1, 1]} : vector<18x24x384xf32> to vector<18x18x128xf32>
    %17 = arith.addf %15, %16 : vector<18x18x128xf32>
    %18 = vector.extract_strided_slice %13 {offsets = [0, 2, 256], sizes = [18, 18, 128], strides = [1, 1, 1]} : vector<18x24x384xf32> to vector<18x18x128xf32>
    %19 = arith.addf %17, %18 : vector<18x18x128xf32>
    %c1_i32 = arith.constant 1 : i32
    %20 = arith.addi %4, %c1_i32 : i32
    %21 = arith.index_cast %20 : i32 to index
    %c0_7 = arith.constant 0 : index
    %c0_8 = arith.constant 0 : index
    %22 = vector.load %arg10[%21, %c0_7, %c0_8] : memref<20x24x128xf32, #tpu.memory_space<vmem>>, vector<18x24x128xf32>
    %23 = vector.shape_cast %22 : vector<18x24x128xf32> to vector<432x128xf32>
    %c1 = arith.constant 1 : index
    %c0_9 = arith.constant 0 : index
    %c0_10 = arith.constant 0 : index
    %24 = vector.load %arg3[%c1, %c0_9, %c0_10] : memref<3x128x384xf32, #tpu.memory_space<vmem>>, vector<1x128x384xf32>
    %25 = vector.shape_cast %24 : vector<1x128x384xf32> to vector<128x384xf32>
    %cst_11 = arith.constant dense<0.000000e+00> : vector<432x384xf32>
    %26 = tpu.matmul %23, %25, %cst_11 {dimension_numbers = #tpu.dot_dimension_numbers<[1], [0], [0], [1], [0, 0, 1, 1], [], []>} : vector<432x128xf32>, vector<128x384xf32>, vector<432x384xf32> -> vector<432x384xf32>
    %27 = vector.shape_cast %26 : vector<432x384xf32> to vector<18x24x384xf32>
    %28 = vector.extract_strided_slice %27 {offsets = [0, 0, 0], sizes = [18, 18, 128], strides = [1, 1, 1]} : vector<18x24x384xf32> to vector<18x18x128xf32>
    %29 = arith.addf %19, %28 : vector<18x18x128xf32>
    %30 = vector.extract_strided_slice %27 {offsets = [0, 1, 128], sizes = [18, 18, 128], strides = [1, 1, 1]} : vector<18x24x384xf32> to vector<18x18x128xf32>
    %31 = arith.addf %29, %30 : vector<18x18x128xf32>
    %32 = vector.extract_strided_slice %27 {offsets = [0, 2, 256], sizes = [18, 18, 128], strides = [1, 1, 1]} : vector<18x24x384xf32> to vector<18x18x128xf32>
    %33 = arith.addf %31, %32 : vector<18x18x128xf32>
    %c2_i32 = arith.constant 2 : i32
    %34 = arith.addi %4, %c2_i32 : i32
    %35 = arith.index_cast %34 : i32 to index
    %c0_12 = arith.constant 0 : index
    %c0_13 = arith.constant 0 : index
    %36 = vector.load %arg10[%35, %c0_12, %c0_13] : memref<20x24x128xf32, #tpu.memory_space<vmem>>, vector<18x24x128xf32>
    %37 = vector.shape_cast %36 : vector<18x24x128xf32> to vector<432x128xf32>
    %c2 = arith.constant 2 : index
    %c0_14 = arith.constant 0 : index
    %c0_15 = arith.constant 0 : index
    %38 = vector.load %arg3[%c2, %c0_14, %c0_15] : memref<3x128x384xf32, #tpu.memory_space<vmem>>, vector<1x128x384xf32>
    %39 = vector.shape_cast %38 : vector<1x128x384xf32> to vector<128x384xf32>
    %cst_16 = arith.constant dense<0.000000e+00> : vector<432x384xf32>
    %40 = tpu.matmul %37, %39, %cst_16 {dimension_numbers = #tpu.dot_dimension_numbers<[1], [0], [0], [1], [0, 0, 1, 1], [], []>} : vector<432x128xf32>, vector<128x384xf32>, vector<432x384xf32> -> vector<432x384xf32>
    %41 = vector.shape_cast %40 : vector<432x384xf32> to vector<18x24x384xf32>
    %42 = vector.extract_strided_slice %41 {offsets = [0, 0, 0], sizes = [18, 18, 128], strides = [1, 1, 1]} : vector<18x24x384xf32> to vector<18x18x128xf32>
    %43 = arith.addf %33, %42 : vector<18x18x128xf32>
    %44 = vector.extract_strided_slice %41 {offsets = [0, 1, 128], sizes = [18, 18, 128], strides = [1, 1, 1]} : vector<18x24x384xf32> to vector<18x18x128xf32>
    %45 = arith.addf %43, %44 : vector<18x18x128xf32>
    %46 = vector.extract_strided_slice %41 {offsets = [0, 2, 256], sizes = [18, 18, 128], strides = [1, 1, 1]} : vector<18x24x384xf32> to vector<18x18x128xf32>
    %47 = arith.addf %45, %46 : vector<18x18x128xf32>
    %c0_17 = arith.constant 0 : index
    %c0_18 = arith.constant 0 : index
    %48 = vector.load %arg4[%c0_17, %c0_18] : memref<1x128xf32, #tpu.memory_space<vmem>>, vector<1x128xf32>
    %49 = vector.shape_cast %48 : vector<1x128xf32> to vector<128xf32>
    %50 = vector.shape_cast %49 : vector<128xf32> to vector<1x1x128xf32>
    %51 = vector.broadcast %50 : vector<1x1x128xf32> to vector<18x18x128xf32>
    %52 = arith.mulf %47, %51 : vector<18x18x128xf32>
    %c0_19 = arith.constant 0 : index
    %c0_20 = arith.constant 0 : index
    %53 = vector.load %arg5[%c0_19, %c0_20] : memref<1x128xf32, #tpu.memory_space<vmem>>, vector<1x128xf32>
    %54 = vector.shape_cast %53 : vector<1x128xf32> to vector<128xf32>
    %55 = vector.shape_cast %54 : vector<128xf32> to vector<1x1x128xf32>
    %56 = vector.broadcast %55 : vector<1x1x128xf32> to vector<18x18x128xf32>
    %57 = arith.addf %52, %56 : vector<18x18x128xf32>
    %58 = arith.negf %57 : vector<18x18x128xf32>
    %59 = math.exp %58 : vector<18x18x128xf32>
    %cst_21 = arith.constant 1.000000e+00 : f32
    %60 = vector.broadcast %cst_21 : f32 to vector<18x18x128xf32>
    %61 = arith.addf %60, %59 : vector<18x18x128xf32>
    %62 = arith.divf %60, %61 : vector<18x18x128xf32>
    %63 = arith.mulf %57, %62 : vector<18x18x128xf32>
    %c0_22 = arith.constant 0 : index
    %c0_23 = arith.constant 0 : index
    %c0_24 = arith.constant 0 : index
    %64 = vector.load %arg11[%c0_22, %c0_23, %c0_24] : memref<18x24x128xf32, #tpu.memory_space<vmem>>, vector<18x18x128xf32>
    tpu.vector_store %arg11[%c0_22, %c0_23, %c0_24], %63 {strides = array<i32>} : memref<18x24x128xf32, #tpu.memory_space<vmem>>, vector<18x18x128xf32>,
    %cst_25 = arith.constant 0.000000e+00 : f32
    %65 = vector.broadcast %cst_25 : f32 to vector<18x1x128xf32>
    %c0_26 = arith.constant 0 : index
    %c0_27 = arith.constant 0 : index
    %c0_28 = arith.constant 0 : index
    %66 = vector.load %arg11[%c0_26, %c0_27, %c0_28] : memref<18x24x128xf32, #tpu.memory_space<vmem>>, vector<18x1x128xf32>
    tpu.vector_store %arg11[%c0_26, %c0_27, %c0_28], %65 {strides = array<i32>} : memref<18x24x128xf32, #tpu.memory_space<vmem>>, vector<18x1x128xf32>,
    %c0_29 = arith.constant 0 : index
    %c17 = arith.constant 17 : index
    %c0_30 = arith.constant 0 : index
    %67 = vector.load %arg11[%c0_29, %c17, %c0_30] : memref<18x24x128xf32, #tpu.memory_space<vmem>>, vector<18x1x128xf32>
    tpu.vector_store %arg11[%c0_29, %c17, %c0_30], %65 {strides = array<i32>} : memref<18x24x128xf32, #tpu.memory_space<vmem>>, vector<18x1x128xf32>,
    %c0_i32_31 = arith.constant 0 : i32
    %68 = arith.cmpi eq, %arg1, %c0_i32_31 : i32
    %69 = arith.extui %68 : i1 to i32
    %c0_i32_32 = arith.constant 0 : i32
    %70 = arith.cmpi ne, %69, %c0_i32_32 : i32
    scf.if %70 {
      %cst_69 = arith.constant 0.000000e+00 : f32
      %134 = vector.broadcast %cst_69 : f32 to vector<1x24x128xf32>
      %c0_70 = arith.constant 0 : index
      %c0_71 = arith.constant 0 : index
      %c0_72 = arith.constant 0 : index
      %135 = vector.load %arg11[%c0_70, %c0_71, %c0_72] : memref<18x24x128xf32, #tpu.memory_space<vmem>>, vector<1x24x128xf32>
      tpu.vector_store %arg11[%c0_70, %c0_71, %c0_72], %134 {strides = array<i32>} : memref<18x24x128xf32, #tpu.memory_space<vmem>>, vector<1x24x128xf32>,
    } else {
    }
    %c0_i32_33 = arith.constant 0 : i32
    %71 = arith.cmpi eq, %arg1, %c0_i32_33 : i32
    %72 = arith.extui %71 : i1 to i32
    %c0_i32_34 = arith.constant 0 : i32
    %73 = arith.cmpi ne, %72, %c0_i32_34 : i32
    scf.if %73 {
      %cst_69 = arith.constant 0.000000e+00 : f32
      %134 = vector.broadcast %cst_69 : f32 to vector<1x24x128xf32>
      %c17_70 = arith.constant 17 : index
      %c0_71 = arith.constant 0 : index
      %c0_72 = arith.constant 0 : index
      %135 = vector.load %arg11[%c17_70, %c0_71, %c0_72] : memref<18x24x128xf32, #tpu.memory_space<vmem>>, vector<1x24x128xf32>
      tpu.vector_store %arg11[%c17_70, %c0_71, %c0_72], %134 {strides = array<i32>} : memref<18x24x128xf32, #tpu.memory_space<vmem>>, vector<1x24x128xf32>,
    } else {
    }
    %cst_35 = arith.constant 0.000000e+00 : f32
    %74 = vector.broadcast %cst_35 : f32 to vector<16x16x128xf32>
    %c0_36 = arith.constant 0 : index
    %c0_37 = arith.constant 0 : index
    %c0_38 = arith.constant 0 : index
    %75 = vector.load %arg11[%c0_36, %c0_37, %c0_38] : memref<18x24x128xf32, #tpu.memory_space<vmem>>, vector<16x24x128xf32>
    %76 = vector.shape_cast %75 : vector<16x24x128xf32> to vector<384x128xf32>
    %c0_39 = arith.constant 0 : index
    %c0_40 = arith.constant 0 : index
    %c0_41 = arith.constant 0 : index
    %77 = vector.load %arg6[%c0_39, %c0_40, %c0_41] : memref<3x128x384xf32, #tpu.memory_space<vmem>>, vector<1x128x384xf32>
    %78 = vector.shape_cast %77 : vector<1x128x384xf32> to vector<128x384xf32>
    %cst_42 = arith.constant dense<0.000000e+00> : vector<384x384xf32>
    %79 = tpu.matmul %76, %78, %cst_42 {dimension_numbers = #tpu.dot_dimension_numbers<[1], [0], [0], [1], [0, 0, 1, 1], [], []>} : vector<384x128xf32>, vector<128x384xf32>, vector<384x384xf32> -> vector<384x384xf32>
    %80 = vector.shape_cast %79 : vector<384x384xf32> to vector<16x24x384xf32>
    %81 = vector.extract_strided_slice %80 {offsets = [0, 0, 0], sizes = [16, 16, 128], strides = [1, 1, 1]} : vector<16x24x384xf32> to vector<16x16x128xf32>
    %82 = arith.addf %74, %81 : vector<16x16x128xf32>
    %83 = vector.extract_strided_slice %80 {offsets = [0, 1, 128], sizes = [16, 16, 128], strides = [1, 1, 1]} : vector<16x24x384xf32> to vector<16x16x128xf32>
    %84 = arith.addf %82, %83 : vector<16x16x128xf32>
    %85 = vector.extract_strided_slice %80 {offsets = [0, 2, 256], sizes = [16, 16, 128], strides = [1, 1, 1]} : vector<16x24x384xf32> to vector<16x16x128xf32>
    %86 = arith.addf %84, %85 : vector<16x16x128xf32>
    %c1_43 = arith.constant 1 : index
    %c0_44 = arith.constant 0 : index
    %c0_45 = arith.constant 0 : index
    %87 = vector.load %arg11[%c1_43, %c0_44, %c0_45] : memref<18x24x128xf32, #tpu.memory_space<vmem>>, vector<16x24x128xf32>
    %88 = vector.shape_cast %87 : vector<16x24x128xf32> to vector<384x128xf32>
    %c1_46 = arith.constant 1 : index
    %c0_47 = arith.constant 0 : index
    %c0_48 = arith.constant 0 : index
    %89 = vector.load %arg6[%c1_46, %c0_47, %c0_48] : memref<3x128x384xf32, #tpu.memory_space<vmem>>, vector<1x128x384xf32>
    %90 = vector.shape_cast %89 : vector<1x128x384xf32> to vector<128x384xf32>
    %cst_49 = arith.constant dense<0.000000e+00> : vector<384x384xf32>
    %91 = tpu.matmul %88, %90, %cst_49 {dimension_numbers = #tpu.dot_dimension_numbers<[1], [0], [0], [1], [0, 0, 1, 1], [], []>} : vector<384x128xf32>, vector<128x384xf32>, vector<384x384xf32> -> vector<384x384xf32>
    %92 = vector.shape_cast %91 : vector<384x384xf32> to vector<16x24x384xf32>
    %93 = vector.extract_strided_slice %92 {offsets = [0, 0, 0], sizes = [16, 16, 128], strides = [1, 1, 1]} : vector<16x24x384xf32> to vector<16x16x128xf32>
    %94 = arith.addf %86, %93 : vector<16x16x128xf32>
    %95 = vector.extract_strided_slice %92 {offsets = [0, 1, 128], sizes = [16, 16, 128], strides = [1, 1, 1]} : vector<16x24x384xf32> to vector<16x16x128xf32>
    %96 = arith.addf %94, %95 : vector<16x16x128xf32>
    %97 = vector.extract_strided_slice %92 {offsets = [0, 2, 256], sizes = [16, 16, 128], strides = [1, 1, 1]} : vector<16x24x384xf32> to vector<16x16x128xf32>
    %98 = arith.addf %96, %97 : vector<16x16x128xf32>
    %c2_50 = arith.constant 2 : index
    %c0_51 = arith.constant 0 : index
    %c0_52 = arith.constant 0 : index
    %99 = vector.load %arg11[%c2_50, %c0_51, %c0_52] : memref<18x24x128xf32, #tpu.memory_space<vmem>>, vector<16x24x128xf32>
    %100 = vector.shape_cast %99 : vector<16x24x128xf32> to vector<384x128xf32>
    %c2_53 = arith.constant 2 : index
    %c0_54 = arith.constant 0 : index
    %c0_55 = arith.constant 0 : index
    %101 = vector.load %arg6[%c2_53, %c0_54, %c0_55] : memref<3x128x384xf32, #tpu.memory_space<vmem>>, vector<1x128x384xf32>
    %102 = vector.shape_cast %101 : vector<1x128x384xf32> to vector<128x384xf32>
    %cst_56 = arith.constant dense<0.000000e+00> : vector<384x384xf32>
    %103 = tpu.matmul %100, %102, %cst_56 {dimension_numbers = #tpu.dot_dimension_numbers<[1], [0], [0], [1], [0, 0, 1, 1], [], []>} : vector<384x128xf32>, vector<128x384xf32>, vector<384x384xf32> -> vector<384x384xf32>
    %104 = vector.shape_cast %103 : vector<384x384xf32> to vector<16x24x384xf32>
    %105 = vector.extract_strided_slice %104 {offsets = [0, 0, 0], sizes = [16, 16, 128], strides = [1, 1, 1]} : vector<16x24x384xf32> to vector<16x16x128xf32>
    %106 = arith.addf %98, %105 : vector<16x16x128xf32>
    %107 = vector.extract_strided_slice %104 {offsets = [0, 1, 128], sizes = [16, 16, 128], strides = [1, 1, 1]} : vector<16x24x384xf32> to vector<16x16x128xf32>
    %108 = arith.addf %106, %107 : vector<16x16x128xf32>
    %109 = vector.extract_strided_slice %104 {offsets = [0, 2, 256], sizes = [16, 16, 128], strides = [1, 1, 1]} : vector<16x24x384xf32> to vector<16x16x128xf32>
    %110 = arith.addf %108, %109 : vector<16x16x128xf32>
    %c0_57 = arith.constant 0 : index
    %c0_58 = arith.constant 0 : index
    %111 = vector.load %arg7[%c0_57, %c0_58] : memref<1x128xf32, #tpu.memory_space<vmem>>, vector<1x128xf32>
    %112 = vector.shape_cast %111 : vector<1x128xf32> to vector<128xf32>
    %113 = vector.shape_cast %112 : vector<128xf32> to vector<1x1x128xf32>
    %114 = vector.broadcast %113 : vector<1x1x128xf32> to vector<16x16x128xf32>
    %115 = arith.mulf %110, %114 : vector<16x16x128xf32>
    %c0_59 = arith.constant 0 : index
    %c0_60 = arith.constant 0 : index
    %116 = vector.load %arg8[%c0_59, %c0_60] : memref<1x128xf32, #tpu.memory_space<vmem>>, vector<1x128xf32>
    %117 = vector.shape_cast %116 : vector<1x128xf32> to vector<128xf32>
    %118 = vector.shape_cast %117 : vector<128xf32> to vector<1x1x128xf32>
    %119 = vector.broadcast %118 : vector<1x1x128xf32> to vector<16x16x128xf32>
    %120 = arith.addf %115, %119 : vector<16x16x128xf32>
    %121 = arith.negf %120 : vector<16x16x128xf32>
    %122 = math.exp %121 : vector<16x16x128xf32>
    %cst_61 = arith.constant 1.000000e+00 : f32
    %123 = vector.broadcast %cst_61 : f32 to vector<16x16x128xf32>
    %124 = arith.addf %123, %122 : vector<16x16x128xf32>
    %125 = arith.divf %123, %124 : vector<16x16x128xf32>
    %126 = arith.mulf %120, %125 : vector<16x16x128xf32>
    %c0_62 = arith.constant 0 : index
    %127 = arith.index_cast %4 : i32 to index
    %c0_63 = arith.constant 0 : index
    %c0_64 = arith.constant 0 : index
    %128 = vector.load %arg2[%c0_62, %127, %c0_63, %c0_64] : memref<1x16x16x4xf32, #tpu.memory_space<vmem>>, vector<1x16x16x4xf32>
    %129 = vector.shape_cast %128 : vector<1x16x16x4xf32> to vector<16x16x4xf32>
    %130 = vector.extract_strided_slice %126 {offsets = [0, 0, 0], sizes = [16, 16, 4], strides = [1, 1, 1]} : vector<16x16x128xf32> to vector<16x16x4xf32>
    %131 = arith.addf %130, %129 : vector<16x16x4xf32>
    %132 = vector.shape_cast %131 : vector<16x16x4xf32> to vector<1x16x16x4xf32>
    %c0_65 = arith.constant 0 : index
    %c0_66 = arith.constant 0 : index
    %c0_67 = arith.constant 0 : index
    %c0_68 = arith.constant 0 : index
    %133 = vector.load %arg9[%c0_65, %c0_66, %c0_67, %c0_68] : memref<1x16x16x4xf32, #tpu.memory_space<vmem>>, vector<1x16x16x4xf32>
    tpu.vector_store %arg9[%c0_65, %c0_66, %c0_67, %c0_68], %132 {strides = array<i32>} : memref<1x16x16x4xf32, #tpu.memory_space<vmem>>, vector<1x16x16x4xf32>,
    return
  }
  func.func @transform_0(%arg0: i32, %arg1: i32) -> (i32, i32, i32, i32) {
    %c0_i32 = arith.constant 0 : i32
    %c0_i32_0 = arith.constant 0 : i32
    %c0_i32_1 = arith.constant 0 : i32
    %c0_i32_2 = arith.constant 0 : i32
    return %arg0, %c0_i32, %c0_i32_0, %c0_i32_1 : i32, i32, i32, i32
  }
  func.func @transform_1(%arg0: i32, %arg1: i32) -> (i32, i32, i32) {
    %c0_i32 = arith.constant 0 : i32
    %c0_i32_0 = arith.constant 0 : i32
    %c0_i32_1 = arith.constant 0 : i32
    %c0_i32_2 = arith.constant 0 : i32
    return %c0_i32, %c0_i32_0, %c0_i32_1 : i32, i32, i32
  }
  func.func @transform_2(%arg0: i32, %arg1: i32) -> (i32, i32) {
    %c0_i32 = arith.constant 0 : i32
    %c0_i32_0 = arith.constant 0 : i32
    %c0_i32_1 = arith.constant 0 : i32
    return %c0_i32, %c0_i32_0 : i32, i32
  }
  func.func @transform_3(%arg0: i32, %arg1: i32) -> (i32, i32) {
    %c0_i32 = arith.constant 0 : i32
    %c0_i32_0 = arith.constant 0 : i32
    %c0_i32_1 = arith.constant 0 : i32
    return %c0_i32, %c0_i32_0 : i32, i32
  }
  func.func @transform_4(%arg0: i32, %arg1: i32) -> (i32, i32, i32) {
    %c0_i32 = arith.constant 0 : i32
    %c0_i32_0 = arith.constant 0 : i32
    %c0_i32_1 = arith.constant 0 : i32
    %c0_i32_2 = arith.constant 0 : i32
    return %c0_i32, %c0_i32_0, %c0_i32_1 : i32, i32, i32
  }
  func.func @transform_5(%arg0: i32, %arg1: i32) -> (i32, i32) {
    %c0_i32 = arith.constant 0 : i32
    %c0_i32_0 = arith.constant 0 : i32
    %c0_i32_1 = arith.constant 0 : i32
    return %c0_i32, %c0_i32_0 : i32, i32
  }
  func.func @transform_6(%arg0: i32, %arg1: i32) -> (i32, i32) {
    %c0_i32 = arith.constant 0 : i32
    %c0_i32_0 = arith.constant 0 : i32
    %c0_i32_1 = arith.constant 0 : i32
    return %c0_i32, %c0_i32_0 : i32, i32
  }
  func.func @transform_7(%arg0: i32, %arg1: i32) -> (i32, i32, i32, i32) {
    %c0_i32 = arith.constant 0 : i32
    %c0_i32_0 = arith.constant 0 : i32
    %c0_i32_1 = arith.constant 0 : i32
    return %arg0, %arg1, %c0_i32, %c0_i32_0 : i32, i32, i32, i32
  }
}

</mosaic_0001>

<bundles_post_ra>
// kernel: bottleneck_forward.1
= control target key start
LH: loop header
LB: loop body
LE: loop exit
PB: predicated region body
PF: predicated region fallthrough
CT: control target
= control target key end

     0   :  { %12 = vsyncpa [#allocation5], 0  ;;  %s15226_s0 = inlined_call_operand.vmem [shape: f32[2,16,16,4], index: 0, kind: input, shape index: {}]   ;;  %s15227_s1 = inlined_call_operand.hbm [shape: f32[3,128,384], index: 1, kind: input, shape index: {}]   ;;  %s15228_s2 = inlined_call_operand.vmem [shape: f32[1,128], index: 2, kind: input, shape index: {}]   ;;  %s15229_s3 = inlined_call_operand.vmem [shape: f32[1,128], index: 3, kind: input, shape index: {}]   ;;  %s15230_s4 = inlined_call_operand.hbm [shape: f32[3,128,384], index: 4, kind: input, shape index: {}]   ;;  %s15231_s5 = inlined_call_operand.vmem [shape: f32[1,128], index: 5, kind: input, shape index: {}]   ;;  %s15232_s6 = inlined_call_operand.vmem [shape: f32[1,128], index: 6, kind: input, shape index: {}]   ;;  %s15233_s7 = inlined_call_operand.vmem [shape: f32[2,16,16,4], index: 7, kind: output, shape index: {}]  }
   0x1   :  { %13 = vsyncpa [#allocation7], 0  ;;  %s10261_s24 = smov 0   ;;  %s10263_s25 = smov 0  }
   0x2   :  { %s10265_s26 = smov 0  }
   0x3 LB: > { %s9295_s27 = sadd.s32 4294967295, %s10214_s26   ;;  %s31_s28 = sadd.s32 1, %s10210_s25  ;;  %s10214_s26 = sphi %s10265_s26, %s19_s26   ;;  %s10210_s25 = sphi %s10263_s25, %s15893_s25   ;;  %s10206_s24 = sphi %s10261_s24, %s15892_s24  }
   0x4   : > { %p33_p0 = scmp.ge.s32.totalorder %s31_s28, 2  ;;  %p9297_p1 = scmp.ge.s32.totalorder %s10214_s26, 1 }
   0x5   : > { %p216_p2 = scmp.lt.s32.totalorder %s10214_s26, 3  ;;  %p10286_p4 = scmp.eq.s32.totalorder %s9295_s27, 0 }
   0x6   : > { %s15895_s28 = smov (%p33_p0, %s31_s28), 0  ;;  %s227_s10 = sshll.u32 %s15227_s1, 4  ;;  %s228_s10 = int_to_ptr.hbm [resolvable:$true] %s227_s10 }
   0x7   : > { %p10282_p3 = pnand %p9297_p1, %p216_p2  ;;  %s10216_s11 = smov [#allocation4]  }
   0x8   : > { %s229_s12 = sshll.u32 %s10216_s11, 4  ;;  %s247_s15 = sshll.u32 %s15230_s4, 4  ;;  %s230_s12 = int_to_ptr.vmem [resolvable:$true] %s229_s12  ;;  %s248_s15 = int_to_ptr.hbm [resolvable:$true] %s247_s15 }
   0x9   : > { %p9562_p5 = pneg %p10282_p3  ;;  %s10217_s16 = smov 384  }
   0xa   : > { %s10218_s17 = smov 24   ;;  %s10219_s18 = smov [#allocation6]  }
   0xb   : > { %p9563_p6 = pnand %p10286_p4, %p9562_p5  ;;  %s249_s19 = sshll.u32 %s10219_s18, 4  ;;  %s250_s19 = int_to_ptr.vmem [resolvable:$true] %s249_s19 }
   0xc   : > { %279 = sbr.rel (%p10282_p3) target bundleno = 2613 (0xa35), region = 48 }
   0xd   : > { %9565 = dma.hbm_to_vmem [thread:$0]  (!%p9563_p6), %s228_s10, 18432, %s230_s12, [#allocation5], %s10217_s16, %s10217_s16, %s10218_s17  }
   0xe   : > { %9568 = dma.hbm_to_vmem [thread:$0]  (!%p9563_p6), %s248_s15, 18432, %s250_s19, [#allocation7], %s10217_s16, %s10217_s16, %s10218_s17  }
  0x11   : > { %10197 = dma.done.wait (%p10286_p4), [#allocation5], 18432  }
  0x12   : > { %10199 = vsyncadd (%p10286_p4), [#allocation5], 4294948864 }
  0x13   : > { %10201 = dma.done.wait (%p10286_p4), [#allocation7], 18432  }
  0x14   : > { %10203 = vsyncadd (%p10286_p4), [#allocation7], 4294948864  ;;  %v15234_v0 = vmov 0.0   ;;  %v624_v1 = vld [vmem:[#allocation4 + $0x168] sm:$0xff]  ;;  %v625_v2 = vld [vmem:[#allocation4 + $0x170] sm:$0xff]  ;;  %p322_p7 = scmp.lt.s32.totalorder %s10206_s24, 1 }
  0x15   : > { %342 = vst [vmem:[#allocation2] sm:$0xff] %v15234_v0  ;;  %v621_v3 = vld [vmem:[#allocation4 + $0x150] sm:$0xff]  ;;  %627 = vmatpush.msra.mxu0 %v624_v1  ;;  %806 = vmatpush.msra.mxu1 %v625_v2  ;;  %v622_v4 = vld [vmem:[#allocation4 + $0x158] sm:$0xff]  ;;  %v619_v6 = vld [vmem:[#allocation4 + $0x140] sm:$0xff]  ;;  %vm489_vm0 = vcmask 31744   ;;  %vm1272_vm1 = vcmask 1046528  }
  0x16   : > { %348 = vst [vmem:[#allocation2 + $0x30] sm:$0xff] %v15234_v0  ;;  %9506 = vmatpush.msra.mxu3 %v625_v2  ;;  %v618_v5 = vld [vmem:[#allocation4 + $0x138] sm:$0xff]  ;;  %v615_v7 = vld [vmem:[#allocation4 + $0x120] sm:$0xff]  ;;  %v616_v8 = vld [vmem:[#allocation4 + $0x128] sm:$0xff]  ;;  %s15897_s24 = smov (!%p322_p7, %s10206_s24), 1  ;;  %vm1525_vm2 = vcmask 1045504  }
  0x17   : > { %349 = vst [vmem:[#allocation2 + $0x38] sm:$0xff] %v15234_v0  ;;  %628 = vmatpush.msra.mxu0 %v621_v3  ;;  %807 = vmatpush.msra.mxu1 %v622_v4  ;;  %v612_v9 = vld [vmem:[#allocation4 + $0x108] sm:$0xff]  ;;  %v613_v10 = vld [vmem:[#allocation4 + $0x110] sm:$0xff]  ;;  %v610_v12 = vld [vmem:[#allocation4 + $0xf8] sm:$0xff]  ;;  %s9504_s20 = sshll.u32 %s15897_s24, 8 }
  0x18   : > { %350 = vst [vmem:[#allocation2 + $0x40] sm:$0xff] %v15234_v0  ;;  %9507 = vmatpush.msra.mxu3 %v622_v4  ;;  %v609_v11 = vld [vmem:[#allocation4 + $0xf0] sm:$0xff]  ;;  %v606_v13 = vld [vmem:[#allocation4 + $0xd8] sm:$0xff]  ;;  %v607_v14 = vld [vmem:[#allocation4 + $0xe0] sm:$0xff]  ;;  %s10391_s23 = scalar_lea.vmem %s15226_s0, %s9504_s20  ;;  %s14783_s10 = scalar_lea.vmem %s15233_s7, %s9504_s20 }
  0x19   : > { %351 = vst [vmem:[#allocation2 + $0x48] sm:$0xff] %v15234_v0  ;;  %629 = vmatpush.msra.mxu0 %v618_v5  ;;  %808 = vmatpush.msra.mxu1 %v619_v6  ;;  %v603_v15 = vld [vmem:[#allocation4 + $0xc0] sm:$0xff]  ;;  %v604_v16 = vld [vmem:[#allocation4 + $0xc8] sm:$0xff]  ;;  %v601_v18 = vld [vmem:[#allocation4 + $0xb0] sm:$0xff] }
  0x1a   : > { %352 = vst [vmem:[#allocation2 + $0x50] sm:$0xff] %v15234_v0  ;;  %9508 = vmatpush.msra.mxu3 %v619_v6  ;;  %v600_v17 = vld [vmem:[#allocation4 + $0xa8] sm:$0xff]  ;;  %v597_v19 = vld [vmem:[#allocation4 + $0x90] sm:$0xff]  ;;  %v598_v20 = vld [vmem:[#allocation4 + $0x98] sm:$0xff] }
  0x1b   : > { %353 = vst [vmem:[#allocation2 + $0x58] sm:$0xff] %v15234_v0  ;;  %630 = vmatpush.msra.mxu0 %v615_v7  ;;  %809 = vmatpush.msra.mxu1 %v616_v8  ;;  %v594_v21 = vld [vmem:[#allocation4 + $0x78] sm:$0xff]  ;;  %v595_v22 = vld [vmem:[#allocation4 + $0x80] sm:$0xff]  ;;  %v592_v24 = vld [vmem:[#allocation4 + $0x68] sm:$0xff] }
  0x1c   : > { %354 = vst [vmem:[#allocation2 + $0x60] sm:$0xff] %v15234_v0  ;;  %9509 = vmatpush.msra.mxu3 %v616_v8  ;;  %v591_v23 = vld [vmem:[#allocation4 + $0x60] sm:$0xff]  ;;  %v588_v25 = vld [vmem:[#allocation4 + $0x48] sm:$0xff]  ;;  %v589_v26 = vld [vmem:[#allocation4 + $0x50] sm:$0xff] }
  0x1d   : > { %355 = vst [vmem:[#allocation2 + $0x68] sm:$0xff] %v15234_v0  ;;  %631 = vmatpush.msra.mxu0 %v612_v9  ;;  %810 = vmatpush.msra.mxu1 %v613_v10  ;;  %v585_v27 = vld [vmem:[#allocation4 + $0x30] sm:$0xff]  ;;  %v586_v28 = vld [vmem:[#allocation4 + $0x38] sm:$0xff]  ;;  %v583_v30 = vld [vmem:[#allocation4 + $0x20] sm:$0xff] }
  0x1e   : > { %356 = vst [vmem:[#allocation2 + $0x70] sm:$0xff] %v15234_v0  ;;  %9510 = vmatpush.msra.mxu3 %v613_v10  ;;  %v582_v29 = vld [vmem:[#allocation4 + $0x18] sm:$0xff]  ;;  %v579_v31 = vld [vmem:[#allocation4] sm:$0xff]  ;;  %v580_v32 = vld [vmem:[#allocation4 + $0x8] sm:$0xff] }
  0x1f   : > { %357 = vst [vmem:[#allocation2 + $0x78] sm:$0xff] %v15234_v0  ;;  %632 = vmatpush.msra.mxu0 %v609_v11  ;;  %811 = vmatpush.msra.mxu1 %v610_v12  ;;  %v626_v33 = vld [vmem:[#allocation4 + $0x178] sm:$0xff]  ;;  %v474_v35 = vld [vmem:[%s10391_s23 + $0x90] sm:$0xff]  ;;  %v475_v36 = vld [vmem:[%s10391_s23 + $0x98] sm:$0xff] }
  0x20   : > { %358 = vst [vmem:[#allocation2 + $0x80] sm:$0xff] %v15234_v0  ;;  %9511 = vmatpush.msra.mxu3 %v610_v12  ;;  %9522 = vmatpush.msra.mxu2 %v626_v33  ;;  %v473_v34 = vld [vmem:[%s10391_s23 + $0x88] sm:$0xff]  ;;  %v623_v37 = vld [vmem:[#allocation4 + $0x160] sm:$0xff]  ;;  %v476_v38 = vld [vmem:[%s10391_s23 + $0xa0] sm:$0xff] }
  0x21   : > { %359 = vst [vmem:[#allocation2 + $0x88] sm:$0xff] %v15234_v0  ;;  %633 = vmatpush.msra.mxu0 %v606_v13  ;;  %812 = vmatpush.msra.mxu1 %v607_v14  ;;  %v477_v40 = vld [vmem:[%s10391_s23 + $0xa8] sm:$0xff]  ;;  %v456_v42 = vld [vmem:[%s10391_s23] sm:$0xff]  ;;  %v478_v46 = vld [vmem:[%s10391_s23 + $0xb0] sm:$0xff] }
  0x22   : > { %360 = vst [vmem:[#allocation2 + $0x90] sm:$0xff] %v15234_v0  ;;  %9512 = vmatpush.msra.mxu3 %v607_v14  ;;  %9523 = vmatpush.msra.mxu2 %v623_v37  ;;  %v457_v45 = vld [vmem:[%s10391_s23 + $0x8] sm:$0xff]  ;;  %v620_v47 = vld [vmem:[#allocation4 + $0x148] sm:$0xff]  ;;  %v458_v53 = vld [vmem:[%s10391_s23 + $0x10] sm:$0xff] }
  0x23   : > { %361 = vst [vmem:[#allocation2 + $0x98] sm:$0xff] %v15234_v0  ;;  %634 = vmatpush.msra.mxu0 %v603_v15  ;;  %813 = vmatpush.msra.mxu1 %v604_v16  ;;  %v479_v50 = vld [vmem:[%s10391_s23 + $0xb8] sm:$0xff]  ;;  %v480_v57 = vld [vmem:[%s10391_s23 + $0xc0] sm:$0xff]  ;;  %v481_v60 = vld [vmem:[%s10391_s23 + $0xc8] sm:$0xff] }
  0x24   : > { %362 = vst [vmem:[#allocation2 + $0xa0] sm:$0xff] %v15234_v0  ;;  %9513 = vmatpush.msra.mxu3 %v604_v16  ;;  %9524 = vmatpush.msra.mxu2 %v620_v47  ;;  %v459_v56 = vld [vmem:[%s10391_s23 + $0x18] sm:$0xff]  ;;  %v617_v61 = vld [vmem:[#allocation4 + $0x130] sm:$0xff]  ;;  %v461_v4 = vld [vmem:[%s10391_s23 + $0x28] sm:$0xff] }
  0x25   : > { %363 = vst [vmem:[#allocation2 + $0xa8] sm:$0xff] %v15234_v0  ;;  %635 = vmatpush.msra.mxu0 %v600_v17  ;;  %814 = vmatpush.msra.mxu1 %v601_v18  ;;  %v460_v1 = vld [vmem:[%s10391_s23 + $0x20] sm:$0xff]  ;;  %v482_v5 = vld [vmem:[%s10391_s23 + $0xd0] sm:$0xff]  ;;  %v483_v8 = vld [vmem:[%s10391_s23 + $0xd8] sm:$0xff] }
  0x26   : > { %364 = vst [vmem:[#allocation2 + $0xb0] sm:$0xff] %v15234_v0  ;;  %9514 = vmatpush.msra.mxu3 %v601_v18  ;;  %9525 = vmatpush.msra.mxu2 %v617_v61  ;;  %v614_v9 = vld [vmem:[#allocation4 + $0x118] sm:$0xff]  ;;  %v462_v12 = vld [vmem:[%s10391_s23 + $0x30] sm:$0xff]  ;;  %v463_v15 = vld [vmem:[%s10391_s23 + $0x38] sm:$0xff] }
  0x27   : > { %365 = vst [vmem:[#allocation2 + $0xb8] sm:$0xff] %v15234_v0  ;;  %636 = vmatpush.msra.mxu0 %v597_v19  ;;  %815 = vmatpush.msra.mxu1 %v598_v20  ;;  %v484_v16 = vld [vmem:[%s10391_s23 + $0xe0] sm:$0xff] }
  0x28   : > { %366 = vst [vmem:[#allocation2 + $0xc0] sm:$0xff] %v15234_v0  ;;  %9515 = vmatpush.msra.mxu3 %v598_v20  ;;  %9526 = vmatpush.msra.mxu2 %v614_v9 }
  0x29   : > { %367 = vst [vmem:[#allocation2 + $0xc8] sm:$0xff] %v15234_v0  ;;  %637 = vmatpush.msra.mxu0 %v594_v21  ;;  %816 = vmatpush.msra.mxu1 %v595_v22  ;;  %v485_v21 = vld [vmem:[%s10391_s23 + $0xe8] sm:$0xff] }
  0x2a   : > { %368 = vst [vmem:[#allocation2 + $0xd0] sm:$0xff] %v15234_v0  ;;  %9516 = vmatpush.msra.mxu3 %v595_v22 }
  0x2b   : > { %369 = vst [vmem:[#allocation2 + $0xd8] sm:$0xff] %v15234_v0  ;;  %638 = vmatpush.msra.mxu0 %v591_v23  ;;  %817 = vmatpush.msra.mxu1 %v592_v24 }
  0x2c   : > { %370 = vst [vmem:[#allocation2 + $0xe0] sm:$0xff] %v15234_v0  ;;  %9517 = vmatpush.msra.mxu3 %v592_v24  ;;  %v611_v24 = vld [vmem:[#allocation4 + $0x100] sm:$0xff] }
  0x2d   : > { %371 = vst [vmem:[#allocation2 + $0xe8] sm:$0xff] %v15234_v0  ;;  %639 = vmatpush.msra.mxu0 %v588_v25  ;;  %818 = vmatpush.msra.mxu1 %v589_v26 }
  0x2e   : > { %372 = vst [vmem:[#allocation2 + $0xf0] sm:$0xff] %v15234_v0  ;;  %9518 = vmatpush.msra.mxu3 %v589_v26  ;;  %9527 = vmatpush.msra.mxu2 %v611_v24 }
  0x2f   : > { %373 = vst [vmem:[#allocation2 + $0xf8] sm:$0xff] %v15234_v0  ;;  %640 = vmatpush.msra.mxu0 %v585_v27  ;;  %819 = vmatpush.msra.mxu1 %v586_v28  ;;  %v464_v27 = vld [vmem:[%s10391_s23 + $0x40] sm:$0xff] }
  0x30   : > { %374 = vst [vmem:[#allocation2 + $0x100] sm:$0xff] %v15234_v0  ;;  %9519 = vmatpush.msra.mxu3 %v586_v28 }
  0x31   : > { %375 = vst [vmem:[#allocation2 + $0x108] sm:$0xff] %v15234_v0  ;;  %641 = vmatpush.msra.mxu0 %v582_v29  ;;  %820 = vmatpush.msra.mxu1 %v583_v30 }
  0x32   : > { %376 = vst [vmem:[#allocation2 + $0x110] sm:$0xff] %v15234_v0  ;;  %9520 = vmatpush.msra.mxu3 %v583_v30  ;;  %v608_v30 = vld [vmem:[#allocation4 + $0xe8] sm:$0xff] }
  0x33   : > { %377 = vst [vmem:[#allocation2 + $0x118] sm:$0xff] %v15234_v0  ;;  %642 = vmatpush.msra.mxu0 %v579_v31  ;;  %821 = vmatpush.msra.mxu1 %v580_v32 }
  0x34   : > { %378 = vst [vmem:[#allocation2 + $0x120] sm:$0xff] %v15234_v0  ;;  %9521 = vmatpush.msra.mxu3 %v580_v32  ;;  %643 = vmatmul.f32.vlgmr.msra.gmra.mxu0 %v15234_v0 }
  0x35   : > { %379 = vst [vmem:[#allocation2 + $0x128] sm:$0xff] %v15234_v0  ;;  %822 = vmatmul.f32.vlgmr.msra.gmra.mxu1 %v15234_v0  ;;  %985 = vmatpush.msrb.mxu0 %v626_v33  ;;  %v605_v33 = vld [vmem:[#allocation4 + $0xd0] sm:$0xff] }
  0x36   : > { %380 = vst [vmem:[#allocation2 + $0x130] sm:$0xff] %v15234_v0  ;;  %9528 = vmatpush.msra.mxu2 %v608_v30 }
  0x37   : > { %381 = vst [vmem:[#allocation2 + $0x138] sm:$0xff] %v15234_v0  ;;  %986 = vmatpush.msrb.mxu0 %v623_v37  ;;  %v486_v37 = vld [vmem:[%s10391_s23 + $0xf0] sm:$0xff] }
  0x38   : > { %382 = vst [vmem:[#allocation2 + $0x140] sm:$0xff] %v15234_v0  ;;  %9529 = vmatpush.msra.mxu2 %v605_v33 }
  0x39   : > { %383 = vst [vmem:[#allocation2 + $0x148] sm:$0xff] %v15234_v0  ;;  %987 = vmatpush.msrb.mxu0 %v620_v47  ;;  %v596_v47 = vld [vmem:[#allocation4 + $0x88] sm:$0xff] }
  0x3a   : > { %384 = vst [vmem:[#allocation2 + $0x150] sm:$0xff] %v15234_v0 }
  0x3b   : > { %385 = vst [vmem:[#allocation2 + $0x158] sm:$0xff] %v15234_v0  ;;  %988 = vmatpush.msrb.mxu0 %v617_v61  ;;  %v1815_v61 = vld [vmem:[#allocation4 + $0x288] sm:$0xff] }
  0x3c   : > { %386 = vst [vmem:[#allocation2 + $0x160] sm:$0xff] %v15234_v0  ;;  %646 = vmatmul.f32.gmra.mxu0 %v15234_v0 }
  0x3d   : > { %387 = vst [vmem:[#allocation2 + $0x168] sm:$0xff] %v15234_v0  ;;  %825 = vmatmul.f32.gmra.mxu1 %v15234_v0  ;;  %989 = vmatpush.msrb.mxu0 %v614_v9  ;;  %v587_v9 = vld [vmem:[#allocation4 + $0x40] sm:$0xff] }
  0x3e   : > { %388 = vst [vmem:[#allocation2 + $0x170] sm:$0xff] %v15234_v0 }
  0x3f   : > { %389 = vst [vmem:[#allocation2 + $0x178] sm:$0xff] %v15234_v0  ;;  %990 = vmatpush.msrb.mxu0 %v611_v24  ;;  %v1806_v24 = vld [vmem:[#allocation4 + $0x240] sm:$0xff] }
  0x40   : > { %390 = vst [vmem:[#allocation2 + $0x180] sm:$0xff] %v15234_v0 }
  0x41   : > { %391 = vst [vmem:[#allocation2 + $0x188] sm:$0xff] %v15234_v0  ;;  %991 = vmatpush.msrb.mxu0 %v608_v30  ;;  %v581_v30 = vld [vmem:[#allocation4 + $0x10] sm:$0xff] }
  0x42   : > { %392 = vst [vmem:[#allocation2 + $0x190] sm:$0xff] %v15234_v0 }
  0x43   : > { %393 = vst [vmem:[#allocation2 + $0x198] sm:$0xff] %v15234_v0  ;;  %992 = vmatpush.msrb.mxu0 %v605_v33  ;;  %v1803_v33 = vld [vmem:[#allocation4 + $0x228] sm:$0xff] }
  0x44   : > { %394 = vst [vmem:[#allocation2 + $0x1a0] sm:$0xff] %v15234_v0  ;;  %649 = vmatmul.f32.gmra.mxu0 %v15234_v0 }
  0x45   : > { %395 = vst [vmem:[#allocation2 + $0x1a8] sm:$0xff] %v15234_v0  ;;  %828 = vmatmul.f32.gmra.mxu1 %v15234_v0 }
  0x46   : > { %407 = vst [vmem:[#allocation3 + $0x28] sm:$0xff] %v15234_v0 }
  0x47   : > { %410 = vst [vmem:[#allocation3 + $0x40] sm:$0xff] %v15234_v0 }
  0x48   : > { %413 = vst [vmem:[#allocation3 + $0x58] sm:$0xff] %v15234_v0 }
  0x49   : > { %416 = vst [vmem:[#allocation3 + $0x70] sm:$0xff] %v15234_v0 }
  0x4a   : > { %419 = vst [vmem:[#allocation3 + $0x88] sm:$0xff] %v15234_v0 }
  0x4b   : > { %422 = vst [vmem:[#allocation3 + $0xa0] sm:$0xff] %v15234_v0 }
  0x4c   : > { %652 = vmatmul.f32.gmra.mxu0 %v15234_v0  ;;  %425 = vst [vmem:[#allocation3 + $0xb8] sm:$0xff] %v15234_v0 }
  0x4d   : > { %831 = vmatmul.f32.gmra.mxu1 %v15234_v0  ;;  %428 = vst [vmem:[#allocation3 + $0xd0] sm:$0xff] %v15234_v0 }
  0x4e   : > { %431 = vst [vmem:[#allocation3 + $0xe8] sm:$0xff] %v15234_v0 }
  0x4f   : > { %434 = vst [vmem:[#allocation3 + $0x100] sm:$0xff] %v15234_v0 }
  0x50   : > { %437 = vst [vmem:[#allocation3 + $0x118] sm:$0xff] %v15234_v0 }
  0x51   : > { %440 = vst [vmem:[#allocation3 + $0x130] sm:$0xff] %v15234_v0 }
  0x52   : > { %443 = vst [vmem:[#allocation3 + $0x148] sm:$0xff] %v15234_v0 }
  0x53   : > { %446 = vst [vmem:[#allocation3 + $0x160] sm:$0xff] %v15234_v0 }
  0x54   : > { %655 = vmatmul.f32.gmra.mxu0 %v15234_v0  ;;  %449 = vst [vmem:[#allocation3 + $0x178] sm:$0xff] %v15234_v0 }
  0x55   : > { %834 = vmatmul.f32.gmra.mxu1 %v15234_v0  ;;  %452 = vst [vmem:[#allocation3 + $0x190] sm:$0xff] %v15234_v0 }
  0x56   : > { %507 = vst.msk [vmem:[#allocation2 + $0xfa] sm:$0xff] %vm489_vm0, %v473_v34  ;;  %v465_v34 = vld [vmem:[%s10391_s23 + $0x48] sm:$0xff] }
  0x57   : > { %508 = vst.msk [vmem:[#allocation2 + $0x10a] sm:$0xff] %vm489_vm0, %v474_v35  ;;  %v1827_v35 = vld [vmem:[#allocation4 + $0x2e8] sm:$0xff] }
  0x58   : > { %509 = vst.msk [vmem:[#allocation2 + $0x112] sm:$0xff] %vm489_vm0, %v475_v36  ;;  %v602_v36 = vld [vmem:[#allocation4 + $0xb8] sm:$0xff]  ;;  %1830 = vmatpush.msrb.mxu3 %v1827_v35  ;;  %v1800_v35 = vld [vmem:[#allocation4 + $0x210] sm:$0xff] }
  0x59   : > { %510 = vst.msk [vmem:[#allocation2 + $0x122] sm:$0xff] %vm489_vm0, %v476_v38  ;;  %v1824_v38 = vld [vmem:[#allocation4 + $0x2d0] sm:$0xff]  ;;  %9530 = vmatpush.msra.mxu2 %v602_v36  ;;  %993 = vmatpush.msrb.mxu0 %v602_v36 }
  0x5a   : > { %511 = vst.msk [vmem:[#allocation2 + $0x12a] sm:$0xff] %vm489_vm0, %v477_v40  ;;  %v599_v40 = vld [vmem:[#allocation4 + $0xa0] sm:$0xff]  ;;  %1831 = vmatpush.msrb.mxu3 %v1824_v38 }
  0x5b   : > { %490 = vst.msk [vmem:[#allocation2 + $0x32] sm:$0xff] %vm489_vm0, %v456_v42  ;;  %9531 = vmatpush.msra.mxu2 %v599_v40  ;;  %994 = vmatpush.msrb.mxu0 %v599_v40  ;;  %v1797_v40 = vld [vmem:[#allocation4 + $0x1f8] sm:$0xff] }
  0x5c   : > { %658 = vmatmul.f32.gmra.mxu0 %v15234_v0  ;;  %491 = vst.msk [vmem:[#allocation2 + $0x3a] sm:$0xff] %vm489_vm0, %v457_v45 }
  0x5d   : > { %837 = vmatmul.f32.gmra.mxu1 %v15234_v0  ;;  %v10407_v39 = vld [vmem:[#allocation2 + $0x100] sm:$0xff]  ;;  %512 = vst.msk [vmem:[#allocation2 + $0x13a] sm:$0xff] %vm489_vm0, %v478_v46  ;;  %v1821_v46 = vld [vmem:[#allocation4 + $0x2b8] sm:$0xff]  ;;  %9532 = vmatpush.msra.mxu2 %v596_v47  ;;  %v470_v0 = vld [vmem:[%s10391_s23 + $0x70] sm:$0xff] }
  0x5e   : > { %918 = vmatmul.f32.vlgmr.msra.gmra.mxu3 %v10407_v39  ;;  %v10412_v41 = vld [vmem:[#allocation2 + $0x108] sm:$0xff]  ;;  %513 = vst.msk [vmem:[#allocation2 + $0x142] sm:$0xff] %vm489_vm0, %v479_v50  ;;  %995 = vmatpush.msrb.mxu0 %v596_v47  ;;  %v1794_v47 = vld [vmem:[#allocation4 + $0x1e0] sm:$0xff] }
  0x5f   : > { %v10417_v43 = vld [vmem:[#allocation2 + $0x110] sm:$0xff]  ;;  %v10428_v48 = vld [vmem:[#allocation2 + $0x118] sm:$0xff]  ;;  %492 = vst.msk [vmem:[#allocation2 + $0x4a] sm:$0xff] %vm489_vm0, %v458_v53  ;;  %1832 = vmatpush.msrb.mxu3 %v1821_v46 }
  0x60   : > { %v10437_v51 = vld [vmem:[#allocation2 + $0x120] sm:$0xff]  ;;  %493 = vst.msk [vmem:[#allocation2 + $0x52] sm:$0xff] %vm489_vm0, %v459_v56  ;;  %v1818_v53 = vld [vmem:[#allocation4 + $0x2a0] sm:$0xff] }
  0x61   : > { %v10446_v54 = vld [vmem:[#allocation2 + $0x128] sm:$0xff]  ;;  %514 = vst.msk [vmem:[#allocation2 + $0x152] sm:$0xff] %vm489_vm0, %v480_v57  ;;  %v10457_v58 = vld [vmem:[#allocation2 + $0x130] sm:$0xff]  ;;  %v593_v57 = vld [vmem:[#allocation4 + $0x70] sm:$0xff]  ;;  %1833 = vmatpush.msrb.mxu3 %v1818_v53 }
  0x62   : > { %v10419_v44 = vld [vmem:[#allocation2 + $0x30] sm:$0xff]  ;;  %515 = vst.msk [vmem:[#allocation2 + $0x15a] sm:$0xff] %vm489_vm0, %v481_v60  ;;  %v487_v60 = vld [vmem:[%s10391_s23 + $0xf8] sm:$0xff]  ;;  %9533 = vmatpush.msra.mxu2 %v593_v57  ;;  %996 = vmatpush.msrb.mxu0 %v593_v57 }
  0x63   : > { %v10430_v49 = vld [vmem:[#allocation2 + $0x38] sm:$0xff]  ;;  %v10439_v52 = vld [vmem:[#allocation2 + $0x40] sm:$0xff]  ;;  %494 = vst.msk [vmem:[#allocation2 + $0x62] sm:$0xff] %vm489_vm0, %v460_v1  ;;  %v590_v1 = vld [vmem:[#allocation4 + $0x58] sm:$0xff]  ;;  %1834 = vmatpush.msrb.mxu3 %v1815_v61 }
  0x64   : > { %661 = vmatmul.f32.gmra.mxu0 %v10419_v44  ;;  %v10466_v62 = vld [vmem:[#allocation2 + $0x138] sm:$0xff]  ;;  %495 = vst.msk [vmem:[#allocation2 + $0x6a] sm:$0xff] %vm489_vm0, %v461_v4  ;;  %v466_v4 = vld [vmem:[%s10391_s23 + $0x50] sm:$0xff]  ;;  %9534 = vmatpush.msra.mxu2 %v590_v1  ;;  %v468_v61 = vld [vmem:[%s10391_s23 + $0x60] sm:$0xff] }
  0x65   : > { %840 = vmatmul.f32.gmra.mxu1 %v10419_v44  ;;  %v10475_v2 = vld [vmem:[#allocation2 + $0x140] sm:$0xff]  ;;  %516 = vst.msk [vmem:[#allocation2 + $0x16a] sm:$0xff] %vm489_vm0, %v482_v5  ;;  %v10486_v6 = vld [vmem:[#allocation2 + $0x148] sm:$0xff]  ;;  %v467_v5 = vld [vmem:[%s10391_s23 + $0x58] sm:$0xff]  ;;  %997 = vmatpush.msrb.mxu0 %v590_v1 }
  0x66   : > { %921 = vmatmul.f32.gmra.mxu3 %v10412_v41  ;;  %v10448_v55 = vld [vmem:[#allocation2 + $0x48] sm:$0xff]  ;;  %517 = vst.msk [vmem:[#allocation2 + $0x172] sm:$0xff] %vm489_vm0, %v483_v8  ;;  %v1812_v8 = vld [vmem:[#allocation4 + $0x270] sm:$0xff]  ;;  %9535 = vmatpush.msra.mxu2 %v587_v9 }
  0x67   : > { %v10459_v59 = vld [vmem:[#allocation2 + $0x50] sm:$0xff]  ;;  %v10468_v63 = vld [vmem:[#allocation2 + $0x58] sm:$0xff]  ;;  %496 = vst.msk [vmem:[#allocation2 + $0x7a] sm:$0xff] %vm489_vm0, %v462_v12  ;;  %1835 = vmatpush.msrb.mxu3 %v1812_v8  ;;  %998 = vmatpush.msrb.mxu0 %v587_v9  ;;  %v1788_v1 = vld [vmem:[#allocation4 + $0x1b0] sm:$0xff] }
  0x68   : > { %v10495_v10 = vld [vmem:[#allocation2 + $0x150] sm:$0xff]  ;;  %497 = vst.msk [vmem:[#allocation2 + $0x82] sm:$0xff] %vm489_vm0, %v463_v15 }
  0x69   : > { %v10504_v13 = vld [vmem:[#allocation2 + $0x158] sm:$0xff]  ;;  %518 = vst.msk [vmem:[#allocation2 + $0x182] sm:$0xff] %vm489_vm0, %v484_v16  ;;  %v10519_v19 = vld [vmem:[#allocation2 + $0x160] sm:$0xff]  ;;  %v1809_v16 = vld [vmem:[#allocation4 + $0x258] sm:$0xff] }
  0x6a   : > { %v10477_v3 = vld [vmem:[#allocation2 + $0x60] sm:$0xff]  ;;  %519 = vst.msk [vmem:[#allocation2 + $0x18a] sm:$0xff] %vm489_vm0, %v485_v21  ;;  %1836 = vmatpush.msrb.mxu3 %v1809_v16 }
  0x6b   : > { %v10488_v7 = vld [vmem:[#allocation2 + $0x68] sm:$0xff]  ;;  %v10497_v11 = vld [vmem:[#allocation2 + $0x70] sm:$0xff]  ;;  %498 = vst.msk [vmem:[#allocation2 + $0x92] sm:$0xff] %vm489_vm0, %v464_v27 }
  0x6c   : > { %664 = vmatmul.f32.gmra.mxu0 %v10430_v49  ;;  %v10530_v25 = vld [vmem:[#allocation2 + $0x168] sm:$0xff]  ;;  %499 = vst.msk [vmem:[#allocation2 + $0x9a] sm:$0xff] %vm489_vm0, %v465_v34  ;;  %1837 = vmatpush.msrb.mxu3 %v1806_v24 }
  0x6d   : > { %843 = vmatmul.f32.gmra.mxu1 %v10430_v49  ;;  %v10543_v31 = vld [vmem:[#allocation2 + $0x170] sm:$0xff]  ;;  %520 = vst.msk [vmem:[#allocation2 + $0x19a] sm:$0xff] %vm489_vm0, %v486_v37  ;;  %v10558_v50 = vld [vmem:[#allocation2 + $0x178] sm:$0xff] }
  0x6e   : > { %924 = vmatmul.f32.gmra.mxu3 %v10417_v43  ;;  %v10506_v14 = vld [vmem:[#allocation2 + $0x78] sm:$0xff]  ;;  %521 = vst.msk [vmem:[#allocation2 + $0x1a2] sm:$0xff] %vm489_vm0, %v487_v60 }
  0x6f   : > { %v10521_v20 = vld [vmem:[#allocation2 + $0x80] sm:$0xff]  ;;  %v10532_v26 = vld [vmem:[#allocation2 + $0x88] sm:$0xff]  ;;  %500 = vst.msk [vmem:[#allocation2 + $0xaa] sm:$0xff] %vm489_vm0, %v466_v4  ;;  %1838 = vmatpush.msrb.mxu3 %v1803_v33  ;;  %v1791_v60 = vld [vmem:[#allocation4 + $0x1c8] sm:$0xff] }
  0x70   : > { %501 = vst.msk [vmem:[#allocation2 + $0xb2] sm:$0xff] %vm489_vm0, %v467_v5  ;;  %v10575_v21 = vld [vmem:[#allocation2 + $0x180] sm:$0xff]  ;;  %v1785_v5 = vld [vmem:[#allocation4 + $0x198] sm:$0xff] }
  0x71   : > { %v10591_v46 = vld [vmem:[#allocation2 + $0x188] sm:$0xff]  ;;  %1839 = vmatpush.msrb.mxu3 %v1800_v35  ;;  %502 = vst.msk [vmem:[#allocation2 + $0xc2] sm:$0xff] %vm489_vm0, %v468_v61  ;;  %v10605_v8 = vld [vmem:[#allocation2 + $0x190] sm:$0xff] }
  0x72   : > { %v10545_v32 = vld [vmem:[#allocation2 + $0x90] sm:$0xff]  ;;  %504 = vst.msk [vmem:[#allocation2 + $0xda] sm:$0xff] %vm489_vm0, %v470_v0 }
  0x73   : > { %v10560_v56 = vld [vmem:[#allocation2 + $0x98] sm:$0xff]  ;;  %v10577_v27 = vld [vmem:[#allocation2 + $0xa0] sm:$0xff]  ;;  %1840 = vmatpush.msrb.mxu3 %v1797_v40 }
  0x74   : > { %667 = vmatmul.f32.gmra.mxu0 %v10439_v52  ;;  %v10621_v35 = vld [vmem:[#allocation2 + $0x198] sm:$0xff] }
  0x75   : > { %846 = vmatmul.f32.gmra.mxu1 %v10439_v52  ;;  %1841 = vmatpush.msrb.mxu3 %v1794_v47 }
  0x76   : > { %927 = vmatmul.f32.gmra.mxu3 %v10428_v48  ;;  %v10593_v53 = vld [vmem:[#allocation2 + $0xa8] sm:$0xff] }
  0x77   : > { %v10582_v34 = vld [vmem:[#allocation2 + $0xb0] sm:$0xff]  ;;  %v10596_v57 = vld [vmem:[#allocation2 + $0xb8] sm:$0xff]  ;;  %1842 = vmatpush.msrb.mxu3 %v1791_v60 }
  0x78   : > { %v10612_v24 = vld [vmem:[#allocation2 + $0xc0] sm:$0xff] }
  0x79   : > { %1843 = vmatpush.msrb.mxu3 %v1788_v1  ;;  %v10635_v1 = vld [vmem:[#allocation2 + $0x1a0] sm:$0xff] }
  0x7b   : > { %1844 = vmatpush.msrb.mxu3 %v1785_v5 }
  0x7c   : > { %670 = vmatmul.f32.gmra.mxu0 %v10448_v55 }
  0x7d   : > { %849 = vmatmul.f32.gmra.mxu1 %v10448_v55 }
  0x7e   : > { %930 = vmatmul.f32.gmra.mxu3 %v10437_v51 }
  0x84   : > { %673 = vmatmul.f32.gmra.mxu0 %v10459_v59 }
  0x85   : > { %852 = vmatmul.f32.gmra.mxu1 %v10459_v59 }
  0x86   : > { %933 = vmatmul.f32.gmra.mxu3 %v10446_v54 }
  0x8c   : > { %676 = vmatmul.f32.gmra.mxu0 %v10468_v63 }
  0x8d   : > { %855 = vmatmul.f32.gmra.mxu1 %v10468_v63 }
  0x8e   : > { %936 = vmatmul.f32.gmra.mxu3 %v10457_v58 }
  0x94   : > { %679 = vmatmul.f32.gmra.mxu0 %v10477_v3 }
  0x95   : > { %858 = vmatmul.f32.gmra.mxu1 %v10477_v3 }
  0x96   : > { %939 = vmatmul.f32.gmra.mxu3 %v10466_v62 }
  0x9c   : > { %682 = vmatmul.f32.gmra.mxu0 %v10488_v7 }
  0x9d   : > { %861 = vmatmul.f32.gmra.mxu1 %v10488_v7 }
  0x9e   : > { %942 = vmatmul.f32.gmra.mxu3 %v10475_v2 }
  0xa4   : > { %685 = vmatmul.f32.gmra.mxu0 %v10497_v11 }
  0xa5   : > { %864 = vmatmul.f32.gmra.mxu1 %v10497_v11 }
  0xa6   : > { %945 = vmatmul.f32.gmra.mxu3 %v10486_v6 }
  0xac   : > { %688 = vmatmul.f32.gmra.mxu0 %v10506_v14 }
  0xad   : > { %867 = vmatmul.f32.gmra.mxu1 %v10506_v14 }
  0xae   : > { %948 = vmatmul.f32.gmra.mxu3 %v10495_v10 }
  0xb1   : > { %v10512_v17 = vpop.f32.mrf.mxu0 }
  0xb2   : > { %15308 = vst [vmem:[#allocation10_spill] sm:$0xff] %v10512_v17  ;;  %v10517_v18 = vpop.f32.mrf.mxu1 }
  0xb3   : > { %15309 = vst [vmem:[#allocation11_spill] sm:$0xff] %v10517_v18 }
  0xb4   : > { %691 = vmatmul.f32.gmra.mxu0 %v10521_v20 }
  0xb5   : > { %870 = vmatmul.f32.gmra.mxu1 %v10521_v20 }
  0xb6   : > { %951 = vmatmul.f32.gmra.mxu3 %v10504_v13 }
  0xb9   : > { %v647_v22 = vpop.f32.mrf.mxu0 }
  0xba   : > { %v10528_v23 = vpop.f32.mrf.mxu1  ;;  %v584_v22 = vld [vmem:[#allocation4 + $0x28] sm:$0xff] }
  0xbb   : > { %15310 = vst [vmem:[#allocation12_spill] sm:$0xff] %v10528_v23  ;;  %9536 = vmatpush.msra.mxu2 %v584_v22  ;;  %999 = vmatpush.msrb.mxu0 %v584_v22  ;;  %v1782_v22 = vld [vmem:[#allocation4 + $0x180] sm:$0xff] }
  0xbc   : > { %694 = vmatmul.f32.gmra.mxu0 %v10532_v26  ;;  %1845 = vmatpush.msrb.mxu3 %v1782_v22 }
  0xbd   : > { %873 = vmatmul.f32.gmra.mxu1 %v10532_v26  ;;  %9537 = vmatpush.msra.mxu2 %v581_v30 }
  0xbe   : > { %954 = vmatmul.f32.gmra.mxu3 %v10519_v19  ;;  %1067 = vmatmul.f32.vlgmr.msra.gmra.mxu2 %v10582_v34 }
  0xbf   : > { %1000 = vmatpush.msrb.mxu0 %v581_v30  ;;  %v469_v30 = vld [vmem:[%s10391_s23 + $0x68] sm:$0xff] }
  0xc0   : > { %503 = vst.msk [vmem:[#allocation2 + $0xca] sm:$0xff] %vm489_vm0, %v469_v30 }
  0xc1   : > { %v10539_v28 = vpop.f32.mrf.mxu0 }
  0xc2   : > { %15311 = vst [vmem:[#allocation13_spill] sm:$0xff] %v10539_v28  ;;  %v10541_v29 = vpop.f32.mrf.mxu1 }
  0xc3   : > { %15312 = vst [vmem:[#allocation14_spill] sm:$0xff] %v10541_v29 }
  0xc4   : > { %697 = vmatmul.f32.gmra.mxu0 %v10545_v32 }
  0xc5   : > { %876 = vmatmul.f32.gmra.mxu1 %v10545_v32 }
  0xc6   : > { %957 = vmatmul.f32.gmra.mxu3 %v10530_v25  ;;  %1070 = vmatmul.f32.gmra.mxu2 %v10596_v57 }
  0xc7   : > { %v10628_v60 = vld [vmem:[#allocation2 + $0xc8] sm:$0xff]  ;;  %v10642_v30 = vld [vmem:[#allocation2 + $0xd0] sm:$0xff] }
  0xc9   : > { %v10554_v42 = vpop.f32.mrf.mxu0 }
  0xca   : > { %15313 = vst [vmem:[#allocation15_spill] sm:$0xff] %v10554_v42  ;;  %v10556_v45 = vpop.f32.mrf.mxu1 }
  0xcb   : > { %15314 = vst [vmem:[#allocation16_spill] sm:$0xff] %v10556_v45 }
  0xcc   : > { %700 = vmatmul.f32.gmra.mxu0 %v10560_v56 }
  0xcd   : > { %879 = vmatmul.f32.gmra.mxu1 %v10560_v56 }
  0xce   : > { %960 = vmatmul.f32.gmra.mxu3 %v10543_v31  ;;  %1073 = vmatmul.f32.gmra.mxu2 %v10612_v24 }
  0xd1   : > { %v10571_v12 = vpop.f32.mrf.mxu0 }
  0xd2   : > { %15315 = vst [vmem:[#allocation17_spill] sm:$0xff] %v10571_v12  ;;  %v10573_v15 = vpop.f32.mrf.mxu1 }
  0xd3   : > { %15316 = vst [vmem:[#allocation18_spill] sm:$0xff] %v10573_v15 }
  0xd4   : > { %703 = vmatmul.f32.gmra.mxu0 %v10577_v27 }
  0xd5   : > { %882 = vmatmul.f32.gmra.mxu1 %v10577_v27 }
  0xd6   : > { %963 = vmatmul.f32.gmra.mxu3 %v10558_v50  ;;  %1076 = vmatmul.f32.gmra.mxu2 %v10628_v60 }
  0xd9   : > { %v10587_v37 = vpop.f32.mrf.mxu0 }
  0xda   : > { %15317 = vst [vmem:[#allocation19_spill] sm:$0xff] %v10587_v37  ;;  %v10589_v38 = vpop.f32.mrf.mxu1  ;;  %v10651_v37 = vld [vmem:[#allocation2 + $0x1a8] sm:$0xff] }
  0xdb   : > { %15318 = vst [vmem:[#allocation20_spill] sm:$0xff] %v10589_v38 }
  0xdc   : > { %706 = vmatmul.f32.gmra.mxu0 %v10593_v53 }
  0xdd   : > { %885 = vmatmul.f32.gmra.mxu1 %v10593_v53 }
  0xde   : > { %966 = vmatmul.f32.gmra.mxu3 %v10575_v21  ;;  %1079 = vmatmul.f32.gmra.mxu2 %v10642_v30 }
  0xe1   : > { %v10584_v36 = vpop.f32.mrf.mxu3  ;;  %v10607_v9 = vpop.f32.mrf.mxu0 }
  0xe2   : > { %15319 = vst [vmem:[#allocation21_spill] sm:$0xff] %v10607_v9  ;;  %v10609_v16 = vpop.f32.mrf.mxu1  ;;  %v10658_v9 = vld [vmem:[#allocation2 + $0xd8] sm:$0xff] }
  0xe3   : > { %15320 = vst [vmem:[#allocation22_spill] sm:$0xff] %v10609_v16 }
  0xe4   : > { %709 = vmatmul.f32.gmra.mxu0 %v10582_v34 }
  0xe5   : > { %888 = vmatmul.f32.gmra.mxu1 %v10582_v34 }
  0xe6   : > { %969 = vmatmul.f32.gmra.mxu3 %v10591_v46  ;;  %1082 = vmatmul.f32.gmra.mxu2 %v10658_v9 }
  0xe9   : > { %v10602_v4 = vpop.f32.mrf.mxu3  ;;  %v10623_v40 = vpop.f32.mrf.mxu0 }
  0xea   : > { %15321 = vst [vmem:[#allocation23_spill] sm:$0xff] %v10623_v40  ;;  %v10625_v47 = vpop.f32.mrf.mxu1 }
  0xeb   : > { %15322 = vst [vmem:[#allocation24_spill] sm:$0xff] %v10625_v47  ;;  %v471_v47 = vld [vmem:[%s10391_s23 + $0x78] sm:$0xff] }
  0xec   : > { %712 = vmatmul.f32.gmra.mxu0 %v10596_v57  ;;  %505 = vst.msk [vmem:[#allocation2 + $0xe2] sm:$0xff] %vm489_vm0, %v471_v47 }
  0xed   : > { %891 = vmatmul.f32.gmra.mxu1 %v10596_v57 }
  0xee   : > { %972 = vmatmul.f32.gmra.mxu3 %v10605_v8 }
  0xf1   : > { %v10618_v33 = vpop.f32.mrf.mxu3  ;;  %v10637_v5 = vpop.f32.mrf.mxu0 }
  0xf2   : > { %15323 = vst [vmem:[#allocation25_spill] sm:$0xff] %v10637_v5  ;;  %v10639_v22 = vpop.f32.mrf.mxu1 }
  0xf3   : > { %15324 = vst [vmem:[#allocation26_spill] sm:$0xff] %v10639_v22  ;;  %v10672_v12 = vld [vmem:[#allocation2 + $0xe0] sm:$0xff] }
  0xf4   : > { %715 = vmatmul.f32.gmra.mxu0 %v10612_v24  ;;  %1085 = vmatmul.f32.gmra.mxu2 %v10672_v12 }
  0xf5   : > { %894 = vmatmul.f32.gmra.mxu1 %v10612_v24 }
  0xf6   : > { %975 = vmatmul.f32.gmra.mxu3 %v10621_v35 }
  0xf9   : > { %v10632_v61 = vpop.f32.mrf.mxu3  ;;  %v10653_v5 = vpop.f32.mrf.mxu0 }
  0xfa   : > { %15325 = vst [vmem:[#allocation27_spill] sm:$0xff] %v10653_v5  ;;  %v10655_v22 = vpop.f32.mrf.mxu1 }
  0xfb   : > { %15326 = vst [vmem:[#allocation28_spill] sm:$0xff] %v10655_v22  ;;  %v15329_v22 = vmov 0.0  }
  0xfc   : > { %718 = vmatmul.f32.gmra.mxu0 %v10628_v60 }
  0xfd   : > { %897 = vmatmul.f32.gmra.mxu1 %v10628_v60 }
  0xfe   : > { %978 = vmatmul.f32.gmra.mxu3 %v10635_v1 }
 0x101   : > { %v10648_v40 = vpop.f32.mrf.mxu3  ;;  %v10667_v16 = vpop.f32.mrf.mxu0 }
 0x102   : > { %15327 = vst [vmem:[#allocation29_spill] sm:$0xff] %v10667_v16  ;;  %v10669_v5 = vpop.f32.mrf.mxu1  ;;  %v10684_v16 = vld [vmem:[#allocation2 + $0xe8] sm:$0xff] }
 0x103   : > { %15328 = vst [vmem:[#allocation30_spill] sm:$0xff] %v10669_v5  ;;  %v472_v5 = vld [vmem:[%s10391_s23 + $0x80] sm:$0xff]  ;;  %1088 = vmatmul.f32.gmra.mxu2 %v10684_v16 }
 0x104   : > { %721 = vmatmul.f32.gmra.mxu0 %v10642_v30  ;;  %506 = vst.msk [vmem:[#allocation2 + $0xf2] sm:$0xff] %vm489_vm0, %v472_v5 }
 0x105   : > { %900 = vmatmul.f32.gmra.mxu1 %v10642_v30 }
 0x106   : > { %981 = vmatmul.f32.gmra.mxu3 %v10651_v37 }
 0x109   : > { %v10664_v0 = vpop.f32.mrf.mxu3  ;;  %v10679_v28 = vpop.f32.mrf.mxu0 }
 0x10a   : > { %15330 = vst [vmem:[#allocation31_spill] sm:$0xff] %v10679_v28  ;;  %v10681_v29 = vpop.f32.mrf.mxu1 }
 0x10b   : > { %15331 = vst [vmem:[#allocation32_spill] sm:$0xff] %v10681_v29  ;;  %v10698_v29 = vld [vmem:[#allocation2 + $0xf0] sm:$0xff] }
 0x10c   : > { %724 = vmatmul.f32.gmra.mxu0 %v10658_v9  ;;  %1091 = vmatmul.f32.gmra.mxu2 %v10698_v29 }
 0x10d   : > { %903 = vmatmul.f32.gmra.mxu1 %v10658_v9 }
 0x10e   : > { %1846 = vmatmul.f32.vlgmr.msrb.gmra.mxu3 %v15329_v22 }
 0x111   : > { %v10676_v47 = vpop.f32.mrf.mxu3  ;;  %v10693_v42 = vpop.f32.mrf.mxu0 }
 0x112   : > { %15332 = vst [vmem:[#allocation33_spill] sm:$0xff] %v10693_v42  ;;  %v10695_v28 = vpop.f32.mrf.mxu1  ;;  %v10710_v42 = vld [vmem:[#allocation2 + $0xf8] sm:$0xff] }
 0x113   : > { %15333 = vst [vmem:[#allocation34_spill] sm:$0xff] %v10695_v28 }
 0x114   : > { %727 = vmatmul.f32.gmra.mxu0 %v10672_v12  ;;  %1094 = vmatmul.f32.gmra.mxu2 %v10710_v42 }
 0x115   : > { %906 = vmatmul.f32.gmra.mxu1 %v10672_v12 }
 0x116   : > { %1849 = vmatmul.f32.gmra.mxu3 %v15329_v22 }
 0x119   : > { %v10690_v38 = vpop.f32.mrf.mxu3  ;;  %v10705_v5 = vpop.f32.mrf.mxu0 }
 0x11a   : > { %15334 = vst [vmem:[#allocation35_spill] sm:$0xff] %v10705_v5  ;;  %v10707_v15 = vpop.f32.mrf.mxu1 }
 0x11b   : > { %15335 = vst [vmem:[#allocation36_spill] sm:$0xff] %v10707_v15 }
 0x11c   : > { %730 = vmatmul.f32.gmra.mxu0 %v10684_v16  ;;  %1097 = vmatmul.f32.gmra.mxu2 %v10407_v39 }
 0x11d   : > { %909 = vmatmul.f32.gmra.mxu1 %v10684_v16 }
 0x11e   : > { %1852 = vmatmul.f32.gmra.mxu3 %v15329_v22 }
 0x121   : > { %v10702_v17 = vpop.f32.mrf.mxu3  ;;  %v10717_v28 = vpop.f32.mrf.mxu0 }
 0x122   : > { %15336 = vst [vmem:[#allocation37_spill] sm:$0xff] %v10717_v28  ;;  %v10719_v45 = vpop.f32.mrf.mxu1 }
 0x123   : > { %15337 = vst [vmem:[#allocation38_spill] sm:$0xff] %v10719_v45 }
 0x124   : > { %733 = vmatmul.f32.gmra.mxu0 %v10698_v29  ;;  %1100 = vmatmul.f32.gmra.mxu2 %v10412_v41 }
 0x125   : > { %912 = vmatmul.f32.gmra.mxu1 %v10698_v29 }
 0x126   : > { %1855 = vmatmul.f32.gmra.mxu3 %v10419_v44 }
 0x129   : > { %v10714_v22 = vpop.f32.mrf.mxu3  ;;  %v10727_v5 = vpop.f32.mrf.mxu0 }
 0x12a   : > { %15338 = vst [vmem:[#allocation39_spill] sm:$0xff] %v10727_v5  ;;  %v10729_v15 = vpop.f32.mrf.mxu1 }
 0x12b   : > { %15339 = vst [vmem:[#allocation40_spill] sm:$0xff] %v10729_v15 }
 0x12c   : > { %736 = vmatmul.f32.gmra.mxu0 %v10710_v42  ;;  %1103 = vmatmul.f32.gmra.mxu2 %v10417_v43 }
 0x12d   : > { %915 = vmatmul.f32.gmra.mxu1 %v10710_v42 }
 0x12e   : > { %1858 = vmatmul.f32.gmra.mxu3 %v10430_v49 }
 0x131   : > { %v10724_v44 = vpop.f32.mrf.mxu3  ;;  %v10737_v49 = vpop.f32.mrf.mxu0 }
 0x132   : > { %15340 = vst [vmem:[#allocation41_spill] sm:$0xff] %v10737_v49  ;;  %v10739_v45 = vpop.f32.mrf.mxu1 }
 0x133   : > { %15341 = vst [vmem:[#allocation42_spill] sm:$0xff] %v10739_v45 }
 0x134   : > { %739 = vmatmul.f32.gmra.mxu0 %v10407_v39  ;;  %1106 = vmatmul.f32.gmra.mxu2 %v10428_v48 }
 0x136   : > { %1861 = vmatmul.f32.gmra.mxu3 %v10439_v52 }
 0x139   : > { %v10734_v28 = vpop.f32.mrf.mxu3  ;;  %v10746_v52 = vpop.f32.mrf.mxu0 }
 0x13a   : > { %15342 = vst [vmem:[#allocation43_spill] sm:$0xff] %v10746_v52  ;;  %v10748_v15 = vpop.f32.mrf.mxu1 }
 0x13b   : > { %15343 = vst [vmem:[#allocation44_spill] sm:$0xff] %v10748_v15 }
 0x13c   : > { %742 = vmatmul.f32.gmra.mxu0 %v10412_v41  ;;  %1109 = vmatmul.f32.gmra.mxu2 %v10437_v51 }
 0x13e   : > { %1864 = vmatmul.f32.gmra.mxu3 %v10448_v55 }
 0x141   : > { %v10743_v5 = vpop.f32.mrf.mxu3  ;;  %v10755_v49 = vpop.f32.mrf.mxu0 }
 0x142   : > { %15344 = vst [vmem:[#allocation45_spill] sm:$0xff] %v10755_v49  ;;  %v10757_v55 = vpop.f32.mrf.mxu1 }
 0x143   : > { %15345 = vst [vmem:[#allocation46_spill] sm:$0xff] %v10757_v55 }
 0x144   : > { %745 = vmatmul.f32.gmra.mxu0 %v10417_v43  ;;  %1112 = vmatmul.f32.gmra.mxu2 %v10446_v54 }
 0x146   : > { %1867 = vmatmul.f32.gmra.mxu3 %v10459_v59 }
 0x149   : > { %v10752_v23 = vpop.f32.mrf.mxu3  ;;  %v10764_v52 = vpop.f32.mrf.mxu0 }
 0x14a   : > { %15346 = vst [vmem:[#allocation47_spill] sm:$0xff] %v10764_v52  ;;  %v10766_v59 = vpop.f32.mrf.mxu1  ;;  %v10782_v52 = vpop.f32.mrf.mxu2 }
 0x14b   : > { %15347 = vst [vmem:[#allocation48_spill] sm:$0xff] %v10766_v59 }
 0x14c   : > { %748 = vmatmul.f32.gmra.mxu0 %v10428_v48  ;;  %1115 = vmatmul.f32.gmra.mxu2 %v10457_v58  ;;  %15352 = vst [vmem:[#allocation53_spill] sm:$0xff] %v10782_v52 }
 0x14e   : > { %1870 = vmatmul.f32.gmra.mxu3 %v10468_v63 }
 0x151   : > { %v10761_v39 = vpop.f32.mrf.mxu3  ;;  %v10773_v49 = vpop.f32.mrf.mxu0 }
 0x152   : > { %15349 = vst [vmem:[#allocation50_spill] sm:$0xff] %v10773_v49  ;;  %v10775_v63 = vpop.f32.mrf.mxu1 }
 0x153   : > { %15350 = vst [vmem:[#allocation51_spill] sm:$0xff] %v10775_v63 }
 0x154   : > { %751 = vmatmul.f32.gmra.mxu0 %v10437_v51  ;;  %1118 = vmatmul.f32.gmra.mxu2 %v10466_v62 }
 0x156   : > { %1873 = vmatmul.f32.gmra.mxu3 %v10477_v3 }
 0x159   : > { %v10770_v41 = vpop.f32.mrf.mxu3  ;;  %v10784_v3 = vpop.f32.mrf.mxu0 }
 0x15a   : > { %15348 = vst [vmem:[#allocation49_spill] sm:$0xff] %v10770_v41  ;;  %v10786_v48 = vpop.f32.mrf.mxu1 }
 0x15b   : > { %15353 = vst [vmem:[#allocation54_spill] sm:$0xff] %v10784_v3 }
 0x15c   : > { %15354 = vst [vmem:[#allocation55_spill] sm:$0xff] %v10786_v48  ;;  %754 = vmatmul.f32.gmra.mxu0 %v10446_v54  ;;  %1121 = vmatmul.f32.gmra.mxu2 %v10475_v2 }
 0x15e   : > { %1876 = vmatmul.f32.gmra.mxu3 %v10488_v7  ;;  %v1071_v7 = vpop.f32.mrf.mxu2 }
 0x15f   : > { %v1564_v55 = vrot.slane %v1071_v7, 2 }
 0x161   : > { %v10779_v43 = vpop.f32.mrf.mxu3  ;;  %v710_v51 = vpop.f32.mrf.mxu0 }
 0x162   : > { %15351 = vst [vmem:[#allocation52_spill] sm:$0xff] %v10779_v43  ;;  %v10793_v63 = vpop.f32.mrf.mxu1 }
 0x163   : > { %15356 = vst [vmem:[#allocation57_spill] sm:$0xff] %v10793_v63  ;;  %v15239_v18 = vrot.slane %v10793_v63, 1 }
 0x164   : > { %757 = vmatmul.f32.gmra.mxu0 %v10457_v58  ;;  %1124 = vmatmul.f32.gmra.mxu2 %v10486_v6 }
 0x166   : > { %1879 = vmatmul.f32.gmra.mxu3 %v10497_v11  ;;  %v15238_v11 = vrot.slane %v10782_v52, 2  ;;  %v1074_v54 = vpop.f32.mrf.mxu2 }
 0x168   : > { %v1565_v7 = vsel %vm1525_vm2, %v15238_v11, %v1564_v55 }
 0x169   : > { %v10790_v49 = vpop.f32.mrf.mxu3  ;;  %v713_v15 = vpop.f32.mrf.mxu0 }
 0x16a   : > { %15355 = vst [vmem:[#allocation56_spill] sm:$0xff] %v10790_v49  ;;  %v892_v45 = vpop.f32.mrf.mxu1 }
 0x16b   : > { %v1311_v3 = vrot.slane %v892_v45, 1 }
 0x16c   : > { %760 = vmatmul.f32.gmra.mxu0 %v10466_v62  ;;  %1127 = vmatmul.f32.gmra.mxu2 %v10495_v10 }
 0x16d   : > { %v1312_v58 = vsel %vm1272_vm1, %v15239_v18, %v1311_v3 }
 0x16e   : > { %1882 = vmatmul.f32.gmra.mxu3 %v10506_v14  ;;  %v1440_v14 = vadd.f32 %v1311_v3, %v713_v15  ;;  %v1077_v62 = vpop.f32.mrf.mxu2  ;;  %v1566_v3 = vrot.slane %v1074_v54, 2 }
 0x16f   : > { %v1567_v11 = vrot.slane %v1077_v62, 2 }
 0x171   : > { %v10797_v59 = vpop.f32.mrf.mxu3  ;;  %v716_v49 = vpop.f32.mrf.mxu0 }
 0x172   : > { %15357 = vst [vmem:[#allocation58_spill] sm:$0xff] %v10797_v59  ;;  %v10813_v59 = vadd.f32 %v1564_v55, %v1440_v14  ;;  %v895_v43 = vpop.f32.mrf.mxu1 }
 0x173   : > { %v1313_v18 = vrot.slane %v895_v43, 1 }
 0x174   : > { %763 = vmatmul.f32.gmra.mxu0 %v10475_v2  ;;  %1130 = vmatmul.f32.gmra.mxu2 %v10504_v13 }
 0x176   : > { %1885 = vmatmul.f32.gmra.mxu3 %v10521_v20  ;;  %v1439_v20 = vadd.f32 %v1312_v58, %v710_v51  ;;  %v1080_v51 = vpop.f32.mrf.mxu2 }
 0x177   : > { %v1569_v43 = vrot.slane %v1080_v51, 2 }
 0x178   : > { %v10815_v45 = vadd.f32 %v1565_v7, %v1439_v20 }
 0x179   : > { %v10810_v48 = vpop.f32.mrf.mxu3  ;;  %v719_v52 = vpop.f32.mrf.mxu0 }
 0x17a   : > { %v898_v55 = vpop.f32.mrf.mxu1 }
 0x17b   : > { %v1314_v58 = vrot.slane %v898_v55, 1 }
 0x17c   : > { %766 = vmatmul.f32.gmra.mxu0 %v10486_v6  ;;  %1133 = vmatmul.f32.gmra.mxu2 %v10519_v19 }
 0x17d   : > { %v1315_v14 = vsel %vm1272_vm1, %v1313_v18, %v1314_v58 }
 0x17e   : > { %1888 = vmatmul.f32.gmra.mxu3 %v10532_v26  ;;  %v1568_v26 = vsel %vm1525_vm2, %v1566_v3, %v1567_v11  ;;  %v1441_v7 = vadd.f32 %v1315_v14, %v716_v49  ;;  %v1083_v55 = vpop.f32.mrf.mxu2  ;;  %v1570_v3 = vsel %vm1525_vm2, %v1567_v11, %v1569_v43 }
 0x17f   : > { %v1571_v11 = vrot.slane %v1083_v55, 2 }
 0x180   : > { %v10829_v54 = vadd.f32 %v1568_v26, %v1441_v7 }
 0x181   : > { %v10819_v15 = vpop.f32.mrf.mxu3  ;;  %v722_v20 = vpop.f32.mrf.mxu0 }
 0x182   : > { %v901_v62 = vpop.f32.mrf.mxu1 }
 0x184   : > { %769 = vmatmul.f32.gmra.mxu0 %v10495_v10  ;;  %1136 = vmatmul.f32.gmra.mxu2 %v10530_v25 }
 0x186   : > { %1891 = vmatmul.f32.gmra.mxu3 %v10545_v32  ;;  %v1316_v32 = vrot.slane %v901_v62, 1 }
 0x188   : > { %v1317_v6 = vsel %vm1272_vm1, %v1314_v58, %v1316_v32  ;;  %v1443_v18 = vadd.f32 %v1316_v32, %v722_v20  ;;  %v1086_v58 = vpop.f32.mrf.mxu2 }
 0x189   : > { %v10826_v2 = vpop.f32.mrf.mxu3  ;;  %v1442_v49 = vadd.f32 %v1317_v6, %v719_v52  ;;  %v725_v26 = vpop.f32.mrf.mxu0  ;;  %v1572_v7 = vrot.slane %v1086_v58, 2 }
 0x18a   : > { %15358 = vst [vmem:[#allocation59_spill] sm:$0xff] %v10826_v2  ;;  %v10838_v14 = vadd.f32 %v1569_v43, %v1443_v18 }
 0x18b   : > { %v10840_v51 = vadd.f32 %v1570_v3, %v1442_v49 }
 0x18c   : > { %772 = vmatmul.f32.gmra.mxu0 %v10504_v13  ;;  %1139 = vmatmul.f32.gmra.mxu2 %v10543_v31 }
 0x18e   : > { %1894 = vmatmul.f32.gmra.mxu3 %v10560_v56  ;;  %v904_v56 = vpop.f32.mrf.mxu1 }
 0x18f   : > { %v1318_v20 = vrot.slane %v904_v56, 1 }
 0x190   : > { %v1089_v18 = vpop.f32.mrf.mxu2 }
 0x191   : > { %v10835_v2 = vpop.f32.mrf.mxu3  ;;  %v728_v62 = vpop.f32.mrf.mxu0  ;;  %v1574_v3 = vrot.slane %v1089_v18, 2 }
 0x192   : > { %15359 = vst [vmem:[#allocation60_spill] sm:$0xff] %v10835_v2 }
 0x193   : > { %v1575_v58 = vsel %vm1525_vm2, %v1572_v7, %v1574_v3 }
 0x194   : > { %775 = vmatmul.f32.gmra.mxu0 %v10519_v19  ;;  %1142 = vmatmul.f32.gmra.mxu2 %v10558_v50 }
 0x196   : > { %1897 = vmatmul.f32.gmra.mxu3 %v10577_v27  ;;  %v907_v32 = vpop.f32.mrf.mxu1  ;;  %v1573_v27 = vsel %vm1525_vm2, %v1571_v11, %v1572_v7  ;;  %v15243_v7 = vrot.slane %v10584_v36, 1 }
 0x197   : > { %v1319_v52 = vrot.slane %v907_v32, 1 }
 0x199   : > { %v1850_v10 = vpop.f32.mrf.mxu3  ;;  %v1320_v43 = vsel %vm1272_vm1, %v1318_v20, %v1319_v52  ;;  %v731_v49 = vpop.f32.mrf.mxu0 }
 0x19a   : > { %v1444_v13 = vadd.f32 %v1320_v43, %v725_v26 }
 0x19c   : > { %v10852_v55 = vadd.f32 %v1573_v27, %v1444_v13  ;;  %778 = vmatmul.f32.gmra.mxu0 %v10530_v25  ;;  %1145 = vmatmul.f32.gmra.mxu2 %v10575_v21 }
 0x19e   : > { %1900 = vmatmul.f32.gmra.mxu3 %v10593_v53  ;;  %v910_v56 = vpop.f32.mrf.mxu1 }
 0x19f   : > { %v1321_v53 = vrot.slane %v910_v56, 1 }
 0x1a1   : > { %v10849_v6 = vpop.f32.mrf.mxu3  ;;  %v1322_v19 = vsel %vm1272_vm1, %v1319_v52, %v1321_v53  ;;  %v1446_v10 = vadd.f32 %v1321_v53, %v731_v49  ;;  %v10865_v43 = vpop.f32.mrf.mxu0  ;;  %v15242_v53 = vrot.slane %v10632_v61, 1 }
 0x1a2   : > { %15360 = vst [vmem:[#allocation61_spill] sm:$0xff] %v10849_v6  ;;  %v1445_v26 = vadd.f32 %v1322_v19, %v728_v62  ;;  %v1334_v19 = vrot.slane %v10664_v0, 1  ;;  %v9346_v6 = vld [vmem:[#allocation2 + $0x148] sm:$0xff] }
 0x1a3   : > { %v10861_v20 = vadd.f32 %v1574_v3, %v1446_v10  ;;  %v1329_v3 = vrot.slane %v10618_v33, 1 }
 0x1a4   : > { %v10863_v32 = vadd.f32 %v1575_v58, %v1445_v26  ;;  %781 = vmatmul.f32.gmra.mxu0 %v10543_v31  ;;  %1148 = vmatmul.f32.gmra.mxu2 %v10591_v46  ;;  %v15241_v58 = vrot.slane %v10676_v47, 1 }
 0x1a6   : > { %1903 = vmatmul.f32.gmra.mxu3 %v10582_v34  ;;  %v10867_v34 = vpop.f32.mrf.mxu1 }
 0x1a9   : > { %v10858_v11 = vpop.f32.mrf.mxu3  ;;  %v737_v52 = vpop.f32.mrf.mxu0 }
 0x1aa   : > { %15361 = vst [vmem:[#allocation62_spill] sm:$0xff] %v10858_v11 }
 0x1ac   : > { %784 = vmatmul.f32.gmra.mxu0 %v10558_v50  ;;  %1151 = vmatmul.f32.gmra.mxu2 %v10605_v8 }
 0x1ae   : > { %1906 = vmatmul.f32.gmra.mxu3 %v10596_v57  ;;  %v10875_v62 = vpop.f32.mrf.mxu1 }
 0x1af   : > { %v15244_v27 = vrot.slane %v10875_v62, 1 }
 0x1b1   : > { %v10871_v25 = vpop.f32.mrf.mxu3  ;;  %v1327_v31 = vsel %vm1272_vm1, %v15244_v27, %v15243_v7  ;;  %v10890_v18 = vpop.f32.mrf.mxu0  ;;  %v1343_v7 = vrot.slane %v10724_v44, 1  ;;  %v1344_v27 = vrot.slane %v10734_v28, 1 }
 0x1b2   : > { %15362 = vst [vmem:[#allocation63_spill] sm:$0xff] %v10871_v25  ;;  %v10888_v13 = vadd.f32 %v1327_v31, %v737_v52  ;;  %v1828_v52 = vld [vmem:[#allocation4 + $0x2f0] sm:$0xff]  ;;  %v11045_v25 = vld [vmem:[#allocation2 + $0x48] sm:$0xff] }
 0x1b3   : > { %v10957_v31 = vld [vmem:[#allocation2] sm:$0xff]  ;;  %2009 = vmatpush.msra.mxu0 %v1828_v52 }
 0x1b4   : > { %787 = vmatmul.f32.gmra.mxu0 %v10575_v21  ;;  %1154 = vmatmul.f32.gmra.mxu2 %v10621_v35  ;;  %v10913_v21 = vsel %vm1272_vm1, %v1329_v3, %v15242_v53 }
 0x1b6   : > { %1909 = vmatmul.f32.gmra.mxu3 %v10612_v24  ;;  %v1328_v24 = vrot.slane %v10602_v4, 1 }
 0x1b8   : > { %v10900_v49 = vsel %vm1272_vm1, %v1328_v24, %v1329_v3 }
 0x1b9   : > { %v10885_v57 = vpop.f32.mrf.mxu3  ;;  %v10902_v56 = vpop.f32.mrf.mxu0 }
 0x1ba   : > { %15363 = vst [vmem:[#allocation64_spill] sm:$0xff] %v10885_v57 }
 0x1bc   : > { %790 = vmatmul.f32.gmra.mxu0 %v10591_v46  ;;  %1157 = vmatmul.f32.gmra.mxu2 %v10635_v1 }
 0x1be   : > { %1912 = vmatmul.f32.gmra.mxu3 %v10628_v60 }
 0x1c1   : > { %v10896_v50 = vpop.f32.mrf.mxu3  ;;  %v10915_v33 = vpop.f32.mrf.mxu0 }
 0x1c2   : > { %15364 = vst [vmem:[#allocation65_spill] sm:$0xff] %v10896_v50  ;;  %v15381_v50 = vld [vmem:[#allocation56_spill] sm:$0xff] }
 0x1c4   : > { %793 = vmatmul.f32.gmra.mxu0 %v10605_v8  ;;  %1160 = vmatmul.f32.gmra.mxu2 %v10651_v37 }
 0x1c6   : > { %1915 = vmatmul.f32.gmra.mxu3 %v10642_v30  ;;  %v1333_v30 = vrot.slane %v10648_v40, 1 }
 0x1c8   : > { %v10932_v8 = vsel %vm1272_vm1, %v1333_v30, %v1334_v19 }
 0x1c9   : > { %v10907_v4 = vpop.f32.mrf.mxu3  ;;  %v10922_v46 = vpop.f32.mrf.mxu0 }
 0x1ca   : > { %15365 = vst [vmem:[#allocation66_spill] sm:$0xff] %v10907_v4  ;;  %v9345_v4 = vld [vmem:[#allocation2 + $0x140] sm:$0xff] }
 0x1cc   : > { %796 = vmatmul.f32.gmra.mxu0 %v10621_v35 }
 0x1ce   : > { %1918 = vmatmul.f32.gmra.mxu3 %v10658_v9 }
 0x1d1   : > { %v10919_v60 = vpop.f32.mrf.mxu3  ;;  %v10934_v9 = vpop.f32.mrf.mxu0 }
 0x1d2   : > { %15366 = vst [vmem:[#allocation67_spill] sm:$0xff] %v10919_v60 }
 0x1d4   : > { %799 = vmatmul.f32.gmra.mxu0 %v10635_v1  ;;  %v1339_v1 = vrot.slane %v10702_v17, 1 }
 0x1d6   : > { %1921 = vmatmul.f32.gmra.mxu3 %v10672_v12  ;;  %v10944_v12 = vsel %vm1272_vm1, %v1334_v19, %v15241_v58  ;;  %v9338_v19 = vld [vmem:[#allocation2 + $0x108] sm:$0xff]  ;;  %v9339_v58 = vld [vmem:[#allocation2 + $0x110] sm:$0xff] }
 0x1d9   : > { %v10928_v10 = vpop.f32.mrf.mxu3  ;;  %v10946_v35 = vpop.f32.mrf.mxu0 }
 0x1da   : > { %15367 = vst [vmem:[#allocation68_spill] sm:$0xff] %v10928_v10  ;;  %v11034_v10 = vld [vmem:[#allocation2 + $0x40] sm:$0xff] }
 0x1dc   : > { %802 = vmatmul.f32.gmra.mxu0 %v10651_v37  ;;  %v9337_v37 = vld [vmem:[#allocation2 + $0x100] sm:$0xff] }
 0x1de   : > { %1924 = vmatmul.f32.gmra.mxu3 %v10684_v16  ;;  %v1338_v16 = vrot.slane %v10690_v38, 1  ;;  %v15245_v38 = vrot.slane %v10714_v22, 1 }
 0x1e0   : > { %v10974_v30 = vsel %vm1272_vm1, %v1339_v1, %v15245_v38 }
 0x1e1   : > { %v10939_v40 = vpop.f32.mrf.mxu3  ;;  %v10952_v26 = vpop.f32.mrf.mxu0 }
 0x1e2   : > { %15368 = vst [vmem:[#allocation69_spill] sm:$0xff] %v10939_v40  ;;  %v9343_v40 = vld [vmem:[#allocation2 + $0x130] sm:$0xff] }
 0x1e4   : > { %1001 = vmatmul.f32.vlgmr.msrb.gmra.mxu0 %v10957_v31 }
 0x1e6   : > { %1927 = vmatmul.f32.gmra.mxu3 %v10698_v29  ;;  %v10963_v29 = vsel %vm1272_vm1, %v1338_v16, %v1339_v1 }
 0x1e9   : > { %v10950_v0 = vpop.f32.mrf.mxu3  ;;  %v10965_v3 = vpop.f32.mrf.mxu0 }
 0x1ea   : > { %15369 = vst [vmem:[#allocation70_spill] sm:$0xff] %v10950_v0  ;;  %v15247_v0 = vrot.slane %v10770_v41, 1 }
 0x1ec   : > { %1004 = vmatmul.f32.gmra.mxu0 %v10957_v31 }
 0x1ee   : > { %1930 = vmatmul.f32.gmra.mxu3 %v10710_v42  ;;  %v1825_v42 = vld [vmem:[#allocation4 + $0x2d8] sm:$0xff] }
 0x1ef   : > { %2010 = vmatpush.msra.mxu0 %v1825_v42  ;;  %v10989_v42 = vsel %vm1272_vm1, %v1343_v7, %v1344_v27 }
 0x1f1   : > { %v10960_v24 = vpop.f32.mrf.mxu3  ;;  %v10976_v16 = vpop.f32.mrf.mxu0 }
 0x1f2   : > { %15370 = vst [vmem:[#allocation71_spill] sm:$0xff] %v10960_v24 }
 0x1f4   : > { %1007 = vmatmul.f32.gmra.mxu0 %v10957_v31 }
 0x1f6   : > { %1933 = vmatmul.f32.gmra.mxu3 %v9337_v37  ;;  %v1822_v37 = vld [vmem:[#allocation4 + $0x2c0] sm:$0xff] }
 0x1f7   : > { %2011 = vmatpush.msra.mxu0 %v1822_v37  ;;  %v15246_v37 = vrot.slane %v10743_v5, 1 }
 0x1f9   : > { %v10969_v17 = vpop.f32.mrf.mxu3  ;;  %v10981_v53 = vpop.f32.mrf.mxu0  ;;  %v11000_v28 = vsel %vm1272_vm1, %v1344_v27, %v15246_v37  ;;  %v11011_v27 = vld [vmem:[#allocation2 + $0x30] sm:$0xff] }
 0x1fa   : > { %15371 = vst [vmem:[#allocation72_spill] sm:$0xff] %v10969_v17  ;;  %v1819_v17 = vld [vmem:[#allocation4 + $0x2a8] sm:$0xff] }
 0x1fb   : > { %2012 = vmatpush.msra.mxu0 %v1819_v17  ;;  %v1348_v17 = vrot.slane %v10752_v23, 1  ;;  %v11022_v23 = vld [vmem:[#allocation2 + $0x38] sm:$0xff] }
 0x1fc   : > { %1010 = vmatmul.f32.gmra.mxu0 %v10957_v31 }
 0x1fe   : > { %1936 = vmatmul.f32.gmra.mxu3 %v9338_v19  ;;  %v9340_v19 = vld [vmem:[#allocation2 + $0x118] sm:$0xff] }
 0x201   : > { %v10979_v52 = vpop.f32.mrf.mxu3  ;;  %v10991_v38 = vpop.f32.mrf.mxu0 }
 0x202   : > { %15372 = vst [vmem:[#allocation73_spill] sm:$0xff] %v10979_v52  ;;  %v9342_v52 = vld [vmem:[#allocation2 + $0x128] sm:$0xff] }
 0x204   : > { %1013 = vmatmul.f32.gmra.mxu0 %v10957_v31 }
 0x206   : > { %1939 = vmatmul.f32.gmra.mxu3 %v9339_v58  ;;  %v9341_v58 = vld [vmem:[#allocation2 + $0x120] sm:$0xff] }
 0x209   : > { %v10986_v1 = vpop.f32.mrf.mxu3  ;;  %v11002_v7 = vpop.f32.mrf.mxu0 }
 0x20a   : > { %15373 = vst [vmem:[#allocation74_spill] sm:$0xff] %v10986_v1 }
 0x20c   : > { %1016 = vmatmul.f32.gmra.mxu0 %v10957_v31 }
 0x20e   : > { %1942 = vmatmul.f32.gmra.mxu3 %v9340_v19  ;;  %v1816_v19 = vld [vmem:[#allocation4 + $0x290] sm:$0xff] }
 0x20f   : > { %2013 = vmatpush.msra.mxu0 %v1816_v19 }
 0x211   : > { %v10995_v44 = vpop.f32.mrf.mxu3  ;;  %v11007_v24 = vpop.f32.mrf.mxu0 }
 0x212   : > { %15374 = vst [vmem:[#allocation75_spill] sm:$0xff] %v10995_v44  ;;  %v1349_v44 = vrot.slane %v10761_v39, 1 }
 0x214   : > { %1019 = vmatmul.f32.gmra.mxu0 %v11011_v27 }
 0x216   : > { %1945 = vmatmul.f32.gmra.mxu3 %v9341_v58  ;;  %v11017_v58 = vsel %vm1272_vm1, %v1348_v17, %v1349_v44  ;;  %v9344_v17 = vld [vmem:[#allocation2 + $0x138] sm:$0xff] }
 0x219   : > { %v11005_v1 = vpop.f32.mrf.mxu3  ;;  %v11019_v19 = vpop.f32.mrf.mxu0 }
 0x21a   : > { %15375 = vst [vmem:[#allocation76_spill] sm:$0xff] %v11005_v1  ;;  %v1813_v1 = vld [vmem:[#allocation4 + $0x278] sm:$0xff] }
 0x21b   : > { %2014 = vmatpush.msra.mxu0 %v1813_v1  ;;  %v1810_v1 = vld [vmem:[#allocation4 + $0x260] sm:$0xff] }
 0x21c   : > { %1022 = vmatmul.f32.gmra.mxu0 %v11022_v23 }
 0x21d   : > { %2015 = vmatpush.msra.mxu0 %v1810_v1 }
 0x21e   : > { %1948 = vmatmul.f32.gmra.mxu3 %v9342_v52  ;;  %v11030_v52 = vsel %vm1272_vm1, %v1349_v44, %v15247_v0  ;;  %v1354_v44 = vrot.slane %v15381_v50, 1  ;;  %v11043_v0 = vpop.f32.mrf.mxu2  ;;  %v11056_v50 = vld [vmem:[#allocation2 + $0x50] sm:$0xff] }
 0x221   : > { %v11014_v37 = vpop.f32.mrf.mxu3 }
 0x222   : > { %15376 = vst [vmem:[#allocation77_spill] sm:$0xff] %v11014_v37  ;;  %v11032_v37 = vpop.f32.mrf.mxu0 }
 0x224   : > { %1025 = vmatmul.f32.gmra.mxu0 %v11034_v10 }
 0x226   : > { %1951 = vmatmul.f32.gmra.mxu3 %v9343_v40 }
 0x229   : > { %v11025_v39 = vpop.f32.mrf.mxu3 }
 0x22a   : > { %15377 = vst [vmem:[#allocation78_spill] sm:$0xff] %v11025_v39  ;;  %v11039_v60 = vpop.f32.mrf.mxu0  ;;  %v15380_v39 = vld [vmem:[#allocation52_spill] sm:$0xff] }
 0x22b   : > { %15379 = vst [vmem:[#allocation80_spill] sm:$0xff] %v11039_v60  ;;  %v1353_v57 = vrot.slane %v15380_v39, 1  ;;  %v15385_v39 = vld [vmem:[#allocation58_spill] sm:$0xff] }
 0x22c   : > { %1028 = vmatmul.f32.gmra.mxu0 %v11045_v25  ;;  %v15250_v2 = vrot.slane %v15385_v39, 1 }
 0x22d   : > { %v11051_v1 = vsel %vm1272_vm1, %v1353_v57, %v1354_v44 }
 0x22e   : > { %1954 = vmatmul.f32.gmra.mxu3 %v9344_v17  ;;  %15383 = vst [vmem:[#allocation56_spill] sm:$0xff] %v11051_v1  ;;  %v11067_v57 = vsel %vm1272_vm1, %v1354_v44, %v15250_v2  ;;  %v1358_v44 = vrot.slane %v10810_v48, 1  ;;  %v1359_v2 = vrot.slane %v10819_v15, 1 }
 0x22f   : > { %15387 = vst [vmem:[#allocation83_spill] sm:$0xff] %v11067_v57  ;;  %v9349_v57 = vld [vmem:[#allocation2 + $0x160] sm:$0xff] }
 0x231   : > { %v11037_v40 = vpop.f32.mrf.mxu3 }
 0x232   : > { %15378 = vst [vmem:[#allocation79_spill] sm:$0xff] %v11037_v40  ;;  %v1807_v40 = vld [vmem:[#allocation4 + $0x248] sm:$0xff]  ;;  %v11053_v11 = vpop.f32.mrf.mxu0 }
 0x233   : > { %2016 = vmatpush.msra.mxu0 %v1807_v40  ;;  %15384 = vst [vmem:[#allocation81_spill] sm:$0xff] %v11053_v11  ;;  %v9347_v40 = vld [vmem:[#allocation2 + $0x150] sm:$0xff]  ;;  %v11071_v11 = vld [vmem:[#allocation2 + $0x58] sm:$0xff] }
 0x234   : > { %1031 = vmatmul.f32.gmra.mxu0 %v11056_v50 }
 0x236   : > { %1957 = vmatmul.f32.gmra.mxu3 %v9345_v4  ;;  %v11059_v4 = vpop.f32.mrf.mxu2 }
 0x239   : > { %v11048_v17 = vpop.f32.mrf.mxu3 }
 0x23a   : > { %15382 = vst [vmem:[#allocation52_spill] sm:$0xff] %v11048_v17  ;;  %v11069_v1 = vpop.f32.mrf.mxu0 }
 0x23b   : > { %15388 = vst [vmem:[#allocation84_spill] sm:$0xff] %v11069_v1  ;;  %v3022_v1 = vld [vmem:[#allocation4 + $0x438] sm:$0xff] }
 0x23c   : > { %1034 = vmatmul.f32.gmra.mxu0 %v11071_v11 }
 0x23e   : > { %1960 = vmatmul.f32.gmra.mxu3 %v9346_v6  ;;  %v1804_v6 = vld [vmem:[#allocation4 + $0x230] sm:$0xff] }
 0x23f   : > { %2017 = vmatpush.msra.mxu0 %v1804_v6 }
 0x241   : > { %v1913_v63 = vpop.f32.mrf.mxu3 }
 0x242   : > { %v11062_v17 = vadd.f32 %v1913_v63, %v10815_v45  ;;  %v11077_v63 = vpop.f32.mrf.mxu2  ;;  %v9348_v45 = vld [vmem:[#allocation2 + $0x158] sm:$0xff] }
 0x244   : > { %15386 = vst [vmem:[#allocation82_spill] sm:$0xff] %v11062_v17  ;;  %v11079_v17 = vpop.f32.mrf.mxu0 }
 0x245   : > { %15390 = vst [vmem:[#allocation86_spill] sm:$0xff] %v11079_v17 }
 0x246   : > { %1963 = vmatmul.f32.gmra.mxu3 %v9347_v40  ;;  %v11083_v40 = vld [vmem:[#allocation2 + $0x60] sm:$0xff] }
 0x247   : > { %1037 = vmatmul.f32.gmra.mxu0 %v11083_v40 }
 0x249   : > { %v1916_v41 = vpop.f32.mrf.mxu3 }
 0x24a   : > { %v11075_v60 = vadd.f32 %v1916_v41, %v10813_v59  ;;  %v1801_v59 = vld [vmem:[#allocation4 + $0x218] sm:$0xff]  ;;  %v11090_v41 = vsel %vm1272_vm1, %v1358_v44, %v1359_v2  ;;  %v11094_v15 = vpop.f32.mrf.mxu2  ;;  %v1798_v2 = vld [vmem:[#allocation4 + $0x200] sm:$0xff] }
 0x24b   : > { %15392 = vst [vmem:[#allocation88_spill] sm:$0xff] %v11090_v41  ;;  %2018 = vmatpush.msra.mxu0 %v1801_v59  ;;  %v9350_v44 = vld [vmem:[#allocation2 + $0x168] sm:$0xff] }
 0x24c   : > { %15389 = vst [vmem:[#allocation85_spill] sm:$0xff] %v11075_v60  ;;  %v3028_v60 = vld [vmem:[#allocation4 + $0x468] sm:$0xff]  ;;  %v11092_v48 = vpop.f32.mrf.mxu0 }
 0x24d   : > { %3031 = vmatpush.msrb.mxu2 %v3028_v60  ;;  %15393 = vst [vmem:[#allocation89_spill] sm:$0xff] %v11092_v48  ;;  %2019 = vmatpush.msra.mxu0 %v1798_v2  ;;  %v3025_v48 = vld [vmem:[#allocation4 + $0x450] sm:$0xff]  ;;  %v11112_v2 = vld [vmem:[#allocation2 + $0x78] sm:$0xff] }
 0x24e   : > { %1966 = vmatmul.f32.gmra.mxu3 %v9348_v45  ;;  %v11096_v45 = vld [vmem:[#allocation2 + $0x68] sm:$0xff]  ;;  %15397 = vst [vmem:[#allocation93_spill] sm:$0xff] %v11112_v2 }
 0x24f   : > { %1040 = vmatmul.f32.gmra.mxu0 %v11096_v45  ;;  %3032 = vmatpush.msrb.mxu2 %v3025_v48  ;;  %v11122_v48 = vld [vmem:[#allocation2 + $0x80] sm:$0xff] }
 0x250   : > { %15400 = vst [vmem:[#allocation96_spill] sm:$0xff] %v11122_v48 }
 0x251   : > { %v1919_v39 = vpop.f32.mrf.mxu3  ;;  %3033 = vmatpush.msrb.mxu2 %v3022_v1 }
 0x252   : > { %v11087_v6 = vadd.f32 %v1919_v39, %v10829_v54  ;;  %v1829_v39 = vld [vmem:[#allocation4 + $0x2f8] sm:$0xff]  ;;  %v11102_v60 = vpop.f32.mrf.mxu2 }
 0x253   : > { %2188 = vmatpush.msrb.mxu1 %v1829_v39  ;;  %v1795_v39 = vld [vmem:[#allocation4 + $0x1e8] sm:$0xff] }
 0x254   : > { %15391 = vst [vmem:[#allocation87_spill] sm:$0xff] %v11087_v6  ;;  %v800_v59 = vpop.f32.mrf.mxu0  ;;  %v11104_v6 = vld [vmem:[#allocation2 + $0x70] sm:$0xff]  ;;  %2020 = vmatpush.msra.mxu0 %v1795_v39  ;;  %v1792_v39 = vld [vmem:[#allocation4 + $0x1d0] sm:$0xff] }
 0x256   : > { %1969 = vmatmul.f32.gmra.mxu3 %v9349_v57  ;;  %2021 = vmatpush.msra.mxu0 %v1792_v39  ;;  %v1823_v39 = vld [vmem:[#allocation4 + $0x2c8] sm:$0xff] }
 0x257   : > { %1043 = vmatmul.f32.gmra.mxu0 %v11104_v6 }
 0x259   : > { %v1922_v17 = vpop.f32.mrf.mxu3 }
 0x25a   : > { %v11100_v54 = vadd.f32 %v1922_v17, %v10840_v51  ;;  %v9351_v51 = vld [vmem:[#allocation2 + $0x170] sm:$0xff] }
 0x25c   : > { %15394 = vst [vmem:[#allocation90_spill] sm:$0xff] %v11100_v54  ;;  %v11110_v17 = vpop.f32.mrf.mxu0 }
 0x25d   : > { %15396 = vst [vmem:[#allocation92_spill] sm:$0xff] %v11110_v17 }
 0x25e   : > { %1972 = vmatmul.f32.gmra.mxu3 %v9350_v44  ;;  %v11115_v44 = vpop.f32.mrf.mxu2 }
 0x25f   : > { %1046 = vmatmul.f32.gmra.mxu0 %v11112_v2 }
 0x261   : > { %v1925_v57 = vpop.f32.mrf.mxu3 }
 0x262   : > { %v11108_v41 = vadd.f32 %v1925_v57, %v10838_v14  ;;  %v1826_v14 = vld [vmem:[#allocation4 + $0x2e0] sm:$0xff]  ;;  %v9352_v57 = vld [vmem:[#allocation2 + $0x178] sm:$0xff] }
 0x263   : > { %2189 = vmatpush.msrb.mxu1 %v1826_v14  ;;  %v1323_v14 = vrot.slane %v10867_v34, 1  ;;  %v9354_v34 = vld [vmem:[#allocation2 + $0x188] sm:$0xff] }
 0x264   : > { %15395 = vst [vmem:[#allocation91_spill] sm:$0xff] %v11108_v41  ;;  %v11120_v41 = vpop.f32.mrf.mxu0 }
 0x265   : > { %15399 = vst [vmem:[#allocation95_spill] sm:$0xff] %v11120_v41  ;;  %2190 = vmatpush.msrb.mxu1 %v1823_v39  ;;  %v3019_v39 = vld [vmem:[#allocation4 + $0x420] sm:$0xff] }
 0x266   : > { %1975 = vmatmul.f32.gmra.mxu3 %v9351_v51  ;;  %v11128_v2 = vpop.f32.mrf.mxu2  ;;  %3034 = vmatpush.msrb.mxu2 %v3019_v39  ;;  %v3013_v39 = vld [vmem:[#allocation4 + $0x3f0] sm:$0xff] }
 0x267   : > { %1049 = vmatmul.f32.gmra.mxu0 %v11122_v48  ;;  %v3007_v48 = vld [vmem:[#allocation4 + $0x3c0] sm:$0xff] }
 0x269   : > { %v1928_v59 = vpop.f32.mrf.mxu3 }
 0x26a   : > { %v11118_v54 = vadd.f32 %v1928_v59, %v10852_v55  ;;  %v9353_v55 = vld [vmem:[#allocation2 + $0x180] sm:$0xff] }
 0x26c   : > { %15398 = vst [vmem:[#allocation94_spill] sm:$0xff] %v11118_v54  ;;  %v11130_v59 = vpop.f32.mrf.mxu0  ;;  %v1576_v54 = vrot.slane %v11043_v0, 2 }
 0x26d   : > { %15402 = vst [vmem:[#allocation98_spill] sm:$0xff] %v11130_v59  ;;  %v1789_v59 = vld [vmem:[#allocation4 + $0x1b8] sm:$0xff] }
 0x26e   : > { %1978 = vmatmul.f32.gmra.mxu3 %v9352_v57  ;;  %v11133_v57 = vld [vmem:[#allocation2 + $0x88] sm:$0xff]  ;;  %2022 = vmatpush.msra.mxu0 %v1789_v59  ;;  %v11147_v0 = vpop.f32.mrf.mxu2 }
 0x26f   : > { %15403 = vst [vmem:[#allocation99_spill] sm:$0xff] %v11133_v57  ;;  %1052 = vmatmul.f32.gmra.mxu0 %v11133_v57 }
 0x271   : > { %v1931_v51 = vpop.f32.mrf.mxu3 }
 0x272   : > { %v11126_v17 = vadd.f32 %v1931_v51, %v10863_v32  ;;  %v1577_v32 = vrot.slane %v11059_v4, 2  ;;  %v15404_v51 = vrot.slane %v10875_v62, 1  ;;  %v3029_v62 = vld [vmem:[#allocation4 + $0x470] sm:$0xff] }
 0x273   : > { %3210 = vmatpush.msra.mxu3 %v3029_v62  ;;  %v3017_v62 = vld [vmem:[#allocation4 + $0x410] sm:$0xff] }
 0x274   : > { %15401 = vst [vmem:[#allocation97_spill] sm:$0xff] %v11126_v17  ;;  %v1325_v17 = vsel %vm1272_vm1, %v1323_v14, %v15404_v51  ;;  %v11145_v57 = vpop.f32.mrf.mxu0  ;;  %v1578_v4 = vsel %vm1525_vm2, %v1576_v54, %v1577_v32  ;;  %v11150_v14 = vld [vmem:[#allocation2 + $0x90] sm:$0xff]  ;;  %v1579_v51 = vrot.slane %v11077_v63, 2 }
 0x275   : > { %15406 = vst [vmem:[#allocation101_spill] sm:$0xff] %v11145_v57  ;;  %v9355_v57 = vld [vmem:[#allocation2 + $0x190] sm:$0xff] }
 0x276   : > { %1981 = vmatmul.f32.gmra.mxu3 %v9353_v55  ;;  %v1447_v55 = vadd.f32 %v1325_v17, %v10865_v43  ;;  %15407 = vst [vmem:[#allocation102_spill] sm:$0xff] %v11150_v14  ;;  %v3023_v17 = vld [vmem:[#allocation4 + $0x440] sm:$0xff]  ;;  %v11159_v63 = vpop.f32.mrf.mxu2 }
 0x277   : > { %1055 = vmatmul.f32.gmra.mxu0 %v11150_v14  ;;  %v3011_v14 = vld [vmem:[#allocation4 + $0x3e0] sm:$0xff] }
 0x279   : > { %v1934_v41 = vpop.f32.mrf.mxu3 }
 0x27a   : > { %v11142_v1 = vadd.f32 %v1934_v41, %v10861_v20  ;;  %v1700_v20 = vadd.f32 %v1578_v4, %v1447_v55  ;;  %v3026_v41 = vld [vmem:[#allocation4 + $0x458] sm:$0xff]  ;;  %v1820_v55 = vld [vmem:[#allocation4 + $0x2b0] sm:$0xff]  ;;  %v3016_v4 = vld [vmem:[#allocation4 + $0x408] sm:$0xff] }
 0x27b   : > { %3211 = vmatpush.msra.mxu3 %v3026_v41  ;;  %v11161_v41 = vld [vmem:[#allocation2 + $0x98] sm:$0xff]  ;;  %2191 = vmatpush.msrb.mxu1 %v1820_v55 }
 0x27c   : > { %15405 = vst [vmem:[#allocation100_spill] sm:$0xff] %v11142_v1  ;;  %v3020_v1 = vld [vmem:[#allocation4 + $0x428] sm:$0xff]  ;;  %v11156_v54 = vpop.f32.mrf.mxu0  ;;  %3035 = vmatpush.msrb.mxu2 %v3016_v4 }
 0x27d   : > { %3212 = vmatpush.msra.mxu3 %v3023_v17  ;;  %15409 = vst [vmem:[#allocation104_spill] sm:$0xff] %v11156_v54  ;;  %v1817_v17 = vld [vmem:[#allocation4 + $0x298] sm:$0xff]  ;;  %v1811_v55 = vld [vmem:[#allocation4 + $0x268] sm:$0xff] }
 0x27e   : > { %1984 = vmatmul.f32.gmra.mxu3 %v9354_v34  ;;  %v1580_v34 = vsel %vm1525_vm2, %v1577_v32, %v1579_v51  ;;  %15410 = vst [vmem:[#allocation105_spill] sm:$0xff] %v11161_v41  ;;  %v3014_v32 = vld [vmem:[#allocation4 + $0x3f8] sm:$0xff]  ;;  %2192 = vmatpush.msrb.mxu1 %v1817_v17  ;;  %v3005_v17 = vld [vmem:[#allocation4 + $0x3b0] sm:$0xff] }
 0x27f   : > { %3213 = vmatpush.msra.mxu3 %v3020_v1  ;;  %1058 = vmatmul.f32.gmra.mxu0 %v11161_v41  ;;  %v3010_v54 = vld [vmem:[#allocation4 + $0x3d8] sm:$0xff]  ;;  %v9356_v41 = vld [vmem:[#allocation2 + $0x198] sm:$0xff] }
 0x280   : > { %3036 = vmatpush.msrb.mxu2 %v3013_v39  ;;  %v11172_v39 = vld [vmem:[#allocation2 + $0xa0] sm:$0xff] }
 0x281   : > { %v1937_v59 = vpop.f32.mrf.mxu3  ;;  %3214 = vmatpush.msra.mxu3 %v3017_v62  ;;  %v3008_v62 = vld [vmem:[#allocation4 + $0x3c8] sm:$0xff] }
 0x282   : > { %v11154_v43 = vadd.f32 %v1937_v59, %v1700_v20  ;;  %v1786_v20 = vld [vmem:[#allocation4 + $0x1a0] sm:$0xff]  ;;  %v1701_v59 = vadd.f32 %v1580_v34, %v10888_v13  ;;  %v15412_v13 = vrot.slane %v10584_v36, 1  ;;  %3037 = vmatpush.msrb.mxu2 %v3010_v54  ;;  %v1805_v36 = vld [vmem:[#allocation4 + $0x238] sm:$0xff]  ;;  %v1582_v54 = vrot.slane %v11102_v60, 2 }
 0x283   : > { %2023 = vmatpush.msra.mxu0 %v1786_v20  ;;  %3215 = vmatpush.msra.mxu3 %v3014_v32  ;;  %v1808_v20 = vld [vmem:[#allocation4 + $0x250] sm:$0xff]  ;;  %v3002_v32 = vld [vmem:[#allocation4 + $0x398] sm:$0xff] }
 0x284   : > { %15408 = vst [vmem:[#allocation103_spill] sm:$0xff] %v11154_v43  ;;  %v1814_v43 = vld [vmem:[#allocation4 + $0x280] sm:$0xff]  ;;  %v1449_v34 = vadd.f32 %v15412_v13, %v10890_v18  ;;  %v11170_v4 = vpop.f32.mrf.mxu0  ;;  %3038 = vmatpush.msrb.mxu2 %v3007_v48  ;;  %v3001_v18 = vld [vmem:[#allocation4 + $0x390] sm:$0xff] }
 0x285   : > { %2193 = vmatpush.msrb.mxu1 %v1814_v43  ;;  %3216 = vmatpush.msra.mxu3 %v3011_v14  ;;  %v1581_v14 = vrot.slane %v11094_v15, 2  ;;  %v1802_v13 = vld [vmem:[#allocation4 + $0x220] sm:$0xff]  ;;  %v1450_v15 = vadd.f32 %v10900_v49, %v10902_v56  ;;  %v1793_v49 = vld [vmem:[#allocation4 + $0x1d8] sm:$0xff]  ;;  %v2989_v56 = vld [vmem:[#allocation4 + $0x330] sm:$0xff] }
 0x286   : > { %1987 = vmatmul.f32.gmra.mxu3 %v9355_v57  ;;  %v1702_v43 = vadd.f32 %v1579_v51, %v1449_v34  ;;  %v2998_v51 = vld [vmem:[#allocation4 + $0x378] sm:$0xff]  ;;  %v9357_v34 = vld [vmem:[#allocation2 + $0x1a0] sm:$0xff] }
 0x287   : > { %2194 = vmatpush.msrb.mxu1 %v1811_v55  ;;  %3217 = vmatpush.msra.mxu3 %v3008_v62  ;;  %v1783_v55 = vld [vmem:[#allocation4 + $0x188] sm:$0xff]  ;;  %v2999_v62 = vld [vmem:[#allocation4 + $0x380] sm:$0xff] }
 0x288   : > { %1061 = vmatmul.f32.gmra.mxu0 %v11172_v39 }
 0x289   : > { %v1940_v1 = vpop.f32.mrf.mxu3  ;;  %2195 = vmatpush.msrb.mxu1 %v1808_v20  ;;  %3218 = vmatpush.msra.mxu3 %v3005_v17  ;;  %v1799_v20 = vld [vmem:[#allocation4 + $0x208] sm:$0xff] }
 0x28a   : > { %v11165_v57 = vadd.f32 %v1940_v1, %v1701_v59  ;;  %v3004_v59 = vld [vmem:[#allocation4 + $0x3a8] sm:$0xff]  ;;  %2024 = vmatpush.msra.mxu0 %v1783_v55  ;;  %v11186_v55 = vld [vmem:[#allocation2 + $0xa8] sm:$0xff] }
 0x28b   : > { %3039 = vmatpush.msrb.mxu2 %v3004_v59  ;;  %2196 = vmatpush.msrb.mxu1 %v1805_v36  ;;  %v2995_v59 = vld [vmem:[#allocation4 + $0x360] sm:$0xff]  ;;  %v2996_v17 = vld [vmem:[#allocation4 + $0x368] sm:$0xff]  ;;  %v1796_v36 = vld [vmem:[#allocation4 + $0x1f0] sm:$0xff] }
 0x28c   : > { %15411 = vst [vmem:[#allocation106_spill] sm:$0xff] %v11165_v57  ;;  %3219 = vmatpush.msra.mxu3 %v3002_v32  ;;  %v11183_v60 = vpop.f32.mrf.mxu0  ;;  %v2993_v32 = vld [vmem:[#allocation4 + $0x350] sm:$0xff] }
 0x28d   : > { %3040 = vmatpush.msrb.mxu2 %v3001_v18  ;;  %2197 = vmatpush.msrb.mxu1 %v1802_v13  ;;  %v2992_v18 = vld [vmem:[#allocation4 + $0x348] sm:$0xff]  ;;  %v2990_v13 = vld [vmem:[#allocation4 + $0x338] sm:$0xff] }
 0x28e   : > { %1990 = vmatmul.f32.gmra.mxu3 %v9356_v41  ;;  %v11177_v41 = vpop.f32.mrf.mxu2 }
 0x28f   : > { %3041 = vmatpush.msrb.mxu2 %v2998_v51  ;;  %3220 = vmatpush.msra.mxu3 %v2999_v62  ;;  %v1584_v51 = vrot.slane %v11115_v44, 2  ;;  %v1790_v62 = vld [vmem:[#allocation4 + $0x1c0] sm:$0xff] }
 0x290   : > { %2198 = vmatpush.msrb.mxu1 %v1799_v20  ;;  %1064 = vmatmul.f32.gmra.mxu0 %v11186_v55  ;;  %v2986_v20 = vld [vmem:[#allocation4 + $0x318] sm:$0xff]  ;;  %v2983_v44 = vld [vmem:[#allocation4 + $0x300] sm:$0xff] }
 0x291   : > { %v1943_v48 = vpop.f32.mrf.mxu3  ;;  %3042 = vmatpush.msrb.mxu2 %v2995_v59  ;;  %3221 = vmatpush.msra.mxu3 %v2996_v17  ;;  %v2987_v59 = vld [vmem:[#allocation4 + $0x320] sm:$0xff]  ;;  %v9358_v17 = vld [vmem:[#allocation2 + $0x1a8] sm:$0xff] }
 0x292   : > { %v11179_v1 = vadd.f32 %v1943_v48, %v1702_v43  ;;  %v1583_v43 = vsel %vm1525_vm2, %v1581_v14, %v1582_v54  ;;  %2199 = vmatpush.msrb.mxu1 %v1796_v36  ;;  %v1451_v36 = vadd.f32 %v10913_v21, %v10915_v33 }
 0x293   : > { %v1703_v48 = vadd.f32 %v1583_v43, %v1450_v15  ;;  %3043 = vmatpush.msrb.mxu2 %v2992_v18  ;;  %3222 = vmatpush.msra.mxu3 %v2993_v32  ;;  %v1787_v43 = vld [vmem:[#allocation4 + $0x1a8] sm:$0xff]  ;;  %v1585_v32 = vsel %vm1525_vm2, %v1582_v54, %v1584_v51  ;;  %v15414_v54 = vrot.slane %v10632_v61, 1  ;;  %v1453_v61 = vadd.f32 %v10932_v8, %v10934_v9 }
 0x294   : > { %2200 = vmatpush.msrb.mxu1 %v1793_v49  ;;  %v11196_v57 = vpop.f32.mrf.mxu0  ;;  %v2984_v18 = vld [vmem:[#allocation4 + $0x308] sm:$0xff]  ;;  %v3030_v49 = vld [vmem:[#allocation4 + $0x478] sm:$0xff]  ;;  %v1454_v8 = vadd.f32 %v10944_v12, %v10946_v35  ;;  %v15417_v12 = vrot.slane %v10676_v47, 1  ;;  %v1456_v47 = vadd.f32 %v10963_v29, %v10965_v3  ;;  %v1457_v29 = vadd.f32 %v10974_v30, %v10976_v16 }
 0x295   : > { %3044 = vmatpush.msrb.mxu2 %v2989_v56  ;;  %3223 = vmatpush.msra.mxu3 %v2990_v13  ;;  %v1704_v56 = vadd.f32 %v1585_v32, %v1451_v36  ;;  %v1452_v13 = vadd.f32 %v15414_v54, %v10922_v46  ;;  %v1587_v36 = vrot.slane %v11147_v0, 2  ;;  %v1589_v0 = vrot.slane %v11159_v63, 2  ;;  %v9365_v54 = vld [vmem:[#allocation2 + $0x48] sm:$0xff] }
 0x296   : > { %1993 = vmatmul.f32.gmra.mxu3 %v9357_v34  ;;  %v11192_v15 = vpop.f32.mrf.mxu2  ;;  %2201 = vmatpush.msrb.mxu1 %v1790_v62  ;;  %v1455_v35 = vadd.f32 %v15417_v12, %v10952_v26  ;;  %v15421_v30 = vrot.slane %v10714_v22, 1  ;;  %v1459_v22 = vadd.f32 %v10989_v42, %v10991_v38  ;;  %v1460_v38 = vadd.f32 %v11000_v28, %v11002_v7 }
 0x297   : > { %3045 = vmatpush.msrb.mxu2 %v2986_v20  ;;  %3224 = vmatpush.msra.mxu3 %v2987_v59  ;;  %v9363_v59 = vld [vmem:[#allocation2 + $0x38] sm:$0xff] }
 0x298   : > { %2202 = vmatpush.msrb.mxu1 %v1787_v43  ;;  %2025 = vmatmul.f32.vlgmr.msra.gmra.mxu0 %v10957_v31  ;;  %v1586_v43 = vrot.slane %v11128_v2, 2  ;;  %v1458_v16 = vadd.f32 %v15421_v30, %v10981_v53 }
 0x299   : > { %v1946_v14 = vpop.f32.mrf.mxu3  ;;  %3046 = vmatpush.msrb.mxu2 %v2983_v44  ;;  %3225 = vmatpush.msra.mxu3 %v2984_v18 }
 0x29a   : > { %v11190_v34 = vadd.f32 %v1946_v14, %v1703_v48  ;;  %v9362_v48 = vld [vmem:[#allocation2 + $0x30] sm:$0xff]  ;;  %v1784_v14 = vld [vmem:[#allocation4 + $0x190] sm:$0xff]  ;;  %3389 = vmatpush.msrb.mxu0 %v3030_v49  ;;  %v1588_v32 = vsel %vm1525_vm2, %v1586_v43, %v1587_v36 }
 0x29b   : > { %3047 = vmatmul.f32.vlgmr.msrb.gmra.mxu2 %v9362_v48  ;;  %2203 = vmatpush.msrb.mxu1 %v1784_v14  ;;  %v1706_v2 = vadd.f32 %v1588_v32, %v1453_v61  ;;  %v1708_v61 = vadd.f32 %v1589_v0, %v1455_v35  ;;  %v1591_v32 = vrot.slane %v11177_v41, 2 }
 0x29c   : > { %2204 = vmatmul.f32.vlgmr.msrb.gmra.mxu1 %v10957_v31  ;;  %v11206_v62 = vpop.f32.mrf.mxu0 }
 0x29e   : > { %1996 = vmatmul.f32.gmra.mxu3 %v9358_v17  ;;  %v11208_v20 = vpop.f32.mrf.mxu2  ;;  %v1705_v17 = vadd.f32 %v1584_v51, %v1452_v13  ;;  %v9364_v51 = vld [vmem:[#allocation2 + $0x40] sm:$0xff] }
 0x29f   : > { %v1594_v41 = vrot.slane %v11208_v20, 2 }
 0x2a0   : > { %2028 = vmatmul.f32.gmra.mxu0 %v10957_v31 }
 0x2a1   : > { %v1949_v21 = vpop.f32.mrf.mxu3 }
 0x2a2   : > { %v11200_v33 = vadd.f32 %v1949_v21, %v1704_v56  ;;  %v1590_v21 = vsel %vm1525_vm2, %v1587_v36, %v1589_v0  ;;  %v9367_v0 = vld [vmem:[#allocation2 + $0x58] sm:$0xff] }
 0x2a3   : > { %3050 = vmatmul.f32.gmra.mxu2 %v9363_v59  ;;  %v1707_v13 = vadd.f32 %v1590_v21, %v1454_v8 }
 0x2a4   : > { %15413 = vst [vmem:[#allocation107_spill] sm:$0xff] %v11200_v33  ;;  %2207 = vmatmul.f32.gmra.mxu1 %v10957_v31  ;;  %v11219_v46 = vpop.f32.mrf.mxu0 }
 0x2a6   : > { %1999 = vmatmul.f32.gmra.mxu3 %v10957_v31  ;;  %v11223_v49 = vpop.f32.mrf.mxu2 }
 0x2a8   : > { %2031 = vmatmul.f32.gmra.mxu0 %v10957_v31 }
 0x2a9   : > { %v1952_v44 = vpop.f32.mrf.mxu3 }
 0x2aa   : > { %v11214_v18 = vadd.f32 %v1952_v44, %v1705_v17  ;;  %v3027_v44 = vld [vmem:[#allocation4 + $0x460] sm:$0xff] }
 0x2ab   : > { %3053 = vmatmul.f32.gmra.mxu2 %v9364_v51  ;;  %3390 = vmatpush.msrb.mxu0 %v3027_v44 }
 0x2ac   : > { %2210 = vmatmul.f32.gmra.mxu1 %v10957_v31  ;;  %v11232_v9 = vpop.f32.mrf.mxu0 }
 0x2ae   : > { %2002 = vmatmul.f32.gmra.mxu3 %v10957_v31  ;;  %v11237_v63 = vpop.f32.mrf.mxu2 }
 0x2b0   : > { %2034 = vmatmul.f32.gmra.mxu0 %v11011_v27 }
 0x2b1   : > { %v1955_v14 = vpop.f32.mrf.mxu3 }
 0x2b2   : > { %v11227_v56 = vadd.f32 %v1955_v14, %v1706_v2  ;;  %v1592_v2 = vrot.slane %v11192_v15, 2 }
 0x2b3   : > { %3056 = vmatmul.f32.gmra.mxu2 %v9365_v54 }
 0x2b4   : > { %15415 = vst [vmem:[#allocation108_spill] sm:$0xff] %v11227_v56  ;;  %2213 = vmatmul.f32.gmra.mxu1 %v11011_v27  ;;  %v11245_v36 = vpop.f32.mrf.mxu0  ;;  %v5511_v56 = vld [vmem:[#allocation6 + $0x148] sm:$0xff] }
 0x2b6   : > { %2005 = vmatmul.f32.gmra.mxu3 %v10957_v31  ;;  %v9366_v31 = vld [vmem:[#allocation2 + $0x50] sm:$0xff]  ;;  %v11253_v8 = vpop.f32.mrf.mxu2 }
 0x2b8   : > { %2037 = vmatmul.f32.gmra.mxu0 %v11022_v23 }
 0x2b9   : > { %v1958_v17 = vpop.f32.mrf.mxu3 }
 0x2ba   : > { %v11239_v43 = vadd.f32 %v1958_v17, %v1707_v13  ;;  %v9368_v17 = vld [vmem:[#allocation2 + $0x60] sm:$0xff] }
 0x2bb   : > { %3059 = vmatmul.f32.gmra.mxu2 %v9366_v31 }
 0x2bc   : > { %15416 = vst [vmem:[#allocation109_spill] sm:$0xff] %v11239_v43  ;;  %2216 = vmatmul.f32.gmra.mxu1 %v11022_v23  ;;  %v11257_v26 = vpop.f32.mrf.mxu0 }
 0x2be   : > { %3226 = vmatmul.f32.vlgmr.msra.gmra.mxu3 %v9362_v48  ;;  %v1593_v48 = vsel %vm1525_vm2, %v1591_v32, %v1592_v2  ;;  %v11269_v23 = vpop.f32.mrf.mxu2  ;;  %v1711_v32 = vadd.f32 %v1594_v41, %v1458_v16 }
 0x2bf   : > { %v1709_v21 = vadd.f32 %v1593_v48, %v1456_v47  ;;  %v9370_v48 = vld [vmem:[#allocation2 + $0x70] sm:$0xff]  ;;  %v1601_v30 = vrot.slane %v11269_v23, 2 }
 0x2c0   : > { %2040 = vmatmul.f32.gmra.mxu0 %v11034_v10 }
 0x2c1   : > { %v1961_v14 = vpop.f32.mrf.mxu3 }
 0x2c2   : > { %v11250_v27 = vadd.f32 %v1961_v14, %v1708_v61  ;;  %v9369_v61 = vld [vmem:[#allocation2 + $0x68] sm:$0xff] }
 0x2c3   : > { %3062 = vmatmul.f32.gmra.mxu2 %v9367_v0 }
 0x2c4   : > { %15418 = vst [vmem:[#allocation110_spill] sm:$0xff] %v11250_v27  ;;  %2219 = vmatmul.f32.gmra.mxu1 %v11034_v10  ;;  %v11267_v3 = vpop.f32.mrf.mxu0  ;;  %v3024_v10 = vld [vmem:[#allocation4 + $0x448] sm:$0xff]  ;;  %v5474_v27 = vld [vmem:[#allocation6 + $0x20] sm:$0xff] }
 0x2c5   : > { %3391 = vmatpush.msrb.mxu0 %v3024_v10  ;;  %v3021_v10 = vld [vmem:[#allocation4 + $0x430] sm:$0xff] }
 0x2c6   : > { %3229 = vmatmul.f32.gmra.mxu3 %v9363_v59  ;;  %v1595_v59 = vsel %vm1525_vm2, %v1592_v2, %v1594_v41  ;;  %v1596_v2 = vrot.slane %v11223_v49, 2  ;;  %v1599_v49 = vrot.slane %v11253_v8, 2 }
 0x2c7   : > { %v1710_v44 = vadd.f32 %v1595_v59, %v1457_v29  ;;  %3392 = vmatpush.msrb.mxu0 %v3021_v10 }
 0x2c8   : > { %2043 = vmatmul.f32.gmra.mxu0 %v11045_v25 }
 0x2c9   : > { %v1964_v15 = vpop.f32.mrf.mxu3 }
 0x2ca   : > { %v11262_v13 = vadd.f32 %v1964_v15, %v1709_v21 }
 0x2cb   : > { %3065 = vmatmul.f32.gmra.mxu2 %v9368_v17 }
 0x2cc   : > { %15419 = vst [vmem:[#allocation111_spill] sm:$0xff] %v11262_v13  ;;  %2222 = vmatmul.f32.gmra.mxu1 %v11045_v25  ;;  %v11279_v35 = vpop.f32.mrf.mxu0  ;;  %v1597_v25 = vrot.slane %v11237_v63, 2 }
 0x2ce   : > { %3232 = vmatmul.f32.gmra.mxu3 %v9364_v51  ;;  %v11281_v51 = vpop.f32.mrf.mxu2 }
 0x2cf   : > { %v1602_v16 = vrot.slane %v11281_v51, 2 }
 0x2d0   : > { %2046 = vmatmul.f32.gmra.mxu0 %v11056_v50 }
 0x2d1   : > { %v1967_v20 = vpop.f32.mrf.mxu3 }
 0x2d2   : > { %v11273_v12 = vadd.f32 %v1967_v20, %v1710_v44  ;;  %v9372_v20 = vld [vmem:[#allocation2 + $0x80] sm:$0xff] }
 0x2d3   : > { %3068 = vmatmul.f32.gmra.mxu2 %v9369_v61 }
 0x2d4   : > { %15420 = vst [vmem:[#allocation112_spill] sm:$0xff] %v11273_v12  ;;  %2225 = vmatmul.f32.gmra.mxu1 %v11056_v50  ;;  %v11291_v53 = vpop.f32.mrf.mxu0  ;;  %v1600_v50 = vsel %vm1525_vm2, %v1597_v25, %v1599_v49 }
 0x2d5   : > { %v1713_v29 = vadd.f32 %v1600_v50, %v1460_v38  ;;  %v15431_v38 = vld [vmem:[#allocation49_spill] sm:$0xff] }
 0x2d6   : > { %3235 = vmatmul.f32.gmra.mxu3 %v9365_v54  ;;  %v1598_v54 = vsel %vm1525_vm2, %v1596_v2, %v1597_v25  ;;  %v1143_v63 = vpop.f32.mrf.mxu2  ;;  %v1603_v2 = vsel %vm1525_vm2, %v1601_v30, %v1602_v16  ;;  %v9373_v25 = vld [vmem:[#allocation2 + $0x88] sm:$0xff]  ;;  %v15432_v50 = vrot.slane %v15431_v38, 1 }
 0x2d7   : > { %v1712_v21 = vadd.f32 %v1598_v54, %v1459_v22  ;;  %v1604_v23 = vrot.slane %v1143_v63, 2  ;;  %v9374_v54 = vld [vmem:[#allocation2 + $0x90] sm:$0xff] }
 0x2d8   : > { %2049 = vmatmul.f32.gmra.mxu0 %v11071_v11 }
 0x2d9   : > { %v1970_v14 = vpop.f32.mrf.mxu3 }
 0x2da   : > { %v11286_v47 = vadd.f32 %v1970_v14, %v1711_v32 }
 0x2db   : > { %3071 = vmatmul.f32.gmra.mxu2 %v9370_v48 }
 0x2dc   : > { %15422 = vst [vmem:[#allocation113_spill] sm:$0xff] %v11286_v47  ;;  %2228 = vmatmul.f32.gmra.mxu1 %v11071_v11  ;;  %v11301_v42 = vpop.f32.mrf.mxu0  ;;  %v15425_v11 = vrot.slane %v10743_v5, 1  ;;  %v1462_v5 = vadd.f32 %v11017_v58, %v11019_v19  ;;  %v1463_v58 = vadd.f32 %v11030_v52, %v11032_v37 }
 0x2de   : > { %3238 = vmatmul.f32.gmra.mxu3 %v9366_v31  ;;  %v9371_v31 = vld [vmem:[#allocation2 + $0x78] sm:$0xff]  ;;  %v1146_v44 = vpop.f32.mrf.mxu2  ;;  %v1461_v28 = vadd.f32 %v15425_v11, %v11007_v24  ;;  %v1715_v14 = vadd.f32 %v1603_v2, %v1462_v5  ;;  %v15436_v5 = vld [vmem:[#allocation56_spill] sm:$0xff] }
 0x2df   : > { %v1606_v11 = vrot.slane %v1146_v44, 2 }
 0x2e0   : > { %2052 = vmatmul.f32.gmra.mxu0 %v11083_v40 }
 0x2e1   : > { %v1973_v41 = vpop.f32.mrf.mxu3 }
 0x2e2   : > { %v11296_v15 = vadd.f32 %v1973_v41, %v1712_v21 }
 0x2e3   : > { %3074 = vmatmul.f32.gmra.mxu2 %v9371_v31 }
 0x2e4   : > { %15423 = vst [vmem:[#allocation114_spill] sm:$0xff] %v11296_v15  ;;  %2231 = vmatmul.f32.gmra.mxu1 %v11083_v40  ;;  %v11311_v7 = vpop.f32.mrf.mxu0 }
 0x2e6   : > { %3241 = vmatmul.f32.gmra.mxu3 %v9367_v0  ;;  %v1714_v0 = vadd.f32 %v1599_v49, %v1461_v28  ;;  %v15428_v49 = vld [vmem:[#allocation93_spill] sm:$0xff] }
 0x2e8   : > { %2055 = vmatmul.f32.gmra.mxu0 %v11096_v45 }
 0x2e9   : > { %v1976_v8 = vpop.f32.mrf.mxu3 }
 0x2ea   : > { %v11305_v59 = vadd.f32 %v1976_v8, %v1713_v29  ;;  %v11342_v29 = vld [vmem:[#allocation2 + $0x98] sm:$0xff]  ;;  %v15433_v8 = vld [vmem:[#allocation96_spill] sm:$0xff] }
 0x2eb   : > { %3077 = vmatmul.f32.gmra.mxu2 %v9372_v20 }
 0x2ec   : > { %15424 = vst [vmem:[#allocation115_spill] sm:$0xff] %v11305_v59  ;;  %2234 = vmatmul.f32.gmra.mxu1 %v11096_v45  ;;  %v11321_v24 = vpop.f32.mrf.mxu0  ;;  %v1605_v45 = vsel %vm1525_vm2, %v1602_v16, %v1604_v23  ;;  %v3018_v16 = vld [vmem:[#allocation4 + $0x418] sm:$0xff]  ;;  %v15468_v59 = vld [vmem:[#allocation20_spill] sm:$0xff] }
 0x2ed   : > { %v1716_v21 = vadd.f32 %v1605_v45, %v1463_v58  ;;  %3393 = vmatpush.msrb.mxu0 %v3018_v16  ;;  %v15438_v58 = vld [vmem:[#allocation99_spill] sm:$0xff]  ;;  %v15444_v16 = vld [vmem:[#allocation54_spill] sm:$0xff] }
 0x2ee   : > { %3244 = vmatmul.f32.gmra.mxu3 %v9368_v17  ;;  %v1149_v17 = vpop.f32.mrf.mxu2 }
 0x2ef   : > { %v1607_v28 = vrot.slane %v1149_v17, 2 }
 0x2f0   : > { %2058 = vmatmul.f32.gmra.mxu0 %v11104_v6 }
 0x2f1   : > { %v1979_v40 = vpop.f32.mrf.mxu3 }
 0x2f2   : > { %v11316_v32 = vadd.f32 %v1979_v40, %v1714_v0  ;;  %v15435_v40 = vld [vmem:[#allocation81_spill] sm:$0xff] }
 0x2f3   : > { %3080 = vmatmul.f32.gmra.mxu2 %v9373_v25  ;;  %v1465_v2 = vadd.f32 %v15436_v5, %v15435_v40 }
 0x2f4   : > { %15426 = vst [vmem:[#allocation116_spill] sm:$0xff] %v11316_v32  ;;  %2237 = vmatmul.f32.gmra.mxu1 %v11104_v6  ;;  %v11330_v19 = vpop.f32.mrf.mxu0  ;;  %v15430_v6 = vld [vmem:[#allocation80_spill] sm:$0xff] }
 0x2f5   : > { %v1464_v37 = vadd.f32 %v15432_v50, %v15430_v6  ;;  %v15440_v6 = vld [vmem:[#allocation57_spill] sm:$0xff] }
 0x2f6   : > { %3247 = vmatmul.f32.gmra.mxu3 %v9369_v61  ;;  %v1152_v61 = vpop.f32.mrf.mxu2  ;;  %v15441_v38 = vrot.slane %v15440_v6, 1  ;;  %v15450_v6 = vld [vmem:[#allocation58_spill] sm:$0xff] }
 0x2f7   : > { %v1609_v45 = vrot.slane %v1152_v61, 2 }
 0x2f8   : > { %2061 = vmatmul.f32.gmra.mxu0 %v15428_v49 }
 0x2f9   : > { %v1982_v51 = vpop.f32.mrf.mxu3 }
 0x2fa   : > { %v11325_v22 = vadd.f32 %v1982_v51, %v1715_v14  ;;  %v15437_v51 = vld [vmem:[#allocation55_spill] sm:$0xff] }
 0x2fb   : > { %3083 = vmatmul.f32.gmra.mxu2 %v9374_v54  ;;  %v1308_v44 = vrot.slane %v15437_v51, 1 }
 0x2fc   : > { %15427 = vst [vmem:[#allocation117_spill] sm:$0xff] %v11325_v22  ;;  %2240 = vmatmul.f32.gmra.mxu1 %v15428_v49  ;;  %v11340_v52 = vpop.f32.mrf.mxu0  ;;  %v15466_v22 = vld [vmem:[#allocation10_spill] sm:$0xff] }
 0x2fd   : > { %v1310_v50 = vsel %vm1272_vm1, %v1308_v44, %v15441_v38  ;;  %v15451_v38 = vrot.slane %v15450_v6, 1 }
 0x2fe   : > { %3250 = vmatmul.f32.gmra.mxu3 %v9370_v48  ;;  %v1717_v48 = vadd.f32 %v1604_v23, %v1464_v37  ;;  %v1155_v10 = vpop.f32.mrf.mxu2  ;;  %v9376_v23 = vld [vmem:[#allocation2 + $0xa0] sm:$0xff]  ;;  %v1438_v40 = vadd.f32 %v1310_v50, %v15444_v16 }
 0x2ff   : > { %v15442_v37 = vld [vmem:[#allocation84_spill] sm:$0xff] }
 0x300   : > { %2064 = vmatmul.f32.gmra.mxu0 %v15433_v8 }
 0x301   : > { %v1985_v63 = vpop.f32.mrf.mxu3 }
 0x302   : > { %v11334_v41 = vadd.f32 %v1985_v63, %v1716_v21 }
 0x303   : > { %3086 = vmatmul.f32.gmra.mxu2 %v11342_v29 }
 0x304   : > { %15429 = vst [vmem:[#allocation93_spill] sm:$0xff] %v11334_v41  ;;  %2243 = vmatmul.f32.gmra.mxu1 %v15433_v8  ;;  %v1610_v8 = vsel %vm1525_vm2, %v1607_v28, %v1609_v45  ;;  %v15465_v41 = vld [vmem:[#allocation104_spill] sm:$0xff] }
 0x305   : > { %v11351_v14 = vpop.f32.mrf.mxu0 }
 0x306   : > { %3253 = vmatmul.f32.gmra.mxu3 %v9371_v31  ;;  %v1608_v31 = vsel %vm1525_vm2, %v1606_v11, %v1607_v28  ;;  %v1158_v63 = vpop.f32.mrf.mxu2 }
 0x307   : > { %v1718_v17 = vadd.f32 %v1608_v31, %v1465_v2  ;;  %v15445_v2 = vld [vmem:[#allocation53_spill] sm:$0xff]  ;;  %v1612_v16 = vrot.slane %v1158_v63, 2 }
 0x308   : > { %2067 = vmatmul.f32.gmra.mxu0 %v15438_v58  ;;  %v15446_v31 = vrot.slane %v15445_v2, 2  ;;  %v3015_v2 = vld [vmem:[#allocation4 + $0x400] sm:$0xff] }
 0x309   : > { %v1988_v0 = vpop.f32.mrf.mxu3  ;;  %3394 = vmatpush.msrb.mxu0 %v3015_v2  ;;  %v15458_v2 = vld [vmem:[#allocation11_spill] sm:$0xff] }
 0x30a   : > { %v11346_v30 = vadd.f32 %v1988_v0, %v1717_v48  ;;  %v15443_v48 = vld [vmem:[#allocation83_spill] sm:$0xff]  ;;  %v11365_v0 = vld [vmem:[#allocation2 + $0xa8] sm:$0xff] }
 0x30b   : > { %3089 = vmatmul.f32.gmra.mxu2 %v9376_v23 }
 0x30c   : > { %15434 = vst [vmem:[#allocation80_spill] sm:$0xff] %v11346_v30  ;;  %2246 = vmatmul.f32.gmra.mxu1 %v15438_v58  ;;  %v11426_v30 = vld [vmem:[#allocation2 + $0xc8] sm:$0xff] }
 0x30d   : > { %v1065_v11 = vpop.f32.mrf.mxu0 }
 0x30e   : > { %3256 = vmatmul.f32.gmra.mxu3 %v9372_v20  ;;  %v1466_v20 = vadd.f32 %v15443_v48, %v15442_v37  ;;  %v1561_v61 = vrot.slane %v1065_v11, 2  ;;  %v11383_v48 = vld [vmem:[#allocation2 + $0xb0] sm:$0xff]  ;;  %v15452_v11 = vld [vmem:[#allocation105_spill] sm:$0xff] }
 0x310   : > { %v1719_v5 = vadd.f32 %v1610_v8, %v1466_v20  ;;  %v1563_v51 = vsel %vm1525_vm2, %v1561_v61, %v15446_v31  ;;  %v1611_v61 = vrot.slane %v1155_v10, 2 }
 0x311   : > { %v1991_v21 = vpop.f32.mrf.mxu3  ;;  %v11373_v58 = vadd.f32 %v1563_v51, %v1438_v40  ;;  %v15454_v51 = vld [vmem:[#allocation89_spill] sm:$0xff] }
 0x312   : > { %v11356_v49 = vadd.f32 %v1991_v21, %v1718_v17  ;;  %v15447_v17 = vld [vmem:[#allocation102_spill] sm:$0xff] }
 0x313   : > { %2070 = vmatmul.f32.gmra.mxu0 %v15447_v17  ;;  %3092 = vmatmul.f32.gmra.mxu2 %v11365_v0  ;;  %v15449_v21 = vld [vmem:[#allocation86_spill] sm:$0xff] }
 0x314   : > { %15439 = vst [vmem:[#allocation49_spill] sm:$0xff] %v11356_v49  ;;  %2249 = vmatmul.f32.gmra.mxu1 %v15447_v17  ;;  %v1467_v50 = vadd.f32 %v15451_v38, %v15449_v21  ;;  %v11397_v21 = vld [vmem:[#allocation2 + $0xb8] sm:$0xff]  ;;  %v1532_v49 = vrot.slane %v11170_v4, 2  ;;  %v9959_v4 = vld [vmem:[#allocation2 + $0xb0] sm:$0xff] }
 0x315   : > { %v11381_v37 = vpop.f32.mrf.mxu0 }
 0x316   : > { %3259 = vmatmul.f32.gmra.mxu3 %v9373_v25  ;;  %v1161_v25 = vpop.f32.mrf.mxu2  ;;  %v1720_v8 = vadd.f32 %v1609_v45, %v1467_v50  ;;  %v1613_v45 = vsel %vm1525_vm2, %v1611_v61, %v1612_v16 }
 0x319   : > { %v1994_v44 = vpop.f32.mrf.mxu3  ;;  %v11385_v20 = vpop.f32.mrf.mxu1 }
 0x31a   : > { %v11375_v28 = vadd.f32 %v1994_v44, %v1719_v5 }
 0x31b   : > { %2073 = vmatmul.f32.gmra.mxu0 %v15452_v11  ;;  %3095 = vmatmul.f32.gmra.mxu2 %v11383_v48 }
 0x31c   : > { %15448 = vst [vmem:[#allocation96_spill] sm:$0xff] %v11375_v28  ;;  %2252 = vmatmul.f32.gmra.mxu1 %v15452_v11  ;;  %v11409_v11 = vld [vmem:[#allocation2 + $0xc0] sm:$0xff] }
 0x31d   : > { %v2029_v44 = vpop.f32.mrf.mxu0 }
 0x31e   : > { %3262 = vmatmul.f32.gmra.mxu3 %v9374_v54  ;;  %v11392_v31 = vpop.f32.mrf.mxu2  ;;  %v15455_v54 = vld [vmem:[#allocation88_spill] sm:$0xff] }
 0x31f   : > { %v1468_v17 = vadd.f32 %v15455_v54, %v15454_v51  ;;  %v1273_v51 = vrot.slane %v15458_v2, 1  ;;  %v15459_v54 = vld [vmem:[#allocation12_spill] sm:$0xff] }
 0x321   : > { %v1997_v40 = vpop.f32.mrf.mxu3  ;;  %v11400_v10 = vpop.f32.mrf.mxu1  ;;  %v1721_v63 = vadd.f32 %v1613_v45, %v1468_v17  ;;  %v1274_v17 = vrot.slane %v15459_v54, 1 }
 0x322   : > { %v11389_v5 = vadd.f32 %v1997_v40, %v1720_v8 }
 0x323   : > { %2076 = vmatmul.f32.gmra.mxu0 %v11172_v39  ;;  %3098 = vmatmul.f32.gmra.mxu2 %v11397_v21  ;;  %v1275_v2 = vsel %vm1272_vm1, %v1273_v51, %v1274_v17  ;;  %v15467_v17 = vld [vmem:[#allocation15_spill] sm:$0xff] }
 0x324   : > { %15453 = vst [vmem:[#allocation81_spill] sm:$0xff] %v11389_v5  ;;  %2255 = vmatmul.f32.gmra.mxu1 %v11172_v39  ;;  %v15460_v39 = vld [vmem:[#allocation16_spill] sm:$0xff]  ;;  %v15463_v5 = vld [vmem:[#allocation98_spill] sm:$0xff]  ;;  %v1417_v51 = vadd.f32 %v1275_v2, %v15466_v22  ;;  %v15471_v2 = vld [vmem:[#allocation101_spill] sm:$0xff] }
 0x325   : > { %v11407_v8 = vpop.f32.mrf.mxu0  ;;  %v1278_v45 = vrot.slane %v15460_v39, 1  ;;  %v1527_v28 = vrot.slane %v15463_v5, 2  ;;  %v15464_v39 = vld [vmem:[#allocation95_spill] sm:$0xff] }
 0x326   : > { %3265 = vmatmul.f32.gmra.mxu3 %v11342_v29  ;;  %v3051_v50 = vpop.f32.mrf.mxu2  ;;  %v15457_v29 = vld [vmem:[#allocation59_spill] sm:$0xff] }
 0x327   : > { %v1361_v16 = vrot.slane %v15457_v29, 1  ;;  %v1614_v50 = vrot.slane %v1161_v25, 2 }
 0x329   : > { %v2000_v6 = vpop.f32.mrf.mxu3  ;;  %v11411_v61 = vpop.f32.mrf.mxu1 }
 0x32a   : > { %v11404_v38 = vadd.f32 %v2000_v6, %v1721_v63  ;;  %v15461_v63 = vld [vmem:[#allocation18_spill] sm:$0xff] }
 0x32b   : > { %2079 = vmatmul.f32.gmra.mxu0 %v11186_v55  ;;  %3101 = vmatmul.f32.gmra.mxu2 %v11409_v11  ;;  %v1279_v6 = vrot.slane %v15461_v63, 1  ;;  %v1526_v63 = vrot.slane %v15464_v39, 2  ;;  %v15262_v39 = vrot.slane %v15468_v59, 1 }
 0x32c   : > { %15456 = vst [vmem:[#allocation56_spill] sm:$0xff] %v11404_v38  ;;  %2258 = vmatmul.f32.gmra.mxu1 %v11186_v55  ;;  %v15462_v38 = vld [vmem:[#allocation92_spill] sm:$0xff]  ;;  %v1531_v55 = vrot.slane %v15465_v41, 2  ;;  %v2476_v41 = vrot.slane %v2029_v44, 1  ;;  %v2727_v44 = vrot.slane %v11385_v20, 2 }
 0x32d   : > { %v1470_v29 = vadd.f32 %v1361_v16, %v15462_v38  ;;  %v1280_v54 = vsel %vm1272_vm1, %v1278_v45, %v1279_v6  ;;  %v1528_v38 = vsel %vm1525_vm2, %v1526_v63, %v1527_v28  ;;  %v1282_v22 = vsel %vm1272_vm1, %v1279_v6, %v15262_v39  ;;  %v15473_v6 = vld [vmem:[#allocation60_spill] sm:$0xff] }
 0x32e   : > { %3268 = vmatmul.f32.gmra.mxu3 %v9376_v23  ;;  %v11421_v23 = vpop.f32.mrf.mxu2  ;;  %v1533_v5 = vsel %vm1525_vm2, %v1531_v55, %v1532_v49  ;;  %v1420_v45 = vadd.f32 %v1280_v54, %v15467_v17  ;;  %v1670_v63 = vadd.f32 %v1528_v38, %v1417_v51  ;;  %v1529_v54 = vrot.slane %v15471_v2, 2  ;;  %v3012_v17 = vld [vmem:[#allocation4 + $0x3e8] sm:$0xff]  ;;  %v15474_v2 = vld [vmem:[#allocation62_spill] sm:$0xff] }
 0x32f   : > { %v1723_v16 = vadd.f32 %v1614_v50, %v1470_v29  ;;  %v2475_v50 = vrot.slane %v11381_v37, 1  ;;  %v2728_v37 = vrot.slane %v11400_v10, 2  ;;  %3395 = vmatpush.msrb.mxu0 %v3012_v17  ;;  %v9960_v10 = vld [vmem:[#allocation2 + $0xb8] sm:$0xff] }
 0x330   : > { %v1673_v55 = vadd.f32 %v1533_v5, %v1420_v45  ;;  %v15472_v45 = vld [vmem:[#allocation13_spill] sm:$0xff]  ;;  %v2367_v39 = vadd.f32 %v15473_v6, %v1670_v63 }
 0x331   : > { %v2003_v40 = vpop.f32.mrf.mxu3  ;;  %v2214_v25 = vpop.f32.mrf.mxu1 }
 0x332   : > { %v2035_v40 = vpop.f32.mrf.mxu0  ;;  %v2732_v5 = vrot.slane %v2214_v25, 2  ;;  %v2370_v12 = vadd.f32 %v15474_v2, %v1673_v55  ;;  %v2729_v55 = vsel %vm1525_vm2, %v2727_v44, %v2728_v37  ;;  %v15478_v44 = vld [vmem:[#allocation63_spill] sm:$0xff] }
 0x333   : > { %2082 = vmatmul.f32.gmra.mxu0 %v9959_v4  ;;  %3104 = vmatmul.f32.gmra.mxu2 %v11426_v30  ;;  %v2480_v38 = vrot.slane %v2035_v40, 1  ;;  %v15476_v40 = vld [vmem:[#allocation17_spill] sm:$0xff] }
 0x334   : > { %2261 = vmatmul.f32.gmra.mxu1 %v9959_v4  ;;  %v11450_v4 = vld [vmem:[#allocation2 + $0xd0] sm:$0xff]  ;;  %v1421_v25 = vadd.f32 %v1282_v22, %v15476_v40 }
 0x336   : > { %3271 = vmatmul.f32.gmra.mxu3 %v11365_v0  ;;  %v15470_v0 = vld [vmem:[#allocation14_spill] sm:$0xff]  ;;  %v3057_v29 = vpop.f32.mrf.mxu2 }
 0x337   : > { %v1276_v28 = vrot.slane %v15470_v0, 1 }
 0x339   : > { %v2006_v32 = vpop.f32.mrf.mxu3  ;;  %v1419_v0 = vadd.f32 %v1276_v28, %v15472_v45  ;;  %v2217_v20 = vpop.f32.mrf.mxu1 }
 0x33a   : > { %v11439_v15 = vadd.f32 %v2006_v32, %v1723_v16  ;;  %v2477_v32 = vsel %vm1272_vm1, %v2475_v50, %v2476_v41  ;;  %v2038_v16 = vpop.f32.mrf.mxu0  ;;  %v15475_v41 = vrot.slane %v11183_v60, 2 }
 0x33b   : > { %v2481_v51 = vrot.slane %v2038_v16, 1  ;;  %2085 = vmatmul.f32.gmra.mxu0 %v9960_v10  ;;  %3107 = vmatmul.f32.gmra.mxu2 %v11450_v4  ;;  %v1672_v28 = vadd.f32 %v1529_v54, %v1419_v0  ;;  %v2619_v63 = vadd.f32 %v2477_v32, %v2367_v39  ;;  %v11471_v54 = vld [vmem:[#allocation2 + $0xd8] sm:$0xff] }
 0x33c   : > { %15469 = vst [vmem:[#allocation55_spill] sm:$0xff] %v11439_v15  ;;  %v1535_v50 = vsel %vm1525_vm2, %v1532_v49, %v15475_v41  ;;  %v2733_v15 = vrot.slane %v2217_v20, 2  ;;  %2264 = vmatmul.f32.gmra.mxu1 %v9960_v10  ;;  %v2478_v49 = vrot.slane %v11407_v8, 1  ;;  %v15477_v41 = vld [vmem:[#allocation61_spill] sm:$0xff]  ;;  %v15479_v10 = vld [vmem:[#allocation22_spill] sm:$0xff] }
 0x33d   : > { %v1674_v6 = vadd.f32 %v1535_v50, %v1421_v25  ;;  %v2871_v20 = vadd.f32 %v2729_v55, %v2619_v63  ;;  %v2369_v47 = vadd.f32 %v15477_v41, %v1672_v28  ;;  %v9961_v50 = vld [vmem:[#allocation2 + $0xc0] sm:$0xff]  ;;  %v1283_v40 = vrot.slane %v15479_v10, 1  ;;  %v11511_v10 = vld [vmem:[#allocation2 + $0xe8] sm:$0xff] }
 0x33e   : > { %3274 = vmatmul.f32.gmra.mxu3 %v11383_v48  ;;  %v2482_v48 = vsel %vm1272_vm1, %v2480_v38, %v2481_v51  ;;  %v2734_v17 = vsel %vm1525_vm2, %v2732_v5, %v2733_v15  ;;  %v3060_v2 = vpop.f32.mrf.mxu2  ;;  %v2730_v5 = vrot.slane %v11411_v61, 2  ;;  %v15480_v25 = vld [vmem:[#allocation24_spill] sm:$0xff] }
 0x33f   : > { %v2622_v45 = vadd.f32 %v2482_v48, %v2370_v12  ;;  %v2621_v39 = vadd.f32 %v2478_v49, %v2369_v47  ;;  %v2371_v32 = vadd.f32 %v15478_v44, %v1674_v6  ;;  %v3568_v47 = vadd.f32 %v11392_v31, %v2871_v20 }
 0x340   : > { %v1284_v28 = vrot.slane %v15480_v25, 1 }
 0x341   : > { %v3227_v16 = vpop.f32.mrf.mxu3  ;;  %v2874_v38 = vadd.f32 %v2734_v17, %v2622_v45  ;;  %v11476_v37 = vpop.f32.mrf.mxu1  ;;  %v1537_v45 = vrot.slane %v11206_v62, 2  ;;  %v2873_v17 = vadd.f32 %v2730_v5, %v2621_v39  ;;  %v15482_v5 = vld [vmem:[#allocation26_spill] sm:$0xff] }
 0x342   : > { %v11469_v22 = vpop.f32.mrf.mxu0  ;;  %v3676_v8 = vrot.slane %v3227_v16, 1  ;;  %v2735_v0 = vrot.slane %v11476_v37, 2  ;;  %v1285_v20 = vsel %vm1272_vm1, %v1283_v40, %v1284_v28 }
 0x343   : > { %v11467_v13 = vadd.f32 %v3057_v29, %v2874_v38  ;;  %v2483_v12 = vrot.slane %v11469_v22, 1  ;;  %2088 = vmatmul.f32.gmra.mxu0 %v9961_v50  ;;  %3110 = vmatmul.f32.gmra.mxu2 %v11471_v54  ;;  %v11498_v38 = vld [vmem:[#allocation2 + $0xe0] sm:$0xff]  ;;  %v3570_v62 = vadd.f32 %v11421_v23, %v2873_v17 }
 0x344   : > { %v2736_v61 = vsel %vm1525_vm2, %v2733_v15, %v2735_v0  ;;  %2267 = vmatmul.f32.gmra.mxu1 %v9961_v50  ;;  %v1536_v15 = vrot.slane %v11196_v57, 2 }
 0x345   : > { %v2484_v29 = vsel %vm1272_vm1, %v2481_v51, %v2483_v12 }
 0x346   : > { %3277 = vmatmul.f32.gmra.mxu3 %v11397_v21  ;;  %v2623_v48 = vadd.f32 %v2484_v29, %v2371_v32  ;;  %v11490_v63 = vpop.f32.mrf.mxu2  ;;  %v1538_v44 = vsel %vm1525_vm2, %v1536_v15, %v1537_v45  ;;  %v9962_v32 = vld [vmem:[#allocation2 + $0xc8] sm:$0xff]  ;;  %v1286_v29 = vrot.slane %v15482_v5, 1 }
 0x348   : > { %v2875_v51 = vadd.f32 %v2736_v61, %v2623_v48  ;;  %v1287_v40 = vsel %vm1272_vm1, %v1284_v28, %v1286_v29  ;;  %v9963_v28 = vld [vmem:[#allocation2 + $0xd0] sm:$0xff] }
 0x349   : > { %v3230_v21 = vpop.f32.mrf.mxu3  ;;  %v2223_v41 = vpop.f32.mrf.mxu1 }
 0x34a   : > { %v3677_v16 = vrot.slane %v3230_v21, 1  ;;  %v11496_v6 = vadd.f32 %v3060_v2, %v2875_v51  ;;  %v2044_v49 = vpop.f32.mrf.mxu0  ;;  %v15481_v2 = vld [vmem:[#allocation21_spill] sm:$0xff]  ;;  %v5516_v21 = vld [vmem:[#allocation6 + $0x170] sm:$0xff]  ;;  %v15483_v51 = vld [vmem:[#allocation19_spill] sm:$0xff] }
 0x34b   : > { %2091 = vmatmul.f32.gmra.mxu0 %v9962_v32  ;;  %3113 = vmatmul.f32.gmra.mxu2 %v11498_v38  ;;  %v1423_v39 = vadd.f32 %v1285_v20, %v15481_v2  ;;  %v2485_v25 = vrot.slane %v2044_v49, 1  ;;  %v15485_v20 = vld [vmem:[#allocation65_spill] sm:$0xff] }
 0x34c   : > { %v3678_v55 = vsel %vm1272_vm1, %v3676_v8, %v3677_v16  ;;  %2270 = vmatmul.f32.gmra.mxu1 %v9962_v32  ;;  %5663 = vmatpush.msra.mxu2 %v5516_v21  ;;  %v2737_v16 = vrot.slane %v2223_v41, 2  ;;  %v15488_v41 = vrot.slane %v11183_v60, 2  ;;  %v15490_v60 = vld [vmem:[#allocation67_spill] sm:$0xff] }
 0x34d   : > { %v11494_v31 = vadd.f32 %v3678_v55, %v3568_v47  ;;  %v1676_v57 = vadd.f32 %v1538_v44, %v1423_v39  ;;  %v15484_v55 = vrot.slane %v15468_v59, 1 }
 0x34e   : > { %3280 = vmatmul.f32.gmra.mxu3 %v11409_v11  ;;  %v3066_v47 = vpop.f32.mrf.mxu2  ;;  %v1539_v11 = vrot.slane %v11219_v46, 2  ;;  %v15486_v46 = vld [vmem:[#allocation25_spill] sm:$0xff] }
 0x34f   : > { %v1422_v17 = vadd.f32 %v15484_v55, %v15483_v51  ;;  %v2373_v15 = vadd.f32 %v15485_v20, %v1676_v57  ;;  %v5515_v55 = vld [vmem:[#allocation6 + $0x168] sm:$0xff] }
 0x350   : > { %v1540_v32 = vsel %vm1525_vm2, %v1537_v45, %v1539_v11  ;;  %5518 = vmatpush.msra.mxu1 %v5515_v55 }
 0x351   : > { %v3233_v8 = vpop.f32.mrf.mxu3  ;;  %v2226_v44 = vpop.f32.mrf.mxu1  ;;  %v1675_v59 = vadd.f32 %v15488_v41, %v1422_v17 }
 0x352   : > { %v3679_v50 = vrot.slane %v3233_v8, 1  ;;  %v2047_v23 = vpop.f32.mrf.mxu0  ;;  %v2738_v39 = vrot.slane %v2226_v44, 2  ;;  %v3009_v44 = vld [vmem:[#allocation4 + $0x3d0] sm:$0xff] }
 0x353   : > { %v2486_v61 = vrot.slane %v2047_v23, 1  ;;  %2094 = vmatmul.f32.gmra.mxu0 %v9963_v28  ;;  %3116 = vmatmul.f32.gmra.mxu2 %v11511_v10  ;;  %v15489_v23 = vld [vmem:[#allocation64_spill] sm:$0xff] }
 0x354   : > { %v11509_v48 = vadd.f32 %v3679_v50, %v3570_v62  ;;  %v1425_v62 = vadd.f32 %v1286_v29, %v15486_v46  ;;  %v2739_v21 = vsel %vm1525_vm2, %v2737_v16, %v2738_v39  ;;  %2273 = vmatmul.f32.gmra.mxu1 %v9963_v28  ;;  %3396 = vmatpush.msrb.mxu0 %v3009_v44 }
 0x355   : > { %v2487_v2 = vsel %vm1272_vm1, %v2485_v25, %v2486_v61  ;;  %v2372_v25 = vadd.f32 %v15489_v23, %v1675_v59 }
 0x356   : > { %3283 = vmatmul.f32.gmra.mxu3 %v11426_v30  ;;  %v15487_v30 = vld [vmem:[#allocation23_spill] sm:$0xff]  ;;  %v2625_v5 = vadd.f32 %v2487_v2, %v2373_v15  ;;  %v1678_v50 = vadd.f32 %v1539_v11, %v1425_v62  ;;  %v3069_v57 = vpop.f32.mrf.mxu2  ;;  %v15491_v15 = vld [vmem:[#allocation66_spill] sm:$0xff] }
 0x357   : > { %v1424_v49 = vadd.f32 %v1287_v40, %v15487_v30  ;;  %v11530_v40 = vld [vmem:[#allocation2 + $0xf0] sm:$0xff]  ;;  %v2624_v16 = vadd.f32 %v2483_v12, %v2372_v25  ;;  %v9964_v30 = vld [vmem:[#allocation2 + $0xd8] sm:$0xff] }
 0x358   : > { %v2877_v45 = vadd.f32 %v2739_v21, %v2625_v5  ;;  %v2375_v11 = vadd.f32 %v15490_v60, %v1678_v50  ;;  %v15493_v5 = vld [vmem:[#allocation30_spill] sm:$0xff] }
 0x359   : > { %v3236_v8 = vpop.f32.mrf.mxu3  ;;  %v1677_v29 = vadd.f32 %v1540_v32, %v1424_v49  ;;  %v2229_v62 = vpop.f32.mrf.mxu1  ;;  %v1289_v22 = vrot.slane %v15493_v5, 1  ;;  %v2876_v23 = vadd.f32 %v2735_v0, %v2624_v16  ;;  %v5513_v5 = vld [vmem:[#allocation6 + $0x158] sm:$0xff] }
 0x35a   : > { %v11528_v51 = vadd.f32 %v3066_v47, %v2877_v45  ;;  %v2050_v20 = vpop.f32.mrf.mxu0  ;;  %v3681_v47 = vrot.slane %v3236_v8, 1  ;;  %v2740_v28 = vrot.slane %v2229_v62, 2  ;;  %5664 = vmatpush.msra.mxu2 %v5513_v5  ;;  %v9967_v5 = vld [vmem:[#allocation2 + $0xf0] sm:$0xff] }
 0x35b   : > { %v2488_v17 = vrot.slane %v2050_v20, 1  ;;  %v2374_v46 = vadd.f32 %v15491_v15, %v1677_v29  ;;  %2097 = vmatmul.f32.gmra.mxu0 %v9964_v30  ;;  %3119 = vmatmul.f32.gmra.mxu2 %v11530_v40  ;;  %v3573_v0 = vadd.f32 %v11490_v63, %v2876_v23  ;;  %v15495_v15 = vld [vmem:[#allocation32_spill] sm:$0xff]  ;;  %v9966_v23 = vld [vmem:[#allocation2 + $0xe8] sm:$0xff] }
 0x35c   : > { %v2741_v50 = vsel %vm1525_vm2, %v2738_v39, %v2740_v28  ;;  %2276 = vmatmul.f32.gmra.mxu1 %v9964_v30  ;;  %v11553_v39 = vld [vmem:[#allocation2 + $0xf8] sm:$0xff]  ;;  %v11570_v30 = vld [vmem:[#allocation2 + $0x100] sm:$0xff] }
 0x35d   : > { %v2489_v32 = vsel %vm1272_vm1, %v2486_v61, %v2488_v17  ;;  %v2627_v2 = vadd.f32 %v2488_v17, %v2375_v11  ;;  %v1542_v61 = vrot.slane %v11245_v36, 2  ;;  %v1541_v11 = vrot.slane %v11232_v9, 2  ;;  %v9965_v17 = vld [vmem:[#allocation2 + $0xe0] sm:$0xff] }
 0x35e   : > { %3286 = vmatmul.f32.gmra.mxu3 %v11450_v4  ;;  %v15492_v4 = vld [vmem:[#allocation28_spill] sm:$0xff]  ;;  %v2626_v59 = vadd.f32 %v2489_v32, %v2374_v46  ;;  %v3072_v29 = vpop.f32.mrf.mxu2  ;;  %v1291_v46 = vrot.slane %v15495_v15, 1  ;;  %v15499_v15 = vld [vmem:[#allocation70_spill] sm:$0xff] }
 0x35f   : > { %v1288_v49 = vrot.slane %v15492_v4, 1  ;;  %v2879_v21 = vadd.f32 %v2740_v28, %v2627_v2  ;;  %v1543_v37 = vsel %vm1525_vm2, %v1541_v11, %v1542_v61 }
 0x360   : > { %v2878_v8 = vadd.f32 %v2741_v50, %v2626_v59  ;;  %v1292_v4 = vsel %vm1272_vm1, %v1289_v22, %v1291_v46  ;;  %v15496_v50 = vld [vmem:[#allocation68_spill] sm:$0xff] }
 0x361   : > { %v3239_v41 = vpop.f32.mrf.mxu3  ;;  %v11546_v25 = vadd.f32 %v3072_v29, %v2879_v21  ;;  %v1290_v60 = vsel %vm1272_vm1, %v1288_v49, %v1289_v22  ;;  %v2232_v36 = vpop.f32.mrf.mxu1 }
 0x362   : > { %v3682_v12 = vrot.slane %v3239_v41, 1  ;;  %v11551_v20 = vadd.f32 %v3069_v57, %v2878_v8  ;;  %v2053_v44 = vpop.f32.mrf.mxu0  ;;  %v2742_v41 = vrot.slane %v2232_v36, 2 }
 0x363   : > { %2100 = vmatmul.f32.gmra.mxu0 %v9965_v17  ;;  %3122 = vmatmul.f32.gmra.mxu2 %v11553_v39  ;;  %v2490_v49 = vrot.slane %v2053_v44, 1 }
 0x364   : > { %v3683_v45 = vsel %vm1272_vm1, %v3681_v47, %v3682_v12  ;;  %2279 = vmatmul.f32.gmra.mxu1 %v9965_v17 }
 0x365   : > { %v11549_v55 = vadd.f32 %v3683_v45, %v11467_v13  ;;  %v15494_v13 = vld [vmem:[#allocation27_spill] sm:$0xff] }
 0x366   : > { %3289 = vmatmul.f32.gmra.mxu3 %v11471_v54  ;;  %v1426_v57 = vadd.f32 %v1290_v60, %v15494_v13  ;;  %v3075_v9 = vpop.f32.mrf.mxu2  ;;  %v1544_v54 = vrot.slane %v11257_v26, 2 }
 0x368   : > { %v1679_v47 = vadd.f32 %v1543_v37, %v1426_v57  ;;  %v5512_v57 = vld [vmem:[#allocation6 + $0x150] sm:$0xff] }
 0x369   : > { %v3242_v16 = vpop.f32.mrf.mxu3  ;;  %v2235_v21 = vpop.f32.mrf.mxu1  ;;  %5519 = vmatpush.msra.mxu1 %v5512_v57 }
 0x36a   : > { %v3684_v62 = vrot.slane %v3242_v16, 1  ;;  %v2056_v28 = vpop.f32.mrf.mxu0  ;;  %v2376_v26 = vadd.f32 %v15496_v50, %v1679_v47  ;;  %v2743_v45 = vrot.slane %v2235_v21, 2  ;;  %v11583_v16 = vld [vmem:[#allocation2 + $0x108] sm:$0xff]  ;;  %v15501_v50 = vld [vmem:[#allocation34_spill] sm:$0xff] }
 0x36b   : > { %v2491_v59 = vrot.slane %v2056_v28, 1  ;;  %2103 = vmatmul.f32.gmra.mxu0 %v9966_v23  ;;  %3125 = vmatmul.f32.gmra.mxu2 %v11570_v30  ;;  %v3006_v47 = vld [vmem:[#allocation4 + $0x3b8] sm:$0xff] }
 0x36c   : > { %v3685_v32 = vsel %vm1272_vm1, %v3682_v12, %v3684_v62  ;;  %v11565_v2 = vadd.f32 %v3684_v62, %v3573_v0  ;;  %v15497_v12 = vld [vmem:[#allocation31_spill] sm:$0xff]  ;;  %v2744_v36 = vsel %vm1525_vm2, %v2742_v41, %v2743_v45  ;;  %2282 = vmatmul.f32.gmra.mxu1 %v9966_v23  ;;  %3397 = vmatpush.msrb.mxu0 %v3006_v47 }
 0x36d   : > { %v11568_v63 = vadd.f32 %v3685_v32, %v11496_v6  ;;  %v1428_v8 = vadd.f32 %v1291_v46, %v15497_v12  ;;  %v1545_v6 = vsel %vm1525_vm2, %v1542_v61, %v1544_v54  ;;  %v2492_v29 = vsel %vm1272_vm1, %v2490_v49, %v2491_v59  ;;  %v15502_v12 = vld [vmem:[#allocation36_spill] sm:$0xff] }
 0x36e   : > { %3292 = vmatmul.f32.gmra.mxu3 %v11498_v38  ;;  %v15498_v38 = vld [vmem:[#allocation29_spill] sm:$0xff]  ;;  %v2628_v60 = vadd.f32 %v2492_v29, %v2376_v26  ;;  %v3078_v17 = vpop.f32.mrf.mxu2 }
 0x36f   : > { %v1427_v22 = vadd.f32 %v1292_v4, %v15498_v38  ;;  %v1681_v11 = vadd.f32 %v1544_v54, %v1428_v8  ;;  %v15500_v54 = vld [vmem:[#allocation69_spill] sm:$0xff]  ;;  %v1294_v8 = vrot.slane %v15502_v12, 1 }
 0x370   : > { %v2880_v0 = vadd.f32 %v2744_v36, %v2628_v60 }
 0x371   : > { %v3245_v44 = vpop.f32.mrf.mxu3  ;;  %v1680_v37 = vadd.f32 %v1545_v6, %v1427_v22  ;;  %v2378_v46 = vadd.f32 %v15499_v15, %v1681_v11  ;;  %v2238_v28 = vpop.f32.mrf.mxu1  ;;  %v9968_v15 = vld [vmem:[#allocation2 + $0xf8] sm:$0xff] }
 0x372   : > { %v11581_v13 = vadd.f32 %v3075_v9, %v2880_v0  ;;  %v2059_v61 = vpop.f32.mrf.mxu0  ;;  %v3686_v4 = vrot.slane %v3245_v44, 1  ;;  %v2745_v41 = vrot.slane %v2238_v28, 2  ;;  %v11602_v0 = vld [vmem:[#allocation2 + $0x110] sm:$0xff] }
 0x373   : > { %v2493_v62 = vrot.slane %v2059_v61, 1  ;;  %v2377_v32 = vadd.f32 %v15500_v54, %v1680_v37  ;;  %2106 = vmatmul.f32.gmra.mxu0 %v9967_v5  ;;  %3128 = vmatmul.f32.gmra.mxu2 %v11583_v16  ;;  %v1546_v61 = vrot.slane %v11267_v3, 2  ;;  %v1549_v3 = vrot.slane %v11291_v53, 2 }
 0x374   : > { %v2746_v29 = vsel %vm1525_vm2, %v2743_v45, %v2745_v41  ;;  %2285 = vmatmul.f32.gmra.mxu1 %v9967_v5 }
 0x375   : > { %v2494_v49 = vsel %vm1272_vm1, %v2491_v59, %v2493_v62  ;;  %v2630_v9 = vadd.f32 %v2493_v62, %v2378_v46  ;;  %v1547_v59 = vrot.slane %v11279_v35, 2  ;;  %v15504_v62 = vld [vmem:[#allocation38_spill] sm:$0xff] }
 0x376   : > { %3295 = vmatmul.f32.gmra.mxu3 %v11511_v10  ;;  %v1293_v10 = vrot.slane %v15501_v50, 1  ;;  %v2629_v21 = vadd.f32 %v2494_v49, %v2377_v32  ;;  %v3081_v22 = vpop.f32.mrf.mxu2  ;;  %v1296_v47 = vrot.slane %v15504_v62, 1 }
 0x377   : > { %v2882_v23 = vadd.f32 %v2745_v41, %v2630_v9  ;;  %v1548_v35 = vsel %vm1525_vm2, %v1546_v61, %v1547_v59  ;;  %v11619_v41 = vld [vmem:[#allocation2 + $0x118] sm:$0xff] }
 0x378   : > { %v2881_v38 = vadd.f32 %v2746_v29, %v2629_v21  ;;  %v1295_v45 = vsel %vm1272_vm1, %v1293_v10, %v1294_v8  ;;  %v1297_v5 = vsel %vm1272_vm1, %v1294_v8, %v1296_v47  ;;  %v15505_v21 = vld [vmem:[#allocation71_spill] sm:$0xff] }
 0x379   : > { %v3248_v26 = vpop.f32.mrf.mxu3  ;;  %v11595_v60 = vadd.f32 %v3081_v22, %v2882_v23  ;;  %v2241_v57 = vpop.f32.mrf.mxu1  ;;  %v15507_v8 = vld [vmem:[#allocation35_spill] sm:$0xff] }
 0x37a   : > { %v3687_v6 = vrot.slane %v3248_v26, 1  ;;  %v11600_v36 = vadd.f32 %v3078_v17, %v2881_v38  ;;  %v2062_v37 = vpop.f32.mrf.mxu0  ;;  %v2747_v10 = vrot.slane %v2241_v57, 2  ;;  %v9969_v38 = vld [vmem:[#allocation2 + $0x100] sm:$0xff]  ;;  %v1430_v22 = vadd.f32 %v1297_v5, %v15507_v8 }
 0x37b   : > { %2109 = vmatmul.f32.gmra.mxu0 %v9968_v15  ;;  %3131 = vmatmul.f32.gmra.mxu2 %v11602_v0  ;;  %v2495_v50 = vrot.slane %v2062_v37, 1 }
 0x37c   : > { %v3688_v44 = vsel %vm1272_vm1, %v3686_v4, %v3687_v6  ;;  %2288 = vmatmul.f32.gmra.mxu1 %v9968_v15 }
 0x37d   : > { %v11598_v11 = vadd.f32 %v3688_v44, %v11528_v51  ;;  %v15503_v51 = vld [vmem:[#allocation33_spill] sm:$0xff] }
 0x37e   : > { %3298 = vmatmul.f32.gmra.mxu3 %v11530_v40  ;;  %v1429_v46 = vadd.f32 %v1295_v45, %v15503_v51  ;;  %v3084_v28 = vpop.f32.mrf.mxu2  ;;  %v5510_v51 = vld [vmem:[#allocation6 + $0x140] sm:$0xff] }
 0x37f   : > { %5665 = vmatpush.msra.mxu2 %v5510_v51  ;;  %v1551_v51 = vrot.slane %v11301_v42, 2  ;;  %v1554_v42 = vrot.slane %v11321_v24, 2 }
 0x380   : > { %v1682_v32 = vadd.f32 %v1548_v35, %v1429_v46  ;;  %v11632_v46 = vld [vmem:[#allocation2 + $0x120] sm:$0xff] }
 0x381   : > { %v3251_v17 = vpop.f32.mrf.mxu3  ;;  %v2244_v12 = vpop.f32.mrf.mxu1 }
 0x382   : > { %v3689_v54 = vrot.slane %v3251_v17, 1  ;;  %v2065_v9 = vpop.f32.mrf.mxu0  ;;  %v2379_v53 = vadd.f32 %v15505_v21, %v1682_v32  ;;  %v2748_v23 = vrot.slane %v2244_v12, 2  ;;  %v15508_v17 = vld [vmem:[#allocation73_spill] sm:$0xff]  ;;  %v15509_v32 = vld [vmem:[#allocation72_spill] sm:$0xff] }
 0x383   : > { %v2496_v26 = vrot.slane %v2065_v9, 1  ;;  %2112 = vmatmul.f32.gmra.mxu0 %v9969_v38  ;;  %3134 = vmatmul.f32.gmra.mxu2 %v11619_v41  ;;  %v15510_v21 = vld [vmem:[#allocation40_spill] sm:$0xff] }
 0x384   : > { %v3690_v40 = vsel %vm1272_vm1, %v3687_v6, %v3689_v54  ;;  %v11614_v4 = vadd.f32 %v3689_v54, %v11546_v25  ;;  %v15506_v6 = vld [vmem:[#allocation37_spill] sm:$0xff]  ;;  %v1550_v25 = vsel %vm1525_vm2, %v1547_v59, %v1549_v3  ;;  %v2749_v45 = vsel %vm1525_vm2, %v2747_v10, %v2748_v23  ;;  %2291 = vmatmul.f32.gmra.mxu1 %v9969_v38 }
 0x385   : > { %v11617_v49 = vadd.f32 %v3690_v40, %v11551_v20  ;;  %v1431_v29 = vadd.f32 %v1296_v47, %v15506_v6  ;;  %v2497_v20 = vsel %vm1272_vm1, %v2495_v50, %v2496_v26  ;;  %v1683_v61 = vadd.f32 %v1550_v25, %v1430_v22  ;;  %v5509_v54 = vld [vmem:[#allocation6 + $0x138] sm:$0xff]  ;;  %v15511_v6 = vld [vmem:[#allocation42_spill] sm:$0xff] }
 0x386   : > { %3301 = vmatmul.f32.gmra.mxu3 %v11553_v39  ;;  %v2631_v44 = vadd.f32 %v2497_v20, %v2379_v53  ;;  %v3087_v35 = vpop.f32.mrf.mxu2  ;;  %5520 = vmatpush.msra.mxu1 %v5509_v54  ;;  %v9970_v10 = vld [vmem:[#allocation2 + $0x108] sm:$0xff]  ;;  %v15513_v54 = vld [vmem:[#allocation44_spill] sm:$0xff] }
 0x387   : > { %v1684_v37 = vadd.f32 %v1549_v3, %v1431_v29  ;;  %v2380_v3 = vadd.f32 %v15509_v32, %v1683_v61  ;;  %v1299_v29 = vrot.slane %v15511_v6, 1  ;;  %v3003_v61 = vld [vmem:[#allocation4 + $0x3a0] sm:$0xff]  ;;  %v1301_v32 = vrot.slane %v15513_v54, 1 }
 0x388   : > { %v2883_v57 = vadd.f32 %v2749_v45, %v2631_v44  ;;  %3398 = vmatpush.msrb.mxu0 %v3003_v61  ;;  %v15514_v6 = vld [vmem:[#allocation74_spill] sm:$0xff] }
 0x389   : > { %v3254_v39 = vpop.f32.mrf.mxu3  ;;  %v2381_v62 = vadd.f32 %v15508_v17, %v1684_v37  ;;  %v2247_v40 = vpop.f32.mrf.mxu1 }
 0x38a   : > { %v11630_v15 = vadd.f32 %v3084_v28, %v2883_v57  ;;  %v2068_v59 = vpop.f32.mrf.mxu0  ;;  %v3691_v9 = vrot.slane %v3254_v39, 1  ;;  %v2750_v50 = vrot.slane %v2247_v40, 2 }
 0x38b   : > { %v2498_v47 = vrot.slane %v2068_v59, 1  ;;  %2115 = vmatmul.f32.gmra.mxu0 %v9970_v10  ;;  %3137 = vmatmul.f32.gmra.mxu2 %v11632_v46  ;;  %v11651_v59 = vld [vmem:[#allocation2 + $0x128] sm:$0xff] }
 0x38c   : > { %v2751_v20 = vsel %vm1525_vm2, %v2748_v23, %v2750_v50  ;;  %2294 = vmatmul.f32.gmra.mxu1 %v9970_v10  ;;  %v11668_v10 = vld [vmem:[#allocation2 + $0x130] sm:$0xff] }
 0x38d   : > { %v2499_v5 = vsel %vm1272_vm1, %v2496_v26, %v2498_v47  ;;  %v2633_v28 = vadd.f32 %v2498_v47, %v2381_v62  ;;  %v1552_v26 = vrot.slane %v11311_v7, 2  ;;  %v9971_v62 = vld [vmem:[#allocation2 + $0x110] sm:$0xff] }
 0x38e   : > { %3304 = vmatmul.f32.gmra.mxu3 %v11570_v30  ;;  %v1298_v30 = vrot.slane %v15510_v21, 1  ;;  %v2632_v12 = vadd.f32 %v2499_v5, %v2380_v3  ;;  %v3090_v22 = vpop.f32.mrf.mxu2  ;;  %v1302_v21 = vsel %vm1272_vm1, %v1299_v29, %v1301_v32 }
 0x38f   : > { %v2885_v38 = vadd.f32 %v2750_v50, %v2633_v28  ;;  %v1553_v17 = vsel %vm1525_vm2, %v1551_v51, %v1552_v26 }
 0x390   : > { %v2884_v8 = vadd.f32 %v2751_v20, %v2632_v12  ;;  %v1300_v23 = vsel %vm1272_vm1, %v1298_v30, %v1299_v29  ;;  %v15516_v29 = vld [vmem:[#allocation41_spill] sm:$0xff] }
 0x391   : > { %v3257_v53 = vpop.f32.mrf.mxu3  ;;  %v11644_v44 = vadd.f32 %v3090_v22, %v2885_v38  ;;  %v2250_v7 = vpop.f32.mrf.mxu1  ;;  %v9972_v22 = vld [vmem:[#allocation2 + $0x118] sm:$0xff] }
 0x392   : > { %v3692_v25 = vrot.slane %v3257_v53, 1  ;;  %v11649_v45 = vadd.f32 %v3087_v35, %v2884_v8  ;;  %v2071_v57 = vpop.f32.mrf.mxu0  ;;  %v2752_v53 = vrot.slane %v2250_v7, 2 }
 0x393   : > { %2118 = vmatmul.f32.gmra.mxu0 %v9971_v62  ;;  %3140 = vmatmul.f32.gmra.mxu2 %v11651_v59  ;;  %v2500_v30 = vrot.slane %v2071_v57, 1 }
 0x394   : > { %v3693_v39 = vsel %vm1272_vm1, %v3691_v9, %v3692_v25  ;;  %2297 = vmatmul.f32.gmra.mxu1 %v9971_v62 }
 0x395   : > { %v11647_v37 = vadd.f32 %v3693_v39, %v11581_v13  ;;  %v15512_v13 = vld [vmem:[#allocation39_spill] sm:$0xff]  ;;  %v1433_v39 = vadd.f32 %v1302_v21, %v15516_v29 }
 0x396   : > { %3307 = vmatmul.f32.gmra.mxu3 %v11583_v16  ;;  %v1432_v35 = vadd.f32 %v1300_v23, %v15512_v13  ;;  %v3093_v9 = vpop.f32.mrf.mxu2  ;;  %v11681_v13 = vld [vmem:[#allocation2 + $0x138] sm:$0xff] }
 0x398   : > { %v1685_v40 = vadd.f32 %v1553_v17, %v1432_v35  ;;  %v15517_v35 = vld [vmem:[#allocation76_spill] sm:$0xff] }
 0x399   : > { %v3260_v47 = vpop.f32.mrf.mxu3  ;;  %v2253_v20 = vpop.f32.mrf.mxu1 }
 0x39a   : > { %v3694_v3 = vrot.slane %v3260_v47, 1  ;;  %v2074_v50 = vpop.f32.mrf.mxu0  ;;  %v2382_v24 = vadd.f32 %v15514_v6, %v1685_v40  ;;  %v2753_v8 = vrot.slane %v2253_v20, 2  ;;  %v15520_v20 = vld [vmem:[#allocation48_spill] sm:$0xff] }
 0x39b   : > { %v2501_v12 = vrot.slane %v2074_v50, 1  ;;  %2121 = vmatmul.f32.gmra.mxu0 %v9972_v22  ;;  %3143 = vmatmul.f32.gmra.mxu2 %v11668_v10 }
 0x39c   : > { %v3695_v16 = vsel %vm1272_vm1, %v3692_v25, %v3694_v3  ;;  %v11663_v5 = vadd.f32 %v3694_v3, %v11595_v60  ;;  %v15515_v25 = vld [vmem:[#allocation43_spill] sm:$0xff]  ;;  %v1555_v60 = vsel %vm1525_vm2, %v1552_v26, %v1554_v42  ;;  %v2754_v23 = vsel %vm1525_vm2, %v2752_v53, %v2753_v8  ;;  %2300 = vmatmul.f32.gmra.mxu1 %v9972_v22  ;;  %v15519_v53 = vld [vmem:[#allocation46_spill] sm:$0xff] }
 0x39d   : > { %v11666_v28 = vadd.f32 %v3695_v16, %v11600_v36  ;;  %v1434_v38 = vadd.f32 %v1301_v32, %v15515_v25  ;;  %v2502_v36 = vsel %vm1272_vm1, %v2500_v30, %v2501_v12  ;;  %v1686_v51 = vadd.f32 %v1555_v60, %v1433_v39  ;;  %v5507_v32 = vld [vmem:[#allocation6 + $0x128] sm:$0xff] }
 0x39e   : > { %3310 = vmatmul.f32.gmra.mxu3 %v11602_v0  ;;  %v2634_v61 = vadd.f32 %v2502_v36, %v2382_v24  ;;  %v3096_v17 = vpop.f32.mrf.mxu2  ;;  %v15518_v3 = vld [vmem:[#allocation75_spill] sm:$0xff]  ;;  %5666 = vmatpush.msra.mxu2 %v5507_v32  ;;  %v1303_v6 = vrot.slane %v15519_v53, 1  ;;  %v1304_v25 = vrot.slane %v15520_v20, 1  ;;  %v11717_v53 = vld [vmem:[#allocation2 + $0x148] sm:$0xff] }
 0x39f   : > { %v1687_v57 = vadd.f32 %v1554_v42, %v1434_v38  ;;  %v2383_v40 = vadd.f32 %v15518_v3, %v1686_v51  ;;  %v15522_v3 = vld [vmem:[#allocation51_spill] sm:$0xff] }
 0x3a0   : > { %v2886_v7 = vadd.f32 %v2754_v23, %v2634_v61  ;;  %v5506_v23 = vld [vmem:[#allocation6 + $0x120] sm:$0xff] }
 0x3a1   : > { %v3263_v0 = vpop.f32.mrf.mxu3  ;;  %v2384_v47 = vadd.f32 %v15517_v35, %v1687_v57  ;;  %v2256_v42 = vpop.f32.mrf.mxu1  ;;  %v1556_v35 = vrot.slane %v11330_v19, 2  ;;  %5521 = vmatpush.msra.mxu1 %v5506_v23 }
 0x3a2   : > { %v11679_v62 = vadd.f32 %v3093_v9, %v2886_v7  ;;  %v2077_v26 = vpop.f32.mrf.mxu0  ;;  %v3696_v16 = vrot.slane %v3263_v0, 1  ;;  %v2755_v30 = vrot.slane %v2256_v42, 2  ;;  %v9973_v9 = vld [vmem:[#allocation2 + $0x120] sm:$0xff]  ;;  %v3000_v7 = vld [vmem:[#allocation4 + $0x388] sm:$0xff] }
 0x3a3   : > { %v2503_v54 = vrot.slane %v2077_v26, 1  ;;  %2124 = vmatmul.f32.gmra.mxu0 %v9973_v9  ;;  %3146 = vmatmul.f32.gmra.mxu2 %v11681_v13  ;;  %v11700_v26 = vld [vmem:[#allocation2 + $0x140] sm:$0xff] }
 0x3a4   : > { %v2756_v60 = vsel %vm1525_vm2, %v2753_v8, %v2755_v30  ;;  %2303 = vmatmul.f32.gmra.mxu1 %v9973_v9  ;;  %v1305_v8 = vsel %vm1272_vm1, %v1303_v6, %v1304_v25  ;;  %3399 = vmatpush.msrb.mxu0 %v3000_v7 }
 0x3a5   : > { %v2504_v50 = vsel %vm1272_vm1, %v2501_v12, %v2503_v54  ;;  %v2636_v21 = vadd.f32 %v2503_v54, %v2384_v47  ;;  %v1557_v12 = vrot.slane %v11340_v52, 2 }
 0x3a6   : > { %3313 = vmatmul.f32.gmra.mxu3 %v11619_v41  ;;  %v2635_v24 = vadd.f32 %v2504_v50, %v2383_v40  ;;  %v3099_v29 = vpop.f32.mrf.mxu2  ;;  %v1306_v40 = vrot.slane %v15522_v3, 1 }
 0x3a7   : > { %v2888_v36 = vadd.f32 %v2755_v30, %v2636_v21  ;;  %v1558_v47 = vsel %vm1525_vm2, %v1556_v35, %v1557_v12 }
 0x3a8   : > { %v2887_v22 = vadd.f32 %v2756_v60, %v2635_v24  ;;  %v1307_v6 = vsel %vm1272_vm1, %v1304_v25, %v1306_v40  ;;  %v15523_v60 = vld [vmem:[#allocation77_spill] sm:$0xff]  ;;  %v15525_v25 = vld [vmem:[#allocation47_spill] sm:$0xff] }
 0x3a9   : > { %v3266_v41 = vpop.f32.mrf.mxu3  ;;  %v11693_v0 = vadd.f32 %v3099_v29, %v2888_v36  ;;  %v2259_v52 = vpop.f32.mrf.mxu1  ;;  %v1436_v23 = vadd.f32 %v1307_v6, %v15525_v25 }
 0x3aa   : > { %v3697_v38 = vrot.slane %v3266_v41, 1  ;;  %v11698_v57 = vadd.f32 %v3096_v17, %v2887_v22  ;;  %v2080_v51 = vpop.f32.mrf.mxu0  ;;  %v15521_v17 = vld [vmem:[#allocation45_spill] sm:$0xff]  ;;  %v2757_v24 = vrot.slane %v2259_v52, 2 }
 0x3ab   : > { %3149 = vmatmul.f32.gmra.mxu2 %v11700_v26  ;;  %v1435_v54 = vadd.f32 %v1305_v8, %v15521_v17  ;;  %v2505_v41 = vrot.slane %v2080_v51, 1  ;;  %v11730_v17 = vld [vmem:[#allocation2 + $0x150] sm:$0xff] }
 0x3ac   : > { %v3698_v39 = vsel %vm1272_vm1, %v3696_v16, %v3697_v38 }
 0x3ad   : > { %v11696_v61 = vadd.f32 %v3698_v39, %v11630_v15  ;;  %v9974_v15 = vld [vmem:[#allocation2 + $0x128] sm:$0xff]  ;;  %v1688_v16 = vadd.f32 %v1558_v47, %v1435_v54  ;;  %v9975_v39 = vld [vmem:[#allocation2 + $0x130] sm:$0xff]  ;;  %v15526_v54 = vld [vmem:[#allocation79_spill] sm:$0xff] }
 0x3ae   : > { %3316 = vmatmul.f32.gmra.mxu3 %v11632_v46  ;;  %2127 = vmatmul.f32.gmra.mxu0 %v9974_v15  ;;  %v3102_v19 = vpop.f32.mrf.mxu2  ;;  %v1559_v46 = vrot.slane %v11351_v14, 2 }
 0x3af   : > { %2306 = vmatmul.f32.gmra.mxu1 %v9974_v15  ;;  %v2385_v14 = vadd.f32 %v15523_v60, %v1688_v16 }
 0x3b1   : > { %v3269_v32 = vpop.f32.mrf.mxu3  ;;  %v2262_v36 = vpop.f32.mrf.mxu1 }
 0x3b2   : > { %v3699_v42 = vrot.slane %v3269_v32, 1  ;;  %v2083_v9 = vpop.f32.mrf.mxu0  ;;  %v2758_v29 = vrot.slane %v2262_v36, 2 }
 0x3b3   : > { %v2506_v20 = vrot.slane %v2083_v9, 1  ;;  %3152 = vmatmul.f32.gmra.mxu2 %v11717_v53 }
 0x3b4   : > { %v3700_v50 = vsel %vm1272_vm1, %v3697_v38, %v3699_v42  ;;  %v11712_v21 = vadd.f32 %v3699_v42, %v11644_v44  ;;  %v15524_v38 = vld [vmem:[#allocation50_spill] sm:$0xff]  ;;  %v1560_v44 = vsel %vm1525_vm2, %v1557_v12, %v1559_v46  ;;  %v2759_v8 = vsel %vm1525_vm2, %v2757_v24, %v2758_v29 }
 0x3b5   : > { %v11715_v30 = vadd.f32 %v3700_v50, %v11649_v45  ;;  %v1437_v22 = vadd.f32 %v1306_v40, %v15524_v38  ;;  %v2507_v45 = vsel %vm1272_vm1, %v2505_v41, %v2506_v20  ;;  %v1689_v35 = vadd.f32 %v1560_v44, %v1436_v23  ;;  %v15527_v40 = vld [vmem:[#allocation78_spill] sm:$0xff]  ;;  %v9976_v41 = vld [vmem:[#allocation2 + $0x138] sm:$0xff] }
 0x3b6   : > { %3319 = vmatmul.f32.gmra.mxu3 %v11651_v59  ;;  %2130 = vmatmul.f32.gmra.mxu0 %v9975_v39  ;;  %v2637_v51 = vadd.f32 %v2507_v45, %v2385_v14  ;;  %v3105_v47 = vpop.f32.mrf.mxu2  ;;  %v5503_v23 = vld [vmem:[#allocation6 + $0x108] sm:$0xff] }
 0x3b7   : > { %v1690_v7 = vadd.f32 %v1559_v46, %v1437_v22  ;;  %2309 = vmatmul.f32.gmra.mxu1 %v9975_v39  ;;  %v2386_v42 = vadd.f32 %v15527_v40, %v1689_v35  ;;  %v5504_v39 = vld [vmem:[#allocation6 + $0x110] sm:$0xff] }
 0x3b8   : > { %v2889_v52 = vadd.f32 %v2759_v8, %v2637_v51  ;;  %5667 = vmatpush.msra.mxu2 %v5504_v39  ;;  %5522 = vmatpush.msra.mxu1 %v5503_v23  ;;  %v9979_v23 = vld [vmem:[#allocation2 + $0x150] sm:$0xff] }
 0x3b9   : > { %v3272_v59 = vpop.f32.mrf.mxu3  ;;  %v2387_v32 = vadd.f32 %v15526_v54, %v1690_v7  ;;  %v2265_v16 = vpop.f32.mrf.mxu1  ;;  %v9977_v7 = vld [vmem:[#allocation2 + $0x140] sm:$0xff] }
 0x3ba   : > { %v11728_v15 = vadd.f32 %v3102_v19, %v2889_v52  ;;  %v2086_v12 = vpop.f32.mrf.mxu0  ;;  %v3701_v46 = vrot.slane %v3272_v59, 1  ;;  %v2760_v6 = vrot.slane %v2265_v16, 2  ;;  %v11746_v59 = vld [vmem:[#allocation2 + $0x158] sm:$0xff]  ;;  %v11757_v54 = vld [vmem:[#allocation2 + $0x160] sm:$0xff] }
 0x3bb   : > { %v2508_v3 = vrot.slane %v2086_v12, 1  ;;  %3155 = vmatmul.f32.gmra.mxu2 %v11730_v17 }
 0x3bd   : > { %v2509_v50 = vsel %vm1272_vm1, %v2506_v20, %v2508_v3  ;;  %v2639_v9 = vadd.f32 %v2508_v3, %v2387_v32 }
 0x3be   : > { %3322 = vmatmul.f32.gmra.mxu3 %v11668_v10  ;;  %2133 = vmatmul.f32.gmra.mxu0 %v9976_v41  ;;  %v2638_v24 = vadd.f32 %v2509_v50, %v2386_v42  ;;  %v2761_v10 = vsel %vm1525_vm2, %v2758_v29, %v2760_v6  ;;  %v3108_v38 = vpop.f32.mrf.mxu2  ;;  %v2997_v29 = vld [vmem:[#allocation4 + $0x370] sm:$0xff] }
 0x3bf   : > { %2312 = vmatmul.f32.gmra.mxu1 %v9976_v41  ;;  %v2891_v14 = vadd.f32 %v2760_v6, %v2639_v9  ;;  %3400 = vmatpush.msrb.mxu0 %v2997_v29  ;;  %v15528_v42 = vld [vmem:[#allocation52_spill] sm:$0xff] }
 0x3c0   : > { %v2890_v36 = vadd.f32 %v2761_v10, %v2638_v24  ;;  %v2388_v16 = vadd.f32 %v15528_v42, %v11373_v58  ;;  %v11767_v10 = vld [vmem:[#allocation2 + $0x168] sm:$0xff] }
 0x3c1   : > { %v3275_v19 = vpop.f32.mrf.mxu3  ;;  %v11739_v44 = vadd.f32 %v3108_v38, %v2891_v14  ;;  %v2268_v51 = vpop.f32.mrf.mxu1 }
 0x3c2   : > { %v3702_v60 = vrot.slane %v3275_v19, 1  ;;  %v11744_v45 = vadd.f32 %v3105_v47, %v2890_v36  ;;  %v2089_v25 = vpop.f32.mrf.mxu0  ;;  %v2762_v3 = vrot.slane %v2268_v51, 2  ;;  %v15530_v51 = vld [vmem:[#allocation82_spill] sm:$0xff] }
 0x3c3   : > { %3158 = vmatmul.f32.gmra.mxu2 %v11746_v59  ;;  %v2510_v32 = vrot.slane %v2089_v25, 1 }
 0x3c4   : > { %v3703_v22 = vsel %vm1272_vm1, %v3701_v46, %v3702_v60 }
 0x3c5   : > { %v11742_v20 = vadd.f32 %v3703_v22, %v11679_v62  ;;  %v15529_v22 = vld [vmem:[#allocation85_spill] sm:$0xff] }
 0x3c6   : > { %3325 = vmatmul.f32.gmra.mxu3 %v11681_v13  ;;  %2136 = vmatmul.f32.gmra.mxu0 %v9977_v7  ;;  %v3111_v35 = vpop.f32.mrf.mxu2 }
 0x3c7   : > { %2315 = vmatmul.f32.gmra.mxu1 %v9977_v7 }
 0x3c9   : > { %v3278_v62 = vpop.f32.mrf.mxu3  ;;  %v2271_v46 = vpop.f32.mrf.mxu1 }
 0x3ca   : > { %v3704_v8 = vrot.slane %v3278_v62, 1  ;;  %v2092_v12 = vpop.f32.mrf.mxu0  ;;  %v2763_v9 = vrot.slane %v2271_v46, 2  ;;  %v11783_v46 = vld [vmem:[#allocation2 + $0x170] sm:$0xff] }
 0x3cb   : > { %v2511_v40 = vrot.slane %v2092_v12, 1  ;;  %3161 = vmatmul.f32.gmra.mxu2 %v11757_v54 }
 0x3cc   : > { %v3705_v52 = vsel %vm1272_vm1, %v3702_v60, %v3704_v8  ;;  %v11752_v47 = vadd.f32 %v3704_v8, %v11693_v0  ;;  %v9978_v0 = vld [vmem:[#allocation2 + $0x148] sm:$0xff]  ;;  %v2764_v41 = vsel %vm1525_vm2, %v2762_v3, %v2763_v9 }
 0x3cd   : > { %v11755_v13 = vadd.f32 %v3705_v52, %v11698_v57  ;;  %v2512_v50 = vsel %vm1272_vm1, %v2510_v32, %v2511_v40 }
 0x3ce   : > { %3328 = vmatmul.f32.gmra.mxu3 %v11700_v26  ;;  %2139 = vmatmul.f32.gmra.mxu0 %v9978_v0  ;;  %v2640_v6 = vadd.f32 %v2512_v50, %v2388_v16  ;;  %v3114_v19 = vpop.f32.mrf.mxu2  ;;  %v5501_v16 = vld [vmem:[#allocation6 + $0xf8] sm:$0xff]  ;;  %v5500_v50 = vld [vmem:[#allocation6 + $0xf0] sm:$0xff] }
 0x3cf   : > { %2318 = vmatmul.f32.gmra.mxu1 %v9978_v0  ;;  %5668 = vmatpush.msra.mxu2 %v5501_v16  ;;  %v9980_v0 = vld [vmem:[#allocation2 + $0x158] sm:$0xff] }
 0x3d0   : > { %v2892_v26 = vadd.f32 %v2764_v41, %v2640_v6  ;;  %5523 = vmatpush.msra.mxu1 %v5500_v50  ;;  %v15532_v16 = vld [vmem:[#allocation91_spill] sm:$0xff] }
 0x3d1   : > { %v3281_v57 = vpop.f32.mrf.mxu3  ;;  %v2274_v14 = vpop.f32.mrf.mxu1 }
 0x3d2   : > { %v11765_v24 = vadd.f32 %v3111_v35, %v2892_v26  ;;  %v2095_v60 = vpop.f32.mrf.mxu0  ;;  %v3706_v36 = vrot.slane %v3281_v57, 1  ;;  %v2765_v25 = vrot.slane %v2274_v14, 2 }
 0x3d3   : > { %v2513_v58 = vrot.slane %v2095_v60, 1  ;;  %3164 = vmatmul.f32.gmra.mxu2 %v11767_v10 }
 0x3d4   : > { %v2766_v8 = vsel %vm1525_vm2, %v2763_v9, %v2765_v25 }
 0x3d5   : > { %v2514_v38 = vsel %vm1272_vm1, %v2511_v40, %v2513_v58  ;;  %v2642_v39 = vadd.f32 %v2513_v58, %v15529_v22  ;;  %v11794_v58 = vld [vmem:[#allocation2 + $0x178] sm:$0xff] }
 0x3d6   : > { %3331 = vmatmul.f32.gmra.mxu3 %v11717_v53  ;;  %2142 = vmatmul.f32.gmra.mxu0 %v9979_v23  ;;  %v2641_v7 = vadd.f32 %v2514_v38, %v15530_v51  ;;  %v3117_v52 = vpop.f32.mrf.mxu2 }
 0x3d7   : > { %2321 = vmatmul.f32.gmra.mxu1 %v9979_v23  ;;  %v2894_v53 = vadd.f32 %v2765_v25, %v2642_v39  ;;  %v9981_v23 = vld [vmem:[#allocation2 + $0x160] sm:$0xff] }
 0x3d8   : > { %v2893_v35 = vadd.f32 %v2766_v8, %v2641_v7 }
 0x3d9   : > { %v3284_v29 = vpop.f32.mrf.mxu3  ;;  %v11776_v32 = vadd.f32 %v3117_v52, %v2894_v53  ;;  %v2277_v9 = vpop.f32.mrf.mxu1  ;;  %v11803_v53 = vld [vmem:[#allocation2 + $0x180] sm:$0xff] }
 0x3da   : > { %v3707_v62 = vrot.slane %v3284_v29, 1  ;;  %v11781_v40 = vadd.f32 %v3114_v19, %v2893_v35  ;;  %v2098_v42 = vpop.f32.mrf.mxu0  ;;  %v15531_v29 = vld [vmem:[#allocation87_spill] sm:$0xff] }
 0x3db   : > { %3167 = vmatmul.f32.gmra.mxu2 %v11783_v46  ;;  %v2515_v14 = vrot.slane %v2098_v42, 1 }
 0x3dc   : > { %v3708_v12 = vsel %vm1272_vm1, %v3706_v36, %v3707_v62  ;;  %v2767_v36 = vrot.slane %v2277_v9, 2 }
 0x3dd   : > { %v11779_v3 = vadd.f32 %v3708_v12, %v11728_v15  ;;  %v2994_v15 = vld [vmem:[#allocation4 + $0x358] sm:$0xff] }
 0x3de   : > { %3334 = vmatmul.f32.gmra.mxu3 %v11730_v17  ;;  %2145 = vmatmul.f32.gmra.mxu0 %v9980_v0  ;;  %v3120_v41 = vpop.f32.mrf.mxu2 }
 0x3df   : > { %2324 = vmatmul.f32.gmra.mxu1 %v9980_v0  ;;  %3401 = vmatpush.msrb.mxu0 %v2994_v15  ;;  %v9982_v0 = vld [vmem:[#allocation2 + $0x168] sm:$0xff] }
 0x3e1   : > { %v3287_v57 = vpop.f32.mrf.mxu3  ;;  %v2280_v22 = vpop.f32.mrf.mxu1 }
 0x3e2   : > { %v3709_v6 = vrot.slane %v3287_v57, 1  ;;  %v2101_v60 = vpop.f32.mrf.mxu0  ;;  %v2768_v25 = vrot.slane %v2280_v22, 2 }
 0x3e3   : > { %v2516_v38 = vrot.slane %v2101_v60, 1  ;;  %3170 = vmatmul.f32.gmra.mxu2 %v11794_v58 }
 0x3e4   : > { %v3710_v26 = vsel %vm1272_vm1, %v3707_v62, %v3709_v6  ;;  %v11789_v19 = vadd.f32 %v3709_v6, %v11739_v44  ;;  %v2769_v51 = vsel %vm1525_vm2, %v2767_v36, %v2768_v25  ;;  %v15533_v6 = vld [vmem:[#allocation90_spill] sm:$0xff] }
 0x3e5   : > { %v11792_v17 = vadd.f32 %v3710_v26, %v11744_v45  ;;  %v2517_v39 = vsel %vm1272_vm1, %v2515_v14, %v2516_v38 }
 0x3e6   : > { %3337 = vmatmul.f32.gmra.mxu3 %v11746_v59  ;;  %2148 = vmatmul.f32.gmra.mxu0 %v9981_v23  ;;  %v2643_v45 = vadd.f32 %v2517_v39, %v15531_v29  ;;  %v3123_v62 = vpop.f32.mrf.mxu2  ;;  %v5498_v29 = vld [vmem:[#allocation6 + $0xe0] sm:$0xff] }
 0x3e7   : > { %2327 = vmatmul.f32.gmra.mxu1 %v9981_v23  ;;  %5669 = vmatpush.msra.mxu2 %v5498_v29 }
 0x3e8   : > { %v2895_v7 = vadd.f32 %v2769_v51, %v2643_v45  ;;  %v9983_v45 = vld [vmem:[#allocation2 + $0x170] sm:$0xff] }
 0x3e9   : > { %v3290_v44 = vpop.f32.mrf.mxu3  ;;  %v2283_v52 = vpop.f32.mrf.mxu1 }
 0x3ea   : > { %v11801_v59 = vadd.f32 %v3120_v41, %v2895_v7  ;;  %v2104_v8 = vpop.f32.mrf.mxu0  ;;  %v3711_v12 = vrot.slane %v3290_v44, 1  ;;  %v2770_v9 = vrot.slane %v2283_v52, 2  ;;  %v11819_v44 = vld [vmem:[#allocation2 + $0x188] sm:$0xff] }
 0x3eb   : > { %v2518_v35 = vrot.slane %v2104_v8, 1  ;;  %3173 = vmatmul.f32.gmra.mxu2 %v11803_v53  ;;  %v5497_v8 = vld [vmem:[#allocation6 + $0xd8] sm:$0xff] }
 0x3ec   : > { %v2771_v26 = vsel %vm1525_vm2, %v2768_v25, %v2770_v9  ;;  %5524 = vmatpush.msra.mxu1 %v5497_v8 }
 0x3ed   : > { %v2519_v42 = vsel %vm1272_vm1, %v2516_v38, %v2518_v35  ;;  %v2645_v50 = vadd.f32 %v2518_v35, %v15532_v16 }
 0x3ee   : > { %3340 = vmatmul.f32.gmra.mxu3 %v11757_v54  ;;  %2151 = vmatmul.f32.gmra.mxu0 %v9982_v0  ;;  %v2644_v15 = vadd.f32 %v2519_v42, %v15533_v6  ;;  %v3126_v14 = vpop.f32.mrf.mxu2  ;;  %v11830_v42 = vld [vmem:[#allocation2 + $0x190] sm:$0xff] }
 0x3ef   : > { %2330 = vmatmul.f32.gmra.mxu1 %v9982_v0  ;;  %v2897_v54 = vadd.f32 %v2770_v9, %v2645_v50 }
 0x3f0   : > { %v2896_v60 = vadd.f32 %v2771_v26, %v2644_v15  ;;  %v9984_v15 = vld [vmem:[#allocation2 + $0x178] sm:$0xff] }
 0x3f1   : > { %v3293_v57 = vpop.f32.mrf.mxu3  ;;  %v11812_v38 = vadd.f32 %v3126_v14, %v2897_v54  ;;  %v2286_v25 = vpop.f32.mrf.mxu1 }
 0x3f2   : > { %v3712_v41 = vrot.slane %v3293_v57, 1  ;;  %v11817_v39 = vadd.f32 %v3123_v62, %v2896_v60  ;;  %v2107_v23 = vpop.f32.mrf.mxu0  ;;  %v2772_v50 = vrot.slane %v2286_v25, 2 }
 0x3f3   : > { %3176 = vmatmul.f32.gmra.mxu2 %v11819_v44  ;;  %v2520_v16 = vrot.slane %v2107_v23, 1 }
 0x3f4   : > { %v3713_v36 = vsel %vm1272_vm1, %v3711_v12, %v3712_v41 }
 0x3f5   : > { %v11815_v22 = vadd.f32 %v3713_v36, %v11765_v24  ;;  %v2991_v24 = vld [vmem:[#allocation4 + $0x340] sm:$0xff]  ;;  %v11839_v36 = vld [vmem:[#allocation2 + $0x198] sm:$0xff] }
 0x3f6   : > { %3343 = vmatmul.f32.gmra.mxu3 %v11767_v10  ;;  %2154 = vmatmul.f32.gmra.mxu0 %v9983_v45  ;;  %v3129_v35 = vpop.f32.mrf.mxu2 }
 0x3f7   : > { %2333 = vmatmul.f32.gmra.mxu1 %v9983_v45  ;;  %3402 = vmatpush.msrb.mxu0 %v2991_v24  ;;  %v9985_v24 = vld [vmem:[#allocation2 + $0x180] sm:$0xff] }
 0x3f9   : > { %v3296_v51 = vpop.f32.mrf.mxu3  ;;  %v2289_v0 = vpop.f32.mrf.mxu1 }
 0x3fa   : > { %v3714_v7 = vrot.slane %v3296_v51, 1  ;;  %v2110_v12 = vpop.f32.mrf.mxu0  ;;  %v2773_v6 = vrot.slane %v2289_v0, 2  ;;  %v15535_v51 = vld [vmem:[#allocation100_spill] sm:$0xff] }
 0x3fb   : > { %v2521_v9 = vrot.slane %v2110_v12, 1  ;;  %3179 = vmatmul.f32.gmra.mxu2 %v11830_v42 }
 0x3fc   : > { %v3715_v62 = vsel %vm1272_vm1, %v3712_v41, %v3714_v7  ;;  %v11825_v52 = vadd.f32 %v3714_v7, %v11776_v32  ;;  %v15534_v41 = vld [vmem:[#allocation94_spill] sm:$0xff]  ;;  %v2774_v26 = vsel %vm1525_vm2, %v2772_v50, %v2773_v6 }
 0x3fd   : > { %v11828_v10 = vadd.f32 %v3715_v62, %v11781_v40  ;;  %v2522_v57 = vsel %vm1272_vm1, %v2520_v16, %v2521_v9 }
 0x3fe   : > { %3346 = vmatmul.f32.gmra.mxu3 %v11783_v46  ;;  %2157 = vmatmul.f32.gmra.mxu0 %v9984_v15  ;;  %v2646_v40 = vadd.f32 %v2522_v57, %v15534_v41  ;;  %v3132_v60 = vpop.f32.mrf.mxu2 }
 0x3ff   : > { %2336 = vmatmul.f32.gmra.mxu1 %v9984_v15 }
 0x400   : > { %v2898_v54 = vadd.f32 %v2774_v26, %v2646_v40  ;;  %v9408_v26 = vld [vmem:[#allocation2 + $0x1a0] sm:$0xff] }
 0x401   : > { %v3299_v32 = vpop.f32.mrf.mxu3  ;;  %v2292_v29 = vpop.f32.mrf.mxu1 }
 0x402   : > { %v11837_v46 = vadd.f32 %v3129_v35, %v2898_v54  ;;  %v2113_v14 = vpop.f32.mrf.mxu0  ;;  %v3716_v25 = vrot.slane %v3299_v32, 1  ;;  %v2775_v8 = vrot.slane %v2292_v29, 2  ;;  %v15536_v35 = vld [vmem:[#allocation97_spill] sm:$0xff] }
 0x403   : > { %v2523_v23 = vrot.slane %v2113_v14, 1  ;;  %3182 = vmatmul.f32.gmra.mxu2 %v11839_v36  ;;  %v9986_v54 = vld [vmem:[#allocation2 + $0x188] sm:$0xff] }
 0x404   : > { %v2776_v50 = vsel %vm1525_vm2, %v2773_v6, %v2775_v8 }
 0x405   : > { %v2524_v45 = vsel %vm1272_vm1, %v2521_v9, %v2523_v23  ;;  %v2648_v7 = vadd.f32 %v2523_v23, %v15535_v51  ;;  %v5495_v23 = vld [vmem:[#allocation6 + $0xc8] sm:$0xff]  ;;  %v5494_v51 = vld [vmem:[#allocation6 + $0xc0] sm:$0xff] }
 0x406   : > { %3349 = vmatmul.f32.gmra.mxu3 %v11794_v58  ;;  %2160 = vmatmul.f32.gmra.mxu0 %v9985_v24  ;;  %v2647_v12 = vadd.f32 %v2524_v45, %v15536_v35  ;;  %v3135_v57 = vpop.f32.mrf.mxu2  ;;  %v9988_v35 = vld [vmem:[#allocation2 + $0x198] sm:$0xff] }
 0x407   : > { %2339 = vmatmul.f32.gmra.mxu1 %v9985_v24  ;;  %v2900_v58 = vadd.f32 %v2775_v8, %v2648_v7  ;;  %5670 = vmatpush.msra.mxu2 %v5495_v23  ;;  %v2988_v7 = vld [vmem:[#allocation4 + $0x328] sm:$0xff]  ;;  %v9987_v8 = vld [vmem:[#allocation2 + $0x190] sm:$0xff] }
 0x408   : > { %v2899_v0 = vadd.f32 %v2776_v50, %v2647_v12  ;;  %5525 = vmatpush.msra.mxu1 %v5494_v51  ;;  %3403 = vmatpush.msrb.mxu0 %v2988_v7  ;;  %v11871_v12 = vld [vmem:[#allocation2] sm:$0xff] }
 0x409   : > { %v3302_v62 = vpop.f32.mrf.mxu3  ;;  %v3597_v9 = vadd.f32 %v3135_v57, %v2900_v58 }
 0x40a   : > { %v3717_v16 = vrot.slane %v3302_v62, 1  ;;  %v3596_v41 = vadd.f32 %v3132_v60, %v2899_v0  ;;  %v11851_v40 = vpop.f32.mrf.mxu0 }
 0x40b   : > { %3185 = vmatmul.f32.gmra.mxu2 %v9408_v26 }
 0x40c   : > { %v3718_v15 = vsel %vm1272_vm1, %v3716_v25, %v3717_v16 }
 0x40d   : > { %v11849_v32 = vadd.f32 %v3718_v15, %v11801_v59 }
 0x40e   : > { %3352 = vmatmul.f32.gmra.mxu3 %v11803_v53  ;;  %2163 = vmatmul.f32.gmra.mxu0 %v9986_v54  ;;  %v11854_v29 = vpop.f32.mrf.mxu2  ;;  %v9409_v53 = vld [vmem:[#allocation2 + $0x1a8] sm:$0xff] }
 0x40f   : > { %15537 = vst [vmem:[#allocation99_spill] sm:$0xff] %v11849_v32  ;;  %2342 = vmatmul.f32.gmra.mxu1 %v9986_v54 }
 0x411   : > { %v3305_v6 = vpop.f32.mrf.mxu3 }
 0x412   : > { %v3719_v14 = vrot.slane %v3305_v6, 1  ;;  %v11863_v45 = vpop.f32.mrf.mxu0  ;;  %v5492_v6 = vld [vmem:[#allocation6 + $0xb0] sm:$0xff] }
 0x413   : > { %3188 = vmatmul.f32.gmra.mxu2 %v9409_v53 }
 0x414   : > { %v3720_v25 = vsel %vm1272_vm1, %v3717_v16, %v3719_v14  ;;  %v11858_v59 = vadd.f32 %v3719_v14, %v11812_v38  ;;  %5671 = vmatpush.msra.mxu2 %v5492_v6  ;;  %v9993_v6 = vld [vmem:[#allocation2 + $0x38] sm:$0xff] }
 0x415   : > { %v11861_v60 = vadd.f32 %v3720_v25, %v11817_v39 }
 0x416   : > { %15538 = vst [vmem:[#allocation57_spill] sm:$0xff] %v11858_v59  ;;  %3355 = vmatmul.f32.gmra.mxu3 %v11819_v44  ;;  %2166 = vmatmul.f32.gmra.mxu0 %v9987_v8  ;;  %v11866_v62 = vpop.f32.mrf.mxu2 }
 0x417   : > { %15539 = vst [vmem:[#allocation84_spill] sm:$0xff] %v11861_v60  ;;  %2345 = vmatmul.f32.gmra.mxu1 %v9987_v8  ;;  %v5491_v8 = vld [vmem:[#allocation6 + $0xa8] sm:$0xff] }
 0x418   : > { %15540 = vst [vmem:[#allocation83_spill] sm:$0xff] %v11866_v62  ;;  %5526 = vmatpush.msra.mxu1 %v5491_v8  ;;  %v9994_v8 = vld [vmem:[#allocation2 + $0x40] sm:$0xff] }
 0x419   : > { %v3308_v24 = vpop.f32.mrf.mxu3 }
 0x41a   : > { %v11868_v38 = vpop.f32.mrf.mxu0  ;;  %v3721_v39 = vrot.slane %v3308_v24, 1 }
 0x41b   : > { %3191 = vmatmul.f32.gmra.mxu2 %v11871_v12 }
 0x41e   : > { %3358 = vmatmul.f32.gmra.mxu3 %v11830_v42  ;;  %2169 = vmatmul.f32.gmra.mxu0 %v9988_v35  ;;  %v11874_v50 = vpop.f32.mrf.mxu2  ;;  %v9990_v42 = vld [vmem:[#allocation2 + $0x1a0] sm:$0xff] }
 0x41f   : > { %2348 = vmatmul.f32.gmra.mxu1 %v9988_v35  ;;  %v5489_v35 = vld [vmem:[#allocation6 + $0x98] sm:$0xff] }
 0x420   : > { %5672 = vmatpush.msra.mxu2 %v5489_v35 }
 0x421   : > { %v3311_v44 = vpop.f32.mrf.mxu3 }
 0x422   : > { %v3722_v16 = vrot.slane %v3311_v44, 1  ;;  %v11880_v57 = vpop.f32.mrf.mxu0 }
 0x423   : > { %3194 = vmatmul.f32.gmra.mxu2 %v11871_v12 }
 0x424   : > { %v3723_v58 = vsel %vm1272_vm1, %v3721_v39, %v3722_v16  ;;  %v2985_v39 = vld [vmem:[#allocation4 + $0x310] sm:$0xff] }
 0x425   : > { %v11878_v0 = vadd.f32 %v3723_v58, %v11837_v46  ;;  %3404 = vmatpush.msrb.mxu0 %v2985_v39  ;;  %v5488_v58 = vld [vmem:[#allocation6 + $0x90] sm:$0xff] }
 0x426   : > { %3361 = vmatmul.f32.gmra.mxu3 %v11839_v36  ;;  %2172 = vmatmul.f32.gmra.mxu0 %v9990_v42  ;;  %v11884_v14 = vpop.f32.mrf.mxu2  ;;  %v9991_v36 = vld [vmem:[#allocation2 + $0x1a8] sm:$0xff] }
 0x427   : > { %15541 = vst [vmem:[#allocation54_spill] sm:$0xff] %v11878_v0  ;;  %2351 = vmatmul.f32.gmra.mxu1 %v9990_v42  ;;  %v9992_v42 = vld [vmem:[#allocation2 + $0x30] sm:$0xff] }
 0x428   : > { %15542 = vst [vmem:[#allocation53_spill] sm:$0xff] %v11884_v14  ;;  %5527 = vmatpush.msra.mxu1 %v5488_v58  ;;  %v5486_v58 = vld [vmem:[#allocation6 + $0x80] sm:$0xff]  ;;  %v10010_v14 = vld [vmem:[#allocation2 + $0xc0] sm:$0xff] }
 0x429   : > { %v3314_v15 = vpop.f32.mrf.mxu3  ;;  %5673 = vmatpush.msra.mxu2 %v5486_v58  ;;  %v5483_v58 = vld [vmem:[#allocation6 + $0x68] sm:$0xff] }
 0x42a   : > { %v3724_v54 = vrot.slane %v3314_v15, 1 }
 0x42b   : > { %v11891_v51 = vpop.f32.mrf.mxu0  ;;  %3197 = vmatmul.f32.gmra.mxu2 %v11871_v12 }
 0x42c   : > { %v3725_v23 = vsel %vm1272_vm1, %v3722_v16, %v3724_v54  ;;  %v11887_v25 = vadd.f32 %v3724_v54, %v3597_v9  ;;  %5674 = vmatpush.msra.mxu2 %v5483_v58 }
 0x42d   : > { %v11889_v46 = vadd.f32 %v3725_v23, %v3596_v41 }
 0x42e   : > { %15543 = vst [vmem:[#allocation102_spill] sm:$0xff] %v11887_v25  ;;  %3364 = vmatmul.f32.gmra.mxu3 %v9408_v26  ;;  %2175 = vmatmul.f32.gmra.mxu0 %v9991_v36  ;;  %v11894_v7 = vpop.f32.mrf.mxu2  ;;  %v9996_v25 = vld [vmem:[#allocation2 + $0x50] sm:$0xff] }
 0x42f   : > { %15544 = vst [vmem:[#allocation86_spill] sm:$0xff] %v11889_v46  ;;  %2354 = vmatmul.f32.gmra.mxu1 %v9991_v36  ;;  %v9995_v46 = vld [vmem:[#allocation2 + $0x48] sm:$0xff] }
 0x430   : > { %15545 = vst [vmem:[#allocation58_spill] sm:$0xff] %v11894_v7 }
 0x433   : > { %v11896_v24 = vpop.f32.mrf.mxu0  ;;  %3200 = vmatmul.f32.gmra.mxu2 %v11871_v12 }
 0x436   : > { %3367 = vmatmul.f32.gmra.mxu3 %v9409_v53  ;;  %2178 = vmatmul.f32.gmra.mxu0 %v11871_v12  ;;  %v11901_v9 = vpop.f32.mrf.mxu2 }
 0x437   : > { %2357 = vmatmul.f32.gmra.mxu1 %v11871_v12  ;;  %15546 = vst [vmem:[#allocation105_spill] sm:$0xff] %v11901_v9 }
 0x43b   : > { %v11903_v41 = vpop.f32.mrf.mxu0  ;;  %3203 = vmatmul.f32.gmra.mxu2 %v11871_v12 }
 0x43c   : > { %15547 = vst [vmem:[#allocation89_spill] sm:$0xff] %v11903_v41 }
 0x43e   : > { %3370 = vmatmul.f32.gmra.mxu3 %v11871_v12  ;;  %2181 = vmatmul.f32.gmra.mxu0 %v11871_v12  ;;  %v11909_v26 = vpop.f32.mrf.mxu2 }
 0x43f   : > { %2360 = vmatmul.f32.gmra.mxu1 %v11871_v12  ;;  %15548 = vst [vmem:[#allocation88_spill] sm:$0xff] %v11909_v26 }
 0x443   : > { %v11911_v53 = vpop.f32.mrf.mxu0  ;;  %3206 = vmatmul.f32.gmra.mxu2 %v11871_v12 }
 0x446   : > { %3373 = vmatmul.f32.gmra.mxu3 %v11871_v12  ;;  %2184 = vmatmul.f32.gmra.mxu0 %v11871_v12  ;;  %v11917_v44 = vpop.f32.mrf.mxu2 }
 0x447   : > { %2363 = vmatmul.f32.gmra.mxu1 %v11871_v12  ;;  %15549 = vst [vmem:[#allocation59_spill] sm:$0xff] %v11917_v44 }
 0x44b   : > { %v11919_v16 = vpop.f32.mrf.mxu0 }
 0x44c   : > { %15550 = vst [vmem:[#allocation11_spill] sm:$0xff] %v11919_v16 }
 0x44e   : > { %3376 = vmatmul.f32.gmra.mxu3 %v11871_v12  ;;  %3405 = vmatmul.f32.vlgmr.msrb.gmra.mxu0 %v9992_v42  ;;  %v11922_v15 = vpop.f32.mrf.mxu2  ;;  %v5485_v42 = vld [vmem:[#allocation6 + $0x78] sm:$0xff] }
 0x44f   : > { %15551 = vst [vmem:[#allocation12_spill] sm:$0xff] %v11922_v15  ;;  %5528 = vmatpush.msra.mxu1 %v5485_v42  ;;  %v9998_v42 = vld [vmem:[#allocation2 + $0x60] sm:$0xff] }
 0x453   : > { %v11924_v54 = vpop.f32.mrf.mxu0 }
 0x454   : > { %15552 = vst [vmem:[#allocation16_spill] sm:$0xff] %v11924_v54 }
 0x456   : > { %3379 = vmatmul.f32.gmra.mxu3 %v11871_v12  ;;  %3408 = vmatmul.f32.gmra.mxu0 %v9993_v6  ;;  %v11927_v23 = vpop.f32.mrf.mxu2 }
 0x457   : > { %15553 = vst [vmem:[#allocation18_spill] sm:$0xff] %v11927_v23 }
 0x45b   : > { %v11929_v36 = vpop.f32.mrf.mxu0 }
 0x45c   : > { %15554 = vst [vmem:[#allocation92_spill] sm:$0xff] %v11929_v36  ;;  %v10003_v36 = vld [vmem:[#allocation2 + $0x88] sm:$0xff] }
 0x45e   : > { %3382 = vmatmul.f32.gmra.mxu3 %v11871_v12  ;;  %3411 = vmatmul.f32.gmra.mxu0 %v9994_v8  ;;  %v11932_v39 = vpop.f32.mrf.mxu2 }
 0x45f   : > { %15555 = vst [vmem:[#allocation98_spill] sm:$0xff] %v11932_v39  ;;  %v9997_v39 = vld [vmem:[#allocation2 + $0x58] sm:$0xff] }
 0x463   : > { %v11934_v35 = vpop.f32.mrf.mxu0 }
 0x464   : > { %15556 = vst [vmem:[#allocation95_spill] sm:$0xff] %v11934_v35 }
 0x466   : > { %3385 = vmatmul.f32.gmra.mxu3 %v11871_v12  ;;  %3414 = vmatmul.f32.gmra.mxu0 %v9995_v46  ;;  %v11937_v6 = vpop.f32.mrf.mxu2 }
 0x467   : > { %15557 = vst [vmem:[#allocation104_spill] sm:$0xff] %v11937_v6  ;;  %v5482_v6 = vld [vmem:[#allocation6 + $0x60] sm:$0xff] }
 0x468   : > { %5529 = vmatpush.msra.mxu1 %v5482_v6 }
 0x46b   : > { %v11939_v23 = vpop.f32.mrf.mxu0 }
 0x46c   : > { %15558 = vst [vmem:[#allocation10_spill] sm:$0xff] %v11939_v23 }
 0x46e   : > { %3417 = vmatmul.f32.gmra.mxu0 %v9996_v25  ;;  %v11941_v0 = vpop.f32.mrf.mxu2  ;;  %v9999_v25 = vld [vmem:[#allocation2 + $0x68] sm:$0xff] }
 0x46f   : > { %15559 = vst [vmem:[#allocation15_spill] sm:$0xff] %v11941_v0 }
 0x473   : > { %v11943_v8 = vpop.f32.mrf.mxu0 }
 0x474   : > { %15560 = vst [vmem:[#allocation20_spill] sm:$0xff] %v11943_v8 }
 0x476   : > { %3420 = vmatmul.f32.gmra.mxu0 %v9997_v39  ;;  %v11945_v35 = vpop.f32.mrf.mxu2  ;;  %v10000_v39 = vld [vmem:[#allocation2 + $0x70] sm:$0xff] }
 0x477   : > { %15561 = vst [vmem:[#allocation14_spill] sm:$0xff] %v11945_v35  ;;  %v11957_v35 = vpop.f32.mrf.mxu1 }
 0x47b   : > { %v11947_v54 = vpop.f32.mrf.mxu0 }
 0x47c   : > { %15562 = vst [vmem:[#allocation101_spill] sm:$0xff] %v11947_v54 }
 0x47e   : > { %3423 = vmatmul.f32.gmra.mxu0 %v9998_v42  ;;  %v11949_v46 = vpop.f32.mrf.mxu2  ;;  %v10001_v42 = vld [vmem:[#allocation2 + $0x78] sm:$0xff] }
 0x47f   : > { %15563 = vst [vmem:[#allocation13_spill] sm:$0xff] %v11949_v46  ;;  %v11963_v46 = vpop.f32.mrf.mxu3  ;;  %v11967_v6 = vpop.f32.mrf.mxu1 }
 0x480   : > { %15569 = vst [vmem:[#allocation22_spill] sm:$0xff] %v11963_v46 }
 0x483   : > { %v11951_v23 = vpop.f32.mrf.mxu0 }
 0x484   : > { %15564 = vst [vmem:[#allocation60_spill] sm:$0xff] %v11951_v23 }
 0x486   : > { %3426 = vmatmul.f32.gmra.mxu0 %v9999_v25  ;;  %v11953_v0 = vpop.f32.mrf.mxu2  ;;  %v5480_v25 = vld [vmem:[#allocation6 + $0x50] sm:$0xff] }
 0x487   : > { %15565 = vst [vmem:[#allocation62_spill] sm:$0xff] %v11953_v0  ;;  %5675 = vmatpush.msra.mxu2 %v5480_v25  ;;  %v11971_v44 = vpop.f32.mrf.mxu3  ;;  %v10004_v25 = vld [vmem:[#allocation2 + $0x90] sm:$0xff] }
 0x488   : > { %15572 = vst [vmem:[#allocation26_spill] sm:$0xff] %v11971_v44 }
 0x48b   : > { %v11955_v8 = vpop.f32.mrf.mxu0 }
 0x48c   : > { %15566 = vst [vmem:[#allocation17_spill] sm:$0xff] %v11955_v8  ;;  %v5479_v8 = vld [vmem:[#allocation6 + $0x48] sm:$0xff] }
 0x48d   : > { %5530 = vmatpush.msra.mxu1 %v5479_v8 }
 0x48e   : > { %3429 = vmatmul.f32.gmra.mxu0 %v10000_v39  ;;  %v11959_v54 = vpop.f32.mrf.mxu2  ;;  %v10002_v39 = vld [vmem:[#allocation2 + $0x80] sm:$0xff] }
 0x48f   : > { %15567 = vst [vmem:[#allocation61_spill] sm:$0xff] %v11959_v54  ;;  %v11981_v15 = vpop.f32.mrf.mxu3 }
 0x490   : > { %15576 = vst [vmem:[#allocation23_spill] sm:$0xff] %v11981_v15  ;;  %v5473_v15 = vld [vmem:[#allocation6 + $0x18] sm:$0xff] }
 0x493   : > { %v11961_v58 = vpop.f32.mrf.mxu0 }
 0x494   : > { %15568 = vst [vmem:[#allocation63_spill] sm:$0xff] %v11961_v58 }
 0x496   : > { %3432 = vmatmul.f32.gmra.mxu0 %v10001_v42  ;;  %v11965_v23 = vpop.f32.mrf.mxu2  ;;  %v11977_v42 = vpop.f32.mrf.mxu1 }
 0x497   : > { %15570 = vst [vmem:[#allocation24_spill] sm:$0xff] %v11965_v23  ;;  %v11991_v7 = vpop.f32.mrf.mxu3 }
 0x498   : > { %15580 = vst [vmem:[#allocation28_spill] sm:$0xff] %v11991_v7 }
 0x49b   : > { %v11969_v0 = vpop.f32.mrf.mxu0 }
 0x49c   : > { %15571 = vst [vmem:[#allocation21_spill] sm:$0xff] %v11969_v0 }
 0x49e   : > { %3435 = vmatmul.f32.gmra.mxu0 %v10002_v39  ;;  %v11973_v54 = vpop.f32.mrf.mxu2  ;;  %v11985_v8 = vpop.f32.mrf.mxu1 }
 0x49f   : > { %15573 = vst [vmem:[#allocation19_spill] sm:$0xff] %v11973_v54  ;;  %v5477_v54 = vld [vmem:[#allocation6 + $0x38] sm:$0xff]  ;;  %v11999_v59 = vpop.f32.mrf.mxu3 }
 0x4a0   : > { %5676 = vmatpush.msra.mxu2 %v5477_v54  ;;  %15583 = vst [vmem:[#allocation32_spill] sm:$0xff] %v11999_v59  ;;  %v10007_v54 = vld [vmem:[#allocation2 + $0xa8] sm:$0xff] }
 0x4a2   : > { %5677 = vmatpush.msra.mxu2 %v5474_v27 }
 0x4a3   : > { %v11975_v58 = vpop.f32.mrf.mxu0 }
 0x4a4   : > { %15574 = vst [vmem:[#allocation65_spill] sm:$0xff] %v11975_v58  ;;  %v5476_v58 = vld [vmem:[#allocation6 + $0x30] sm:$0xff] }
 0x4a5   : > { %5531 = vmatpush.msra.mxu1 %v5476_v58 }
 0x4a6   : > { %3438 = vmatmul.f32.gmra.mxu0 %v10003_v36  ;;  %v11979_v23 = vpop.f32.mrf.mxu2  ;;  %v10005_v36 = vld [vmem:[#allocation2 + $0x98] sm:$0xff] }
 0x4a7   : > { %15575 = vst [vmem:[#allocation25_spill] sm:$0xff] %v11979_v23  ;;  %v11993_v23 = vpop.f32.mrf.mxu1  ;;  %v12005_v58 = vpop.f32.mrf.mxu3  ;;  %5532 = vmatpush.msra.mxu1 %v5473_v15  ;;  %v5471_v15 = vld [vmem:[#allocation6 + $0x8] sm:$0xff] }
 0x4a8   : > { %15585 = vst [vmem:[#allocation31_spill] sm:$0xff] %v12005_v58  ;;  %v10009_v58 = vld [vmem:[#allocation2 + $0xb8] sm:$0xff]  ;;  %5678 = vmatpush.msra.mxu2 %v5471_v15  ;;  %v5484_v15 = vld [vmem:[#allocation6 + $0x70] sm:$0xff] }
 0x4a9   : > { %5679 = vmatmul.f32.vlgmr.msra.gmra.mxu2 %v11871_v12 }
 0x4ab   : > { %v11983_v0 = vpop.f32.mrf.mxu0 }
 0x4ac   : > { %15577 = vst [vmem:[#allocation64_spill] sm:$0xff] %v11983_v0 }
 0x4ae   : > { %3441 = vmatmul.f32.gmra.mxu0 %v10004_v25  ;;  %v11987_v39 = vpop.f32.mrf.mxu2  ;;  %v10006_v25 = vld [vmem:[#allocation2 + $0xa0] sm:$0xff] }
 0x4af   : > { %15578 = vst [vmem:[#allocation67_spill] sm:$0xff] %v11987_v39 }
 0x4b1   : > { %5682 = vmatmul.f32.gmra.mxu2 %v11871_v12 }
 0x4b3   : > { %v11989_v26 = vpop.f32.mrf.mxu0 }
 0x4b4   : > { %15579 = vst [vmem:[#allocation66_spill] sm:$0xff] %v11989_v26  ;;  %v12001_v26 = vpop.f32.mrf.mxu1 }
 0x4b6   : > { %3444 = vmatmul.f32.gmra.mxu0 %v10005_v36  ;;  %v11995_v60 = vpop.f32.mrf.mxu2  ;;  %v5517_v36 = vld [vmem:[#allocation6 + $0x178] sm:$0xff] }
 0x4b7   : > { %15581 = vst [vmem:[#allocation30_spill] sm:$0xff] %v11995_v60  ;;  %5824 = vmatpush.msrb.mxu3 %v5517_v36 }
 0x4b9   : > { %5685 = vmatmul.f32.gmra.mxu2 %v11871_v12 }
 0x4bb   : > { %v11997_v0 = vpop.f32.mrf.mxu0 }
 0x4bc   : > { %15582 = vst [vmem:[#allocation27_spill] sm:$0xff] %v11997_v0  ;;  %v12007_v60 = vpop.f32.mrf.mxu1  ;;  %v10008_v0 = vld [vmem:[#allocation2 + $0xb0] sm:$0xff] }
 0x4bd   : > { %15586 = vst [vmem:[#allocation29_spill] sm:$0xff] %v12007_v60 }
 0x4be   : > { %3447 = vmatmul.f32.gmra.mxu0 %v10006_v25  ;;  %v3204_v39 = vpop.f32.mrf.mxu2  ;;  %v12009_v25 = vpop.f32.mrf.mxu3 }
 0x4bf   : > { %15587 = vst [vmem:[#allocation70_spill] sm:$0xff] %v12009_v25 }
 0x4c3   : > { %v12003_v43 = vpop.f32.mrf.mxu0 }
 0x4c4   : > { %15584 = vst [vmem:[#allocation68_spill] sm:$0xff] %v12003_v43  ;;  %v12017_v36 = vpop.f32.mrf.mxu1 }
 0x4c5   : > { %15588 = vst [vmem:[#allocation69_spill] sm:$0xff] %v12017_v36 }
 0x4c6   : > { %3450 = vmatmul.f32.gmra.mxu0 %v10007_v54  ;;  %v12014_v54 = vld [vmem:[%s15228_s2] ss:$0 sm:$0xff] }
 0x4cb   : > { %v3406_v7 = vpop.f32.mrf.mxu0 }
 0x4cc   : > { %v3928_v59 = vrot.slane %v3406_v7, 2 }
 0x4ce   : > { %3453 = vmatmul.f32.gmra.mxu0 %v10008_v0  ;;  %v12023_v0 = vld [vmem:[%s15229_s3] ss:$0 sm:$0xff] }
 0x4d3   : > { %v3409_v39 = vpop.f32.mrf.mxu0 }
 0x4d4   : > { %v3929_v32 = vrot.slane %v3409_v39, 2  ;;  %v5514_v39 = vld [vmem:[#allocation6 + $0x160] sm:$0xff] }
 0x4d5   : > { %5825 = vmatpush.msrb.mxu3 %v5514_v39 }
 0x4d6   : > { %v3930_v43 = vsel %vm1525_vm2, %v3928_v59, %v3929_v32  ;;  %3456 = vmatmul.f32.gmra.mxu0 %v10009_v58  ;;  %v12027_v59 = vpop.f32.mrf.mxu3 }
 0x4d7   : > { %v4072_v27 = vadd.f32 %v3930_v43, %v11494_v31  ;;  %5826 = vmatpush.msrb.mxu3 %v5511_v56  ;;  %15589 = vst [vmem:[#allocation34_spill] sm:$0xff] %v12027_v59  ;;  %v5508_v43 = vld [vmem:[#allocation6 + $0x130] sm:$0xff] }
 0x4d9   : > { %v4130_v7 = vmul.f32 %v12014_v54, %v4072_v27  ;;  %5827 = vmatpush.msrb.mxu3 %v5508_v43  ;;  %v5505_v27 = vld [vmem:[#allocation6 + $0x118] sm:$0xff] }
 0x4da   : > { %v5493_v43 = vld [vmem:[#allocation6 + $0xb8] sm:$0xff] }
 0x4db   : > { %v4188_v25 = vadd.f32 %v12023_v0, %v4130_v7  ;;  %v3412_v9 = vpop.f32.mrf.mxu0  ;;  %v12031_v7 = vpop.f32.mrf.mxu1  ;;  %5828 = vmatpush.msrb.mxu3 %v5505_v27 }
 0x4dc   : > { %v3931_v32 = vrot.slane %v3412_v9, 2  ;;  %15590 = vst [vmem:[#allocation36_spill] sm:$0xff] %v12031_v7  ;;  %v5502_v9 = vld [vmem:[#allocation6 + $0x100] sm:$0xff] }
 0x4dd   : > { %v9416_v58 = vmul.f32 -1.442695, %v4188_v25  ;;  %5829 = vmatpush.msrb.mxu3 %v5502_v9  ;;  %v5499_v25 = vld [vmem:[#allocation6 + $0xe8] sm:$0xff] }
 0x4de   : > { %v4074_v31 = vadd.f32 %v3931_v32, %v11509_v48  ;;  %3459 = vmatmul.f32.gmra.mxu0 %v10010_v14  ;;  %v5496_v48 = vld [vmem:[#allocation6 + $0xd0] sm:$0xff]  ;;  %v10011_v32 = vld [vmem:[#allocation2 + $0xc8] sm:$0xff]  ;;  %v5487_v9 = vld [vmem:[#allocation6 + $0x88] sm:$0xff] }
 0x4df   : > { %9606 = vpow2.f32 %v9416_v58  ;;  %5830 = vmatpush.msrb.mxu3 %v5499_v25  ;;  %v12035_v58 = vpop.f32.mrf.mxu3 }
 0x4e0   : > { %v4132_v39 = vmul.f32 %v12014_v54, %v4074_v31  ;;  %15591 = vst [vmem:[#allocation33_spill] sm:$0xff] %v12035_v58  ;;  %v5490_v31 = vld [vmem:[#allocation6 + $0xa0] sm:$0xff] }
 0x4e1   : > { %5831 = vmatpush.msrb.mxu3 %v5496_v48  ;;  %v10012_v58 = vld [vmem:[#allocation2 + $0xd0] sm:$0xff]  ;;  %v5481_v48 = vld [vmem:[#allocation6 + $0x58] sm:$0xff] }
 0x4e2   : > { %v4190_v56 = vadd.f32 %v12023_v0, %v4132_v39 }
 0x4e3   : > { %v3415_v59 = vpop.f32.mrf.mxu0  ;;  %5832 = vmatpush.msrb.mxu3 %v5493_v43  ;;  %v12037_v27 = vpop.f32.mrf.mxu1 }
 0x4e4   : > { %v9418_v62 = vmul.f32 -1.442695, %v4190_v56  ;;  %15592 = vst [vmem:[#allocation38_spill] sm:$0xff] %v12037_v27  ;;  %v3933_v25 = vrot.slane %v3415_v59, 2  ;;  %v5478_v59 = vld [vmem:[#allocation6 + $0x40] sm:$0xff]  ;;  %v6496_v27 = vld [vmem:[#allocation6 + $0x2e8] sm:$0xff] }
 0x4e5   : > { %v9607_v16 = vpop.eup %9606  ;;  %5833 = vmatpush.msrb.mxu3 %v5490_v31 }
 0x4e6   : > { %v4404_v14 = vadd.f32 1.0, %v9607_v16  ;;  %9608 = vpow2.f32 %v9418_v62  ;;  %3462 = vmatmul.f32.gmra.mxu0 %v10011_v32 }
 0x4e7   : > { %5834 = vmatpush.msrb.mxu3 %v5487_v9  ;;  %v12042_v43 = vpop.f32.mrf.mxu3  ;;  %v5475_v9 = vld [vmem:[#allocation6 + $0x28] sm:$0xff] }
 0x4e8   : > { %9610 = vrcp.f32 %v4404_v14  ;;  %15593 = vst [vmem:[#allocation71_spill] sm:$0xff] %v12042_v43 }
 0x4e9   : > { %5835 = vmatpush.msrb.mxu3 %v5484_v15  ;;  %v5472_v15 = vld [vmem:[#allocation6 + $0x10] sm:$0xff] }
 0x4eb   : > { %v3418_v39 = vpop.f32.mrf.mxu0  ;;  %5836 = vmatpush.msrb.mxu3 %v5481_v48  ;;  %v10013_v48 = vld [vmem:[#allocation2 + $0xd8] sm:$0xff] }
 0x4ec   : > { %v9609_v56 = vpop.eup %9608  ;;  %v3934_v16 = vrot.slane %v3418_v39, 2 }
 0x4ed   : > { %v4406_v62 = vadd.f32 1.0, %v9609_v56  ;;  %5837 = vmatpush.msrb.mxu3 %v5478_v59 }
 0x4ee   : > { %v9611_v32 = vpop.eup %9610  ;;  %v3935_v7 = vsel %vm1525_vm2, %v3933_v25, %v3934_v16  ;;  %3465 = vmatmul.f32.gmra.mxu0 %v10012_v58 }
 0x4ef   : > { %9612 = vrcp.f32 %v4406_v62  ;;  %v4075_v14 = vadd.f32 %v3935_v7, %v11549_v55  ;;  %v12048_v32 = vpop.f32.mrf.mxu1  ;;  %v5470_v62 = vld [vmem:[#allocation6] sm:$0xff]  ;;  %5838 = vmatpush.msrb.mxu3 %v5475_v9  ;;  %v12059_v9 = vpop.f32.mrf.mxu3 }
 0x4f0   : > { %15594 = vst [vmem:[#allocation37_spill] sm:$0xff] %v12048_v32  ;;  %5533 = vmatpush.msra.mxu1 %v5470_v62 }
 0x4f1   : > { %v4133_v31 = vmul.f32 %v12014_v54, %v4075_v14  ;;  %5839 = vmatpush.msrb.mxu3 %v5472_v15  ;;  %5534 = vmatmul.f32.vlgmr.msra.gmra.mxu1 %v11871_v12  ;;  %15595 = vst [vmem:[#allocation35_spill] sm:$0xff] %v12059_v9  ;;  %v10014_v15 = vld [vmem:[#allocation2 + $0xe0] sm:$0xff] }
 0x4f2   : > { %5840 = vmatmul.f32.vlgmr.msrb.gmra.mxu3 %v11871_v12  ;;  %6499 = vmatpush.msrb.mxu1 %v6496_v27 }
 0x4f3   : > { %v3421_v39 = vpop.f32.mrf.mxu0  ;;  %v12046_v56 = vadd.f32 %v12023_v0, %v4133_v31 }
 0x4f4   : > { %v3936_v58 = vrot.slane %v3421_v39, 2 }
 0x4f5   : > { %v9613_v25 = vpop.eup %9612  ;;  %v9419_v55 = vmul.f32 -1.442695, %v12046_v56 }
 0x4f6   : > { %v3937_v7 = vsel %vm1525_vm2, %v3934_v16, %v3936_v58  ;;  %3468 = vmatmul.f32.gmra.mxu0 %v10013_v48  ;;  %v4077_v59 = vadd.f32 %v3936_v58, %v11565_v2 }
 0x4f7   : > { %v4076_v14 = vadd.f32 %v3937_v7, %v11568_v63  ;;  %9614 = vpow2.f32 %v9419_v55  ;;  %v12069_v55 = vpop.f32.mrf.mxu1 }
 0x4f8   : > { %v4135_v39 = vmul.f32 %v12014_v54, %v4077_v59  ;;  %15596 = vst [vmem:[#allocation73_spill] sm:$0xff] %v12069_v55  ;;  %v10015_v55 = vld [vmem:[#allocation2 + $0xe8] sm:$0xff] }
 0x4f9   : > { %v4134_v31 = vmul.f32 %v12014_v54, %v4076_v14  ;;  %5537 = vmatmul.f32.gmra.mxu1 %v11871_v12 }
 0x4fa   : > { %v12065_v63 = vadd.f32 %v12023_v0, %v4135_v39  ;;  %5843 = vmatmul.f32.gmra.mxu3 %v11871_v12  ;;  %v12073_v39 = vpop.f32.mrf.mxu3 }
 0x4fb   : > { %v12062_v16 = vadd.f32 %v12023_v0, %v4134_v31  ;;  %v3424_v2 = vpop.f32.mrf.mxu0  ;;  %15597 = vst [vmem:[#allocation72_spill] sm:$0xff] %v12073_v39 }
 0x4fc   : > { %v9421_v25 = vmul.f32 -1.442695, %v12065_v63  ;;  %v3938_v14 = vrot.slane %v3424_v2, 2 }
 0x4fd   : > { %v9420_v58 = vmul.f32 -1.442695, %v12062_v16  ;;  %v9615_v62 = vpop.eup %9614 }
 0x4fe   : > { %3471 = vmatmul.f32.gmra.mxu0 %v10014_v15  ;;  %v4407_v7 = vadd.f32 1.0, %v9615_v62 }
 0x4ff   : > { %9616 = vpow2.f32 %v9420_v58  ;;  %v12084_v2 = vpop.f32.mrf.mxu1 }
 0x500   : > { %9618 = vpow2.f32 %v9421_v25  ;;  %15598 = vst [vmem:[#allocation40_spill] sm:$0xff] %v12084_v2  ;;  %vm4508_vm4 = vweird.f32 %v4407_v7 }
 0x501   : > { %9620 = vrcp.f32 %v4407_v7  ;;  %5540 = vmatmul.f32.gmra.mxu1 %v11871_v12 }
 0x502   : > { %5846 = vmatmul.f32.gmra.mxu3 %v11871_v12 }
 0x503   : > { %v3427_v48 = vpop.f32.mrf.mxu0 }
 0x504   : > { %v3939_v59 = vrot.slane %v3427_v48, 2 }
 0x505   : > { %v9617_v31 = vpop.eup %9616 }
 0x506   : > { %v9619_v9 = vpop.eup %9618  ;;  %v12075_v43 = vadd.f32 1.0, %v9617_v31  ;;  %v3940_v15 = vsel %vm1525_vm2, %v3938_v14, %v3939_v59  ;;  %3474 = vmatmul.f32.gmra.mxu0 %v10015_v55  ;;  %v4512_v14 = vand.u32 2147483647, %v4407_v7  ;;  %v4514_v31 = vand.u32 2147483648, %v4407_v7 }
 0x507   : > { %v9621_v58 = vpop.eup %9620  ;;  %v12078_v62 = vadd.f32 1.0, %v9619_v9  ;;  %v4078_v25 = vadd.f32 %v3940_v15, %v11598_v11  ;;  %v6497_v15 = vld [vmem:[#allocation6 + $0x2f0] sm:$0xff] }
 0x508   : > { %v4504_v32 = vmul.f32 %v9621_v58, %v4407_v7  ;;  %9622 = vrcp.f32 %v12075_v43  ;;  %vm4509_vm3 = vweird.f32 %v9621_v58  ;;  %vm12091_vm5 = vcmp.eq.f32.partialorder %v4512_v14, 8.507059e+37  ;;  %6644 = vmatpush.msrb.mxu2 %v6497_v15  ;;  %v10016_v7 = vld [vmem:[#allocation2 + $0xf0] sm:$0xff] }
 0x509   : > { %9624 = vrcp.f32 %v12078_v62  ;;  %v4136_v55 = vmul.f32 %v12014_v54, %v4078_v25  ;;  %vm4510_vm6 = vmor %vm4508_vm4, %vm4509_vm3  ;;  %v4527_v46 = vand.u32 2147483647, %v12075_v43  ;;  %vm4523_vm8 = vweird.f32 %v12075_v43 }
 0x50a   : > { %v4505_v48 = vsub.f32 1.0, %v4504_v32  ;;  %vm4538_vm10 = vweird.f32 %v12078_v62 }
 0x50b   : > { %v3430_v9 = vpop.f32.mrf.mxu0  ;;  %v12089_v11 = vadd.f32 %v12023_v0, %v4136_v55  ;;  %v4515_v55 = vor.u32 1.1754944e-38, %v4514_v31  ;;  %vm4528_vm12 = vcmp.eq.f32.partialorder %v4527_v46, 8.507059e+37 }
 0x50c   : > { %v4506_v39 = vmul.f32 %v9621_v58, %v4505_v48  ;;  %v3941_v36 = vrot.slane %v3430_v9, 2  ;;  %v12096_v48 = vpop.f32.mrf.mxu3 }
 0x50d   : > { %v9422_v32 = vmul.f32 -1.442695, %v12089_v11  ;;  %15601 = vst [vmem:[#allocation42_spill] sm:$0xff] %v12096_v48 }
 0x50e   : > { %v9623_v60 = vpop.eup %9622  ;;  %v4507_v33 = vadd.f32 %v9621_v58, %v4506_v39  ;;  %v3942_v9 = vsel %vm1525_vm2, %v3939_v59, %v3941_v36  ;;  %v4080_v39 = vadd.f32 %v3941_v36, %v11614_v4  ;;  %3477 = vmatmul.f32.gmra.mxu0 %v10016_v7  ;;  %v4529_v4 = vand.u32 2147483648, %v12075_v43 }
 0x50f   : > { %v9625_v25 = vpop.eup %9624  ;;  %v4519_v44 = vmul.f32 %v9623_v60, %v12075_v43  ;;  %9626 = vpow2.f32 %v9422_v32  ;;  %v4079_v31 = vadd.f32 %v3942_v9, %v11617_v49  ;;  %vm4524_vm7 = vweird.f32 %v9623_v60 }
 0x510   : > { %v4511_v14 = vsel %vm4510_vm6, %v9621_v58, %v4507_v33  ;;  %v4534_v41 = vmul.f32 %v9625_v25, %v12078_v62  ;;  %v4138_v48 = vmul.f32 %v12014_v54, %v4080_v39  ;;  %v4544_v33 = vand.u32 2147483648, %v12078_v62  ;;  %v12110_v58 = vpop.f32.mrf.mxu1  ;;  %vm4525_vm11 = vmor %vm4523_vm8, %vm4524_vm7 }
 0x511   : > { %v4516_v27 = vsel %vm12091_vm5, %v4515_v55, %v4511_v14  ;;  %v4520_v15 = vsub.f32 1.0, %v4519_v44  ;;  %v4137_v32 = vmul.f32 %v12014_v54, %v4079_v31  ;;  %vm4539_vm9 = vweird.f32 %v9625_v25 }
 0x512   : > { %v5271_v59 = vmul.f32 %v4516_v27, %v12046_v56  ;;  %v4535_v36 = vsub.f32 1.0, %v4534_v41  ;;  %v12114_v2 = vadd.f32 %v12023_v0, %v4138_v48  ;;  %v4542_v56 = vand.u32 2147483647, %v12078_v62  ;;  %vm4540_vm13 = vmor %vm4538_vm10, %vm4539_vm9  ;;  %v10017_v62 = vld [vmem:[#allocation2 + $0xf8] sm:$0xff] }
 0x513   : > { %v4521_v7 = vmul.f32 %v9623_v60, %v4520_v15  ;;  %v3433_v44 = vpop.f32.mrf.mxu0  ;;  %v12121_v55 = vadd.f32 %v12023_v0, %v4137_v32  ;;  %v4530_v39 = vor.u32 1.1754944e-38, %v4529_v4  ;;  %v4545_v14 = vor.u32 1.1754944e-38, %v4544_v33 }
 0x514   : > { %5325 = vst [vmem:[#allocation3 + $0x18] sm:$0xff] %v5271_v59  ;;  %v4536_v49 = vmul.f32 %v9625_v25, %v4535_v36  ;;  %v9424_v9 = vmul.f32 -1.442695, %v12114_v2  ;;  %vm4543_vm14 = vcmp.eq.f32.partialorder %v4542_v56, 8.507059e+37  ;;  %v3943_v33 = vrot.slane %v3433_v44, 2 }
 0x515   : > { %5377 = vst [vmem:[#allocation3 + $0x18] sm:$0x1] %v11871_v12  ;;  %v4522_v41 = vadd.f32 %v9623_v60, %v4521_v7  ;;  %v9627_v48 = vpop.eup %9626  ;;  %v9423_v31 = vmul.f32 -1.442695, %v12121_v55  ;;  %v12128_v7 = vpop.f32.mrf.mxu3 }
 0x516   : > { %v4537_v43 = vadd.f32 %v9625_v25, %v4536_v49  ;;  %v12125_v15 = vadd.f32 1.0, %v9627_v48  ;;  %9628 = vpow2.f32 %v9424_v9  ;;  %3480 = vmatmul.f32.gmra.mxu0 %v10017_v62  ;;  %15602 = vst [vmem:[#allocation39_spill] sm:$0xff] %v12128_v7 }
 0x517   : > { %v4526_v27 = vsel %vm4525_vm11, %v9623_v60, %v4522_v41 }
 0x518   : > { %v4531_v59 = vsel %vm4528_vm12, %v4530_v39, %v4526_v27  ;;  %v4541_v36 = vsel %vm4540_vm13, %v9625_v25, %v4537_v43  ;;  %9630 = vrcp.f32 %v12125_v15  ;;  %v12133_v48 = vpop.f32.mrf.mxu1  ;;  %v10018_v39 = vld [vmem:[#allocation2 + $0x100] sm:$0xff]  ;;  %vm4553_vm3 = vweird.f32 %v12125_v15 }
 0x519   : > { %v4546_v32 = vsel %vm4543_vm14, %v4545_v14, %v4541_v36  ;;  %v5272_v46 = vmul.f32 %v4531_v59, %v12062_v16  ;;  %9632 = vpow2.f32 %v9423_v31  ;;  %v4559_v59 = vand.u32 2147483648, %v12125_v15 }
 0x51a   : > { %v5273_v60 = vmul.f32 %v4546_v32, %v12065_v63  ;;  %v4557_v32 = vand.u32 2147483647, %v12125_v15 }
 0x51b   : > { %5326 = vst [vmem:[#allocation3 + $0x20] sm:$0xff] %v5272_v46  ;;  %v3436_v4 = vpop.f32.mrf.mxu0 }
 0x51c   : > { %5327 = vst [vmem:[#allocation3 + $0x28] sm:$0x3] %v5273_v60  ;;  %v3944_v49 = vrot.slane %v3436_v4, 2  ;;  %v5425_v41 = vld [vmem:[#allocation3 + $0x18] sm:$0xff]  ;;  %v9629_v9 = vpop.eup %9628  ;;  %v6494_v4 = vld [vmem:[#allocation6 + $0x2d8] sm:$0xff]  ;;  %vm4558_vm5 = vcmp.eq.f32.partialorder %v4557_v32, 8.507059e+37 }
 0x51d   : > { %5395 = vst [vmem:[#allocation3 + $0x29] sm:$0x1] %v11871_v12  ;;  %5542 = vmatmul.f32.gmra.mxu1 %v5425_v41  ;;  %5688 = vmatmul.f32.gmra.mxu2 %v5425_v41  ;;  %v12136_v25 = vadd.f32 1.0, %v9629_v9  ;;  %v12145_v62 = vpop.f32.mrf.mxu3 }
 0x51e   : > { %v3945_v16 = vsel %vm1525_vm2, %v3943_v33, %v3944_v49  ;;  %5849 = vmatmul.f32.gmra.mxu3 %v5425_v41  ;;  %v9631_v63 = vpop.eup %9630  ;;  %3483 = vmatmul.f32.gmra.mxu0 %v10018_v39  ;;  %15603 = vst [vmem:[#allocation44_spill] sm:$0xff] %v12145_v62  ;;  %v6493_v33 = vld [vmem:[#allocation6 + $0x2d0] sm:$0xff] }
 0x51f   : > { %v4081_v56 = vadd.f32 %v3945_v16, %v11647_v37  ;;  %v9633_v44 = vpop.eup %9632  ;;  %v4549_v43 = vmul.f32 %v9631_v63, %v12125_v15  ;;  %9634 = vrcp.f32 %v12136_v25  ;;  %vm4554_vm15 = vweird.f32 %v9631_v63  ;;  %6645 = vmatpush.msrb.mxu2 %v6494_v4  ;;  %6500 = vmatpush.msrb.mxu1 %v6493_v33 }
 0x520   : > { %v12142_v14 = vadd.f32 1.0, %v9633_v44  ;;  %v12155_v39 = vpop.f32.mrf.mxu1  ;;  %vm4555_vm4 = vmor %vm4553_vm3, %vm4554_vm15  ;;  %v4560_v44 = vor.u32 1.1754944e-38, %v4559_v59  ;;  %vm4583_vm7 = vweird.f32 %v12136_v25 }
 0x521   : > { %v4139_v27 = vmul.f32 %v12014_v54, %v4081_v56  ;;  %v4550_v31 = vsub.f32 1.0, %v4549_v43  ;;  %15604 = vst [vmem:[#allocation74_spill] sm:$0xff] %v12155_v39 }
 0x522   : > { %9636 = vrcp.f32 %v12142_v14  ;;  %vm4568_vm11 = vweird.f32 %v12142_v14 }
 0x523   : > { %v3439_v36 = vpop.f32.mrf.mxu0  ;;  %v4551_v37 = vmul.f32 %v9631_v63, %v4550_v31  ;;  %v12151_v60 = vadd.f32 %v12023_v0, %v4139_v27 }
 0x524   : > { %v3946_v41 = vrot.slane %v3439_v36, 2  ;;  %v10019_v36 = vld [vmem:[#allocation2 + $0x108] sm:$0xff] }
 0x525   : > { %5545 = vmatmul.f32.gmra.mxu1 %v5272_v46  ;;  %5691 = vmatmul.f32.gmra.mxu2 %v5272_v46  ;;  %v9635_v9 = vpop.eup %9634  ;;  %v4552_v16 = vadd.f32 %v9631_v63, %v4551_v37  ;;  %v9425_v56 = vmul.f32 -1.442695, %v12151_v60 }
 0x526   : > { %v4579_v43 = vmul.f32 %v9635_v9, %v12136_v25  ;;  %v3947_v27 = vsel %vm1525_vm2, %v3944_v49, %v3946_v41  ;;  %v4083_v31 = vadd.f32 %v3946_v41, %v11663_v5  ;;  %5852 = vmatmul.f32.gmra.mxu3 %v5272_v46  ;;  %3486 = vmatmul.f32.gmra.mxu0 %v10019_v36  ;;  %v4589_v49 = vand.u32 2147483648, %v12136_v25 }
 0x527   : > { %v4556_v37 = vsel %vm4555_vm4, %v9631_v63, %v4552_v16  ;;  %9638 = vpow2.f32 %v9425_v56  ;;  %v4082_v15 = vadd.f32 %v3947_v27, %v11666_v28  ;;  %vm4584_vm6 = vweird.f32 %v9635_v9  ;;  %v5427_v56 = vld [vmem:[#allocation3 + $0x28] sm:$0xff] }
 0x528   : > { %v9637_v4 = vpop.eup %9636  ;;  %v4561_v33 = vsel %vm4558_vm5, %v4560_v44, %v4556_v37  ;;  %v4580_v62 = vsub.f32 1.0, %v4579_v43  ;;  %v4141_v7 = vmul.f32 %v12014_v54, %v4083_v31  ;;  %v4587_v63 = vand.u32 2147483647, %v12136_v25  ;;  %v12175_v44 = vpop.f32.mrf.mxu3  ;;  %vm4585_vm9 = vmor %vm4583_vm7, %vm4584_vm6 }
 0x529   : > { %v5274_v59 = vmul.f32 %v4561_v33, %v12089_v11  ;;  %v4564_v39 = vmul.f32 %v9637_v4, %v12142_v14  ;;  %v4140_v5 = vmul.f32 %v12014_v54, %v4082_v15  ;;  %v4572_v16 = vand.u32 2147483647, %v12142_v14  ;;  %15605 = vst [vmem:[#allocation43_spill] sm:$0xff] %v12175_v44  ;;  %v10020_v33 = vld [vmem:[#allocation2 + $0x110] sm:$0xff] }
 0x52a   : > { %v4581_v46 = vmul.f32 %v9635_v9, %v4580_v62  ;;  %v12169_v32 = vadd.f32 %v12023_v0, %v4141_v7  ;;  %v4574_v62 = vand.u32 2147483648, %v12142_v14  ;;  %vm4569_vm8 = vweird.f32 %v9637_v4 }
 0x52b   : > { %v3442_v28 = vpop.f32.mrf.mxu0  ;;  %5328 = vst [vmem:[#allocation3 + $0x30] sm:$0xff] %v5274_v59  ;;  %v4565_v41 = vsub.f32 1.0, %v4564_v39  ;;  %v12173_v11 = vadd.f32 %v12023_v0, %v4140_v5  ;;  %v4590_v31 = vor.u32 1.1754944e-38, %v4589_v49  ;;  %vm4588_vm10 = vcmp.eq.f32.partialorder %v4587_v63, 8.507059e+37  ;;  %v12186_v5 = vpop.f32.mrf.mxu1  ;;  %vm4570_vm12 = vmor %vm4568_vm11, %vm4569_vm8 }
 0x52c   : > { %5378 = vst [vmem:[#allocation3 + $0x30] sm:$0x1] %v11871_v12  ;;  %v4582_v43 = vadd.f32 %v9635_v9, %v4581_v46  ;;  %v9427_v7 = vmul.f32 -1.442695, %v12169_v32  ;;  %v4575_v49 = vor.u32 1.1754944e-38, %v4574_v62  ;;  %vm4573_vm13 = vcmp.eq.f32.partialorder %v4572_v16, 8.507059e+37 }
 0x52d   : > { %5548 = vmatmul.f32.gmra.mxu1 %v5427_v56  ;;  %5694 = vmatmul.f32.gmra.mxu2 %v5427_v56  ;;  %v9639_v39 = vpop.eup %9638  ;;  %v4566_v27 = vmul.f32 %v9637_v4, %v4565_v41  ;;  %v9426_v36 = vmul.f32 -1.442695, %v12173_v11  ;;  %v3948_v14 = vrot.slane %v3442_v28, 2 }
 0x52e   : > { %v4586_v37 = vsel %vm4585_vm9, %v9635_v9, %v4582_v43  ;;  %v12183_v15 = vadd.f32 1.0, %v9639_v39  ;;  %9640 = vpow2.f32 %v9427_v7  ;;  %5855 = vmatmul.f32.gmra.mxu3 %v5427_v56  ;;  %3489 = vmatmul.f32.gmra.mxu0 %v10020_v33 }
 0x52f   : > { %v4567_v25 = vadd.f32 %v9637_v4, %v4566_v27  ;;  %v4591_v59 = vsel %vm4588_vm10, %v4590_v31, %v4586_v37  ;;  %9642 = vpow2.f32 %v9426_v36 }
 0x530   : > { %v5276_v46 = vmul.f32 %v4591_v59, %v12114_v2  ;;  %9644 = vrcp.f32 %v12183_v15  ;;  %v12196_v27 = vpop.f32.mrf.mxu3  ;;  %v4602_v37 = vand.u32 2147483647, %v12183_v15  ;;  %v4604_v59 = vand.u32 2147483648, %v12183_v15 }
 0x531   : > { %v4571_v9 = vsel %vm4570_vm12, %v9637_v4, %v4567_v25  ;;  %15606 = vst [vmem:[#allocation41_spill] sm:$0xff] %v12196_v27  ;;  %vm4598_vm15 = vweird.f32 %v12183_v15 }
 0x532   : > { %v4576_v63 = vsel %vm4573_vm13, %v4575_v49, %v4571_v9  ;;  %5330 = vst [vmem:[#allocation3 + $0x40] sm:$0x3] %v5276_v46  ;;  %v6491_v9 = vld [vmem:[#allocation6 + $0x2c0] sm:$0xff]  ;;  %vm12215_vm3 = vcmp.eq.f32.partialorder %v4602_v37, 8.507059e+37 }
 0x533   : > { %v3445_v41 = vpop.f32.mrf.mxu0  ;;  %v5275_v56 = vmul.f32 %v4576_v63, %v12121_v55  ;;  %5396 = vst [vmem:[#allocation3 + $0x41] sm:$0x1] %v11871_v12  ;;  %v5428_v7 = vld [vmem:[#allocation3 + $0x30] sm:$0xff]  ;;  %v10021_v12 = vld [vmem:[#allocation2 + $0x118] sm:$0xff]  ;;  %v12206_v25 = vpop.f32.mrf.mxu1  ;;  %v6490_v63 = vld [vmem:[#allocation6 + $0x2b8] sm:$0xff]  ;;  %6646 = vmatpush.msrb.mxu2 %v6491_v9 }
 0x534   : > { %v3949_v43 = vrot.slane %v3445_v41, 2  ;;  %v9641_v39 = vpop.eup %9640  ;;  %6501 = vmatpush.msrb.mxu1 %v6490_v63 }
 0x535   : > { %5550 = vmatmul.f32.gmra.mxu1 %v5428_v7  ;;  %5697 = vmatmul.f32.gmra.mxu2 %v5428_v7  ;;  %v9643_v62 = vpop.eup %9642  ;;  %5329 = vst [vmem:[#allocation3 + $0x38] sm:$0xff] %v5275_v56  ;;  %v12193_v2 = vadd.f32 1.0, %v9641_v39 }
 0x536   : > { %v3950_v4 = vsel %vm1525_vm2, %v3948_v14, %v3949_v43  ;;  %v9645_v16 = vpop.eup %9644  ;;  %v12198_v31 = vadd.f32 1.0, %v9643_v62  ;;  %5858 = vmatmul.f32.gmra.mxu3 %v5428_v7  ;;  %3492 = vmatmul.f32.gmra.mxu0 %v10021_v12 }
 0x537   : > { %v4084_v55 = vadd.f32 %v3950_v4, %v11696_v61  ;;  %v4594_v28 = vmul.f32 %v9645_v16, %v12183_v15  ;;  %9646 = vrcp.f32 %v12193_v2  ;;  %vm4599_vm14 = vweird.f32 %v9645_v16  ;;  %v10022_v15 = vld [vmem:[#allocation2 + $0x120] sm:$0xff] }
 0x538   : > { %9648 = vrcp.f32 %v12198_v31  ;;  %vm4600_vm4 = vmor %vm4598_vm15, %vm4599_vm14  ;;  %vm4628_vm7 = vweird.f32 %v12193_v2  ;;  %vm4613_vm8 = vweird.f32 %v12198_v31 }
 0x539   : > { %v4595_v36 = vsub.f32 1.0, %v4594_v28  ;;  %v4142_v33 = vmul.f32 %v12014_v54, %v4084_v55  ;;  %v4605_v55 = vor.u32 1.1754944e-38, %v4604_v59 }
 0x53b   : > { %v3448_v49 = vpop.f32.mrf.mxu0  ;;  %v4596_v61 = vmul.f32 %v9645_v16, %v4595_v36  ;;  %v12210_v46 = vadd.f32 %v12023_v0, %v4142_v33 }
 0x53c   : > { %v3951_v41 = vrot.slane %v3448_v49, 2  ;;  %v4619_v49 = vand.u32 2147483648, %v12198_v31 }
 0x53d   : > { %5553 = vmatmul.f32.gmra.mxu1 %v5275_v56  ;;  %5700 = vmatmul.f32.gmra.mxu2 %v5275_v56  ;;  %v12212_v14 = vpop.eup %9646  ;;  %v4597_v7 = vadd.f32 %v9645_v16, %v4596_v61  ;;  %v9428_v62 = vmul.f32 -1.442695, %v12210_v46  ;;  %v12227_v61 = vpop.f32.mrf.mxu3 }
 0x53e   : > { %v9649_v4 = vpop.eup %9648  ;;  %v4624_v12 = vmul.f32 %v12212_v14, %v12193_v2  ;;  %v3952_v28 = vsel %vm1525_vm2, %v3949_v43, %v3951_v41  ;;  %v4086_v36 = vadd.f32 %v3951_v41, %v11712_v21  ;;  %5861 = vmatmul.f32.gmra.mxu3 %v5275_v56  ;;  %3495 = vmatmul.f32.gmra.mxu0 %v10022_v15  ;;  %v4634_v41 = vand.u32 2147483648, %v12193_v2 }
 0x53f   : > { %v4601_v37 = vsel %vm4600_vm4, %v9645_v16, %v4597_v7  ;;  %v4609_v33 = vmul.f32 %v9649_v4, %v12198_v31  ;;  %9650 = vpow2.f32 %v9428_v62  ;;  %15609 = vst [vmem:[#allocation76_spill] sm:$0xff] %v12227_v61  ;;  %v4085_v63 = vadd.f32 %v3952_v28, %v11715_v30  ;;  %v12244_v28 = vpop.f32.mrf.mxu1 }
 0x540   : > { %v4606_v59 = vsel %vm12215_vm3, %v4605_v55, %v4601_v37  ;;  %v4625_v9 = vsub.f32 1.0, %v4624_v12  ;;  %v4144_v43 = vmul.f32 %v12014_v54, %v4086_v36  ;;  %v4632_v16 = vand.u32 2147483647, %v12193_v2  ;;  %v5430_v12 = vld [vmem:[#allocation3 + $0x40] sm:$0xff] }
 0x541   : > { %v5277_v21 = vmul.f32 %v4606_v59, %v12151_v60  ;;  %v4610_v56 = vsub.f32 1.0, %v4609_v33  ;;  %vm4629_vm5 = vweird.f32 %v12212_v14  ;;  %v4143_v62 = vmul.f32 %v12014_v54, %v4085_v63  ;;  %v12246_v36 = vld [vmem:[#allocation2] sm:$0xff] }
 0x542   : > { %v4626_v7 = vmul.f32 %v12212_v14, %v4625_v9  ;;  %v12240_v39 = vadd.f32 %v12023_v0, %v4144_v43  ;;  %vm4614_vm6 = vweird.f32 %v9649_v4  ;;  %v4617_v60 = vand.u32 2147483647, %v12198_v31  ;;  %vm4630_vm9 = vmor %vm4628_vm7, %vm4629_vm5 }
 0x543   : > { %v3451_v55 = vpop.f32.mrf.mxu0  ;;  %5331 = vst [vmem:[#allocation3 + $0x48] sm:$0xff] %v5277_v21  ;;  %v4611_v30 = vmul.f32 %v9649_v4, %v4610_v56  ;;  %v12252_v37 = vadd.f32 %v12023_v0, %v4143_v62  ;;  %v4620_v9 = vor.u32 1.1754944e-38, %v4619_v49  ;;  %vm4633_vm10 = vcmp.eq.f32.partialorder %v4632_v16, 8.507059e+37  ;;  %vm4615_vm11 = vmor %vm4613_vm8, %vm4614_vm6  ;;  %v10024_v56 = vld [vmem:[#allocation2 + $0x128] sm:$0xff] }
 0x544   : > { %5379 = vst [vmem:[#allocation3 + $0x48] sm:$0x1] %v12246_v36  ;;  %v4627_v15 = vadd.f32 %v12212_v14, %v4626_v7  ;;  %v9430_v33 = vmul.f32 -1.442695, %v12240_v39  ;;  %v4635_v63 = vor.u32 1.1754944e-38, %v4634_v41  ;;  %vm4618_vm12 = vcmp.eq.f32.partialorder %v4617_v60, 8.507059e+37 }
 0x545   : > { %5556 = vmatmul.f32.gmra.mxu1 %v5430_v12  ;;  %5703 = vmatmul.f32.gmra.mxu2 %v5430_v12  ;;  %v9651_v59 = vpop.eup %9650  ;;  %v4612_v2 = vadd.f32 %v9649_v4, %v4611_v30  ;;  %v9429_v21 = vmul.f32 -1.442695, %v12252_v37 }
 0x546   : > { %v4631_v31 = vsel %vm4630_vm9, %v12212_v14, %v4627_v15  ;;  %v12259_v43 = vadd.f32 1.0, %v9651_v59  ;;  %9652 = vpow2.f32 %v9430_v33  ;;  %5864 = vmatmul.f32.gmra.mxu3 %v5430_v12  ;;  %3498 = vmatmul.f32.gmra.mxu0 %v10024_v56  ;;  %v12265_v14 = vpop.f32.mrf.mxu3  ;;  %v3953_v15 = vrot.slane %v3451_v55, 2 }
 0x547   : > { %v4616_v7 = vsel %vm4615_vm11, %v9649_v4, %v4612_v2  ;;  %v4636_v49 = vsel %vm4633_vm10, %v4635_v63, %v4631_v31  ;;  %15610 = vst [vmem:[#allocation75_spill] sm:$0xff] %v12265_v14 }
 0x548   : > { %v4621_v62 = vsel %vm4618_vm12, %v4620_v9, %v4616_v7  ;;  %v5279_v30 = vmul.f32 %v4636_v49, %v12169_v32  ;;  %9654 = vrcp.f32 %v12259_v43  ;;  %v10025_v9 = vld [vmem:[#allocation2 + $0x130] sm:$0xff]  ;;  %v4649_v7 = vand.u32 2147483648, %v12259_v43 }
 0x549   : > { %v5278_v16 = vmul.f32 %v4621_v62, %v12173_v11  ;;  %9656 = vpow2.f32 %v9429_v21  ;;  %v12271_v11 = vpop.f32.mrf.mxu1  ;;  %vm4643_vm14 = vweird.f32 %v12259_v43 }
 0x54a   : > { %5333 = vst [vmem:[#allocation3 + $0x58] sm:$0x3] %v5279_v30 }
 0x54b   : > { %v3454_v41 = vpop.f32.mrf.mxu0  ;;  %5332 = vst [vmem:[#allocation3 + $0x50] sm:$0xff] %v5278_v16  ;;  %v5431_v33 = vld [vmem:[#allocation3 + $0x48] sm:$0xff] }
 0x54c   : > { %v3954_v12 = vrot.slane %v3454_v41, 2  ;;  %v9653_v59 = vpop.eup %9652  ;;  %5397 = vst [vmem:[#allocation3 + $0x59] sm:$0x1] %v12246_v36 }
 0x54d   : > { %5558 = vmatmul.f32.gmra.mxu1 %v5431_v33  ;;  %5706 = vmatmul.f32.gmra.mxu2 %v5431_v33  ;;  %v12268_v4 = vadd.f32 1.0, %v9653_v59 }
 0x54e   : > { %v3955_v32 = vsel %vm1525_vm2, %v3953_v15, %v3954_v12  ;;  %v9655_v60 = vpop.eup %9654  ;;  %5867 = vmatmul.f32.gmra.mxu3 %v5431_v33  ;;  %3501 = vmatmul.f32.gmra.mxu0 %v10025_v9  ;;  %v12285_v41 = vpop.f32.mrf.mxu3  ;;  %v6488_v15 = vld [vmem:[#allocation6 + $0x2a8] sm:$0xff]  ;;  %v6487_v33 = vld [vmem:[#allocation6 + $0x2a0] sm:$0xff] }
 0x54f   : > { %v4087_v2 = vadd.f32 %v3955_v32, %v11742_v20  ;;  %v9657_v55 = vpop.eup %9656  ;;  %v4639_v63 = vmul.f32 %v9655_v60, %v12259_v43  ;;  %9658 = vrcp.f32 %v12268_v4  ;;  %vm4644_vm13 = vweird.f32 %v9655_v60  ;;  %15611 = vst [vmem:[#allocation46_spill] sm:$0xff] %v12285_v41  ;;  %6647 = vmatpush.msrb.mxu2 %v6488_v15  ;;  %6502 = vmatpush.msrb.mxu1 %v6487_v33 }
 0x550   : > { %v12276_v31 = vadd.f32 1.0, %v9657_v55  ;;  %v4647_v20 = vand.u32 2147483647, %v12259_v43  ;;  %vm4645_vm15 = vmor %vm4643_vm14, %vm4644_vm13  ;;  %v4650_v55 = vor.u32 1.1754944e-38, %v4649_v7  ;;  %vm4673_vm5 = vweird.f32 %v12268_v4 }
 0x551   : > { %v4145_v21 = vmul.f32 %v12014_v54, %v4087_v2  ;;  %v4640_v56 = vsub.f32 1.0, %v4639_v63  ;;  %v12294_v15 = vpop.f32.mrf.mxu1 }
 0x552   : > { %9660 = vrcp.f32 %v12276_v31  ;;  %vm4648_vm3 = vcmp.eq.f32.partialorder %v4647_v20, 8.507059e+37  ;;  %15612 = vst [vmem:[#allocation48_spill] sm:$0xff] %v12294_v15  ;;  %v4677_v20 = vand.u32 2147483647, %v12268_v4  ;;  %vm4658_vm9 = vweird.f32 %v12276_v31 }
 0x553   : > { %v3457_v49 = vpop.f32.mrf.mxu0  ;;  %v4641_v62 = vmul.f32 %v9655_v60, %v4640_v56  ;;  %v12283_v30 = vadd.f32 %v12023_v0, %v4145_v21 }
 0x554   : > { %v3956_v59 = vrot.slane %v3457_v49, 2  ;;  %v10026_v49 = vld [vmem:[#allocation2 + $0x138] sm:$0xff]  ;;  %vm4678_vm8 = vcmp.eq.f32.partialorder %v4677_v20, 8.507059e+37 }
 0x555   : > { %5561 = vmatmul.f32.gmra.mxu1 %v5278_v16  ;;  %5709 = vmatmul.f32.gmra.mxu2 %v5278_v16  ;;  %v9659_v32 = vpop.eup %9658  ;;  %v4642_v2 = vadd.f32 %v9655_v60, %v4641_v62  ;;  %v9431_v9 = vmul.f32 -1.442695, %v12283_v30 }
 0x556   : > { %v4669_v63 = vmul.f32 %v9659_v32, %v12268_v4  ;;  %v3957_v21 = vsel %vm1525_vm2, %v3954_v12, %v3956_v59  ;;  %v4089_v56 = vadd.f32 %v3956_v59, %v11752_v47  ;;  %5870 = vmatmul.f32.gmra.mxu3 %v5278_v16  ;;  %3504 = vmatmul.f32.gmra.mxu0 %v10026_v49  ;;  %v4679_v47 = vand.u32 2147483648, %v12268_v4  ;;  %v10027_v4 = vld [vmem:[#allocation2 + $0x140] sm:$0xff] }
 0x557   : > { %v4646_v41 = vsel %vm4645_vm15, %v9655_v60, %v4642_v2  ;;  %9662 = vpow2.f32 %v9431_v9  ;;  %v4088_v43 = vadd.f32 %v3957_v21, %v11755_v13  ;;  %vm4674_vm4 = vweird.f32 %v9659_v32  ;;  %v5433_v9 = vld [vmem:[#allocation3 + $0x58] sm:$0xff] }
 0x558   : > { %v9661_v62 = vpop.eup %9660  ;;  %v4651_v33 = vsel %vm4648_vm3, %v4650_v55, %v4646_v41  ;;  %v4670_v14 = vsub.f32 1.0, %v4669_v63  ;;  %v4147_v7 = vmul.f32 %v12014_v54, %v4089_v56  ;;  %v4662_v2 = vand.u32 2147483647, %v12276_v31  ;;  %vm4675_vm7 = vmor %vm4673_vm5, %vm4674_vm4  ;;  %v12315_v56 = vpop.f32.mrf.mxu3 }
 0x559   : > { %v5280_v61 = vmul.f32 %v4651_v33, %v12210_v46  ;;  %v4654_v12 = vmul.f32 %v9661_v62, %v12276_v31  ;;  %v4146_v16 = vmul.f32 %v12014_v54, %v4088_v43  ;;  %v4664_v54 = vand.u32 2147483648, %v12276_v31  ;;  %15613 = vst [vmem:[#allocation45_spill] sm:$0xff] %v12315_v56 }
 0x55a   : > { %v4671_v60 = vmul.f32 %v9659_v32, %v4670_v14  ;;  %v12303_v13 = vadd.f32 %v12023_v0, %v4147_v7  ;;  %vm4659_vm6 = vweird.f32 %v9661_v62  ;;  %v4680_v21 = vor.u32 1.1754944e-38, %v4679_v47 }
 0x55b   : > { %v3460_v59 = vpop.f32.mrf.mxu0  ;;  %5334 = vst [vmem:[#allocation3 + $0x60] sm:$0xff] %v5280_v61  ;;  %v4655_v41 = vsub.f32 1.0, %v4654_v12  ;;  %v12307_v46 = vadd.f32 %v12023_v0, %v4146_v16  ;;  %vm4660_vm10 = vmor %vm4658_vm9, %vm4659_vm6  ;;  %v4665_v12 = vor.u32 1.1754944e-38, %v4664_v54  ;;  %vm4663_vm11 = vcmp.eq.f32.partialorder %v4662_v2, 8.507059e+37  ;;  %v12323_v16 = vpop.f32.mrf.mxu1 }
 0x55c   : > { %5380 = vst [vmem:[#allocation3 + $0x60] sm:$0x1] %v12246_v36  ;;  %v4672_v14 = vadd.f32 %v9659_v32, %v4671_v60  ;;  %v9433_v55 = vmul.f32 -1.442695, %v12303_v13  ;;  %v3958_v31 = vrot.slane %v3460_v59, 2 }
 0x55d   : > { %5564 = vmatmul.f32.gmra.mxu1 %v5433_v9  ;;  %5712 = vmatmul.f32.gmra.mxu2 %v5433_v9  ;;  %v9663_v63 = vpop.eup %9662  ;;  %v4656_v61 = vmul.f32 %v9661_v62, %v4655_v41  ;;  %v9432_v0 = vmul.f32 -1.442695, %v12307_v46  ;;  %15614 = vst [vmem:[#allocation51_spill] sm:$0xff] %v12323_v16 }
 0x55e   : > { %v4676_v49 = vsel %vm4675_vm7, %v9659_v32, %v4672_v14  ;;  %v12317_v43 = vadd.f32 1.0, %v9663_v63  ;;  %9664 = vpow2.f32 %v9433_v55  ;;  %5873 = vmatmul.f32.gmra.mxu3 %v5433_v9  ;;  %3507 = vmatmul.f32.gmra.mxu0 %v10027_v4 }
 0x55f   : > { %v4657_v33 = vadd.f32 %v9661_v62, %v4656_v61  ;;  %v4681_v7 = vsel %vm4678_vm8, %v4680_v21, %v4676_v49  ;;  %9666 = vpow2.f32 %v9432_v0  ;;  %v15292_v21 = vrot.slane %v11863_v45, 1 }
 0x560   : > { %v5282_v47 = vmul.f32 %v4681_v7, %v12240_v39  ;;  %9668 = vrcp.f32 %v12317_v43  ;;  %v12336_v0 = vpop.f32.mrf.mxu3  ;;  %v4692_v4 = vand.u32 2147483647, %v12317_v43  ;;  %v2525_v7 = vrot.slane %v11851_v40, 1 }
 0x561   : > { %v4661_v32 = vsel %vm4660_vm10, %v9661_v62, %v4657_v33  ;;  %15615 = vst [vmem:[#allocation77_spill] sm:$0xff] %v12336_v0  ;;  %vm4688_vm13 = vweird.f32 %v12317_v43 }
 0x562   : > { %v4666_v60 = vsel %vm4663_vm11, %v4665_v12, %v4661_v32  ;;  %5336 = vst [vmem:[#allocation3 + $0x70] sm:$0x3] %v5282_v47  ;;  %v4694_v12 = vand.u32 2147483648, %v12317_v43  ;;  %vm12368_vm14 = vcmp.eq.f32.partialorder %v4692_v4, 8.507059e+37 }
 0x563   : > { %v3463_v20 = vpop.f32.mrf.mxu0  ;;  %v5281_v41 = vmul.f32 %v4666_v60, %v12252_v37  ;;  %5398 = vst [vmem:[#allocation3 + $0x71] sm:$0x1] %v12246_v36  ;;  %v5434_v14 = vld [vmem:[#allocation3 + $0x60] sm:$0xff]  ;;  %v10028_v37 = vld [vmem:[#allocation2 + $0x148] sm:$0xff] }
 0x564   : > { %v3959_v9 = vrot.slane %v3463_v20, 2  ;;  %v9665_v55 = vpop.eup %9664  ;;  %v12351_v60 = vld [vmem:[%s15229_s3] ss:$0 sm:$0xff] }
 0x565   : > { %5566 = vmatmul.f32.gmra.mxu1 %v5434_v14  ;;  %5715 = vmatmul.f32.gmra.mxu2 %v5434_v14  ;;  %v9667_v39 = vpop.eup %9666  ;;  %5335 = vst [vmem:[#allocation3 + $0x68] sm:$0xff] %v5281_v41  ;;  %v12327_v54 = vadd.f32 1.0, %v9665_v55  ;;  %v12363_v55 = vpop.f32.mrf.mxu1 }
 0x566   : > { %v3960_v62 = vsel %vm1525_vm2, %v3958_v31, %v3959_v9  ;;  %v9669_v2 = vpop.eup %9668  ;;  %v12330_v63 = vadd.f32 1.0, %v9667_v39  ;;  %5876 = vmatmul.f32.gmra.mxu3 %v5434_v14  ;;  %3510 = vmatmul.f32.gmra.mxu0 %v10028_v37  ;;  %v12360_v14 = vsel %vm1272_vm1, %v2525_v7, %v15292_v21  ;;  %15616 = vst [vmem:[#allocation50_spill] sm:$0xff] %v12363_v55  ;;  %v6485_v39 = vld [vmem:[#allocation6 + $0x290] sm:$0xff]  ;;  %v4695_v21 = vor.u32 1.1754944e-38, %v4694_v12 }
 0x567   : > { %v4090_v61 = vadd.f32 %v3960_v62, %v11779_v3  ;;  %v4684_v59 = vmul.f32 %v9669_v2, %v12317_v43  ;;  %9670 = vrcp.f32 %v12327_v54  ;;  %v12343_v3 = vld [vmem:[%s15228_s2] ss:$0 sm:$0xff]  ;;  %vm4689_vm12 = vweird.f32 %v9669_v2  ;;  %v6484_v62 = vld [vmem:[#allocation6 + $0x288] sm:$0xff]  ;;  %6648 = vmatpush.msrb.mxu2 %v6485_v39  ;;  %v10031_v43 = vld [vmem:[#allocation2 + $0x150] sm:$0xff] }
 0x568   : > { %9672 = vrcp.f32 %v12330_v63  ;;  %6503 = vmatpush.msrb.mxu1 %v6484_v62  ;;  %vm4690_vm15 = vmor %vm4688_vm13, %vm4689_vm12  ;;  %v4709_v39 = vand.u32 2147483648, %v12330_v63  ;;  %vm4718_vm5 = vweird.f32 %v12327_v54  ;;  %vm4703_vm6 = vweird.f32 %v12330_v63 }
 0x569   : > { %v4685_v49 = vsub.f32 1.0, %v4684_v59  ;;  %v4148_v33 = vmul.f32 %v12343_v3, %v4090_v61 }
 0x56b   : > { %v3466_v47 = vpop.f32.mrf.mxu0  ;;  %v4686_v32 = vmul.f32 %v9669_v2, %v4685_v49  ;;  %v12354_v20 = vadd.f32 %v12351_v60, %v4148_v33 }
 0x56c   : > { %v3961_v61 = vrot.slane %v3466_v47, 2 }
 0x56d   : > { %5569 = vmatmul.f32.gmra.mxu1 %v5281_v41  ;;  %5718 = vmatmul.f32.gmra.mxu2 %v5281_v41  ;;  %v12365_v37 = vpop.eup %9670  ;;  %v4687_v59 = vadd.f32 %v9669_v2, %v4686_v32  ;;  %v9434_v33 = vmul.f32 -1.442695, %v12354_v20 }
 0x56e   : > { %v9673_v7 = vpop.eup %9672  ;;  %v4714_v47 = vmul.f32 %v12365_v37, %v12327_v54  ;;  %v3962_v31 = vsel %vm1525_vm2, %v3959_v9, %v3961_v61  ;;  %v4092_v32 = vadd.f32 %v3961_v61, %v11789_v19  ;;  %5879 = vmatmul.f32.gmra.mxu3 %v5281_v41  ;;  %3513 = vmatmul.f32.gmra.mxu0 %v10031_v43  ;;  %v4722_v41 = vand.u32 2147483647, %v12327_v54  ;;  %v12387_v61 = vpop.f32.mrf.mxu3 }
 0x56f   : > { %v4691_v4 = vsel %vm4690_vm15, %v9669_v2, %v4687_v59  ;;  %v4699_v40 = vmul.f32 %v9673_v7, %v12330_v63  ;;  %9674 = vpow2.f32 %v9434_v33  ;;  %v4091_v0 = vadd.f32 %v3962_v31, %v11792_v17  ;;  %15619 = vst [vmem:[#allocation47_spill] sm:$0xff] %v12387_v61 }
 0x570   : > { %v4696_v62 = vsel %vm12368_vm14, %v4695_v21, %v4691_v4  ;;  %v4715_v12 = vsub.f32 1.0, %v4714_v47  ;;  %v4150_v56 = vmul.f32 %v12343_v3, %v4092_v32  ;;  %v4724_v2 = vand.u32 2147483648, %v12327_v54  ;;  %v12410_v4 = vpop.f32.mrf.mxu1 }
 0x571   : > { %v5283_v9 = vmul.f32 %v4696_v62, %v12283_v30  ;;  %v4700_v19 = vsub.f32 1.0, %v4699_v40  ;;  %vm4719_vm3 = vweird.f32 %v12365_v37  ;;  %v4149_v21 = vmul.f32 %v12343_v3, %v4091_v0  ;;  %v5436_v40 = vld [vmem:[#allocation3 + $0x70] sm:$0xff]  ;;  %15622 = vst [vmem:[#allocation79_spill] sm:$0xff] %v12410_v4 }
 0x572   : > { %v4716_v59 = vmul.f32 %v12365_v37, %v4715_v12  ;;  %v12393_v49 = vadd.f32 %v12351_v60, %v4150_v56  ;;  %vm4704_vm4 = vweird.f32 %v9673_v7  ;;  %v4707_v30 = vand.u32 2147483647, %v12330_v63  ;;  %vm12406_vm7 = vmor %vm4718_vm5, %vm4719_vm3 }
 0x573   : > { %v3469_v17 = vpop.f32.mrf.mxu0  ;;  %5337 = vst [vmem:[#allocation3 + $0x78] sm:$0xff] %v5283_v9  ;;  %v4701_v31 = vmul.f32 %v9673_v7, %v4700_v19  ;;  %v12401_v0 = vadd.f32 %v12351_v60, %v4149_v21  ;;  %v4710_v43 = vor.u32 1.1754944e-38, %v4709_v39  ;;  %vm4723_vm8 = vcmp.eq.f32.partialorder %v4722_v41, 8.507059e+37  ;;  %vm4705_vm9 = vmor %vm4703_vm6, %vm4704_vm4  ;;  %v10032_v9 = vld [vmem:[#allocation2 + $0x158] sm:$0xff] }
 0x574   : > { %5381 = vst [vmem:[#allocation3 + $0x78] sm:$0x1] %v12246_v36  ;;  %v4717_v33 = vadd.f32 %v12365_v37, %v4716_v59  ;;  %v9436_v56 = vmul.f32 -1.442695, %v12393_v49  ;;  %v4725_v63 = vor.u32 1.1754944e-38, %v4724_v2  ;;  %v2528_v19 = vrot.slane %v11868_v38, 1 }
 0x575   : > { %5572 = vmatmul.f32.gmra.mxu1 %v5436_v40  ;;  %5721 = vmatmul.f32.gmra.mxu2 %v5436_v40  ;;  %v9675_v47 = vpop.eup %9674  ;;  %v4702_v32 = vadd.f32 %v9673_v7, %v4701_v31  ;;  %v9435_v39 = vmul.f32 -1.442695, %v12401_v0  ;;  %vm4708_vm10 = vcmp.eq.f32.partialorder %v4707_v30, 8.507059e+37  ;;  %v15623_v31 = vld [vmem:[#allocation103_spill] sm:$0xff] }
 0x576   : > { %v4721_v62 = vsel %vm12406_vm7, %v12365_v37, %v4717_v33  ;;  %v12416_v12 = vadd.f32 1.0, %v9675_v47  ;;  %9676 = vpow2.f32 %v9436_v56  ;;  %5882 = vmatmul.f32.gmra.mxu3 %v5436_v40  ;;  %3516 = vmatmul.f32.gmra.mxu0 %v10032_v9  ;;  %v2649_v37 = vadd.f32 %v12360_v14, %v15623_v31 }
 0x577   : > { %v4706_v41 = vsel %vm4705_vm9, %v9673_v7, %v4702_v32  ;;  %v4726_v2 = vsel %vm4723_vm8, %v4725_v63, %v4721_v62  ;;  %v15624_v40 = vrot.slane %v11967_v6, 2  ;;  %v15625_v56 = vrot.slane %v11957_v35, 2  ;;  %v12443_v63 = vpop.f32.mrf.mxu3 }
 0x578   : > { %v4711_v59 = vsel %vm4708_vm10, %v4710_v43, %v4706_v41  ;;  %v5285_v21 = vmul.f32 %v4726_v2, %v12303_v13  ;;  %9678 = vrcp.f32 %v12416_v12  ;;  %v2780_v7 = vrot.slane %v11977_v42, 2  ;;  %15628 = vst [vmem:[#allocation52_spill] sm:$0xff] %v12443_v63 }
 0x579   : > { %v12425_v33 = vmul.f32 %v4711_v59, %v12307_v46  ;;  %9680 = vpow2.f32 %v9435_v39  ;;  %v2779_v38 = vsel %vm1525_vm2, %v15625_v56, %v15624_v40  ;;  %v15626_v13 = vrot.slane %v11863_v45, 1  ;;  %v12439_v46 = vpop.f32.mrf.mxu2  ;;  %v10033_v59 = vld [vmem:[#allocation2 + $0x160] sm:$0xff] }
 0x57a   : > { %5339 = vst [vmem:[#allocation3 + $0x88] sm:$0x3] %v5285_v21  ;;  %v2651_v14 = vadd.f32 %v2528_v19, %v11179_v1  ;;  %v3963_v32 = vrot.slane %v3469_v17, 2  ;;  %v2901_v45 = vadd.f32 %v2779_v38, %v2649_v37  ;;  %v2531_v42 = vrot.slane %v11891_v51, 1  ;;  %v15629_v17 = vld [vmem:[#allocation106_spill] sm:$0xff]  ;;  %v12457_v21 = vpop.f32.mrf.mxu1 }
 0x57b   : > { %v12433_v30 = vpop.f32.mrf.mxu0  ;;  %v2529_v47 = vsel %vm1272_vm1, %v15626_v13, %v2528_v19  ;;  %15627 = vst [vmem:[#allocation78_spill] sm:$0xff] %v12439_v46  ;;  %v5437_v43 = vld [vmem:[#allocation3 + $0x78] sm:$0xff]  ;;  %v15630_v19 = vmov %v15624_v40  ;;  %v2530_v37 = vrot.slane %v11880_v57, 1  ;;  %v2782_v6 = vrot.slane %v11985_v8, 2 }
 0x57c   : > { %5338 = vst [vmem:[#allocation3 + $0x80] sm:$0xff] %v12425_v33  ;;  %v3964_v35 = vrot.slane %v12433_v30, 2  ;;  %v9677_v54 = vpop.eup %9676  ;;  %v2650_v9 = vadd.f32 %v2529_v47, %v15629_v17  ;;  %v2781_v41 = vsel %vm1525_vm2, %v15630_v19, %v2780_v7  ;;  %v2903_v31 = vadd.f32 %v2780_v7, %v2651_v14  ;;  %v6482_v17 = vld [vmem:[#allocation6 + $0x278] sm:$0xff] }
 0x57d   : > { %5399 = vst [vmem:[#allocation3 + $0x89] sm:$0x1] %v12246_v36  ;;  %5574 = vmatmul.f32.gmra.mxu1 %v5437_v43  ;;  %5724 = vmatmul.f32.gmra.mxu2 %v5437_v43  ;;  %v12447_v62 = vadd.f32 1.0, %v9677_v54  ;;  %v2783_v56 = vrot.slane %v11993_v23, 2  ;;  %v2532_v30 = vsel %vm1272_vm1, %v2530_v37, %v2531_v42  ;;  %v2533_v13 = vrot.slane %v11896_v24, 1 }
 0x57e   : > { %v3965_v1 = vsel %vm1525_vm2, %v3963_v32, %v3964_v35  ;;  %v12450_v39 = vpop.eup %9678  ;;  %5885 = vmatmul.f32.gmra.mxu3 %v5437_v43  ;;  %3519 = vmatmul.f32.gmra.mxu0 %v10033_v59  ;;  %15631 = vst [vmem:[#allocation85_spill] sm:$0xff] %v12457_v21  ;;  %v12471_v57 = vadd.f32 %v11854_v29, %v2901_v45  ;;  %v4739_v14 = vand.u32 2147483648, %v12416_v12  ;;  %v4737_v43 = vand.u32 2147483647, %v12416_v12 }
 0x57f   : > { %v4093_v2 = vadd.f32 %v3965_v1, %v11815_v22  ;;  %v9681_v51 = vpop.eup %9680  ;;  %v4729_v40 = vmul.f32 %v12450_v39, %v12416_v12  ;;  %9682 = vrcp.f32 %v12447_v62  ;;  %v12473_v47 = vadd.f32 %v2781_v41, %v2650_v9  ;;  %v6481_v9 = vld [vmem:[#allocation6 + $0x270] sm:$0xff]  ;;  %v12498_v41 = vpop.f32.mrf.mxu3  ;;  %6649 = vmatpush.msrb.mxu2 %v6482_v17 }
 0x580   : > { %v12465_v38 = vadd.f32 1.0, %v9681_v51  ;;  %vm4734_vm11 = vweird.f32 %v12450_v39  ;;  %v12486_v29 = vadd.f32 %v11874_v50, %v2903_v31  ;;  %v12489_v45 = vadd.f32 %v2532_v30, %v11190_v34  ;;  %15633 = vst [vmem:[#allocation87_spill] sm:$0xff] %v12498_v41  ;;  %6504 = vmatpush.msrb.mxu1 %v6481_v9 }
 0x581   : > { %v4151_v22 = vmul.f32 %v12343_v3, %v4093_v2  ;;  %v4730_v7 = vsub.f32 1.0, %v4729_v40  ;;  %v12483_v24 = vpop.f32.mrf.mxu2  ;;  %v12494_v1 = vsel %vm1525_vm2, %v2782_v6, %v2783_v56  ;;  %v12503_v50 = vsel %vm1272_vm1, %v2531_v42, %v2533_v13 }
 0x582   : > { %9684 = vrcp.f32 %v12465_v38  ;;  %15632 = vst [vmem:[#allocation82_spill] sm:$0xff] %v12483_v24  ;;  %vm4733_vm12 = vweird.f32 %v12416_v12  ;;  %v4740_v31 = vor.u32 1.1754944e-38, %v4739_v14  ;;  %v10034_v12 = vld [vmem:[#allocation2 + $0x168] sm:$0xff]  ;;  %v12519_v6 = vpop.f32.mrf.mxu1  ;;  %vm4738_vm14 = vcmp.eq.f32.partialorder %v4737_v43, 8.507059e+37 }
 0x583   : > { %v3475_v8 = vpop.f32.mrf.mxu0  ;;  %v4731_v32 = vmul.f32 %v12450_v39, %v4730_v7  ;;  %v12481_v54 = vadd.f32 %v12351_v60, %v4151_v22  ;;  %vm12510_vm13 = vmor %vm4733_vm12, %vm4734_vm11  ;;  %15636 = vst [vmem:[#allocation91_spill] sm:$0xff] %v12519_v6  ;;  %v12526_v14 = vadd.f32 %v2533_v13, %v11214_v18  ;;  %v4769_v17 = vand.u32 2147483648, %v12447_v62 }
 0x584   : > { %v3966_v19 = vrot.slane %v3475_v8, 2  ;;  %v2536_v13 = vrot.slane %v11911_v53, 1  ;;  %v4754_v51 = vand.u32 2147483648, %v12465_v38  ;;  %vm4763_vm3 = vweird.f32 %v12447_v62 }
 0x585   : > { %5577 = vmatmul.f32.gmra.mxu1 %v12425_v33  ;;  %5727 = vmatmul.f32.gmra.mxu2 %v12425_v33  ;;  %v12500_v2 = vpop.eup %9682  ;;  %v4732_v34 = vadd.f32 %v12450_v39, %v4731_v32  ;;  %v9437_v59 = vmul.f32 -1.442695, %v12481_v54  ;;  %vm4748_vm7 = vweird.f32 %v12465_v38 }
 0x586   : > { %v4759_v37 = vmul.f32 %v12500_v2, %v12447_v62  ;;  %v3967_v42 = vsel %vm1525_vm2, %v3964_v35, %v3966_v19  ;;  %v4095_v40 = vadd.f32 %v3966_v19, %v11825_v52  ;;  %5888 = vmatmul.f32.gmra.mxu3 %v12425_v33  ;;  %3522 = vmatmul.f32.gmra.mxu0 %v10034_v12  ;;  %vm4764_vm15 = vweird.f32 %v12500_v2 }
 0x587   : > { %v4736_v22 = vsel %vm12510_vm13, %v12450_v39, %v4732_v34  ;;  %9686 = vpow2.f32 %v9437_v59  ;;  %v4094_v30 = vadd.f32 %v3967_v42, %v11828_v10  ;;  %v4767_v10 = vand.u32 2147483647, %v12447_v62  ;;  %v5439_v59 = vld [vmem:[#allocation3 + $0x88] sm:$0xff]  ;;  %vm12553_vm5 = vmor %vm4763_vm3, %vm4764_vm15 }
 0x588   : > { %v9685_v7 = vpop.eup %9684  ;;  %v4741_v35 = vsel %vm4738_vm14, %v4740_v31, %v4736_v22  ;;  %v4760_v52 = vsub.f32 1.0, %v4759_v37  ;;  %v4153_v33 = vmul.f32 %v12343_v3, %v4095_v40  ;;  %v4770_v22 = vor.u32 1.1754944e-38, %v4769_v17 }
 0x589   : > { %v5286_v8 = vmul.f32 %v4741_v35, %v12354_v20  ;;  %v4744_v32 = vmul.f32 %v9685_v7, %v12465_v38  ;;  %v4152_v39 = vmul.f32 %v12343_v3, %v4094_v30  ;;  %v4752_v20 = vand.u32 2147483647, %v12465_v38  ;;  %v12558_v35 = vpop.f32.mrf.mxu2 }
 0x58a   : > { %v4761_v43 = vmul.f32 %v12500_v2, %v4760_v52  ;;  %v12537_v18 = vadd.f32 %v12351_v60, %v4153_v33  ;;  %vm4749_vm4 = vweird.f32 %v9685_v7  ;;  %15639 = vst [vmem:[#allocation90_spill] sm:$0xff] %v12558_v35  ;;  %vm4768_vm6 = vcmp.eq.f32.partialorder %v4767_v10, 8.507059e+37  ;;  %v10035_v33 = vld [vmem:[#allocation2 + $0x170] sm:$0xff] }
 0x58b   : > { %5340 = vst [vmem:[#allocation3 + $0x90] sm:$0xff] %v5286_v8  ;;  %v4745_v9 = vsub.f32 1.0, %v4744_v32  ;;  %v12542_v19 = vadd.f32 %v12351_v60, %v4152_v39  ;;  %v12544_v34 = vpop.f32.mrf.mxu0  ;;  %v12565_v8 = vpop.f32.mrf.mxu3  ;;  %vm4750_vm8 = vmor %vm4748_vm7, %vm4749_vm4  ;;  %vm4753_vm9 = vcmp.eq.f32.partialorder %v4752_v20, 8.507059e+37 }
 0x58c   : > { %5382 = vst [vmem:[#allocation3 + $0x90] sm:$0x1] %v12246_v36  ;;  %v4762_v31 = vadd.f32 %v12500_v2, %v4761_v43  ;;  %v9439_v37 = vmul.f32 -1.442695, %v12537_v18  ;;  %v5541_v32 = vpop.f32.mrf.mxu1  ;;  %v2785_v43 = vrot.slane %v12001_v26, 2 }
 0x58d   : > { %5580 = vmatmul.f32.gmra.mxu1 %v5439_v59  ;;  %5730 = vmatmul.f32.gmra.mxu2 %v5439_v59  ;;  %v9687_v42 = vpop.eup %9686  ;;  %v4746_v40 = vmul.f32 %v9685_v7, %v4745_v9  ;;  %v9438_v30 = vmul.f32 -1.442695, %v12542_v19  ;;  %15640 = vst [vmem:[#allocation94_spill] sm:$0xff] %v12565_v8  ;;  %v2904_v9 = vadd.f32 %v12494_v1, %v12489_v45  ;;  %v15646_v45 = vld [vmem:[#allocation69_spill] sm:$0xff] }
 0x58e   : > { %v4766_v62 = vsel %vm12553_vm5, %v12500_v2, %v4762_v31  ;;  %v12563_v52 = vadd.f32 1.0, %v9687_v42  ;;  %9688 = vpow2.f32 %v9439_v37  ;;  %5891 = vmatmul.f32.gmra.mxu3 %v5439_v59  ;;  %3525 = vmatmul.f32.gmra.mxu0 %v10035_v33  ;;  %v4755_v2 = vor.u32 1.1754944e-38, %v4754_v51  ;;  %v15641_v59 = vld [vmem:[#allocation89_spill] sm:$0xff]  ;;  %v15642_v42 = vld [vmem:[#allocation22_spill] sm:$0xff] }
 0x58f   : > { %v4747_v39 = vadd.f32 %v9685_v7, %v4746_v40  ;;  %v4771_v17 = vsel %vm4768_vm6, %v4770_v22, %v4766_v62  ;;  %9690 = vpow2.f32 %v9438_v30  ;;  %v2535_v31 = vrot.slane %v15641_v59, 1  ;;  %v15643_v40 = vld [vmem:[#allocation26_spill] sm:$0xff]  ;;  %v15644_v22 = vld [vmem:[#allocation107_spill] sm:$0xff]  ;;  %v15645_v51 = vld [vmem:[#allocation29_spill] sm:$0xff] }
 0x590   : > { %v5288_v10 = vmul.f32 %v4771_v17, %v12393_v49  ;;  %9692 = vrcp.f32 %v12563_v52  ;;  %v3726_v38 = vrot.slane %v15642_v42, 1  ;;  %v3727_v12 = vrot.slane %v15643_v40, 1 }
 0x591   : > { %v4751_v37 = vsel %vm4750_vm8, %v9685_v7, %v4747_v39  ;;  %v2653_v26 = vadd.f32 %v12503_v50, %v15644_v22  ;;  %v2787_v49 = vrot.slane %v15645_v51, 2  ;;  %v2537_v62 = vsel %vm1272_vm1, %v2535_v31, %v2536_v13  ;;  %v15647_v39 = vld [vmem:[#allocation11_spill] sm:$0xff]  ;;  %v15651_v51 = vld [vmem:[#allocation108_spill] sm:$0xff] }
 0x592   : > { %v4756_v30 = vsel %vm4753_vm9, %v4755_v2, %v4751_v37  ;;  %5342 = vst [vmem:[#allocation3 + $0xa0] sm:$0x3] %v5288_v10  ;;  %v15294_v1 = vrot.slane %v15646_v45, 2  ;;  %v2906_v50 = vadd.f32 %v2785_v43, %v12526_v14  ;;  %v2538_v17 = vrot.slane %v15647_v39, 1  ;;  %v15649_v37 = vld [vmem:[#allocation53_spill] sm:$0xff]  ;;  %v15650_v22 = vld [vmem:[#allocation23_spill] sm:$0xff] }
 0x593   : > { %v12585_v7 = vmul.f32 %v4756_v30, %v12401_v0  ;;  %5400 = vst [vmem:[#allocation3 + $0xa1] sm:$0x1] %v12246_v36  ;;  %v12588_v20 = vpop.f32.mrf.mxu0  ;;  %v5440_v33 = vld [vmem:[#allocation3 + $0x90] sm:$0xff]  ;;  %v3968_v2 = vrot.slane %v12544_v34, 2  ;;  %v15648_v0 = vld [vmem:[#allocation83_spill] sm:$0xff]  ;;  %v12599_v42 = vadd.f32 %v15649_v37, %v2904_v9  ;;  %v2786_v14 = vsel %vm1525_vm2, %v2783_v56, %v2785_v43 }
 0x594   : > { %v9689_v32 = vpop.eup %9688  ;;  %v3969_v10 = vrot.slane %v12588_v20, 2  ;;  %v12596_v31 = vadd.f32 %v15648_v0, %v12473_v47  ;;  %v15295_v30 = vrot.slane %v15650_v22, 1  ;;  %v2655_v20 = vadd.f32 %v2537_v62, %v15651_v51  ;;  %v10036_v9 = vld [vmem:[#allocation2 + $0x178] sm:$0xff] }
 0x595   : > { %5582 = vmatmul.f32.gmra.mxu1 %v5440_v33  ;;  %5733 = vmatmul.f32.gmra.mxu2 %v5440_v33  ;;  %v9691_v59 = vpop.eup %9690  ;;  %5341 = vst [vmem:[#allocation3 + $0x98] sm:$0xff] %v12585_v7  ;;  %v12605_v40 = vadd.f32 1.0, %v9689_v32  ;;  %v3728_v23 = vsel %vm1272_vm1, %v3726_v38, %v3727_v12  ;;  %v2789_v56 = vsel %vm1525_vm2, %v2787_v49, %v15294_v1  ;;  %v12621_v32 = vpop.f32.mrf.mxu2  ;;  %v4782_v0 = vand.u32 2147483647, %v12563_v52  ;;  %v15655_v51 = vld [vmem:[#allocation99_spill] sm:$0xff] }
 0x596   : > { %v12607_v34 = vpop.eup %9692  ;;  %v12611_v39 = vadd.f32 1.0, %v9691_v59  ;;  %v3970_v47 = vsel %vm1525_vm2, %v3968_v2, %v3969_v10  ;;  %5894 = vmatmul.f32.gmra.mxu3 %v5440_v33  ;;  %3528 = vmatmul.f32.gmra.mxu0 %v10036_v9  ;;  %15652 = vst [vmem:[#allocation100_spill] sm:$0xff] %v12621_v32  ;;  %v12623_v62 = vadd.f32 %v2786_v14, %v2653_v26  ;;  %v15653_v59 = vld [vmem:[#allocation105_spill] sm:$0xff]  ;;  %v12632_v33 = vpop.f32.mrf.mxu3  ;;  %v4784_v37 = vand.u32 2147483648, %v12563_v52 }
 0x597   : > { %v4774_v43 = vmul.f32 %v12607_v34, %v12563_v52  ;;  %9694 = vrcp.f32 %v12605_v40  ;;  %v12626_v2 = vadd.f32 %v15653_v59, %v2906_v50  ;;  %v2539_v38 = vsel %vm1272_vm1, %v2536_v13, %v2538_v17  ;;  %15654 = vst [vmem:[#allocation97_spill] sm:$0xff] %v12632_v33  ;;  %v15656_v13 = vld [vmem:[#allocation28_spill] sm:$0xff] }
 0x598   : > { %9696 = vrcp.f32 %v12611_v39  ;;  %v4096_v9 = vadd.f32 %v3970_v47, %v15655_v51  ;;  %v12640_v50 = vadd.f32 %v3728_v23, %v12471_v57  ;;  %v12645_v53 = vsel %vm1272_vm1, %v3727_v12, %v15295_v30  ;;  %v15658_v23 = vld [vmem:[#allocation109_spill] sm:$0xff]  ;;  %v15659_v33 = vld [vmem:[#allocation36_spill] sm:$0xff] }
 0x599   : > { %v4775_v49 = vsub.f32 1.0, %v4774_v43  ;;  %v12648_v59 = vadd.f32 %v2789_v56, %v2655_v20  ;;  %v15657_v43 = vld [vmem:[#allocation110_spill] sm:$0xff]  ;;  %vm4779_vm10 = vweird.f32 %v12607_v34  ;;  %v12657_v51 = vadd.f32 %v2539_v38, %v15658_v23  ;;  %v15664_v23 = vld [vmem:[#allocation57_spill] sm:$0xff]  ;;  %v10037_v30 = vld [vmem:[#allocation2 + $0x180] sm:$0xff] }
 0x59a   : > { %v12637_v26 = vpop.f32.mrf.mxu1  ;;  %v12651_v1 = vadd.f32 %v2538_v17, %v15657_v43  ;;  %v4154_v47 = vmul.f32 %v12343_v3, %v4096_v9  ;;  %vm4778_vm11 = vweird.f32 %v12563_v52  ;;  %vm12666_vm12 = vcmp.eq.f32.partialorder %v4782_v0, 8.507059e+37  ;;  %v6479_v0 = vld [vmem:[#allocation6 + $0x260] sm:$0xff] }
 0x59b   : > { %v4776_v6 = vmul.f32 %v12607_v34, %v4775_v49  ;;  %v3484_v57 = vpop.f32.mrf.mxu0  ;;  %v4785_v49 = vor.u32 1.1754944e-38, %v4784_v37  ;;  %vm12677_vm13 = vmor %vm4778_vm11, %vm4779_vm10  ;;  %v4799_v43 = vand.u32 2147483648, %v12611_v39  ;;  %v4812_v21 = vand.u32 2147483647, %v12605_v40  ;;  %6650 = vmatpush.msrb.mxu2 %v6479_v0 }
 0x59c   : > { %v3971_v14 = vrot.slane %v3484_v57, 2  ;;  %v12671_v38 = vadd.f32 %v12351_v60, %v4154_v47  ;;  %v6478_v57 = vld [vmem:[#allocation6 + $0x258] sm:$0xff]  ;;  %v4814_v35 = vand.u32 2147483648, %v12605_v40  ;;  %vm4808_vm3 = vweird.f32 %v12605_v40 }
 0x59d   : > { %5585 = vmatmul.f32.gmra.mxu1 %v12585_v7  ;;  %5736 = vmatmul.f32.gmra.mxu2 %v12585_v7  ;;  %v12663_v17 = vpop.eup %9694  ;;  %v4777_v20 = vadd.f32 %v12607_v34, %v4776_v6  ;;  %vm4793_vm4 = vweird.f32 %v12611_v39  ;;  %vm4813_vm7 = vcmp.eq.f32.partialorder %v4812_v21, 8.507059e+37 }
 0x59e   : > { %v12673_v9 = vpop.eup %9696  ;;  %v4804_v6 = vmul.f32 %v12663_v17, %v12605_v40  ;;  %v3972_v37 = vsel %vm1525_vm2, %v3969_v10, %v3971_v14  ;;  %v4098_v47 = vadd.f32 %v3971_v14, %v15664_v23  ;;  %5897 = vmatmul.f32.gmra.mxu3 %v12585_v7  ;;  %3531 = vmatmul.f32.gmra.mxu0 %v10037_v30  ;;  %v9440_v8 = vmul.f32 -1.442695, %v12671_v38  ;;  %v15665_v30 = vld [vmem:[#allocation84_spill] sm:$0xff] }
 0x59f   : > { %v4781_v12 = vsel %vm12677_vm13, %v12607_v34, %v4777_v20  ;;  %v4789_v32 = vmul.f32 %v12673_v9, %v12611_v39  ;;  %6505 = vmatpush.msrb.mxu1 %v6478_v57  ;;  %v4097_v23 = vadd.f32 %v3972_v37, %v15665_v30  ;;  %vm4809_vm14 = vweird.f32 %v12663_v17  ;;  %v5442_v37 = vld [vmem:[#allocation3 + $0xa0] sm:$0xff] }
 0x5a0   : > { %v12694_v10 = vpop.f32.mrf.mxu2  ;;  %v4786_v7 = vsel %vm12666_vm12, %v4785_v49, %v4781_v12  ;;  %v4805_v14 = vsub.f32 1.0, %v4804_v6  ;;  %v4156_v52 = vmul.f32 %v12343_v3, %v4098_v47  ;;  %9698 = vpow2.f32 %v9440_v8  ;;  %v15666_v49 = vld [vmem:[#allocation32_spill] sm:$0xff]  ;;  %vm4810_vm5 = vmor %vm4808_vm3, %vm4809_vm14 }
 0x5a1   : > { %v12700_v34 = vpop.f32.mrf.mxu3  ;;  %v5289_v20 = vmul.f32 %v4786_v7, %v12481_v54  ;;  %v4790_v41 = vsub.f32 1.0, %v4789_v32  ;;  %v4155_v12 = vmul.f32 %v12343_v3, %v4097_v23  ;;  %v15296_v6 = vrot.slane %v15666_v49, 1 }
 0x5a2   : > { %v12704_v0 = vpop.f32.mrf.mxu1  ;;  %v4806_v57 = vmul.f32 %v12663_v17, %v4805_v14  ;;  %v12710_v56 = vadd.f32 %v12351_v60, %v4156_v52  ;;  %vm4794_vm15 = vweird.f32 %v12673_v9  ;;  %v4797_v8 = vand.u32 2147483647, %v12611_v39  ;;  %v10038_v52 = vld [vmem:[#allocation2 + $0x188] sm:$0xff] }
 0x5a3   : > { %5343 = vst [vmem:[#allocation3 + $0xa8] sm:$0xff] %v5289_v20  ;;  %v4791_v54 = vmul.f32 %v12673_v9, %v4790_v41  ;;  %v12716_v32 = vpop.f32.mrf.mxu0  ;;  %v12722_v7 = vadd.f32 %v12351_v60, %v4155_v12  ;;  %v4800_v30 = vor.u32 1.1754944e-38, %v4799_v43  ;;  %vm4795_vm6 = vmor %vm4793_vm4, %vm4794_vm15  ;;  %v15667_v39 = vrot.slane %v15659_v33, 2 }
 0x5a4   : > { %5383 = vst [vmem:[#allocation3 + $0xa8] sm:$0x1] %v12246_v36  ;;  %v4807_v47 = vadd.f32 %v12663_v17, %v4806_v57  ;;  %v9442_v14 = vmul.f32 -1.442695, %v12710_v56  ;;  %v4815_v36 = vor.u32 1.1754944e-38, %v4814_v35  ;;  %v15668_v43 = vrot.slane %v15646_v45, 2 }
 0x5a5   : > { %5588 = vmatmul.f32.gmra.mxu1 %v5442_v37  ;;  %5739 = vmatmul.f32.gmra.mxu2 %v5442_v37  ;;  %v4792_v41 = vadd.f32 %v12673_v9, %v4791_v54  ;;  %v9441_v23 = vmul.f32 -1.442695, %v12722_v7  ;;  %vm4798_vm8 = vcmp.eq.f32.partialorder %v4797_v8, 8.507059e+37 }
 0x5a6   : > { %v4811_v40 = vsel %vm4810_vm5, %v12663_v17, %v4807_v47  ;;  %9700 = vpow2.f32 %v9442_v14  ;;  %5900 = vmatmul.f32.gmra.mxu3 %v5442_v37  ;;  %3534 = vmatmul.f32.gmra.mxu0 %v10038_v52  ;;  %v9699_v20 = vpop.eup %9698  ;;  %v2791_v57 = vsel %vm1525_vm2, %v15668_v43, %v15667_v39  ;;  %v15669_v37 = vmov %v15667_v39  ;;  %v15673_v43 = vld [vmem:[#allocation88_spill] sm:$0xff] }
 0x5a7   : > { %v4796_v35 = vsel %vm4795_vm6, %v12673_v9, %v4792_v41  ;;  %v4816_v12 = vsel %vm4813_vm7, %v4815_v36, %v4811_v40  ;;  %v12742_v47 = vadd.f32 1.0, %v9699_v20  ;;  %9702 = vpow2.f32 %v9441_v23  ;;  %v12780_v20 = vld [vmem:[#allocation2] sm:$0xff] }
 0x5a8   : > { %v12739_v54 = vpop.f32.mrf.mxu2  ;;  %v4801_v21 = vsel %vm4798_vm8, %v4800_v30, %v4796_v35  ;;  %v5291_v17 = vmul.f32 %v4816_v12, %v12537_v18  ;;  %v2909_v14 = vadd.f32 %v15669_v37, %v12651_v1  ;;  %v6070_v52 = vrot.slane %v12694_v10, 1  ;;  %v15671_v1 = vld [vmem:[#allocation58_spill] sm:$0xff]  ;;  %v15674_v35 = vld [vmem:[#allocation12_spill] sm:$0xff] }
 0x5a9   : > { %v12748_v45 = vmul.f32 %v4801_v21, %v12542_v19  ;;  %v6071_v9 = vrot.slane %v12739_v54, 1  ;;  %v12752_v8 = vpop.f32.mrf.mxu3  ;;  %v12756_v18 = vadd.f32 %v12645_v53, %v12596_v31  ;;  %v15670_v30 = vrot.slane %v15650_v22, 1 }
 0x5aa   : > { %v5549_v41 = vpop.f32.mrf.mxu1  ;;  %v12765_v19 = vadd.f32 %v15671_v1, %v12623_v62  ;;  %5345 = vst [vmem:[#allocation3 + $0xb8] sm:$0x3] %v5291_v17  ;;  %9704 = vrcp.f32 %v12742_v47  ;;  %v2908_v33 = vadd.f32 %v2791_v57, %v12657_v51  ;;  %v6262_v10 = vrot.slane %v12700_v34, 2  ;;  %v15675_v17 = vld [vmem:[#allocation92_spill] sm:$0xff] }
 0x5ab   : > { %v12761_v36 = vadd.f32 %v15670_v30, %v12486_v29  ;;  %5344 = vst [vmem:[#allocation3 + $0xb0] sm:$0xff] %v12748_v45  ;;  %v6072_v31 = vsel %vm1272_vm1, %v6070_v52, %v6071_v9  ;;  %v6263_v53 = vrot.slane %v12752_v8, 2  ;;  %v12773_v22 = vpop.f32.mrf.mxu0  ;;  %v5443_v29 = vld [vmem:[#allocation3 + $0xa8] sm:$0xff]  ;;  %v15672_v62 = vrot.slane %v15656_v13, 1 }
 0x5ac   : > { %v9701_v40 = vpop.eup %9700  ;;  %5401 = vst [vmem:[#allocation3 + $0xb9] sm:$0x1] %v12780_v20  ;;  %v3973_v51 = vrot.slane %v12716_v32, 2  ;;  %v3974_v34 = vrot.slane %v12773_v22, 2  ;;  %v6179_v39 = vadd.f32 %v6072_v31, %v12637_v26  ;;  %v12788_v57 = vadd.f32 %v15673_v43, %v12648_v59  ;;  %v10040_v26 = vld [vmem:[#allocation2 + $0x190] sm:$0xff]  ;;  %v15678_v31 = vld [vmem:[#allocation16_spill] sm:$0xff] }
 0x5ad   : > { %v3733_v23 = vsel %vm1272_vm1, %v15672_v62, %v15296_v6  ;;  %5590 = vmatmul.f32.gmra.mxu1 %v5443_v29  ;;  %5742 = vmatmul.f32.gmra.mxu2 %v5443_v29  ;;  %v12791_v13 = vadd.f32 %v15674_v35, %v2909_v14  ;;  %v12793_v12 = vadd.f32 1.0, %v9701_v40  ;;  %v6264_v54 = vsel %vm1525_vm2, %v6262_v10, %v6263_v53  ;;  %v9703_v21 = vpop.eup %9702  ;;  %v15677_v14 = vld [vmem:[#allocation59_spill] sm:$0xff]  ;;  %v15679_v40 = vld [vmem:[#allocation54_spill] sm:$0xff] }
 0x5ae   : > { %v15297_v32 = vrot.slane %v15675_v17, 1  ;;  %v4827_v37 = vand.u32 2147483647, %v12742_v47  ;;  %v3975_v52 = vsel %vm1525_vm2, %v3973_v51, %v3974_v34  ;;  %5903 = vmatmul.f32.gmra.mxu3 %v5443_v29  ;;  %3537 = vmatmul.f32.gmra.mxu0 %v10040_v26  ;;  %v12799_v8 = vadd.f32 %v6264_v54, %v6179_v39  ;;  %v15680_v39 = vld [vmem:[#allocation31_spill] sm:$0xff]  ;;  %v15682_v26 = vld [vmem:[#allocation37_spill] sm:$0xff] }
 0x5af   : > { %v12802_v59 = vadd.f32 %v3733_v23, %v12599_v42  ;;  %v12805_v41 = vadd.f32 %v15677_v14, %v2908_v33  ;;  %v12807_v30 = vadd.f32 1.0, %v9703_v21  ;;  %9706 = vrcp.f32 %v12793_v12  ;;  %v15681_v42 = vld [vmem:[#allocation38_spill] sm:$0xff] }
 0x5b0   : > { %15676 = vst [vmem:[#allocation103_spill] sm:$0xff] %v12799_v8  ;;  %v5695_v1 = vpop.f32.mrf.mxu2  ;;  %v9705_v10 = vpop.eup %9704  ;;  %v2540_v22 = vrot.slane %v15678_v31, 1  ;;  %v4829_v29 = vand.u32 2147483648, %v12742_v47  ;;  %v4099_v62 = vadd.f32 %v3975_v52, %v15679_v40  ;;  %vm4823_vm9 = vweird.f32 %v12742_v47  ;;  %v15685_v8 = vld [vmem:[#allocation102_spill] sm:$0xff] }
 0x5b1   : > { %v6073_v51 = vrot.slane %v5695_v1, 1  ;;  %v4819_v33 = vmul.f32 %v9705_v10, %v12742_v47  ;;  %9708 = vrcp.f32 %v12807_v30  ;;  %v5856_v35 = vpop.f32.mrf.mxu3  ;;  %vm12826_vm10 = vcmp.eq.f32.partialorder %v4827_v37, 8.507059e+37 }
 0x5b2   : > { %v12817_v54 = vpop.f32.mrf.mxu1  ;;  %v12822_v21 = vsel %vm1272_vm1, %v2540_v22, %v15297_v32  ;;  %v4157_v31 = vmul.f32 %v12343_v3, %v4099_v62  ;;  %v6265_v23 = vrot.slane %v5856_v35, 2  ;;  %v4830_v43 = vor.u32 1.1754944e-38, %v4829_v29 }
 0x5b3   : > { %v4820_v1 = vsub.f32 1.0, %v4819_v33  ;;  %v6074_v40 = vsel %vm1272_vm1, %v6071_v9, %v6073_v51  ;;  %v3493_v6 = vpop.f32.mrf.mxu0  ;;  %vm4853_vm11 = vweird.f32 %v12793_v12  ;;  %vm4824_vm12 = vweird.f32 %v9705_v10  ;;  %v6476_v51 = vld [vmem:[#allocation6 + $0x248] sm:$0xff]  ;;  %v6475_v33 = vld [vmem:[#allocation6 + $0x240] sm:$0xff] }
 0x5b4   : > { %v3976_v22 = vrot.slane %v3493_v6, 2  ;;  %v6180_v37 = vadd.f32 %v6074_v40, %v12704_v0  ;;  %v12839_v62 = vadd.f32 %v12351_v60, %v4157_v31  ;;  %v6266_v9 = vsel %vm1525_vm2, %v6263_v53, %v6265_v23  ;;  %6651 = vmatpush.msrb.mxu2 %v6476_v51  ;;  %6506 = vmatpush.msrb.mxu1 %v6475_v33  ;;  %v15686_v23 = vld [vmem:[#allocation86_spill] sm:$0xff]  ;;  %vm4825_vm13 = vmor %vm4823_vm9, %vm4824_vm12 }
 0x5b5   : > { %5593 = vmatmul.f32.gmra.mxu1 %v12748_v45  ;;  %5745 = vmatmul.f32.gmra.mxu2 %v12748_v45  ;;  %v12836_v32 = vpop.eup %9706  ;;  %v4821_v14 = vmul.f32 %v9705_v10, %v4820_v1  ;;  %v4857_v6 = vand.u32 2147483647, %v12793_v12  ;;  %v10041_v1 = vld [vmem:[#allocation2 + $0x198] sm:$0xff]  ;;  %vm4838_vm3 = vweird.f32 %v12807_v30 }
 0x5b6   : > { %v4849_v29 = vmul.f32 %v12836_v32, %v12793_v12  ;;  %v3977_v35 = vsel %vm1525_vm2, %v3974_v34, %v3976_v22  ;;  %v4101_v0 = vadd.f32 %v3976_v22, %v15685_v8  ;;  %5906 = vmatmul.f32.gmra.mxu3 %v12748_v45  ;;  %3540 = vmatmul.f32.gmra.mxu0 %v10041_v1  ;;  %v9443_v53 = vmul.f32 -1.442695, %v12839_v62 }
 0x5b7   : > { %v12848_v40 = vpop.eup %9708  ;;  %v4822_v31 = vadd.f32 %v9705_v10, %v4821_v14  ;;  %v4100_v24 = vadd.f32 %v3977_v35, %v15686_v23  ;;  %v12854_v46 = vadd.f32 %v6266_v9, %v6180_v37  ;;  %v4859_v8 = vand.u32 2147483648, %v12793_v12 }
 0x5b8   : > { %v12852_v63 = vpop.f32.mrf.mxu2  ;;  %v4834_v45 = vmul.f32 %v12848_v40, %v12807_v30  ;;  %v4850_v34 = vsub.f32 1.0, %v4849_v29  ;;  %v4159_v14 = vmul.f32 %v12343_v3, %v4101_v0  ;;  %vm4854_vm14 = vweird.f32 %v12836_v32 }
 0x5b9   : > { %15687 = vst [vmem:[#allocation106_spill] sm:$0xff] %v12854_v46  ;;  %v4826_v22 = vsel %vm4825_vm13, %v9705_v10, %v4822_v31  ;;  %9710 = vpow2.f32 %v9443_v53  ;;  %v4158_v51 = vmul.f32 %v12343_v3, %v4100_v24  ;;  %v12865_v37 = vpop.f32.mrf.mxu3  ;;  %v4842_v0 = vand.u32 2147483647, %v12807_v30  ;;  %v5445_v31 = vld [vmem:[#allocation3 + $0xb8] sm:$0xff]  ;;  %vm12893_vm4 = vmor %vm4853_vm11, %vm4854_vm14  ;;  %v13008_v46 = vld [vmem:[%s15228_s2] ss:$0 sm:$0xff] }
 0x5ba   : > { %v12867_v9 = vpop.f32.mrf.mxu1  ;;  %v4831_v47 = vsel %vm12826_vm10, %v4830_v43, %v4826_v22  ;;  %v4835_v33 = vsub.f32 1.0, %v4834_v45  ;;  %v4851_v29 = vmul.f32 %v12836_v32, %v4850_v34  ;;  %v12873_v35 = vadd.f32 %v12351_v60, %v4159_v14 }
 0x5bb   : > { %v5292_v10 = vmul.f32 %v4831_v47, %v12671_v38  ;;  %v4844_v1 = vand.u32 2147483648, %v12807_v30  ;;  %v12879_v3 = vadd.f32 %v12351_v60, %v4158_v51  ;;  %v12881_v24 = vpop.f32.mrf.mxu0  ;;  %vm4839_vm15 = vweird.f32 %v12848_v40  ;;  %v15688_v38 = vld [vmem:[#allocation95_spill] sm:$0xff]  ;;  %v10042_v30 = vld [vmem:[#allocation2 + $0x1a0] sm:$0xff] }
 0x5bc   : > { %v4836_v43 = vmul.f32 %v12848_v40, %v4835_v33  ;;  %v4852_v52 = vadd.f32 %v12836_v32, %v4851_v29  ;;  %v9445_v53 = vmul.f32 -1.442695, %v12873_v35  ;;  %v2543_v23 = vrot.slane %v15688_v38, 1  ;;  %vm4840_vm6 = vmor %vm4838_vm3, %vm4839_vm15  ;;  %v15694_v38 = vld [vmem:[#allocation70_spill] sm:$0xff] }
 0x5bd   : > { %5596 = vmatmul.f32.gmra.mxu1 %v5445_v31  ;;  %5748 = vmatmul.f32.gmra.mxu2 %v5445_v31  ;;  %5346 = vst [vmem:[#allocation3 + $0xc0] sm:$0xff] %v5292_v10  ;;  %v4860_v45 = vor.u32 1.1754944e-38, %v4859_v8  ;;  %v9444_v34 = vmul.f32 -1.442695, %v12879_v3  ;;  %vm4858_vm5 = vcmp.eq.f32.partialorder %v4857_v6, 8.507059e+37  ;;  %vm4843_vm7 = vcmp.eq.f32.partialorder %v4842_v0, 8.507059e+37 }
 0x5be   : > { %5384 = vst [vmem:[#allocation3 + $0xc0] sm:$0x1] %v12780_v20  ;;  %v4837_v14 = vadd.f32 %v12848_v40, %v4836_v43  ;;  %v4856_v22 = vsel %vm12893_vm4, %v12836_v32, %v4852_v52  ;;  %9712 = vpow2.f32 %v9445_v53  ;;  %5909 = vmatmul.f32.gmra.mxu3 %v5445_v31  ;;  %3543 = vmatmul.f32.gmra.mxu0 %v10042_v30  ;;  %v4845_v8 = vor.u32 1.1754944e-38, %v4844_v1 }
 0x5bf   : > { %v9711_v12 = vpop.eup %9710  ;;  %v4861_v51 = vsel %vm4858_vm5, %v4860_v45, %v4856_v22  ;;  %9714 = vpow2.f32 %v9444_v34  ;;  %v15691_v10 = vrot.slane %v15680_v39, 1  ;;  %v15692_v31 = vrot.slane %v15666_v49, 1  ;;  %v15695_v45 = vld [vmem:[#allocation111_spill] sm:$0xff] }
 0x5c0   : > { %v12905_v47 = vpop.f32.mrf.mxu2  ;;  %v4841_v33 = vsel %vm4840_vm6, %v12848_v40, %v4837_v14  ;;  %v5294_v29 = vmul.f32 %v4861_v51, %v12710_v56  ;;  %v12909_v32 = vadd.f32 1.0, %v9711_v12  ;;  %v6075_v40 = vrot.slane %v12852_v63, 1 }
 0x5c1   : > { %v15299_v6 = vrot.slane %v12905_v47, 1  ;;  %v12917_v43 = vsel %vm1272_vm1, %v15692_v31, %v15691_v10  ;;  %v15693_v0 = vmov %v15691_v10  ;;  %v4846_v52 = vsel %vm4843_vm7, %v4845_v8, %v4841_v33  ;;  %v12925_v56 = vpop.f32.mrf.mxu3  ;;  %v15699_v8 = vld [vmem:[#allocation73_spill] sm:$0xff]  ;;  %v15700_v10 = vld [vmem:[#allocation20_spill] sm:$0xff] }
 0x5c2   : > { %v12922_v1 = vadd.f32 %v15693_v0, %v12626_v2  ;;  %v5557_v53 = vpop.f32.mrf.mxu1  ;;  %v12930_v34 = vadd.f32 %v12822_v21, %v15695_v45  ;;  %v12933_v49 = vmul.f32 %v4846_v52, %v12722_v7  ;;  %5348 = vst [vmem:[#allocation3 + $0xd0] sm:$0x3] %v5294_v29  ;;  %9716 = vrcp.f32 %v12909_v32 }
 0x5c3   : > { %v15696_v2 = vrot.slane %v15682_v26, 2  ;;  %v15697_v39 = vrot.slane %v15681_v42, 2  ;;  %5402 = vst [vmem:[#allocation3 + $0xd1] sm:$0x1] %v12780_v20  ;;  %v6267_v14 = vrot.slane %v12865_v37, 2  ;;  %v6077_v21 = vsel %vm1272_vm1, %v6075_v40, %v15299_v6  ;;  %v12949_v22 = vpop.f32.mrf.mxu0 }
 0x5c4   : > { %v6268_v7 = vrot.slane %v12925_v56, 2  ;;  %v9713_v30 = vpop.eup %9712  ;;  %v15698_v12 = vrot.slane %v15675_v17, 1  ;;  %v15298_v51 = vrot.slane %v15699_v8, 2  ;;  %5347 = vst [vmem:[#allocation3 + $0xc8] sm:$0xff] %v12933_v49  ;;  %v3979_v33 = vrot.slane %v12949_v22, 2  ;;  %v15701_v56 = vld [vmem:[#allocation113_spill] sm:$0xff] }
 0x5c5   : > { %v12941_v63 = vsel %vm1525_vm2, %v15697_v39, %v15696_v2  ;;  %v6181_v37 = vadd.f32 %v6077_v21, %v12817_v54  ;;  %v9715_v29 = vpop.eup %9714  ;;  %v15300_v31 = vrot.slane %v15700_v10, 1  ;;  %v12959_v0 = vadd.f32 1.0, %v9713_v30  ;;  %v5446_v40 = vld [vmem:[#allocation3 + $0xc0] sm:$0xff]  ;;  %v15703_v39 = vld [vmem:[#allocation10_spill] sm:$0xff] }
 0x5c6   : > { %v2544_v42 = vsel %vm1272_vm1, %v15698_v12, %v2543_v23  ;;  %v3978_v52 = vrot.slane %v12881_v24, 2  ;;  %v6269_v17 = vsel %vm1525_vm2, %v6267_v14, %v6268_v7  ;;  %v12964_v53 = vadd.f32 %v2543_v23, %v15701_v56  ;;  %5598 = vmatmul.f32.gmra.mxu1 %v5446_v40  ;;  %5751 = vmatmul.f32.gmra.mxu2 %v5446_v40  ;;  %v10043_v14 = vld [vmem:[#allocation2 + $0x1a8] sm:$0xff]  ;;  %v15704_v12 = vld [vmem:[#allocation34_spill] sm:$0xff]  ;;  %v15705_v56 = vld [vmem:[#allocation112_spill] sm:$0xff] }
 0x5c7   : > { %v4872_v45 = vand.u32 2147483647, %v12909_v32  ;;  %v12967_v2 = vadd.f32 1.0, %v9715_v29  ;;  %v12969_v54 = vadd.f32 %v6269_v17, %v6181_v37  ;;  %v2545_v21 = vrot.slane %v15703_v39, 1  ;;  %5912 = vmatmul.f32.gmra.mxu3 %v5446_v40  ;;  %3546 = vmatmul.f32.gmra.mxu0 %v10043_v14 }
 0x5c8   : > { %v4874_v22 = vand.u32 2147483648, %v12909_v32  ;;  %9718 = vrcp.f32 %v12959_v0  ;;  %v3980_v24 = vsel %vm1525_vm2, %v3978_v52, %v3979_v33  ;;  %v5704_v23 = vpop.f32.mrf.mxu2  ;;  %v9717_v30 = vpop.eup %9716  ;;  %v12977_v60 = vadd.f32 %v2544_v42, %v15705_v56  ;;  %v15707_v52 = vld [vmem:[#allocation40_spill] sm:$0xff] }
 0x5c9   : > { %15702 = vst [vmem:[#allocation89_spill] sm:$0xff] %v12969_v54  ;;  %v15706_v37 = vrot.slane %v15682_v26, 2  ;;  %9720 = vrcp.f32 %v12967_v2  ;;  %v12991_v39 = vsel %vm1272_vm1, %v2545_v21, %v15300_v31  ;;  %v4864_v42 = vmul.f32 %v9717_v30, %v12909_v32  ;;  %v5865_v56 = vpop.f32.mrf.mxu3 }
 0x5ca   : > { %v12995_v29 = vpop.f32.mrf.mxu1  ;;  %vm4868_vm8 = vweird.f32 %v12909_v32  ;;  %vm12998_vm9 = vcmp.eq.f32.partialorder %v4872_v45, 8.507059e+37  ;;  %v4875_v6 = vor.u32 1.1754944e-38, %v4874_v22  ;;  %v4902_v21 = vand.u32 2147483647, %v12959_v0 }
 0x5cb   : > { %v12984_v17 = vsel %vm1525_vm2, %v15706_v37, %v15298_v51  ;;  %v4102_v37 = vadd.f32 %v3980_v24, %v12640_v50  ;;  %v6078_v51 = vrot.slane %v5704_v23, 1  ;;  %v4865_v40 = vsub.f32 1.0, %v4864_v42  ;;  %v3502_v14 = vpop.f32.mrf.mxu0 }
 0x5cc   : > { %v6270_v31 = vrot.slane %v5865_v56, 2  ;;  %v4904_v54 = vand.u32 2147483648, %v12959_v0  ;;  %v15710_v4 = vrot.slane %v12905_v47, 1  ;;  %v3981_v24 = vrot.slane %v3502_v14, 2  ;;  %v6472_v14 = vld [vmem:[#allocation6 + $0x228] sm:$0xff] }
 0x5cd   : > { %v4160_v45 = vmul.f32 %v13008_v46, %v4102_v37  ;;  %v4866_v22 = vmul.f32 %v9717_v30, %v4865_v40  ;;  %vm4869_vm10 = vweird.f32 %v9717_v30  ;;  %v4887_v55 = vand.u32 2147483647, %v12967_v2  ;;  %v6473_v40 = vld [vmem:[#allocation6 + $0x230] sm:$0xff]  ;;  %6507 = vmatpush.msrb.mxu1 %v6472_v14 }
 0x5ce   : > { %v6079_v50 = vsel %vm1272_vm1, %v15710_v4, %v6078_v51  ;;  %v13014_v23 = vpop.eup %9718  ;;  %v6271_v56 = vsel %vm1525_vm2, %v6268_v7, %v6270_v31  ;;  %v13026_v4 = vld [vmem:[%s15229_s3] ss:$0 sm:$0xff]  ;;  %v3982_v51 = vsel %vm1525_vm2, %v3979_v33, %v3981_v24  ;;  %5601 = vmatmul.f32.gmra.mxu1 %v12933_v49  ;;  %5754 = vmatmul.f32.gmra.mxu2 %v12933_v49  ;;  %v4889_v31 = vand.u32 2147483648, %v12967_v2  ;;  %vm4870_vm11 = vmor %vm4868_vm8, %vm4869_vm10 }
 0x5cf   : > { %v6182_v42 = vadd.f32 %v6079_v50, %v12867_v9  ;;  %v13018_v61 = vpop.eup %9720  ;;  %v4894_v37 = vmul.f32 %v13014_v23, %v12959_v0  ;;  %v13029_v47 = vadd.f32 %v13026_v4, %v4160_v45  ;;  %v4867_v9 = vadd.f32 %v9717_v30, %v4866_v22  ;;  %5915 = vmatmul.f32.gmra.mxu3 %v12933_v49 }
 0x5d0   : > { %v4879_v7 = vmul.f32 %v13018_v61, %v12967_v2  ;;  %v4103_v50 = vadd.f32 %v3982_v51, %v12756_v18  ;;  %3549 = vmatmul.f32.gmra.mxu0 %v12780_v20  ;;  %v13040_v45 = vpop.f32.mrf.mxu2  ;;  %vm4899_vm12 = vweird.f32 %v13014_v23  ;;  %6652 = vmatpush.msrb.mxu2 %v6473_v40  ;;  %v4104_v16 = vadd.f32 %v3981_v24, %v12761_v36 }
 0x5d1   : > { %v4895_v33 = vsub.f32 1.0, %v4894_v37  ;;  %v9446_v22 = vmul.f32 -1.442695, %v13029_v47  ;;  %v4871_v18 = vsel %vm4870_vm11, %v9717_v30, %v4867_v9  ;;  %v13049_v15 = vpop.f32.mrf.mxu3  ;;  %v13053_v44 = vadd.f32 %v6271_v56, %v6182_v42  ;;  %v5448_v56 = vld [vmem:[#allocation3 + $0xd0] sm:$0xff] }
 0x5d2   : > { %v4880_v51 = vsub.f32 1.0, %v4879_v7  ;;  %v4161_v49 = vmul.f32 %v13008_v46, %v4103_v50  ;;  %v13051_v27 = vpop.f32.mrf.mxu1  ;;  %v4876_v32 = vsel %vm12998_vm9, %v4875_v6, %v4871_v18  ;;  %v4162_v40 = vmul.f32 %v13008_v46, %v4104_v16  ;;  %v15713_v18 = vld [vmem:[#allocation33_spill] sm:$0xff] }
 0x5d3   : > { %v4896_v37 = vmul.f32 %v13014_v23, %v4895_v33  ;;  %9722 = vpow2.f32 %v9446_v22  ;;  %v5295_v36 = vmul.f32 %v4876_v32, %v12839_v62  ;;  %vm4884_vm13 = vweird.f32 %v13018_v61  ;;  %v13065_v9 = vpop.f32.mrf.mxu0 }
 0x5d4   : > { %v4881_v30 = vmul.f32 %v13018_v61, %v4880_v51  ;;  %v13063_v24 = vadd.f32 %v13026_v4, %v4161_v49  ;;  %vm4883_vm14 = vweird.f32 %v12967_v2  ;;  %vm4898_vm15 = vweird.f32 %v12959_v0  ;;  %v15714_v49 = vld [vmem:[#allocation114_spill] sm:$0xff] }
 0x5d5   : > { %v4897_v6 = vadd.f32 %v13014_v23, %v4896_v37  ;;  %v13071_v26 = vadd.f32 %v13026_v4, %v4162_v40  ;;  %5349 = vst [vmem:[#allocation3 + $0xd8] sm:$0xff] %v5295_v36  ;;  %vm4900_vm3 = vmor %vm4898_vm15, %vm4899_vm12  ;;  %vm4903_vm4 = vcmp.eq.f32.partialorder %v4902_v21, 8.507059e+37  ;;  %v4905_v62 = vor.u32 1.1754944e-38, %v4904_v54 }
 0x5d6   : > { %v4882_v16 = vadd.f32 %v13018_v61, %v4881_v30  ;;  %v9447_v42 = vmul.f32 -1.442695, %v13063_v24  ;;  %5385 = vst [vmem:[#allocation3 + $0xd8] sm:$0x1] %v12780_v20  ;;  %vm13080_vm5 = vmor %vm4883_vm14, %vm4884_vm13  ;;  %vm4888_vm6 = vcmp.eq.f32.partialorder %v4887_v55, 8.507059e+37  ;;  %v4890_v2 = vor.u32 1.1754944e-38, %v4889_v31  ;;  %5604 = vmatmul.f32.gmra.mxu1 %v5448_v56  ;;  %5757 = vmatmul.f32.gmra.mxu2 %v5448_v56 }
 0x5d7   : > { %v4901_v7 = vsel %vm4900_vm3, %v13014_v23, %v4897_v6  ;;  %v9448_v14 = vmul.f32 -1.442695, %v13071_v26  ;;  %v6080_v50 = vrot.slane %v13040_v45, 1  ;;  %5918 = vmatmul.f32.gmra.mxu3 %v5448_v56  ;;  %v3739_v51 = vrot.slane %v15713_v18, 1  ;;  %v7477_v56 = vld [vmem:[#allocation6 + $0x468] sm:$0xff]  ;;  %v15722_v18 = vld [vmem:[#allocation18_spill] sm:$0xff] }
 0x5d8   : > { %v4886_v54 = vsel %vm13080_vm5, %v13018_v61, %v4882_v16  ;;  %v4906_v21 = vsel %vm4903_vm4, %v4905_v62, %v4901_v7  ;;  %9724 = vpow2.f32 %v9447_v42  ;;  %3552 = vmatmul.f32.gmra.mxu0 %v12780_v20  ;;  %v13091_v33 = vpop.f32.mrf.mxu2  ;;  %v2661_v61 = vadd.f32 %v12991_v39, %v15714_v49 }
 0x5d9   : > { %v9723_v55 = vpop.eup %9722  ;;  %v4891_v31 = vsel %vm4888_vm6, %v4890_v2, %v4886_v54  ;;  %v5297_v23 = vmul.f32 %v4906_v21, %v12873_v35  ;;  %9726 = vpow2.f32 %v9448_v14  ;;  %v6081_v22 = vrot.slane %v13091_v33, 1  ;;  %v13103_v37 = vpop.f32.mrf.mxu3  ;;  %7480 = vmatpush.msra.mxu0 %v7477_v56  ;;  %v7474_v21 = vld [vmem:[#allocation6 + $0x450] sm:$0xff]  ;;  %v7465_v33 = vld [vmem:[#allocation6 + $0x408] sm:$0xff] }
 0x5da   : > { %v13099_v32 = vmul.f32 %v4891_v31, %v12879_v3  ;;  %v13101_v45 = vadd.f32 1.0, %v9723_v55  ;;  %v5565_v40 = vpop.f32.mrf.mxu1  ;;  %v15715_v36 = vrot.slane %v12110_v58, 2  ;;  %v15716_v35 = vrot.slane %v15707_v52, 2  ;;  %v15721_v55 = vld [vmem:[#allocation101_spill] sm:$0xff] }
 0x5db   : > { %5351 = vst [vmem:[#allocation3 + $0xe8] sm:$0x3] %v5297_v23  ;;  %v6272_v6 = vrot.slane %v13049_v15, 2  ;;  %v6082_v39 = vsel %vm1272_vm1, %v6080_v50, %v6081_v22  ;;  %v6273_v3 = vrot.slane %v13103_v37, 2  ;;  %v13117_v16 = vadd.f32 %v12917_v43, %v12765_v19  ;;  %v13126_v15 = vpop.f32.mrf.mxu0  ;;  %7481 = vmatpush.msra.mxu0 %v7474_v21 }
 0x5dc   : > { %v2799_v30 = vsel %vm1525_vm2, %v15716_v35, %v15715_v36  ;;  %v2910_v62 = vadd.f32 %v12941_v63, %v12930_v34  ;;  %v15717_v52 = vrot.slane %v15699_v8, 2  ;;  %5350 = vst [vmem:[#allocation3 + $0xe0] sm:$0xff] %v13099_v32  ;;  %9728 = vrcp.f32 %v13101_v45  ;;  %v7471_v35 = vld [vmem:[#allocation6 + $0x438] sm:$0xff] }
 0x5dd   : > { %5403 = vst [vmem:[#allocation3 + $0xe9] sm:$0x1] %v12780_v20  ;;  %v3983_v0 = vrot.slane %v13065_v9, 2  ;;  %v3984_v19 = vrot.slane %v13126_v15, 2  ;;  %v6183_v43 = vadd.f32 %v6082_v39, %v12995_v29  ;;  %v6274_v34 = vsel %vm1525_vm2, %v6272_v6, %v6273_v3  ;;  %v5449_v29 = vld [vmem:[#allocation3 + $0xd8] sm:$0xff]  ;;  %7482 = vmatpush.msra.mxu0 %v7471_v35  ;;  %v6470_v35 = vld [vmem:[#allocation6 + $0x218] sm:$0xff] }
 0x5de   : > { %v2912_v42 = vadd.f32 %v15717_v52, %v12964_v53  ;;  %v9725_v63 = vpop.eup %9724  ;;  %v15718_v8 = vrot.slane %v15704_v12, 1  ;;  %v15719_v53 = vrot.slane %v15694_v38, 1  ;;  %v2911_v14 = vadd.f32 %v12984_v17, %v12977_v60  ;;  %5606 = vmatmul.f32.gmra.mxu1 %v5449_v29  ;;  %5760 = vmatmul.f32.gmra.mxu2 %v5449_v29  ;;  %v15723_v60 = vld [vmem:[#allocation104_spill] sm:$0xff] }
 0x5df   : > { %v2913_v54 = vadd.f32 %v2799_v30, %v2661_v61  ;;  %v9727_v50 = vpop.eup %9726  ;;  %v2548_v31 = vrot.slane %v15721_v55, 1  ;;  %v13146_v23 = vadd.f32 1.0, %v9725_v63  ;;  %v3985_v38 = vsel %vm1525_vm2, %v3983_v0, %v3984_v19  ;;  %5921 = vmatmul.f32.gmra.mxu3 %v5449_v29  ;;  %6653 = vmatpush.msrb.mxu2 %v6470_v35  ;;  %v7456_v29 = vld [vmem:[#allocation6 + $0x3c0] sm:$0xff]  ;;  %v7447_v55 = vld [vmem:[#allocation6 + $0x378] sm:$0xff] }
 0x5e0   : > { %v3738_v2 = vsel %vm1272_vm1, %v15719_v53, %v15718_v8  ;;  %v15720_v7 = vmov %v15718_v8  ;;  %v13151_v12 = vadd.f32 %v6274_v34, %v6183_v43  ;;  %v13154_v49 = vadd.f32 %v15722_v18, %v2910_v62  ;;  %3555 = vmatmul.f32.gmra.mxu0 %v12780_v20  ;;  %v5713_v36 = vpop.f32.mrf.mxu2  ;;  %v7468_v43 = vld [vmem:[#allocation6 + $0x420] sm:$0xff]  ;;  %v15725_v34 = vld [vmem:[#allocation71_spill] sm:$0xff] }
 0x5e1   : > { %v3740_v9 = vsel %vm1272_vm1, %v15720_v7, %v3739_v51  ;;  %v13157_v17 = vadd.f32 %v15723_v60, %v2912_v42  ;;  %v13159_v61 = vadd.f32 1.0, %v9727_v50  ;;  %v4105_v40 = vadd.f32 %v3985_v38, %v12802_v59  ;;  %v15724_v42 = vld [vmem:[#allocation98_spill] sm:$0xff]  ;;  %v15726_v8 = vld [vmem:[#allocation15_spill] sm:$0xff]  ;;  %7483 = vmatpush.msra.mxu0 %v7468_v43 }
 0x5e2   : > { %v13164_v30 = vadd.f32 %v3738_v2, %v12788_v57  ;;  %v4917_v6 = vand.u32 2147483647, %v13101_v45  ;;  %v4919_v39 = vand.u32 2147483648, %v13101_v45  ;;  %9730 = vrcp.f32 %v13146_v23  ;;  %v13169_v62 = vpop.eup %9728  ;;  %v13181_v57 = vpop.f32.mrf.mxu3 }
 0x5e3   : > { %v13172_v52 = vadd.f32 %v3740_v9, %v12805_v41  ;;  %v13175_v59 = vadd.f32 %v3739_v51, %v12791_v13  ;;  %v13178_v56 = vadd.f32 %v15724_v42, %v2911_v14  ;;  %9732 = vrcp.f32 %v13159_v61  ;;  %v13183_v0 = vpop.f32.mrf.mxu1  ;;  %v3511_v14 = vpop.f32.mrf.mxu0  ;;  %7484 = vmatpush.msra.mxu0 %v7465_v33 }
 0x5e4   : > { %v3741_v63 = vrot.slane %v15725_v34, 1  ;;  %v13187_v53 = vadd.f32 %v15726_v8, %v2913_v54  ;;  %v15727_v13 = vrot.slane %v15700_v10, 1  ;;  %v4909_v51 = vmul.f32 %v13169_v62, %v13101_v45 }
 0x5e5   : > { %v2800_v2 = vrot.slane %v12133_v48, 2  ;;  %vm4913_vm7 = vweird.f32 %v13101_v45  ;;  %v4163_v7 = vmul.f32 %v13008_v46, %v4105_v40  ;;  %v6083_v9 = vrot.slane %v5713_v36, 1  ;;  %v7459_v45 = vld [vmem:[#allocation6 + $0x3d8] sm:$0xff] }
 0x5e6   : > { %v13194_v41 = vsel %vm1272_vm1, %v15727_v13, %v2548_v31  ;;  %v4910_v54 = vsub.f32 1.0, %v4909_v51  ;;  %vm13201_vm8 = vcmp.eq.f32.partialorder %v4917_v6, 8.507059e+37  ;;  %v4920_v10 = vor.u32 1.1754944e-38, %v4919_v39  ;;  %v6469_v6 = vld [vmem:[#allocation6 + $0x210] sm:$0xff]  ;;  %5609 = vmatmul.f32.gmra.mxu1 %v13099_v32  ;;  %5763 = vmatmul.f32.gmra.mxu2 %v13099_v32 }
 0x5e7   : > { %v3986_v21 = vrot.slane %v3511_v14, 2  ;;  %vm4928_vm9 = vweird.f32 %v13146_v23  ;;  %v4932_v50 = vand.u32 2147483647, %v13146_v23  ;;  %v4934_v38 = vand.u32 2147483648, %v13146_v23  ;;  %6508 = vmatpush.msrb.mxu1 %v6469_v6  ;;  %5924 = vmatmul.f32.gmra.mxu3 %v13099_v32  ;;  %v7462_v14 = vld [vmem:[#allocation6 + $0x3f0] sm:$0xff] }
 0x5e8   : > { %v13209_v18 = vadd.f32 %v13026_v4, %v4163_v7  ;;  %v6084_v60 = vsel %vm1272_vm1, %v6081_v22, %v6083_v9  ;;  %v13214_v40 = vpop.eup %9730  ;;  %v4911_v36 = vmul.f32 %v13169_v62, %v4910_v54  ;;  %vm4914_vm10 = vweird.f32 %v13169_v62  ;;  %3558 = vmatmul.f32.gmra.mxu0 %v12780_v20 }
 0x5e9   : > { %vm4943_vm11 = vweird.f32 %v13159_v61  ;;  %v3987_v39 = vsel %vm1525_vm2, %v3984_v19, %v3986_v21  ;;  %v4107_v42 = vadd.f32 %v3986_v21, %v12922_v1  ;;  %v13225_v22 = vpop.eup %9732  ;;  %v4924_v43 = vmul.f32 %v13214_v40, %v13146_v23  ;;  %v13232_v19 = vpop.f32.mrf.mxu2  ;;  %vm4915_vm12 = vmor %vm4913_vm7, %vm4914_vm10  ;;  %7485 = vmatpush.msra.mxu0 %v7462_v14  ;;  %v5451_v14 = vld [vmem:[#allocation3 + $0xe8] sm:$0xff] }
 0x5ea   : > { %v4947_v8 = vand.u32 2147483647, %v13159_v61  ;;  %v9449_v13 = vmul.f32 -1.442695, %v13209_v18  ;;  %v4106_v15 = vadd.f32 %v3987_v39, %v13117_v16  ;;  %v4912_v1 = vadd.f32 %v13169_v62, %v4911_v36  ;;  %v13247_v36 = vpop.f32.mrf.mxu3 }
 0x5eb   : > { %v4939_v51 = vmul.f32 %v13225_v22, %v13159_v61  ;;  %v4949_v7 = vand.u32 2147483648, %v13159_v61  ;;  %v4165_v9 = vmul.f32 %v13008_v46, %v4107_v42  ;;  %v4925_v16 = vsub.f32 1.0, %v4924_v43  ;;  %v13249_v35 = vpop.f32.mrf.mxu1  ;;  %v13262_v43 = vpop.f32.mrf.mxu0  ;;  %7486 = vmatpush.msra.mxu0 %v7459_v45  ;;  %v7450_v61 = vld [vmem:[#allocation6 + $0x390] sm:$0xff] }
 0x5ec   : > { %9734 = vpow2.f32 %v9449_v13  ;;  %v6275_v54 = vrot.slane %v13181_v57, 2  ;;  %v4164_v21 = vmul.f32 %v13008_v46, %v4106_v15  ;;  %v4916_v32 = vsel %vm4915_vm12, %v13169_v62, %v4912_v1  ;;  %v15734_v45 = vld [vmem:[#allocation116_spill] sm:$0xff] }
 0x5ed   : > { %vm4929_vm13 = vweird.f32 %v13214_v40  ;;  %v4940_v6 = vsub.f32 1.0, %v4939_v51  ;;  %v13254_v39 = vadd.f32 %v13026_v4, %v4165_v9  ;;  %v4921_v42 = vsel %vm13201_vm8, %v4920_v10, %v4916_v32  ;;  %7487 = vmatpush.msra.mxu0 %v7456_v29 }
 0x5ee   : > { %v4926_v57 = vmul.f32 %v13214_v40, %v4925_v16  ;;  %v13260_v33 = vadd.f32 %v13026_v4, %v4164_v21  ;;  %v6184_v62 = vadd.f32 %v6084_v60, %v13051_v27  ;;  %v5298_v13 = vmul.f32 %v4921_v42, %v13029_v47  ;;  %vm13282_vm3 = vmor %vm4928_vm9, %vm4929_vm13  ;;  %5612 = vmatmul.f32.gmra.mxu1 %v5451_v14  ;;  %v7453_v16 = vld [vmem:[#allocation6 + $0x3a8] sm:$0xff]  ;;  %v15739_v47 = vld [vmem:[#allocation60_spill] sm:$0xff] }
 0x5ef   : > { %v4941_v15 = vmul.f32 %v13225_v22, %v4940_v6  ;;  %vm4944_vm14 = vweird.f32 %v13225_v22  ;;  %v9451_v1 = vmul.f32 -1.442695, %v13254_v39  ;;  %vm13270_vm15 = vcmp.eq.f32.partialorder %v4932_v50, 8.507059e+37  ;;  %5766 = vmatmul.f32.gmra.mxu2 %v5451_v14  ;;  %5927 = vmatmul.f32.gmra.mxu3 %v5451_v14 }
 0x5f0   : > { %v4927_v10 = vadd.f32 %v13214_v40, %v4926_v57  ;;  %v9450_v9 = vmul.f32 -1.442695, %v13260_v33  ;;  %v6276_v27 = vsel %vm1525_vm2, %v6273_v3, %v6275_v54  ;;  %5352 = vst [vmem:[#allocation3 + $0xf0] sm:$0xff] %v5298_v13  ;;  %v4935_v50 = vor.u32 1.1754944e-38, %v4934_v38  ;;  %vm4945_vm4 = vmor %vm4943_vm11, %vm4944_vm14  ;;  %3561 = vmatmul.f32.gmra.mxu0 %v12780_v20  ;;  %v15735_v13 = vld [vmem:[#allocation115_spill] sm:$0xff] }
 0x5f1   : > { %v4942_v60 = vadd.f32 %v13225_v22, %v4941_v15  ;;  %9736 = vpow2.f32 %v9451_v1  ;;  %v13287_v21 = vadd.f32 %v6276_v27, %v6184_v62  ;;  %5386 = vst [vmem:[#allocation3 + $0xf0] sm:$0x1] %v12780_v20  ;;  %vm4948_vm5 = vcmp.eq.f32.partialorder %v4947_v8, 8.507059e+37  ;;  %v13297_v38 = vpop.f32.mrf.mxu2  ;;  %7488 = vmatpush.msra.mxu0 %v7453_v16  ;;  %v15736_v1 = vld [vmem:[#allocation17_spill] sm:$0xff] }
 0x5f2   : > { %v9735_v37 = vpop.eup %9734  ;;  %v4931_v3 = vsel %vm13282_vm3, %v13214_v40, %v4927_v10  ;;  %v4950_v23 = vor.u32 1.1754944e-38, %v4949_v7  ;;  %9738 = vpow2.f32 %v9450_v9  ;;  %v6086_v40 = vrot.slane %v13297_v38, 1 }
 0x5f3   : > { %v4936_v54 = vsel %vm13270_vm15, %v4935_v50, %v4931_v3  ;;  %v4946_v32 = vsel %vm4945_vm4, %v13225_v22, %v4942_v60  ;;  %v13302_v6 = vadd.f32 1.0, %v9735_v37  ;;  %v2663_v8 = vadd.f32 %v2548_v31, %v15734_v45  ;;  %v13313_v22 = vpop.f32.mrf.mxu3  ;;  %v5573_v62 = vpop.f32.mrf.mxu1  ;;  %v15737_v31 = vld [vmem:[#allocation35_spill] sm:$0xff]  ;;  %7489 = vmatpush.msra.mxu0 %v7450_v61 }
 0x5f4   : > { %v4951_v7 = vsel %vm4948_vm5, %v4950_v23, %v4946_v32  ;;  %v13310_v42 = vmul.f32 %v4936_v54, %v13063_v24  ;;  %v6085_v57 = vrot.slane %v13232_v19, 1  ;;  %v2662_v15 = vadd.f32 %v13194_v41, %v15735_v13  ;;  %v13327_v41 = vpop.f32.mrf.mxu0  ;;  %v7444_v23 = vld [vmem:[#allocation6 + $0x360] sm:$0xff] }
 0x5f5   : > { %v15305_v29 = vrot.slane %v15736_v1, 1  ;;  %v5300_v10 = vmul.f32 %v4951_v7, %v13071_v26  ;;  %9740 = vrcp.f32 %v13302_v6  ;;  %v15304_v51 = vrot.slane %v15737_v31, 1  ;;  %7490 = vmatpush.msra.mxu0 %v7447_v55  ;;  %v7441_v7 = vld [vmem:[#allocation6 + $0x348] sm:$0xff]  ;;  %v15741_v55 = vld [vmem:[#allocation74_spill] sm:$0xff] }
 0x5f6   : > { %5353 = vst [vmem:[#allocation3 + $0xf8] sm:$0xff] %v13310_v42  ;;  %v6277_v24 = vrot.slane %v13247_v36, 2  ;;  %v6087_v19 = vsel %vm1272_vm1, %v6085_v57, %v6086_v40  ;;  %v6278_v9 = vrot.slane %v13313_v22, 2  ;;  %v15738_v26 = vrot.slane %v12110_v58, 2 }
 0x5f7   : > { %v9737_v14 = vpop.eup %9736  ;;  %v2550_v50 = vrot.slane %v15739_v47, 1  ;;  %5354 = vst [vmem:[#allocation3 + $0x100] sm:$0x3] %v5300_v10  ;;  %v3989_v36 = vrot.slane %v13327_v41, 2  ;;  %v6185_v60 = vadd.f32 %v6087_v19, %v13183_v0  ;;  %v13339_v37 = vadd.f32 %v2800_v2, %v2663_v8  ;;  %7491 = vmatpush.msra.mxu0 %v7444_v23  ;;  %v15742_v19 = vld [vmem:[#allocation117_spill] sm:$0xff] }
 0x5f8   : > { %v2801_v27 = vsel %vm1525_vm2, %v15738_v26, %v2800_v2  ;;  %v9739_v16 = vpop.eup %9738  ;;  %5404 = vst [vmem:[#allocation3 + $0x101] sm:$0x1] %v12780_v20  ;;  %v13342_v3 = vadd.f32 1.0, %v9737_v14  ;;  %v3988_v58 = vrot.slane %v13262_v43, 2  ;;  %v6279_v54 = vsel %vm1525_vm2, %v6277_v24, %v6278_v9  ;;  %v5452_v32 = vld [vmem:[#allocation3 + $0xf0] sm:$0xff]  ;;  %3564 = vmatmul.f32.gmra.mxu0 %v12780_v20 }
 0x5f9   : > { %v2552_v0 = vsel %vm1272_vm1, %v2550_v50, %v15305_v29  ;;  %v4962_v48 = vand.u32 2147483647, %v13302_v6  ;;  %v13352_v2 = vadd.f32 1.0, %v9739_v16  ;;  %v13354_v61 = vadd.f32 %v6279_v54, %v6185_v60  ;;  %5614 = vmatmul.f32.gmra.mxu1 %v5452_v32  ;;  %5769 = vmatmul.f32.gmra.mxu2 %v5452_v32  ;;  %v5722_v57 = vpop.f32.mrf.mxu2  ;;  %v7438_v50 = vld [vmem:[#allocation6 + $0x330] sm:$0xff] }
 0x5fa   : > { %v13356_v45 = vadd.f32 %v2801_v27, %v2662_v15  ;;  %v4964_v43 = vand.u32 2147483648, %v13302_v6  ;;  %9742 = vrcp.f32 %v13342_v3  ;;  %v3990_v8 = vsel %vm1525_vm2, %v3988_v58, %v3989_v36  ;;  %v15740_v15 = vld [vmem:[#allocation72_spill] sm:$0xff]  ;;  %5930 = vmatmul.f32.gmra.mxu3 %v5452_v32  ;;  %v15743_v27 = vld [vmem:[#allocation63_spill] sm:$0xff]  ;;  %7492 = vmatpush.msra.mxu0 %v7441_v7 }
 0x5fb   : > { %v13363_v62 = vpop.eup %9740  ;;  %v13370_v13 = vsel %vm1272_vm1, %v3741_v63, %v15304_v51  ;;  %v2802_v24 = vrot.slane %v15741_v55, 2  ;;  %9744 = vrcp.f32 %v13352_v2  ;;  %v13376_v14 = vadd.f32 %v2552_v0, %v15742_v19  ;;  %v5883_v63 = vpop.f32.mrf.mxu3  ;;  %v7435_v51 = vld [vmem:[#allocation6 + $0x318] sm:$0xff] }
 0x5fc   : > { %v2803_v26 = vrot.slane %v12186_v5, 2  ;;  %v4954_v34 = vmul.f32 %v13363_v62, %v13302_v6  ;;  %v13383_v60 = vpop.f32.mrf.mxu1  ;;  %vm4958_vm6 = vweird.f32 %v13302_v6  ;;  %vm13386_vm7 = vcmp.eq.f32.partialorder %v4962_v48, 8.507059e+37  ;;  %v3520_v20 = vpop.f32.mrf.mxu0  ;;  %7493 = vmatpush.msra.mxu0 %v7438_v50 }
 0x5fd   : > { %v4108_v58 = vadd.f32 %v3990_v8, %v13164_v30  ;;  %v6088_v23 = vrot.slane %v5722_v57, 1  ;;  %v4965_v0 = vor.u32 1.1754944e-38, %v4964_v43  ;;  %v4992_v32 = vand.u32 2147483647, %v13342_v3 }
 0x5fe   : > { %v4955_v54 = vsub.f32 1.0, %v4954_v34  ;;  %v6280_v19 = vrot.slane %v5883_v63, 2  ;;  %vm4988_vm8 = vweird.f32 %v13342_v3  ;;  %v4994_v10 = vand.u32 2147483648, %v13342_v3  ;;  %7494 = vmatpush.msra.mxu0 %v7435_v51 }
 0x5ff   : > { %v4166_v48 = vmul.f32 %v13008_v46, %v4108_v58  ;;  %v6089_v29 = vsel %vm1272_vm1, %v6086_v40, %v6088_v23  ;;  %v3991_v30 = vrot.slane %v3520_v20, 2  ;;  %vm4959_vm9 = vweird.f32 %v13363_v62  ;;  %v6467_v58 = vld [vmem:[#allocation6 + $0x200] sm:$0xff]  ;;  %v6466_v23 = vld [vmem:[#allocation6 + $0x1f8] sm:$0xff] }
 0x600   : > { %v13398_v8 = vpop.eup %9742  ;;  %v4956_v43 = vmul.f32 %v13363_v62, %v4955_v54  ;;  %v6186_v7 = vadd.f32 %v6089_v29, %v13249_v35  ;;  %v6281_v57 = vsel %vm1525_vm2, %v6278_v9, %v6280_v19  ;;  %v4977_v38 = vand.u32 2147483647, %v13352_v2  ;;  %v7432_v35 = vld [vmem:[#allocation6 + $0x300] sm:$0xff]  ;;  %vm13430_vm10 = vmor %vm4958_vm6, %vm4959_vm9  ;;  %6654 = vmatpush.msrb.mxu2 %v6467_v58  ;;  %6509 = vmatpush.msrb.mxu1 %v6466_v23  ;;  %v13484_v23 = vld [vmem:[#allocation2] sm:$0xff] }
 0x601   : > { %v13406_v34 = vpop.eup %9744  ;;  %v4984_v40 = vmul.f32 %v13398_v8, %v13342_v3  ;;  %v13412_v63 = vadd.f32 %v13026_v4, %v4166_v48  ;;  %v3992_v50 = vsel %vm1525_vm2, %v3989_v36, %v3991_v30  ;;  %v4979_v9 = vand.u32 2147483648, %v13352_v2  ;;  %5617 = vmatmul.f32.gmra.mxu1 %v13310_v42  ;;  %5772 = vmatmul.f32.gmra.mxu2 %v13310_v42  ;;  %v13424_v41 = vpop.f32.mrf.mxu2 }
 0x602   : > { %v4957_v22 = vadd.f32 %v13363_v62, %v4956_v43  ;;  %v4969_v29 = vmul.f32 %v13406_v34, %v13352_v2  ;;  %v4109_v54 = vadd.f32 %v3992_v50, %v13172_v52  ;;  %vm4989_vm11 = vweird.f32 %v13398_v8  ;;  %5933 = vmatmul.f32.gmra.mxu3 %v13310_v42  ;;  %7495 = vmatpush.msra.mxu0 %v7432_v35  ;;  %v7383_v43 = vld [vmem:[#allocation3 + $0x30] sm:$0xff] }
 0x603   : > { %v4985_v36 = vsub.f32 1.0, %v4984_v40  ;;  %v9452_v19 = vmul.f32 -1.442695, %v13412_v63  ;;  %v4110_v52 = vadd.f32 %v3991_v30, %v13175_v59  ;;  %v13442_v40 = vpop.f32.mrf.mxu3  ;;  %v13446_v47 = vadd.f32 %v6281_v57, %v6186_v7  ;;  %7496 = vmatmul.f32.vlgmr.msra.gmra.mxu0 %v7383_v43  ;;  %vm4990_vm3 = vmor %vm4988_vm8, %vm4989_vm11 }
 0x604   : > { %v4961_v20 = vsel %vm13430_vm10, %v13363_v62, %v4957_v22  ;;  %v4970_v48 = vsub.f32 1.0, %v4969_v29  ;;  %v4167_v6 = vmul.f32 %v13008_v46, %v4109_v54  ;;  %v13444_v50 = vpop.f32.mrf.mxu1  ;;  %vm4974_vm12 = vweird.f32 %v13406_v34  ;;  %v13458_v7 = vpop.f32.mrf.mxu0  ;;  %v5454_v54 = vld [vmem:[#allocation3 + $0x100] sm:$0xff] }
 0x605   : > { %v4966_v59 = vsel %vm13386_vm7, %v4965_v0, %v4961_v20  ;;  %v4986_v30 = vmul.f32 %v13398_v8, %v4985_v36  ;;  %9746 = vpow2.f32 %v9452_v19  ;;  %v4168_v62 = vmul.f32 %v13008_v46, %v4110_v52 }
 0x606   : > { %v5301_v22 = vmul.f32 %v4966_v59, %v13209_v18  ;;  %v4971_v42 = vmul.f32 %v13406_v34, %v4970_v48  ;;  %v13456_v35 = vadd.f32 %v13026_v4, %v4167_v6  ;;  %vm4973_vm13 = vweird.f32 %v13352_v2 }
 0x607   : > { %v4987_v16 = vadd.f32 %v13398_v8, %v4986_v30  ;;  %vm13462_vm14 = vcmp.eq.f32.partialorder %v4992_v32, 8.507059e+37  ;;  %v13467_v57 = vadd.f32 %v13026_v4, %v4168_v62  ;;  %vm13470_vm15 = vcmp.eq.f32.partialorder %v4977_v38, 8.507059e+37  ;;  %vm4975_vm4 = vmor %vm4973_vm13, %vm4974_vm12 }
 0x608   : > { %5355 = vst [vmem:[#allocation3 + $0x108] sm:$0xff] %v5301_v22  ;;  %v4972_v18 = vadd.f32 %v13406_v34, %v4971_v42  ;;  %v4995_v2 = vor.u32 1.1754944e-38, %v4994_v10  ;;  %v9453_v32 = vmul.f32 -1.442695, %v13456_v35  ;;  %v2804_v58 = vsel %vm1525_vm2, %v2802_v24, %v2803_v26 }
 0x609   : > { %5387 = vst [vmem:[#allocation3 + $0x108] sm:$0x1] %v13484_v23  ;;  %v4980_v38 = vor.u32 1.1754944e-38, %v4979_v9  ;;  %v4991_v3 = vsel %vm4990_vm3, %v13398_v8, %v4987_v16  ;;  %v9454_v10 = vmul.f32 -1.442695, %v13467_v57  ;;  %v6090_v24 = vrot.slane %v13424_v41, 1  ;;  %5620 = vmatmul.f32.gmra.mxu1 %v5454_v54  ;;  %5775 = vmatmul.f32.gmra.mxu2 %v5454_v54  ;;  %v13495_v36 = vpop.f32.mrf.mxu2 }
 0x60a   : > { %v4976_v51 = vsel %vm4975_vm4, %v13406_v34, %v4972_v18  ;;  %v4996_v55 = vsel %vm13462_vm14, %v4995_v2, %v4991_v3  ;;  %9748 = vpow2.f32 %v9453_v32  ;;  %v6091_v52 = vrot.slane %v13495_v36, 1  ;;  %v15752_v34 = vld [vmem:[#allocation13_spill] sm:$0xff]  ;;  %5936 = vmatmul.f32.gmra.mxu3 %v5454_v54  ;;  %v15760_v54 = vld [vmem:[#allocation80_spill] sm:$0xff] }
 0x60b   : > { %v9747_v19 = vpop.eup %9746  ;;  %v4981_v9 = vsel %vm13470_vm15, %v4980_v38, %v4976_v51  ;;  %v5303_v8 = vmul.f32 %v4996_v55, %v13254_v39  ;;  %9750 = vpow2.f32 %v9454_v10  ;;  %v13503_v20 = vadd.f32 %v15752_v34, %v13339_v37  ;;  %v7384_v39 = vld [vmem:[#allocation3 + $0x38] sm:$0xff]  ;;  %v13515_v30 = vpop.f32.mrf.mxu3  ;;  %v15759_v3 = vld [vmem:[#allocation93_spill] sm:$0xff] }
 0x60c   : > { %v15753_v48 = vrot.slane %v15743_v27, 1  ;;  %v15754_v41 = vrot.slane %v15736_v1, 1  ;;  %v13511_v43 = vmul.f32 %v4981_v9, %v13260_v33  ;;  %v13513_v59 = vadd.f32 1.0, %v9747_v19  ;;  %v5581_v62 = vpop.f32.mrf.mxu1  ;;  %7499 = vmatmul.f32.gmra.mxu0 %v7384_v39 }
 0x60d   : > { %v2805_v22 = vrot.slane %v12206_v25, 2  ;;  %5357 = vst [vmem:[#allocation3 + $0x118] sm:$0x3] %v5303_v8  ;;  %v6282_v37 = vrot.slane %v13442_v40, 2  ;;  %v6092_v1 = vsel %vm1272_vm1, %v6090_v24, %v6091_v52  ;;  %v6283_v33 = vrot.slane %v13515_v30, 2  ;;  %v3526_v40 = vpop.f32.mrf.mxu0 }
 0x60e   : > { %v2554_v6 = vsel %vm1272_vm1, %v15754_v41, %v15753_v48  ;;  %v3859_v42 = vadd.f32 %v13370_v13, %v13154_v49  ;;  %v15755_v16 = vrot.slane %v15740_v15, 1  ;;  %v15756_v0 = vrot.slane %v15737_v31, 1  ;;  %5356 = vst [vmem:[#allocation3 + $0x110] sm:$0xff] %v13511_v43  ;;  %v15763_v41 = vld [vmem:[#allocation62_spill] sm:$0xff] }
 0x60f   : > { %v2916_v25 = vadd.f32 %v2804_v58, %v13376_v14  ;;  %9752 = vrcp.f32 %v13513_v59  ;;  %5405 = vst [vmem:[#allocation3 + $0x119] sm:$0x1] %v13484_v23  ;;  %v3993_v29 = vrot.slane %v13458_v7, 2  ;;  %v3994_v2 = vrot.slane %v3526_v40, 2  ;;  %v15758_v58 = vld [vmem:[#allocation14_spill] sm:$0xff]  ;;  %v15766_v40 = vld [vmem:[#allocation21_spill] sm:$0xff] }
 0x610   : > { %v3745_v18 = vsel %vm1272_vm1, %v15756_v0, %v15755_v16  ;;  %v6187_v49 = vadd.f32 %v6092_v1, %v13383_v60  ;;  %v6284_v31 = vsel %vm1525_vm2, %v6282_v37, %v6283_v33  ;;  %v9749_v13 = vpop.eup %9748  ;;  %v15757_v14 = vmov %v15755_v16  ;;  %v5455_v60 = vld [vmem:[#allocation3 + $0x108] sm:$0xff] }
 0x611   : > { %v3861_v32 = vadd.f32 %v15757_v14, %v13157_v17  ;;  %v13544_v38 = vadd.f32 %v15758_v58, %v13356_v45  ;;  %v2665_v10 = vadd.f32 %v2554_v6, %v15759_v3  ;;  %v15761_v7 = vmov %v15753_v48  ;;  %v9751_v55 = vpop.eup %9750  ;;  %5622 = vmatmul.f32.gmra.mxu1 %v5455_v60  ;;  %v5731_v34 = vpop.f32.mrf.mxu2  ;;  %v15762_v48 = vld [vmem:[#allocation42_spill] sm:$0xff] }
 0x612   : > { %v2666_v51 = vadd.f32 %v15761_v7, %v15760_v54  ;;  %v2806_v24 = vsel %vm1525_vm2, %v2803_v26, %v2805_v22  ;;  %v13553_v19 = vadd.f32 1.0, %v9749_v13  ;;  %v3995_v17 = vsel %vm1525_vm2, %v3993_v29, %v3994_v2  ;;  %5778 = vmatmul.f32.gmra.mxu2 %v5455_v60  ;;  %5939 = vmatmul.f32.gmra.mxu3 %v5455_v60 }
 0x613   : > { %v13556_v15 = vadd.f32 %v6284_v31, %v6187_v49  ;;  %v3860_v45 = vadd.f32 %v3745_v18, %v13178_v56  ;;  %v5007_v9 = vand.u32 2147483647, %v13513_v59  ;;  %v13560_v8 = vadd.f32 1.0, %v9751_v55  ;;  %v15764_v56 = vld [vmem:[#allocation39_spill] sm:$0xff]  ;;  %v5892_v16 = vpop.f32.mrf.mxu3  ;;  %v15765_v18 = vld [vmem:[#allocation44_spill] sm:$0xff]  ;;  %v15767_v49 = vld [vmem:[#allocation65_spill] sm:$0xff] }
 0x614   : > { %v4111_v27 = vadd.f32 %v3995_v17, %v3859_v42  ;;  %v3746_v5 = vrot.slane %v15762_v48, 1  ;;  %v13564_v26 = vadd.f32 %v15763_v41, %v2916_v25  ;;  %v5009_v6 = vand.u32 2147483648, %v13513_v59  ;;  %v7385_v42 = vld [vmem:[#allocation3 + $0x40] sm:$0xff]  ;;  %v13576_v0 = vpop.f32.mrf.mxu1 }
 0x615   : > { %9754 = vrcp.f32 %v13553_v19  ;;  %v13568_v39 = vpop.eup %9752  ;;  %v3747_v62 = vrot.slane %v15764_v56, 1  ;;  %v13571_v37 = vadd.f32 %v2806_v24, %v2665_v10  ;;  %v13573_v1 = vadd.f32 %v2805_v22, %v2666_v51  ;;  %7502 = vmatmul.f32.gmra.mxu0 %v7385_v42  ;;  %v3529_v3 = vpop.f32.mrf.mxu0 }
 0x616   : > { %9756 = vrcp.f32 %v13560_v8  ;;  %v3749_v25 = vrot.slane %v15765_v18, 1  ;;  %v2555_v29 = vrot.slane %v15766_v40, 1  ;;  %v2556_v31 = vrot.slane %v15767_v49, 1 }
 0x617   : > { %v4999_v13 = vmul.f32 %v13568_v39, %v13513_v59  ;;  %vm5003_vm5 = vweird.f32 %v13513_v59  ;;  %vm13584_vm6 = vcmp.eq.f32.partialorder %v5007_v9, 8.507059e+37  ;;  %v4169_v14 = vmul.f32 %v13008_v46, %v4111_v27  ;;  %v6464_v27 = vld [vmem:[#allocation6 + $0x1e8] sm:$0xff] }
 0x618   : > { %v6093_v58 = vrot.slane %v5731_v34, 1  ;;  %v5010_v54 = vor.u32 1.1754944e-38, %v5009_v6  ;;  %v5022_v7 = vand.u32 2147483647, %v13553_v19  ;;  %v3996_v51 = vrot.slane %v3529_v3, 2  ;;  %v6463_v34 = vld [vmem:[#allocation6 + $0x1e0] sm:$0xff]  ;;  %6655 = vmatpush.msrb.mxu2 %v6464_v27 }
 0x619   : > { %v5000_v10 = vsub.f32 1.0, %v4999_v13  ;;  %vm5004_vm7 = vweird.f32 %v13568_v39  ;;  %vm5018_vm8 = vweird.f32 %v13553_v19  ;;  %v5024_v60 = vand.u32 2147483648, %v13553_v19  ;;  %6510 = vmatpush.msrb.mxu1 %v6463_v34  ;;  %v13609_v3 = vpop.f32.mrf.mxu2 }
 0x61a   : > { %v13594_v55 = vadd.f32 %v13026_v4, %v4169_v14  ;;  %v6094_v24 = vsel %vm1272_vm1, %v6091_v52, %v6093_v58  ;;  %v3997_v41 = vsel %vm1525_vm2, %v3994_v2, %v3996_v51  ;;  %v4113_v6 = vadd.f32 %v3996_v51, %v3861_v32  ;;  %5625 = vmatmul.f32.gmra.mxu1 %v13511_v43  ;;  %vm5005_vm9 = vmor %vm5003_vm5, %vm5004_vm7 }
 0x61b   : > { %v13599_v17 = vpop.eup %9754  ;;  %v5001_v9 = vmul.f32 %v13568_v39, %v5000_v10  ;;  %v6188_v42 = vadd.f32 %v6094_v24, %v13444_v50  ;;  %v6285_v52 = vrot.slane %v5892_v16, 2  ;;  %v4112_v58 = vadd.f32 %v3997_v41, %v3860_v45  ;;  %5781 = vmatmul.f32.gmra.mxu2 %v13511_v43  ;;  %5942 = vmatmul.f32.gmra.mxu3 %v13511_v43  ;;  %v7386_v24 = vld [vmem:[#allocation3 + $0x48] sm:$0xff] }
 0x61c   : > { %v13604_v13 = vpop.eup %9756  ;;  %v5014_v14 = vmul.f32 %v13599_v17, %v13553_v19  ;;  %v9455_v36 = vmul.f32 -1.442695, %v13594_v55  ;;  %v5037_v50 = vand.u32 2147483647, %v13560_v8  ;;  %v4171_v32 = vmul.f32 %v13008_v46, %v4113_v6  ;;  %v13627_v27 = vpop.f32.mrf.mxu1 }
 0x61d   : > { %v5002_v10 = vadd.f32 %v13568_v39, %v5001_v9  ;;  %v5029_v2 = vmul.f32 %v13604_v13, %v13560_v8  ;;  %v5039_v16 = vand.u32 2147483648, %v13560_v8  ;;  %v4170_v51 = vmul.f32 %v13008_v46, %v4112_v58  ;;  %v13625_v9 = vpop.f32.mrf.mxu3  ;;  %7504 = vmatmul.f32.gmra.mxu0 %v7386_v24 }
 0x61e   : > { %v5015_v45 = vsub.f32 1.0, %v5014_v14  ;;  %9758 = vpow2.f32 %v9455_v36  ;;  %vm5019_vm10 = vweird.f32 %v13599_v17  ;;  %v13632_v59 = vadd.f32 %v13026_v4, %v4171_v32  ;;  %v13640_v14 = vpop.f32.mrf.mxu0 }
 0x61f   : > { %v5006_v34 = vsel %vm5005_vm9, %v13568_v39, %v5002_v10  ;;  %v5030_v41 = vsub.f32 1.0, %v5029_v2  ;;  %v13638_v43 = vadd.f32 %v13026_v4, %v4170_v51  ;;  %v6286_v39 = vsel %vm1525_vm2, %v6283_v33, %v6285_v52  ;;  %vm5020_vm13 = vmor %vm5018_vm8, %vm5019_vm10  ;;  %v5457_v52 = vld [vmem:[#allocation3 + $0x118] sm:$0xff] }
 0x620   : > { %v5011_v6 = vsel %vm13584_vm6, %v5010_v54, %v5006_v34  ;;  %v5016_v46 = vmul.f32 %v13599_v17, %v5015_v45  ;;  %vm5034_vm11 = vweird.f32 %v13604_v13  ;;  %v9457_v22 = vmul.f32 -1.442695, %v13632_v59 }
 0x621   : > { %v5304_v36 = vmul.f32 %v5011_v6, %v13412_v63  ;;  %v5031_v58 = vmul.f32 %v13604_v13, %v5030_v41  ;;  %vm5033_vm12 = vweird.f32 %v13560_v8  ;;  %v9456_v4 = vmul.f32 -1.442695, %v13638_v43  ;;  %v13663_v2 = vpop.f32.mrf.mxu2 }
 0x622   : > { %v5017_v54 = vadd.f32 %v13599_v17, %v5016_v46  ;;  %v13652_v10 = vadd.f32 %v6286_v39, %v6188_v42  ;;  %vm5023_vm14 = vcmp.eq.f32.partialorder %v5022_v7, 8.507059e+37  ;;  %v5025_v63 = vor.u32 1.1754944e-38, %v5024_v60  ;;  %vm5035_vm15 = vmor %vm5033_vm12, %vm5034_vm11  ;;  %5628 = vmatmul.f32.gmra.mxu1 %v5457_v52 }
 0x623   : > { %5358 = vst [vmem:[#allocation3 + $0x120] sm:$0xff] %v5304_v36  ;;  %v5032_v30 = vadd.f32 %v13604_v13, %v5031_v58  ;;  %9760 = vpow2.f32 %v9457_v22  ;;  %vm5038_vm3 = vcmp.eq.f32.partialorder %v5037_v50, 8.507059e+37  ;;  %v5040_v42 = vor.u32 1.1754944e-38, %v5039_v16  ;;  %5784 = vmatmul.f32.gmra.mxu2 %v5457_v52  ;;  %5945 = vmatmul.f32.gmra.mxu3 %v5457_v52  ;;  %v7387_v16 = vld [vmem:[#allocation3 + $0x50] sm:$0xff]  ;;  %v15771_v58 = vld [vmem:[#allocation49_spill] sm:$0xff] }
 0x624   : > { %v9759_v33 = vpop.eup %9758  ;;  %5388 = vst [vmem:[#allocation3 + $0x120] sm:$0x1] %v13484_v23  ;;  %v5021_v8 = vsel %vm5020_vm13, %v13599_v17, %v5017_v54  ;;  %9762 = vpow2.f32 %v9456_v4  ;;  %v6096_v32 = vrot.slane %v13663_v2, 1  ;;  %v2807_v17 = vrot.slane %v12244_v28, 2  ;;  %v5589_v34 = vpop.f32.mrf.mxu1 }
 0x625   : > { %v5026_v19 = vsel %vm5023_vm14, %v5025_v63, %v5021_v8  ;;  %v5036_v7 = vsel %vm5035_vm15, %v13604_v13, %v5032_v30  ;;  %v13666_v60 = vadd.f32 1.0, %v9759_v33  ;;  %v6095_v50 = vrot.slane %v13609_v3, 1  ;;  %v13674_v24 = vpop.f32.mrf.mxu3  ;;  %7507 = vmatmul.f32.gmra.mxu0 %v7387_v16 }
 0x626   : > { %v5041_v45 = vsel %vm5038_vm3, %v5040_v42, %v5036_v7  ;;  %v13671_v51 = vmul.f32 %v5026_v19, %v13456_v35  ;;  %v2557_v13 = vsel %vm1272_vm1, %v2555_v29, %v2556_v31  ;;  %v2808_v41 = vrot.slane %v12271_v11, 2 }
 0x627   : > { %v5306_v28 = vmul.f32 %v5041_v45, %v13467_v57  ;;  %9764 = vrcp.f32 %v13666_v60  ;;  %v3748_v35 = vsel %vm1272_vm1, %v3746_v5, %v3747_v62  ;;  %v6287_v3 = vrot.slane %v13625_v9, 2  ;;  %v13695_v57 = vpop.f32.mrf.mxu0  ;;  %v15770_v5 = vld [vmem:[#allocation24_spill] sm:$0xff] }
 0x628   : > { %5359 = vst [vmem:[#allocation3 + $0x128] sm:$0xff] %v13671_v51  ;;  %v6097_v40 = vsel %vm1272_vm1, %v6095_v50, %v6096_v32  ;;  %v6288_v29 = vrot.slane %v13674_v24, 2  ;;  %v3750_v48 = vsel %vm1272_vm1, %v3747_v62, %v3749_v25  ;;  %v13704_v46 = vadd.f32 %v15770_v5, %v13573_v1  ;;  %v15774_v24 = vld [vmem:[#allocation64_spill] sm:$0xff] }
 0x629   : > { %v9761_v6 = vpop.eup %9760  ;;  %5360 = vst [vmem:[#allocation3 + $0x130] sm:$0x3] %v5306_v28  ;;  %v3999_v9 = vrot.slane %v13695_v57, 2  ;;  %v6189_v39 = vadd.f32 %v6097_v40, %v13576_v0  ;;  %v2667_v22 = vadd.f32 %v2557_v13, %v15771_v58  ;;  %v3998_v56 = vrot.slane %v13640_v14, 2  ;;  %v5740_v42 = vpop.f32.mrf.mxu2 }
 0x62a   : > { %v9763_v36 = vpop.eup %9762  ;;  %5406 = vst [vmem:[#allocation3 + $0x131] sm:$0x1] %v13484_v23  ;;  %v13710_v54 = vadd.f32 1.0, %v9761_v6  ;;  %v6289_v62 = vsel %vm1525_vm2, %v6287_v3, %v6288_v29  ;;  %v2809_v1 = vsel %vm1525_vm2, %v2807_v17, %v2808_v41  ;;  %v5052_v4 = vand.u32 2147483647, %v13666_v60  ;;  %v15772_v17 = vld [vmem:[#allocation43_spill] sm:$0xff] }
 0x62b   : > { %v13718_v63 = vadd.f32 1.0, %v9763_v36  ;;  %v5458_v0 = vld [vmem:[#allocation3 + $0x120] sm:$0xff]  ;;  %v13720_v30 = vadd.f32 %v6289_v62, %v6189_v39  ;;  %v3862_v33 = vadd.f32 %v3748_v35, %v13187_v53  ;;  %v5054_v8 = vand.u32 2147483648, %v13666_v60  ;;  %v15773_v53 = vld [vmem:[#allocation41_spill] sm:$0xff] }
 0x62c   : > { %9766 = vrcp.f32 %v13710_v54  ;;  %v4000_v14 = vsel %vm1525_vm2, %v3998_v56, %v3999_v9  ;;  %v3863_v19 = vadd.f32 %v3750_v48, %v13544_v38  ;;  %v3864_v7 = vadd.f32 %v3749_v25, %v13503_v20  ;;  %5630 = vmatmul.f32.gmra.mxu1 %v5458_v0  ;;  %5787 = vmatmul.f32.gmra.mxu2 %v5458_v0  ;;  %v7388_v38 = vld [vmem:[#allocation3 + $0x58] sm:$0xff]  ;;  %v13740_v18 = vpop.f32.mrf.mxu1  ;;  %v13752_v39 = vld [vmem:[%s15228_s2] ss:$0 sm:$0xff] }
 0x62d   : > { %v13726_v52 = vpop.eup %9764  ;;  %v3751_v45 = vrot.slane %v15772_v17, 1  ;;  %9768 = vrcp.f32 %v13718_v63  ;;  %v3752_v50 = vrot.slane %v15773_v53, 1  ;;  %v13735_v16 = vadd.f32 %v2809_v1, %v2667_v22  ;;  %5948 = vmatmul.f32.gmra.mxu3 %v5458_v0  ;;  %v5901_v28 = vpop.f32.mrf.mxu3  ;;  %7510 = vmatmul.f32.gmra.mxu0 %v7388_v38  ;;  %v6460_v38 = vld [vmem:[#allocation6 + $0x1c8] sm:$0xff] }
 0x62e   : > { %v2558_v34 = vrot.slane %v15774_v24, 1  ;;  %v5044_v13 = vmul.f32 %v13726_v52, %v13666_v60  ;;  %vm5048_vm4 = vweird.f32 %v13666_v60  ;;  %vm13743_vm5 = vcmp.eq.f32.partialorder %v5052_v4, 8.507059e+37  ;;  %6511 = vmatpush.msrb.mxu1 %v6460_v38  ;;  %v7389_v60 = vld [vmem:[#allocation3 + $0x60] sm:$0xff] }
 0x62f   : > { %v4114_v25 = vadd.f32 %v4000_v14, %v3862_v33  ;;  %v6098_v35 = vrot.slane %v5740_v42, 1  ;;  %v5055_v40 = vor.u32 1.1754944e-38, %v5054_v8  ;;  %v5082_v57 = vand.u32 2147483647, %v13710_v54  ;;  %v3538_v48 = vpop.f32.mrf.mxu0 }
 0x630   : > { %v5045_v3 = vsub.f32 1.0, %v5044_v13  ;;  %v6290_v6 = vrot.slane %v5901_v28, 2  ;;  %v5084_v5 = vand.u32 2147483648, %v13710_v54  ;;  %v4001_v22 = vrot.slane %v3538_v48, 2  ;;  %v6461_v13 = vld [vmem:[#allocation6 + $0x1d0] sm:$0xff] }
 0x631   : > { %v4172_v36 = vmul.f32 %v13752_v39, %v4114_v25  ;;  %v6099_v58 = vsel %vm1272_vm1, %v6096_v32, %v6098_v35  ;;  %vm5049_vm6 = vweird.f32 %v13726_v52  ;;  %v5067_v33 = vand.u32 2147483647, %v13718_v63  ;;  %v13772_v32 = vld [vmem:[%s15229_s3] ss:$0 sm:$0xff]  ;;  %v13782_v25 = vpop.f32.mrf.mxu2  ;;  %6656 = vmatpush.msrb.mxu2 %v6461_v13 }
 0x632   : > { %v13758_v56 = vpop.eup %9766  ;;  %v5046_v62 = vmul.f32 %v13726_v52, %v5045_v3  ;;  %v6190_v1 = vadd.f32 %v6099_v58, %v13627_v27  ;;  %v6291_v4 = vsel %vm1525_vm2, %v6288_v29, %v6290_v6  ;;  %v4002_v14 = vsel %vm1525_vm2, %v3999_v9, %v4001_v22  ;;  %vm13788_vm7 = vmor %vm5048_vm4, %vm5049_vm6 }
 0x633   : > { %v13764_v0 = vpop.eup %9768  ;;  %v5074_v2 = vmul.f32 %v13758_v56, %v13710_v54  ;;  %v13775_v8 = vadd.f32 %v13772_v32, %v4172_v36  ;;  %v5069_v42 = vand.u32 2147483648, %v13718_v63  ;;  %v4115_v28 = vadd.f32 %v4002_v14, %v3863_v19 }
 0x634   : > { %v5047_v27 = vadd.f32 %v13726_v52, %v5046_v62  ;;  %v5059_v29 = vmul.f32 %v13764_v0, %v13718_v63  ;;  %vm5079_vm8 = vweird.f32 %v13758_v56  ;;  %v4116_v6 = vadd.f32 %v4001_v22, %v3864_v7  ;;  %5633 = vmatmul.f32.gmra.mxu1 %v13671_v51  ;;  %5790 = vmatmul.f32.gmra.mxu2 %v13671_v51  ;;  %v13802_v62 = vpop.f32.mrf.mxu1 }
 0x635   : > { %v5075_v9 = vsub.f32 1.0, %v5074_v2  ;;  %v9458_v3 = vmul.f32 -1.442695, %v13775_v8  ;;  %v4173_v36 = vmul.f32 %v13752_v39, %v4115_v28  ;;  %v13800_v58 = vpop.f32.mrf.mxu3  ;;  %v13804_v2 = vadd.f32 %v6291_v4, %v6190_v1  ;;  %5951 = vmatmul.f32.gmra.mxu3 %v13671_v51  ;;  %7512 = vmatmul.f32.gmra.mxu0 %v7389_v60 }
 0x636   : > { %v5051_v19 = vsel %vm13788_vm7, %v13726_v52, %v5047_v27  ;;  %v5060_v48 = vsub.f32 1.0, %v5059_v29  ;;  %v4174_v52 = vmul.f32 %v13752_v39, %v4116_v6  ;;  %vm5064_vm9 = vweird.f32 %v13764_v0  ;;  %v5460_v6 = vld [vmem:[#allocation3 + $0x130] sm:$0xff] }
 0x637   : > { %v5056_v7 = vsel %vm13743_vm5, %v5055_v40, %v5051_v19  ;;  %v5076_v22 = vmul.f32 %v13758_v56, %v5075_v9  ;;  %9770 = vpow2.f32 %v9458_v3  ;;  %v13815_v1 = vadd.f32 %v13772_v32, %v4173_v36  ;;  %v13817_v4 = vpop.f32.mrf.mxu0 }
 0x638   : > { %v5307_v14 = vmul.f32 %v5056_v7, %v13594_v55  ;;  %v5061_v27 = vmul.f32 %v13764_v0, %v5060_v48  ;;  %vm5063_vm10 = vweird.f32 %v13718_v63  ;;  %vm5078_vm11 = vweird.f32 %v13710_v54  ;;  %v15781_v7 = vld [vmem:[#allocation48_spill] sm:$0xff] }
 0x639   : > { %v5077_v20 = vadd.f32 %v13758_v56, %v5076_v22  ;;  %v13823_v51 = vadd.f32 %v13772_v32, %v4174_v52  ;;  %vm5080_vm12 = vmor %vm5078_vm11, %vm5079_vm8  ;;  %vm5083_vm13 = vcmp.eq.f32.partialorder %v5082_v57, 8.507059e+37  ;;  %v5085_v40 = vor.u32 1.1754944e-38, %v5084_v5  ;;  %v13834_v9 = vpop.f32.mrf.mxu2  ;;  %v15782_v52 = vld [vmem:[#allocation19_spill] sm:$0xff] }
 0x63a   : > { %5361 = vst [vmem:[#allocation3 + $0x138] sm:$0xff] %v5307_v14  ;;  %v5062_v55 = vadd.f32 %v13764_v0, %v5061_v27  ;;  %v9459_v29 = vmul.f32 -1.442695, %v13815_v1  ;;  %vm5065_vm14 = vmor %vm5063_vm10, %vm5064_vm9  ;;  %vm5068_vm15 = vcmp.eq.f32.partialorder %v5067_v33, 8.507059e+37  ;;  %v5070_v63 = vor.u32 1.1754944e-38, %v5069_v42 }
 0x63b   : > { %5389 = vst [vmem:[#allocation3 + $0x138] sm:$0x1] %v13484_v23  ;;  %v5081_v54 = vsel %vm5080_vm12, %v13758_v56, %v5077_v20  ;;  %v9460_v13 = vmul.f32 -1.442695, %v13823_v51  ;;  %v6100_v35 = vrot.slane %v13782_v25, 1  ;;  %v6101_v33 = vrot.slane %v13834_v9, 1 }
 0x63c   : > { %v5066_v38 = vsel %vm5065_vm14, %v13764_v0, %v5062_v55  ;;  %v5086_v28 = vsel %vm5083_vm13, %v5085_v40, %v5081_v54  ;;  %9772 = vpow2.f32 %v9459_v29  ;;  %v15779_v56 = vld [vmem:[#allocation61_spill] sm:$0xff]  ;;  %v2559_v0 = vsel %vm1272_vm1, %v2556_v31, %v2558_v34  ;;  %5636 = vmatmul.f32.gmra.mxu1 %v5460_v6  ;;  %5793 = vmatmul.f32.gmra.mxu2 %v5460_v6  ;;  %v5597_v36 = vpop.f32.mrf.mxu1 }
 0x63d   : > { %v9771_v57 = vpop.eup %9770  ;;  %v5071_v5 = vsel %vm5068_vm15, %v5070_v63, %v5066_v38  ;;  %v5309_v3 = vmul.f32 %v5086_v28, %v13632_v59  ;;  %9774 = vpow2.f32 %v9460_v13  ;;  %v3614_v42 = vadd.f32 %v15779_v56, %v13571_v37  ;;  %v7390_v59 = vld [vmem:[#allocation3 + $0x68] sm:$0xff]  ;;  %v13850_v48 = vpop.f32.mrf.mxu3  ;;  %5954 = vmatmul.f32.gmra.mxu3 %v5460_v6  ;;  %v15783_v63 = vld [vmem:[#allocation96_spill] sm:$0xff]  ;;  %v15786_v56 = vld [vmem:[#allocation66_spill] sm:$0xff] }
 0x63e   : > { %v13846_v25 = vmul.f32 %v5071_v5, %v13638_v43  ;;  %v13848_v19 = vadd.f32 1.0, %v9771_v57  ;;  %v3753_v37 = vsel %vm1272_vm1, %v3751_v45, %v3752_v50  ;;  %7515 = vmatmul.f32.gmra.mxu0 %v7390_v59  ;;  %v6102_v49 = vsel %vm1272_vm1, %v6100_v35, %v6101_v33  ;;  %v15780_v43 = vld [vmem:[#allocation76_spill] sm:$0xff] }
 0x63f   : > { %5363 = vst [vmem:[#allocation3 + $0x148] sm:$0x3] %v5309_v3  ;;  %v6293_v31 = vrot.slane %v13850_v48, 2  ;;  %v3754_v60 = vrot.slane %v15780_v43, 1  ;;  %v2810_v22 = vrot.slane %v15781_v7, 2  ;;  %v6292_v17 = vrot.slane %v13800_v58, 2  ;;  %v13866_v45 = vpop.f32.mrf.mxu0 }
 0x640   : > { %5362 = vst [vmem:[#allocation3 + $0x140] sm:$0xff] %v13846_v25  ;;  %9776 = vrcp.f32 %v13848_v19  ;;  %v13870_v14 = vadd.f32 %v15782_v52, %v13735_v16  ;;  %v4003_v27 = vrot.slane %v13817_v4, 2  ;;  %v4004_v20 = vrot.slane %v13866_v45, 2  ;;  %v15784_v58 = vld [vmem:[#allocation81_spill] sm:$0xff]  ;;  %v15785_v4 = vld [vmem:[#allocation27_spill] sm:$0xff] }
 0x641   : > { %5407 = vst [vmem:[#allocation3 + $0x149] sm:$0x1] %v13484_v23  ;;  %v6191_v55 = vadd.f32 %v6102_v49, %v13740_v18  ;;  %v3865_v29 = vadd.f32 %v3753_v37, %v13564_v26  ;;  %v13878_v54 = vadd.f32 %v2559_v0, %v15783_v63  ;;  %v2669_v13 = vadd.f32 %v2558_v34, %v15784_v58  ;;  %v5749_v6 = vpop.f32.mrf.mxu2  ;;  %v7391_v49 = vld [vmem:[#allocation3 + $0x70] sm:$0xff] }
 0x642   : > { %v9773_v40 = vpop.eup %9772  ;;  %v6294_v16 = vsel %vm1525_vm2, %v6292_v17, %v6293_v31  ;;  %v2561_v28 = vrot.slane %v15785_v4, 1  ;;  %v4005_v26 = vsel %vm1525_vm2, %v4003_v27, %v4004_v20  ;;  %v5461_v18 = vld [vmem:[#allocation3 + $0x138] sm:$0xff]  ;;  %v3755_v24 = vsel %vm1272_vm1, %v3752_v50, %v3754_v60 }
 0x643   : > { %v9775_v38 = vpop.eup %9774  ;;  %v13887_v35 = vadd.f32 1.0, %v9773_v40  ;;  %v13892_v57 = vadd.f32 %v6294_v16, %v6191_v55  ;;  %v13900_v34 = vsel %vm1525_vm2, %v2808_v41, %v2810_v22  ;;  %v4117_v3 = vadd.f32 %v4005_v26, %v3865_v29  ;;  %v15787_v41 = vld [vmem:[#allocation51_spill] sm:$0xff] }
 0x644   : > { %v13902_v5 = vadd.f32 1.0, %v9775_v38  ;;  %v2560_v0 = vrot.slane %v15786_v56, 1  ;;  %v5097_v59 = vand.u32 2147483647, %v13848_v19  ;;  %v5099_v36 = vand.u32 2147483648, %v13848_v19  ;;  %5638 = vmatmul.f32.gmra.mxu1 %v5461_v18  ;;  %5796 = vmatmul.f32.gmra.mxu2 %v5461_v18  ;;  %v15788_v17 = vld [vmem:[#allocation75_spill] sm:$0xff]  ;;  %v13924_v29 = vpop.f32.mrf.mxu1 }
 0x645   : > { %9778 = vrcp.f32 %v13887_v35  ;;  %v3867_v50 = vadd.f32 %v3754_v60, %v13704_v46  ;;  %v13911_v11 = vadd.f32 %v2810_v22, %v2669_v13  ;;  %v2812_v37 = vrot.slane %v15787_v41, 2  ;;  %v5910_v43 = vpop.f32.mrf.mxu3  ;;  %5957 = vmatmul.f32.gmra.mxu3 %v5461_v18  ;;  %v15789_v46 = vld [vmem:[#allocation46_spill] sm:$0xff]  ;;  %v6457_v56 = vld [vmem:[#allocation6 + $0x1b0] sm:$0xff] }
 0x646   : > { %v13908_v53 = vpop.eup %9776  ;;  %9780 = vrcp.f32 %v13902_v5  ;;  %v3866_v7 = vadd.f32 %v3755_v24, %v3614_v42  ;;  %v3756_v52 = vrot.slane %v15788_v17, 1  ;;  %v13917_v27 = vsel %vm1272_vm1, %v2560_v0, %v2561_v28  ;;  %7518 = vmatmul.f32.gmra.mxu0 %v7391_v49  ;;  %6512 = vmatpush.msrb.mxu1 %v6457_v56 }
 0x647   : > { %v5089_v55 = vmul.f32 %v13908_v53, %v13848_v19  ;;  %v3757_v60 = vrot.slane %v15789_v46, 1  ;;  %vm5093_vm3 = vweird.f32 %v13848_v19  ;;  %v4175_v22 = vmul.f32 %v13752_v39, %v4117_v3  ;;  %v3547_v16 = vpop.f32.mrf.mxu0 }
 0x648   : > { %v6103_v40 = vrot.slane %v5749_v6, 1  ;;  %vm13926_vm4 = vcmp.eq.f32.partialorder %v5097_v59, 8.507059e+37  ;;  %v5100_v58 = vor.u32 1.1754944e-38, %v5099_v36  ;;  %v6295_v13 = vrot.slane %v5910_v43, 2  ;;  %v6458_v6 = vld [vmem:[#allocation6 + $0x1b8] sm:$0xff] }
 0x649   : > { %v5090_v42 = vsub.f32 1.0, %v5089_v55  ;;  %v5112_v38 = vand.u32 2147483647, %v13887_v35  ;;  %v13932_v4 = vadd.f32 %v13772_v32, %v4175_v22  ;;  %v4006_v26 = vrot.slane %v3547_v16, 2  ;;  %6657 = vmatpush.msrb.mxu2 %v6458_v6 }
 0x64a   : > { %v6104_v28 = vsel %vm1272_vm1, %v6101_v33, %v6103_v40  ;;  %vm5094_vm5 = vweird.f32 %v13908_v53  ;;  %v5114_v3 = vand.u32 2147483648, %v13887_v35  ;;  %v5127_v9 = vand.u32 2147483647, %v13902_v5 }
 0x64b   : > { %v13937_v18 = vpop.eup %9778  ;;  %v5091_v24 = vmul.f32 %v13908_v53, %v5090_v42  ;;  %v6192_v0 = vadd.f32 %v6104_v28, %v13802_v62  ;;  %v9461_v33 = vmul.f32 -1.442695, %v13932_v4  ;;  %v4007_v49 = vsel %vm1525_vm2, %v4004_v20, %v4006_v26  ;;  %vm13959_vm6 = vmor %vm5093_vm3, %vm5094_vm5  ;;  %v13965_v42 = vpop.f32.mrf.mxu2 }
 0x64c   : > { %v9781_v59 = vpop.eup %9780  ;;  %v5104_v36 = vmul.f32 %v13937_v18, %v13887_v35  ;;  %v4118_v22 = vadd.f32 %v4007_v49, %v3866_v7  ;;  %v6296_v62 = vsel %vm1525_vm2, %v6293_v31, %v6295_v13  ;;  %v4119_v20 = vadd.f32 %v4006_v26, %v3867_v50  ;;  %5641 = vmatmul.f32.gmra.mxu1 %v13846_v25  ;;  %v7392_v7 = vld [vmem:[#allocation3 + $0x78] sm:$0xff] }
 0x64d   : > { %v5092_v43 = vadd.f32 %v13908_v53, %v5091_v24  ;;  %v5119_v55 = vmul.f32 %v9781_v59, %v13902_v5  ;;  %9782 = vpow2.f32 %v9461_v33  ;;  %5799 = vmatmul.f32.gmra.mxu2 %v13846_v25  ;;  %v13967_v48 = vadd.f32 %v6296_v62, %v6192_v0  ;;  %5960 = vmatmul.f32.gmra.mxu3 %v13846_v25  ;;  %v13975_v50 = vpop.f32.mrf.mxu3 }
 0x64e   : > { %v5105_v45 = vsub.f32 1.0, %v5104_v36  ;;  %v5129_v13 = vand.u32 2147483648, %v13902_v5  ;;  %v4176_v16 = vmul.f32 %v13752_v39, %v4118_v22  ;;  %7520 = vmatmul.f32.gmra.mxu0 %v7392_v7  ;;  %vm5109_vm7 = vweird.f32 %v13937_v18 }
 0x64f   : > { %v5096_v19 = vsel %vm13959_vm6, %v13908_v53, %v5092_v43  ;;  %v5120_v31 = vsub.f32 1.0, %v5119_v55  ;;  %v4177_v24 = vmul.f32 %v13752_v39, %v4119_v20  ;;  %v13982_v53 = vpop.f32.mrf.mxu1  ;;  %vm5124_vm8 = vweird.f32 %v9781_v59  ;;  %v13988_v0 = vpop.f32.mrf.mxu0 }
 0x650   : > { %v5101_v28 = vsel %vm13926_vm4, %v5100_v58, %v5096_v19  ;;  %v5106_v26 = vmul.f32 %v13937_v18, %v5105_v45  ;;  %v13986_v25 = vadd.f32 %v13772_v32, %v4176_v16  ;;  %vm5108_vm9 = vweird.f32 %v13887_v35 }
 0x651   : > { %v5310_v6 = vmul.f32 %v5101_v28, %v13775_v8  ;;  %v5121_v56 = vmul.f32 %v9781_v59, %v5120_v31  ;;  %vm5123_vm10 = vweird.f32 %v13902_v5  ;;  %v13994_v58 = vadd.f32 %v13772_v32, %v4177_v24  ;;  %vm5110_vm11 = vmor %vm5108_vm9, %vm5109_vm7  ;;  %v15795_v28 = vld [vmem:[#allocation45_spill] sm:$0xff] }
 0x652   : > { %v5107_v63 = vadd.f32 %v13937_v18, %v5106_v26  ;;  %vm5113_vm12 = vcmp.eq.f32.partialorder %v5112_v38, 8.507059e+37  ;;  %v5115_v8 = vor.u32 1.1754944e-38, %v5114_v3  ;;  %v9462_v33 = vmul.f32 -1.442695, %v13986_v25  ;;  %vm5125_vm13 = vmor %vm5123_vm10, %vm5124_vm8  ;;  %v5463_v38 = vld [vmem:[#allocation3 + $0x148] sm:$0xff]  ;;  %v15794_v3 = vld [vmem:[#allocation50_spill] sm:$0xff] }
 0x653   : > { %5364 = vst [vmem:[#allocation3 + $0x150] sm:$0xff] %v5310_v6  ;;  %v5122_v36 = vadd.f32 %v9781_v59, %v5121_v56  ;;  %v9783_v49 = vpop.eup %9782  ;;  %vm5128_vm14 = vcmp.eq.f32.partialorder %v5127_v9, 8.507059e+37  ;;  %v5130_v35 = vor.u32 1.1754944e-38, %v5129_v13  ;;  %v9463_v5 = vmul.f32 -1.442695, %v13994_v58  ;;  %v14007_v9 = vpop.f32.mrf.mxu2 }
 0x654   : > { %5390 = vst [vmem:[#allocation3 + $0x150] sm:$0x1] %v13484_v23  ;;  %v5111_v43 = vsel %vm5110_vm11, %v13937_v18, %v5107_v63  ;;  %v14001_v62 = vadd.f32 1.0, %v9783_v49  ;;  %9784 = vpow2.f32 %v9462_v33  ;;  %v2813_v40 = vrot.slane %v15794_v3, 2  ;;  %5644 = vmatmul.f32.gmra.mxu1 %v5463_v38  ;;  %v7393_v18 = vld [vmem:[#allocation3 + $0x80] sm:$0xff] }
 0x655   : > { %v5116_v55 = vsel %vm5113_vm12, %v5115_v8, %v5111_v43  ;;  %v5126_v22 = vsel %vm5125_vm13, %v9781_v59, %v5122_v36  ;;  %9786 = vpow2.f32 %v9463_v5  ;;  %5802 = vmatmul.f32.gmra.mxu2 %v5463_v38  ;;  %v3758_v59 = vsel %vm1272_vm1, %v3756_v52, %v3757_v60  ;;  %5963 = vmatmul.f32.gmra.mxu3 %v5463_v38  ;;  %v15796_v63 = vld [vmem:[#allocation56_spill] sm:$0xff] }
 0x656   : > { %v5131_v45 = vsel %vm5128_vm14, %v5130_v35, %v5126_v22  ;;  %v14005_v20 = vmul.f32 %v5116_v55, %v13815_v1  ;;  %9788 = vrcp.f32 %v14001_v62  ;;  %v6105_v19 = vrot.slane %v13965_v42, 1  ;;  %7523 = vmatmul.f32.gmra.mxu0 %v7393_v18  ;;  %v14017_v1 = vpop.f32.mrf.mxu3  ;;  %v15799_v55 = vld [vmem:[#allocation25_spill] sm:$0xff]  ;;  %v15800_v18 = vld [vmem:[#allocation55_spill] sm:$0xff] }
 0x657   : > { %v5312_v7 = vmul.f32 %v5131_v45, %v13823_v51  ;;  %v6297_v31 = vrot.slane %v13975_v50, 2  ;;  %v4008_v13 = vrot.slane %v13988_v0, 2  ;;  %v6106_v17 = vrot.slane %v14007_v9, 1  ;;  %v5605_v16 = vpop.f32.mrf.mxu1  ;;  %v14026_v42 = vpop.f32.mrf.mxu0 }
 0x658   : > { %5365 = vst [vmem:[#allocation3 + $0x158] sm:$0xff] %v14005_v20  ;;  %v6298_v52 = vrot.slane %v14017_v1, 2  ;;  %v2920_v51 = vadd.f32 %v13900_v34, %v13878_v54  ;;  %v3759_v26 = vrot.slane %v15795_v28, 1  ;;  %v4009_v50 = vrot.slane %v14026_v42, 2  ;;  %v15797_v54 = vld [vmem:[#allocation68_spill] sm:$0xff]  ;;  %v15801_v16 = vld [vmem:[#allocation77_spill] sm:$0xff] }
 0x659   : > { %5366 = vst [vmem:[#allocation3 + $0x160] sm:$0x3] %v5312_v7  ;;  %v6107_v24 = vsel %vm1272_vm1, %v6105_v19, %v6106_v17  ;;  %v3868_v0 = vadd.f32 %v3758_v59, %v13870_v14  ;;  %v2670_v8 = vadd.f32 %v13917_v27, %v15796_v63  ;;  %v2563_v34 = vrot.slane %v15797_v54, 1  ;;  %v6455_v63 = vld [vmem:[#allocation6 + $0x1a0] sm:$0xff]  ;;  %v6454_v54 = vld [vmem:[#allocation6 + $0x198] sm:$0xff] }
 0x65a   : > { %5408 = vst [vmem:[#allocation3 + $0x161] sm:$0x1] %v13484_v23  ;;  %v6299_v6 = vsel %vm1525_vm2, %v6297_v31, %v6298_v52  ;;  %v9785_v56 = vpop.eup %9784  ;;  %v6193_v33 = vadd.f32 %v6107_v24, %v13924_v29  ;;  %v15798_v23 = vld [vmem:[#allocation67_spill] sm:$0xff]  ;;  %v2814_v35 = vsel %vm1525_vm2, %v2812_v37, %v2813_v40  ;;  %v4010_v14 = vsel %vm1525_vm2, %v4008_v13, %v4009_v50  ;;  %v7394_v37 = vld [vmem:[#allocation3 + $0x88] sm:$0xff] }
 0x65b   : > { %v5464_v36 = vld [vmem:[#allocation3 + $0x150] sm:$0xff]  ;;  %v9787_v49 = vpop.eup %9786  ;;  %v3618_v43 = vadd.f32 %v15798_v23, %v13911_v11  ;;  %v14043_v5 = vadd.f32 1.0, %v9785_v56  ;;  %v3617_v22 = vadd.f32 %v15799_v55, %v2920_v51  ;;  %v4120_v29 = vadd.f32 %v4010_v14, %v3868_v0  ;;  %v5758_v40 = vpop.f32.mrf.mxu2  ;;  %6658 = vmatpush.msrb.mxu2 %v6455_v63  ;;  %6513 = vmatpush.msrb.mxu1 %v6454_v54  ;;  %v14134_v0 = vld [vmem:[#allocation2] sm:$0xff] }
 0x65c   : > { %v14048_v27 = vpop.eup %9788  ;;  %v14051_v38 = vadd.f32 1.0, %v9787_v49  ;;  %v14053_v3 = vadd.f32 %v6299_v6, %v6193_v33  ;;  %v3760_v11 = vsel %vm1272_vm1, %v3757_v60, %v3759_v26  ;;  %5646 = vmatmul.f32.gmra.mxu1 %v5464_v36  ;;  %v14061_v45 = vadd.f32 %v2814_v35, %v2670_v8 }
 0x65d   : > { %v5134_v41 = vmul.f32 %v14048_v27, %v14001_v62  ;;  %9790 = vrcp.f32 %v14043_v5  ;;  %5805 = vmatmul.f32.gmra.mxu2 %v5464_v36  ;;  %v14064_v9 = vadd.f32 %v2563_v34, %v15800_v18  ;;  %v5142_v59 = vand.u32 2147483647, %v14001_v62  ;;  %5966 = vmatmul.f32.gmra.mxu3 %v5464_v36 }
 0x65e   : > { %9792 = vrcp.f32 %v14051_v38  ;;  %7526 = vmatmul.f32.gmra.mxu0 %v7394_v37  ;;  %v5919_v46 = vpop.f32.mrf.mxu3  ;;  %v3870_v60 = vadd.f32 %v3759_v26, %v3618_v43  ;;  %v5144_v19 = vand.u32 2147483648, %v14001_v62  ;;  %v4178_v1 = vmul.f32 %v13752_v39, %v4120_v29  ;;  %v6498_v37 = vld [vmem:[#allocation6 + $0x2f8] sm:$0xff] }
 0x65f   : > { %v5135_v7 = vsub.f32 1.0, %v5134_v41  ;;  %v14070_v31 = vpop.f32.mrf.mxu1  ;;  %v3869_v13 = vadd.f32 %v3760_v11, %v3617_v22  ;;  %v3761_v51 = vrot.slane %v15801_v16, 1  ;;  %v6108_v28 = vrot.slane %v5758_v40, 1  ;;  %v3556_v6 = vpop.f32.mrf.mxu0  ;;  %6805 = vmatpush.msra.mxu3 %v6498_v37 }
 0x660   : > { %v6300_v24 = vrot.slane %v5919_v46, 2  ;;  %vm5138_vm15 = vweird.f32 %v14001_v62  ;;  %vm5139_vm3 = vweird.f32 %v14048_v27  ;;  %v14077_v26 = vadd.f32 %v13772_v32, %v4178_v1  ;;  %v7395_v62 = vld [vmem:[#allocation3 + $0x90] sm:$0xff] }
 0x661   : > { %v5136_v56 = vmul.f32 %v14048_v27, %v5135_v7  ;;  %vm14079_vm4 = vcmp.eq.f32.partialorder %v5142_v59, 8.507059e+37  ;;  %v6109_v8 = vsel %vm1272_vm1, %v6106_v17, %v6108_v28  ;;  %v4011_v34 = vrot.slane %v3556_v6, 2  ;;  %vm5140_vm5 = vmor %vm5138_vm15, %vm5139_vm3 }
 0x662   : > { %v6301_v36 = vsel %vm1525_vm2, %v6298_v52, %v6300_v24  ;;  %v5145_v23 = vor.u32 1.1754944e-38, %v5144_v19  ;;  %v9464_v43 = vmul.f32 -1.442695, %v14077_v26  ;;  %v6194_v35 = vadd.f32 %v6109_v8, %v13982_v53  ;;  %v6495_v19 = vld [vmem:[#allocation6 + $0x2e0] sm:$0xff] }
 0x663   : > { %v14085_v33 = vpop.eup %9790  ;;  %v5137_v49 = vadd.f32 %v14048_v27, %v5136_v56  ;;  %v5157_v52 = vand.u32 2147483647, %v14043_v5  ;;  %v4012_v55 = vsel %vm1525_vm2, %v4009_v50, %v4011_v34  ;;  %v4122_v22 = vadd.f32 %v4011_v34, %v3870_v60  ;;  %v14108_v41 = vpop.f32.mrf.mxu2  ;;  %6806 = vmatpush.msra.mxu3 %v6495_v19  ;;  %v6492_v56 = vld [vmem:[#allocation6 + $0x2c8] sm:$0xff] }
 0x664   : > { %v14090_v14 = vpop.eup %9792  ;;  %v5149_v17 = vmul.f32 %v14085_v33, %v14043_v5  ;;  %v5159_v53 = vand.u32 2147483648, %v14043_v5  ;;  %9794 = vpow2.f32 %v9464_v43  ;;  %5649 = vmatmul.f32.gmra.mxu1 %v14005_v20  ;;  %v4121_v40 = vadd.f32 %v4012_v55, %v3869_v13  ;;  %v15806_v55 = vld [vmem:[#allocation47_spill] sm:$0xff] }
 0x665   : > { %v5141_v29 = vsel %vm5140_vm5, %v14048_v27, %v5137_v49  ;;  %v5164_v11 = vmul.f32 %v14090_v14, %v14051_v38  ;;  %5808 = vmatmul.f32.gmra.mxu2 %v14005_v20  ;;  %v4180_v27 = vmul.f32 %v13752_v39, %v4122_v22  ;;  %5969 = vmatmul.f32.gmra.mxu3 %v14005_v20  ;;  %vm5154_vm6 = vweird.f32 %v14085_v33 }
 0x666   : > { %v5146_v42 = vsel %vm14079_vm4, %v5145_v23, %v5141_v29  ;;  %v5150_v50 = vsub.f32 1.0, %v5149_v17  ;;  %7528 = vmatmul.f32.gmra.mxu0 %v7395_v62  ;;  %v14114_v18 = vpop.f32.mrf.mxu3  ;;  %v5174_v60 = vand.u32 2147483648, %v14051_v38  ;;  %v4179_v13 = vmul.f32 %v13752_v39, %v4121_v40  ;;  %6807 = vmatpush.msra.mxu3 %v6492_v56  ;;  %v5466_v17 = vld [vmem:[#allocation3 + $0x160] sm:$0xff]  ;;  %v15807_v62 = vld [vmem:[#allocation79_spill] sm:$0xff]  ;;  %v6486_v40 = vld [vmem:[#allocation6 + $0x298] sm:$0xff] }
 0x667   : > { %v5313_v59 = vmul.f32 %v5146_v42, %v13932_v4  ;;  %v5165_v46 = vsub.f32 1.0, %v5164_v11  ;;  %v14119_v7 = vpop.f32.mrf.mxu1  ;;  %v14124_v20 = vadd.f32 %v13772_v32, %v4180_v27  ;;  %v14126_v28 = vadd.f32 %v6301_v36, %v6194_v35  ;;  %v14132_v6 = vpop.f32.mrf.mxu0 }
 0x668   : > { %v5151_v1 = vmul.f32 %v14085_v33, %v5150_v50  ;;  %vm5153_vm7 = vweird.f32 %v14043_v5  ;;  %vm5169_vm8 = vweird.f32 %v14090_v14  ;;  %v5172_v24 = vand.u32 2147483647, %v14051_v38 }
 0x669   : > { %5367 = vst [vmem:[#allocation3 + $0x168] sm:$0xff] %v5313_v59  ;;  %v5166_v4 = vmul.f32 %v14090_v14, %v5165_v46  ;;  %vm5168_vm9 = vweird.f32 %v14051_v38  ;;  %v14140_v5 = vadd.f32 %v13772_v32, %v4179_v13  ;;  %v9466_v8 = vmul.f32 -1.442695, %v14124_v20  ;;  %vm5155_vm10 = vmor %vm5153_vm7, %vm5154_vm6  ;;  %v14196_v38 = vld [vmem:[#allocation3 + $0xa0] sm:$0xff] }
 0x66a   : > { %5391 = vst [vmem:[#allocation3 + $0x168] sm:$0x1] %v14134_v0  ;;  %v5152_v63 = vadd.f32 %v14085_v33, %v5151_v1  ;;  %v9795_v54 = vpop.eup %9794  ;;  %vm5158_vm11 = vcmp.eq.f32.partialorder %v5157_v52, 8.507059e+37  ;;  %v5160_v34 = vor.u32 1.1754944e-38, %v5159_v53  ;;  %v5175_v49 = vor.u32 1.1754944e-38, %v5174_v60  ;;  %vm14149_vm12 = vmor %vm5168_vm9, %vm5169_vm8  ;;  %v6489_v52 = vld [vmem:[#allocation6 + $0x2b0] sm:$0xff] }
 0x66b   : > { %v5167_v36 = vadd.f32 %v14090_v14, %v5166_v4  ;;  %v14153_v43 = vadd.f32 1.0, %v9795_v54  ;;  %v9465_v35 = vmul.f32 -1.442695, %v14140_v5  ;;  %9796 = vpow2.f32 %v9466_v8  ;;  %v14160_v53 = vld [vmem:[#allocation3 + $0x98] sm:$0xff]  ;;  %v14162_v11 = vpop.f32.mrf.mxu2  ;;  %6808 = vmatpush.msra.mxu3 %v6489_v52 }
 0x66c   : > { %v5156_v23 = vsel %vm5155_vm10, %v14085_v33, %v5152_v63  ;;  %v3762_v22 = vrot.slane %v15806_v55, 1  ;;  %vm5173_vm13 = vcmp.eq.f32.partialorder %v5172_v24, 8.507059e+37  ;;  %5652 = vmatmul.f32.gmra.mxu1 %v5466_v17  ;;  %v2815_v37 = vrot.slane %v15807_v62, 2  ;;  %v15810_v55 = vld [vmem:[#allocation52_spill] sm:$0xff] }
 0x66d   : > { %v5161_v29 = vsel %vm5158_vm11, %v5160_v34, %v5156_v23  ;;  %v5171_v33 = vsel %vm14149_vm12, %v14090_v14, %v5167_v36  ;;  %5811 = vmatmul.f32.gmra.mxu2 %v5466_v17  ;;  %9798 = vrcp.f32 %v14153_v43  ;;  %5972 = vmatmul.f32.gmra.mxu3 %v5466_v17  ;;  %v15808_v14 = vld [vmem:[#allocation30_spill] sm:$0xff]  ;;  %v6110_v46 = vrot.slane %v14108_v41, 1 }
 0x66e   : > { %v5176_v42 = vsel %vm5173_vm13, %v5175_v49, %v5171_v33  ;;  %v14166_v50 = vmul.f32 %v5161_v29, %v13986_v25  ;;  %7531 = vmatmul.f32.gmra.mxu0 %v14160_v53  ;;  %v3619_v27 = vadd.f32 %v15808_v14, %v14061_v45  ;;  %9800 = vpow2.f32 %v9465_v35  ;;  %v14174_v60 = vpop.f32.mrf.mxu3  ;;  %v6483_v45 = vld [vmem:[#allocation6 + $0x280] sm:$0xff]  ;;  %6809 = vmatpush.msra.mxu3 %v6486_v40  ;;  %v6477_v33 = vld [vmem:[#allocation6 + $0x250] sm:$0xff] }
 0x66f   : > { %v5315_v59 = vmul.f32 %v5176_v42, %v13994_v58  ;;  %v5613_v19 = vpop.f32.mrf.mxu1  ;;  %v6302_v25 = vrot.slane %v14114_v18, 2  ;;  %v4013_v1 = vrot.slane %v14132_v6, 2  ;;  %v6111_v13 = vrot.slane %v14162_v11, 1  ;;  %v3562_v41 = vpop.f32.mrf.mxu0  ;;  %v15809_v17 = vld [vmem:[#allocation78_spill] sm:$0xff] }
 0x670   : > { %5368 = vst [vmem:[#allocation3 + $0x170] sm:$0xff] %v14166_v50  ;;  %v6303_v4 = vrot.slane %v14174_v60, 2  ;;  %v3763_v58 = vsel %vm1272_vm1, %v3761_v51, %v3762_v22  ;;  %v2924_v56 = vadd.f32 %v2815_v37, %v14064_v9  ;;  %v4014_v6 = vrot.slane %v3562_v41, 2  ;;  %6810 = vmatpush.msra.mxu3 %v6483_v45  ;;  %v6480_v9 = vld [vmem:[#allocation6 + $0x268] sm:$0xff] }
 0x671   : > { %5369 = vst [vmem:[#allocation3 + $0x178] sm:$0x3] %v5315_v59  ;;  %v9797_v24 = vpop.eup %9796  ;;  %v6112_v18 = vsel %vm1272_vm1, %v6110_v46, %v6111_v13  ;;  %v5467_v63 = vld [vmem:[#allocation3 + $0x168] sm:$0xff]  ;;  %v3871_v34 = vadd.f32 %v3763_v58, %v3619_v27  ;;  %v3764_v22 = vrot.slane %v15810_v55, 1  ;;  %v5187_v40 = vand.u32 2147483647, %v14153_v43 }
 0x672   : > { %5409 = vst [vmem:[#allocation3 + $0x179] sm:$0x1] %v14134_v0  ;;  %v6304_v8 = vsel %vm1525_vm2, %v6302_v25, %v6303_v4  ;;  %v14190_v54 = vadd.f32 1.0, %v9797_v24  ;;  %v6195_v16 = vadd.f32 %v6112_v18, %v14070_v31  ;;  %v4015_v36 = vsel %vm1525_vm2, %v4013_v1, %v4014_v6  ;;  %6811 = vmatpush.msra.mxu3 %v6480_v9  ;;  %v6474_v59 = vld [vmem:[#allocation6 + $0x238] sm:$0xff]  ;;  %v6451_v9 = vld [vmem:[#allocation6 + $0x180] sm:$0xff] }
 0x673   : > { %v9799_v51 = vpop.eup %9798  ;;  %v5767_v35 = vpop.f32.mrf.mxu2  ;;  %v3621_v52 = vadd.f32 %v15809_v17, %v2924_v56  ;;  %v4123_v29 = vadd.f32 %v4015_v36, %v3871_v34  ;;  %v5189_v14 = vand.u32 2147483648, %v14153_v43  ;;  %vm5183_vm15 = vweird.f32 %v14153_v43  ;;  %v6452_v36 = vld [vmem:[#allocation6 + $0x188] sm:$0xff]  ;;  %6514 = vmatpush.msrb.mxu1 %v6451_v9 }
 0x674   : > { %v9801_v49 = vpop.eup %9800  ;;  %v5179_v23 = vmul.f32 %v9799_v51, %v14153_v43  ;;  %9802 = vrcp.f32 %v14190_v54  ;;  %5654 = vmatmul.f32.gmra.mxu1 %v5467_v63  ;;  %v6113_v62 = vrot.slane %v5767_v35, 1  ;;  %v14203_v42 = vadd.f32 %v6304_v8, %v6195_v16  ;;  %6812 = vmatpush.msra.mxu3 %v6477_v33  ;;  %v6468_v33 = vld [vmem:[#allocation6 + $0x208] sm:$0xff] }
 0x675   : > { %5814 = vmatmul.f32.gmra.mxu2 %v5467_v63  ;;  %v14200_v31 = vadd.f32 1.0, %v9801_v49  ;;  %5975 = vmatmul.f32.gmra.mxu3 %v5467_v63  ;;  %vm5184_vm14 = vweird.f32 %v9799_v51  ;;  %v4181_v19 = vmul.f32 %v13752_v39, %v4123_v29  ;;  %v3873_v25 = vadd.f32 %v3764_v22, %v3621_v52  ;;  %v6471_v49 = vld [vmem:[#allocation6 + $0x220] sm:$0xff] }
 0x676   : > { %7534 = vmatmul.f32.gmra.mxu0 %v14196_v38  ;;  %v5180_v11 = vsub.f32 1.0, %v5179_v23  ;;  %v5928_v37 = vpop.f32.mrf.mxu3  ;;  %v6114_v1 = vsel %vm1272_vm1, %v6111_v13, %v6113_v62  ;;  %6813 = vmatpush.msra.mxu3 %v6474_v59  ;;  %vm14217_vm3 = vmor %vm5183_vm15, %vm5184_vm14  ;;  %vm5188_vm4 = vcmp.eq.f32.partialorder %v5187_v40, 8.507059e+37  ;;  %v5190_v8 = vor.u32 1.1754944e-38, %v5189_v14  ;;  %v6465_v14 = vld [vmem:[#allocation6 + $0x1f0] sm:$0xff]  ;;  %v6459_v63 = vld [vmem:[#allocation6 + $0x1c0] sm:$0xff] }
 0x677   : > { %9804 = vrcp.f32 %v14200_v31  ;;  %v14208_v27 = vpop.f32.mrf.mxu1  ;;  %v6305_v45 = vrot.slane %v5928_v37, 2  ;;  %v3565_v58 = vpop.f32.mrf.mxu0  ;;  %v4239_v56 = vadd.f32 %v13772_v32, %v4181_v19  ;;  %v6196_v6 = vadd.f32 %v6114_v1, %v14119_v7  ;;  %6659 = vmatpush.msrb.mxu2 %v6452_v36 }
 0x678   : > { %v5181_v46 = vmul.f32 %v9799_v51, %v5180_v11  ;;  %v4016_v18 = vrot.slane %v3565_v58, 2  ;;  %v5219_v22 = vand.u32 2147483648, %v14190_v54  ;;  %v5217_v62 = vand.u32 2147483647, %v14190_v54  ;;  %6814 = vmatpush.msra.mxu3 %v6471_v49  ;;  %v7476_v49 = vld [vmem:[#allocation6 + $0x460] sm:$0xff] }
 0x679   : > { %v6306_v13 = vsel %vm1525_vm2, %v6303_v4, %v6305_v45  ;;  %v9467_v34 = vmul.f32 -1.442695, %v4239_v56  ;;  %v14234_v4 = vld [vmem:[#allocation3 + $0xa8] sm:$0xff]  ;;  %vm5213_vm6 = vweird.f32 %v14190_v54  ;;  %vm5198_vm10 = vweird.f32 %v14200_v31 }
 0x67a   : > { %v14213_v41 = vpop.eup %9802  ;;  %v5182_v24 = vadd.f32 %v9799_v51, %v5181_v46  ;;  %v4125_v7 = vadd.f32 %v4016_v18, %v3873_v25  ;;  %v14230_v23 = vadd.f32 %v6306_v13, %v6196_v6  ;;  %6815 = vmatpush.msra.mxu3 %v6468_v33  ;;  %v5220_v25 = vor.u32 1.1754944e-38, %v5219_v22  ;;  %v6462_v45 = vld [vmem:[#allocation6 + $0x1d8] sm:$0xff]  ;;  %v6453_v33 = vld [vmem:[#allocation6 + $0x190] sm:$0xff] }
 0x67b   : > { %v5209_v43 = vmul.f32 %v14213_v41, %v14190_v54  ;;  %9806 = vpow2.f32 %v9467_v34  ;;  %vm5214_vm5 = vweird.f32 %v14213_v41  ;;  %vm5218_vm9 = vcmp.eq.f32.partialorder %v5217_v62, 8.507059e+37 }
 0x67c   : > { %v5186_v16 = vsel %vm14217_vm3, %v9799_v51, %v5182_v24  ;;  %5657 = vmatmul.f32.gmra.mxu1 %v14166_v50  ;;  %v14236_v51 = vpop.f32.mrf.mxu2  ;;  %vm5215_vm8 = vmor %vm5213_vm6, %vm5214_vm5  ;;  %6816 = vmatpush.msra.mxu3 %v6465_v14  ;;  %v7479_v24 = vld [vmem:[#allocation6 + $0x478] sm:$0xff] }
 0x67d   : > { %5817 = vmatmul.f32.gmra.mxu2 %v14166_v50  ;;  %v14232_v35 = vpop.eup %9804  ;;  %v5191_v17 = vsel %vm5188_vm4, %v5190_v8, %v5186_v16  ;;  %v5210_v60 = vsub.f32 1.0, %v5209_v43  ;;  %5978 = vmatmul.f32.gmra.mxu3 %v14166_v50  ;;  %v5204_v50 = vand.u32 2147483648, %v14200_v31  ;;  %v7478_v8 = vld [vmem:[#allocation6 + $0x470] sm:$0xff]  ;;  %v6115_v9 = vrot.slane %v14236_v51, 1 }
 0x67e   : > { %v5316_v52 = vmul.f32 %v5191_v17, %v14077_v26  ;;  %v5194_v55 = vmul.f32 %v14232_v35, %v14200_v31  ;;  %7536 = vmatmul.f32.gmra.mxu0 %v14234_v4  ;;  %v14244_v29 = vpop.f32.mrf.mxu3  ;;  %v4183_v26 = vmul.f32 %v13752_v39, %v4125_v7  ;;  %vm5199_vm7 = vweird.f32 %v14232_v35  ;;  %6817 = vmatpush.msra.mxu3 %v6462_v45  ;;  %v10051_v45 = vld [vmem:[#allocation6 + $0x450] sm:$0xff] }
 0x67f   : > { %v5211_v11 = vmul.f32 %v14213_v41, %v5210_v60  ;;  %v14250_v37 = vpop.f32.mrf.mxu1  ;;  %v5202_v39 = vand.u32 2147483647, %v14200_v31  ;;  %vm14273_vm11 = vmor %vm5198_vm10, %vm5199_vm7  ;;  %v5205_v43 = vor.u32 1.1754944e-38, %v5204_v50  ;;  %v14278_v31 = vld [vmem:[#allocation3 + $0xb0] sm:$0xff]  ;;  %7786 = vmatpush.msra.mxu2 %v7479_v24  ;;  %7625 = vmatpush.msra.mxu1 %v7478_v8  ;;  %v10052_v24 = vld [vmem:[#allocation6 + $0x438] sm:$0xff] }
 0x680   : > { %5370 = vst [vmem:[#allocation3 + $0x180] sm:$0xff] %v5316_v52  ;;  %v5195_v40 = vsub.f32 1.0, %v5194_v55  ;;  %v4241_v46 = vadd.f32 %v13772_v32, %v4183_v26  ;;  %v14262_v1 = vpop.f32.mrf.mxu0  ;;  %v14265_v32 = vld [vmem:[#allocation3 + $0x178] sm:$0xff]  ;;  %6818 = vmatpush.msra.mxu3 %v6459_v63  ;;  %v6403_v63 = vld [vmem:[#allocation3 + $0x20] sm:$0xff]  ;;  %v10053_v8 = vld [vmem:[#allocation6 + $0x420] sm:$0xff] }
 0x681   : > { %5392 = vst [vmem:[#allocation3 + $0x180] sm:$0x1] %v14134_v0  ;;  %v5212_v59 = vadd.f32 %v14213_v41, %v5211_v11  ;;  %v9807_v56 = vpop.eup %9806  ;;  %vm5203_vm12 = vcmp.eq.f32.partialorder %v5202_v39, 8.507059e+37  ;;  %7787 = vmatpush.msra.mxu2 %v7476_v49  ;;  %v7475_v11 = vld [vmem:[#allocation6 + $0x458] sm:$0xff] }
 0x682   : > { %v5196_v19 = vmul.f32 %v14232_v35, %v5195_v40  ;;  %15813 = vst [vmem:[#allocation22_spill] sm:$0xff] %v14262_v1  ;;  %v9469_v54 = vmul.f32 -1.442695, %v4241_v46  ;;  %v4455_v16 = vadd.f32 1.0, %v9807_v56  ;;  %7626 = vmatpush.msra.mxu1 %v7475_v11  ;;  %v6404_v49 = vld [vmem:[#allocation3 + $0x28] sm:$0xff]  ;;  %v10059_v11 = vld [vmem:[#allocation6 + $0x390] sm:$0xff] }
 0x683   : > { %v5216_v58 = vsel %vm5215_vm8, %v14213_v41, %v5212_v59  ;;  %v14296_v59 = vld [vmem:[#allocation3 + $0xb8] sm:$0xff]  ;;  %v7460_v1 = vld [vmem:[#allocation6 + $0x3e0] sm:$0xff] }
 0x684   : > { %v5197_v18 = vadd.f32 %v14232_v35, %v5196_v19  ;;  %v5221_v6 = vsel %vm5218_vm9, %v5220_v25, %v5216_v58  ;;  %5660 = vmatmul.f32.gmra.mxu1 %v14265_v32  ;;  %9808 = vpow2.f32 %v9469_v54  ;;  %v5773_v34 = vpop.f32.mrf.mxu2  ;;  %v10050_v19 = vld [vmem:[#allocation6 + $0x468] sm:$0xff] }
 0x685   : > { %5820 = vmatmul.f32.gmra.mxu2 %v14265_v32  ;;  %v5318_v13 = vmul.f32 %v5221_v6, %v14124_v20  ;;  %5981 = vmatmul.f32.gmra.mxu3 %v14265_v32  ;;  %v6116_v7 = vrot.slane %v5773_v34, 1  ;;  %v6456_v20 = vld [vmem:[#allocation6 + $0x1a8] sm:$0xff]  ;;  %9810 = vrcp.f32 %v4455_v16 }
 0x686   : > { %v5201_v36 = vsel %vm14273_vm11, %v14232_v35, %v5197_v18  ;;  %7539 = vmatmul.f32.gmra.mxu0 %v14278_v31  ;;  %v5934_v60 = vpop.f32.mrf.mxu3  ;;  %v6307_v35 = vrot.slane %v14244_v29, 2  ;;  %6819 = vmatpush.msra.mxu3 %v6456_v20  ;;  %v10054_v34 = vld [vmem:[#allocation6 + $0x408] sm:$0xff] }
 0x687   : > { %v5206_v17 = vsel %vm5203_vm12, %v5205_v43, %v5201_v36  ;;  %5372 = vst [vmem:[#allocation3 + $0x190] sm:$0x3] %v5318_v13  ;;  %v5621_v52 = vpop.f32.mrf.mxu1  ;;  %v6117_v51 = vsel %vm1272_vm1, %v6115_v9, %v6116_v7  ;;  %v6308_v22 = vrot.slane %v5934_v60, 2  ;;  %v14304_v13 = vld [vmem:[#allocation3 + $0xc0] sm:$0xff]  ;;  %v14309_v60 = vld [vmem:[#allocation3 + $0xc8] sm:$0xff] }
 0x688   : > { %v5317_v55 = vmul.f32 %v5206_v17, %v14140_v5  ;;  %5410 = vst [vmem:[#allocation3 + $0x191] sm:$0x1] %v14134_v0  ;;  %v6197_v62 = vadd.f32 %v6117_v51, %v14208_v27  ;;  %6820 = vmatpush.msra.mxu3 %v6453_v33  ;;  %v6402_v0 = vld [vmem:[#allocation3 + $0x18] sm:$0xff]  ;;  %v10057_v17 = vld [vmem:[#allocation6 + $0x3c0] sm:$0xff] }
 0x689   : > { %v14291_v26 = vpop.f32.mrf.mxu0  ;;  %v6309_v40 = vsel %vm1525_vm2, %v6307_v35, %v6308_v22  ;;  %v10058_v52 = vld [vmem:[#allocation6 + $0x3a8] sm:$0xff] }
 0x68a   : > { %5371 = vst [vmem:[#allocation3 + $0x188] sm:$0xff] %v5317_v55  ;;  %v9809_v5 = vpop.eup %9808  ;;  %v14294_v14 = vadd.f32 %v6309_v40, %v6197_v62  ;;  %9538 = vmatpush.msrb.mxu3 %v10050_v19  ;;  %v7473_v35 = vld [vmem:[#allocation6 + $0x448] sm:$0xff] }
 0x68b   : > { %15816 = vst [vmem:[#allocation26_spill] sm:$0xff] %v14291_v26  ;;  %v4457_v29 = vadd.f32 1.0, %v9809_v5  ;;  %v9811_v50 = vpop.eup %9810  ;;  %7788 = vmatpush.msra.mxu2 %v7473_v35  ;;  %v14400_v26 = vld [vmem:[#allocation3 + $0x130] sm:$0xff] }
 0x68c   : > { %6515 = vmatmul.f32.vlgmr.msrb.gmra.mxu1 %v6402_v0  ;;  %v5776_v46 = vpop.f32.mrf.mxu2  ;;  %9539 = vmatpush.msrb.mxu3 %v10051_v45  ;;  %v10061_v45 = vld [vmem:[#allocation6 + $0x360] sm:$0xff] }
 0x68d   : > { %6660 = vmatmul.f32.vlgmr.msrb.gmra.mxu2 %v6402_v0  ;;  %9812 = vrcp.f32 %v4457_v29  ;;  %6821 = vmatmul.f32.vlgmr.msra.gmra.mxu3 %v6402_v0  ;;  %v6118_v27 = vrot.slane %v5776_v46, 1  ;;  %v10060_v29 = vld [vmem:[#allocation6 + $0x378] sm:$0xff]  ;;  %v7472_v46 = vld [vmem:[#allocation6 + $0x440] sm:$0xff] }
 0x68e   : > { %7542 = vmatmul.f32.gmra.mxu0 %v14296_v59  ;;  %v5937_v39 = vpop.f32.mrf.mxu3  ;;  %9540 = vmatpush.msrb.mxu3 %v10052_v24  ;;  %v10062_v24 = vld [vmem:[#allocation6 + $0x348] sm:$0xff] }
 0x68f   : > { %v5623_v25 = vpop.f32.mrf.mxu1  ;;  %v6310_v58 = vrot.slane %v5937_v39, 2  ;;  %v6119_v54 = vsel %vm1272_vm1, %v6116_v7, %v6118_v27  ;;  %v10056_v7 = vld [vmem:[#allocation6 + $0x3d8] sm:$0xff]  ;;  %v6405_v39 = vld [vmem:[#allocation3 + $0x30] sm:$0xff]  ;;  %7627 = vmatpush.msra.mxu1 %v7472_v46 }
 0x690   : > { %v6198_v18 = vadd.f32 %v6119_v54, %v14250_v37  ;;  %9541 = vmatpush.msrb.mxu3 %v10053_v8  ;;  %v10055_v37 = vld [vmem:[#allocation6 + $0x3f0] sm:$0xff]  ;;  %v14318_v54 = vld [vmem:[#allocation3 + $0xd0] sm:$0xff] }
 0x691   : > { %v6311_v6 = vsel %vm1525_vm2, %v6308_v22, %v6310_v58 }
 0x692   : > { %v7503_v56 = vpop.f32.mrf.mxu0  ;;  %v14302_v43 = vadd.f32 %v6311_v6, %v6198_v18  ;;  %9542 = vmatpush.msrb.mxu3 %v10054_v34  ;;  %v10063_v6 = vld [vmem:[#allocation6 + $0x330] sm:$0xff] }
 0x693   : > { %v9813_v41 = vpop.eup %9812 }
 0x694   : > { %6518 = vmatmul.f32.gmra.mxu1 %v6403_v63  ;;  %15817 = vst [vmem:[#allocation107_spill] sm:$0xff] %v14302_v43  ;;  %9543 = vmatpush.msrb.mxu3 %v10055_v37 }
 0x695   : > { %6663 = vmatmul.f32.gmra.mxu2 %v6403_v63  ;;  %v5779_v16 = vpop.f32.mrf.mxu2  ;;  %6824 = vmatmul.f32.gmra.mxu3 %v6403_v63 }
 0x696   : > { %7544 = vmatmul.f32.gmra.mxu0 %v14304_v13  ;;  %v5940_v36 = vpop.f32.mrf.mxu3  ;;  %9544 = vmatpush.msrb.mxu3 %v10056_v7  ;;  %v6120_v51 = vrot.slane %v5779_v16, 1  ;;  %v10064_v16 = vld [vmem:[#allocation6 + $0x318] sm:$0xff]  ;;  %v6406_v7 = vld [vmem:[#allocation3 + $0x38] sm:$0xff] }
 0x697   : > { %v5626_v9 = vpop.f32.mrf.mxu1  ;;  %v6312_v62 = vrot.slane %v5940_v36, 2 }
 0x698   : > { %9545 = vmatpush.msrb.mxu3 %v10057_v17 }
 0x69a   : > { %v14307_v20 = vpop.f32.mrf.mxu0  ;;  %9546 = vmatpush.msrb.mxu3 %v10058_v52  ;;  %v14325_v52 = vld [vmem:[#allocation3 + $0xd8] sm:$0xff] }
 0x69b   : > { %15818 = vst [vmem:[#allocation29_spill] sm:$0xff] %v14307_v20  ;;  %v10070_v20 = vld [vmem:[#allocation3 + $0x90] sm:$0xff] }
 0x69c   : > { %6521 = vmatmul.f32.gmra.mxu1 %v6404_v49  ;;  %9547 = vmatpush.msrb.mxu3 %v10059_v11  ;;  %v7470_v11 = vld [vmem:[#allocation6 + $0x430] sm:$0xff] }
 0x69d   : > { %6666 = vmatmul.f32.gmra.mxu2 %v6404_v49  ;;  %6827 = vmatmul.f32.gmra.mxu3 %v6404_v49  ;;  %v10065_v49 = vld [vmem:[#allocation6 + $0x300] sm:$0xff] }
 0x69e   : > { %7547 = vmatmul.f32.gmra.mxu0 %v14309_v60  ;;  %v5782_v55 = vpop.f32.mrf.mxu2  ;;  %v5943_v33 = vpop.f32.mrf.mxu3  ;;  %9548 = vmatpush.msrb.mxu3 %v10060_v29 }
 0x69f   : > { %v6121_v22 = vrot.slane %v5782_v55, 1  ;;  %v6313_v40 = vrot.slane %v5943_v33, 2  ;;  %v5629_v5 = vpop.f32.mrf.mxu1  ;;  %v14330_v33 = vld [vmem:[#allocation3 + $0xe0] sm:$0xff]  ;;  %7789 = vmatpush.msra.mxu2 %v7470_v11 }
 0x6a0   : > { %9549 = vmatpush.msrb.mxu3 %v10061_v45  ;;  %v7469_v45 = vld [vmem:[#allocation6 + $0x428] sm:$0xff] }
 0x6a1   : > { %v6122_v0 = vsel %vm1272_vm1, %v6120_v51, %v6121_v22  ;;  %v6314_v27 = vsel %vm1525_vm2, %v6312_v62, %v6313_v40  ;;  %7628 = vmatpush.msra.mxu1 %v7469_v45 }
 0x6a2   : > { %v14313_v50 = vpop.f32.mrf.mxu0  ;;  %v6199_v19 = vadd.f32 %v6122_v0, %v5623_v25  ;;  %9550 = vmatpush.msrb.mxu3 %v10062_v24  ;;  %v6408_v24 = vld [vmem:[#allocation3 + $0x48] sm:$0xff] }
 0x6a3   : > { %15819 = vst [vmem:[#allocation69_spill] sm:$0xff] %v14313_v50 }
 0x6a4   : > { %6523 = vmatmul.f32.gmra.mxu1 %v6405_v39  ;;  %v14316_v58 = vadd.f32 %v6314_v27, %v6199_v19  ;;  %9551 = vmatpush.msrb.mxu3 %v10063_v6 }
 0x6a5   : > { %6669 = vmatmul.f32.gmra.mxu2 %v6405_v39  ;;  %6830 = vmatmul.f32.gmra.mxu3 %v6405_v39 }
 0x6a6   : > { %15820 = vst [vmem:[#allocation11_spill] sm:$0xff] %v14316_v58  ;;  %7550 = vmatmul.f32.gmra.mxu0 %v14318_v54  ;;  %v5785_v56 = vpop.f32.mrf.mxu2  ;;  %v5946_v25 = vpop.f32.mrf.mxu3  ;;  %9552 = vmatpush.msrb.mxu3 %v10064_v16 }
 0x6a7   : > { %v6123_v18 = vrot.slane %v5785_v56, 1  ;;  %v6315_v63 = vrot.slane %v5946_v25, 2  ;;  %v14337_v25 = vld [vmem:[#allocation3 + $0xe8] sm:$0xff] }
 0x6a8   : > { %9553 = vmatpush.msrb.mxu3 %v10065_v49 }
 0x6a9   : > { %v5631_v8 = vpop.f32.mrf.mxu1  ;;  %v6124_v41 = vsel %vm1272_vm1, %v6121_v22, %v6123_v18  ;;  %v6316_v37 = vsel %vm1525_vm2, %v6313_v40, %v6315_v63 }
 0x6aa   : > { %v7511_v34 = vpop.f32.mrf.mxu0  ;;  %v6200_v36 = vadd.f32 %v6124_v41, %v5626_v9  ;;  %v6407_v9 = vld [vmem:[#allocation3 + $0x40] sm:$0xff] }
 0x6ac   : > { %6526 = vmatmul.f32.gmra.mxu1 %v6406_v7  ;;  %v14323_v17 = vadd.f32 %v6316_v37, %v6200_v36 }
 0x6ad   : > { %6672 = vmatmul.f32.gmra.mxu2 %v6406_v7  ;;  %6833 = vmatmul.f32.gmra.mxu3 %v6406_v7 }
 0x6ae   : > { %15821 = vst [vmem:[#allocation83_spill] sm:$0xff] %v14323_v17  ;;  %7552 = vmatmul.f32.gmra.mxu0 %v14325_v52 }
 0x6af   : > { %v5788_v55 = vpop.f32.mrf.mxu2 }
 0x6b0   : > { %v5949_v35 = vpop.f32.mrf.mxu3  ;;  %v6125_v40 = vrot.slane %v5788_v55, 1 }
 0x6b1   : > { %v5634_v51 = vpop.f32.mrf.mxu1  ;;  %v6317_v29 = vrot.slane %v5949_v35, 2  ;;  %v14344_v35 = vld [vmem:[#allocation3 + $0xf0] sm:$0xff] }
 0x6b2   : > { %v14328_v22 = vpop.f32.mrf.mxu0 }
 0x6b3   : > { %15822 = vst [vmem:[#allocation53_spill] sm:$0xff] %v14328_v22 }
 0x6b4   : > { %6529 = vmatmul.f32.gmra.mxu1 %v6407_v9 }
 0x6b5   : > { %6675 = vmatmul.f32.gmra.mxu2 %v6407_v9  ;;  %6836 = vmatmul.f32.gmra.mxu3 %v6407_v9 }
 0x6b6   : > { %7555 = vmatmul.f32.gmra.mxu0 %v14330_v33 }
 0x6b7   : > { %v5791_v62 = vpop.f32.mrf.mxu2 }
 0x6b8   : > { %v6126_v5 = vrot.slane %v5791_v62, 1  ;;  %v5952_v0 = vpop.f32.mrf.mxu3 }
 0x6b9   : > { %v6318_v46 = vrot.slane %v5952_v0, 2  ;;  %v5637_v19 = vpop.f32.mrf.mxu1 }
 0x6ba   : > { %v6127_v27 = vsel %vm1272_vm1, %v6125_v40, %v6126_v5 }
 0x6bb   : > { %v14334_v39 = vpop.f32.mrf.mxu0  ;;  %v6201_v56 = vadd.f32 %v6127_v27, %v5631_v8  ;;  %v6319_v18 = vsel %vm1525_vm2, %v6317_v29, %v6318_v46  ;;  %v6409_v8 = vld [vmem:[#allocation3 + $0x50] sm:$0xff]  ;;  %v7467_v29 = vld [vmem:[#allocation6 + $0x418] sm:$0xff] }
 0x6bc   : > { %15823 = vst [vmem:[#allocation23_spill] sm:$0xff] %v14334_v39  ;;  %6531 = vmatmul.f32.gmra.mxu1 %v6408_v24  ;;  %7790 = vmatpush.msra.mxu2 %v7467_v29  ;;  %v14379_v39 = vld [vmem:[#allocation3 + $0x118] sm:$0xff] }
 0x6bd   : > { %6678 = vmatmul.f32.gmra.mxu2 %v6408_v24  ;;  %v14339_v6 = vadd.f32 %v6319_v18, %v6201_v56  ;;  %6839 = vmatmul.f32.gmra.mxu3 %v6408_v24 }
 0x6be   : > { %7558 = vmatmul.f32.gmra.mxu0 %v14337_v25 }
 0x6bf   : > { %15824 = vst [vmem:[#allocation108_spill] sm:$0xff] %v14339_v6  ;;  %v5794_v63 = vpop.f32.mrf.mxu2 }
 0x6c0   : > { %v6128_v41 = vrot.slane %v5794_v63, 1  ;;  %v5955_v16 = vpop.f32.mrf.mxu3 }
 0x6c1   : > { %v6320_v34 = vrot.slane %v5955_v16, 2  ;;  %v5639_v36 = vpop.f32.mrf.mxu1  ;;  %v7466_v16 = vld [vmem:[#allocation6 + $0x410] sm:$0xff] }
 0x6c2   : > { %v6129_v37 = vsel %vm1272_vm1, %v6126_v5, %v6128_v41  ;;  %v6410_v5 = vld [vmem:[#allocation3 + $0x58] sm:$0xff]  ;;  %7629 = vmatpush.msra.mxu1 %v7466_v16 }
 0x6c3   : > { %v7519_v7 = vpop.f32.mrf.mxu0  ;;  %v6202_v49 = vadd.f32 %v6129_v37, %v5634_v51  ;;  %v6321_v55 = vsel %vm1525_vm2, %v6318_v46, %v6320_v34  ;;  %v14351_v51 = vld [vmem:[#allocation3 + $0xf8] sm:$0xff]  ;;  %v6411_v34 = vld [vmem:[#allocation3 + $0x60] sm:$0xff] }
 0x6c4   : > { %6534 = vmatmul.f32.gmra.mxu1 %v6409_v8 }
 0x6c5   : > { %6681 = vmatmul.f32.gmra.mxu2 %v6409_v8  ;;  %v14346_v9 = vadd.f32 %v6321_v55, %v6202_v49  ;;  %6842 = vmatmul.f32.gmra.mxu3 %v6409_v8  ;;  %v14358_v8 = vld [vmem:[#allocation3 + $0x100] sm:$0xff] }
 0x6c6   : > { %7560 = vmatmul.f32.gmra.mxu0 %v14344_v35 }
 0x6c7   : > { %15825 = vst [vmem:[#allocation105_spill] sm:$0xff] %v14346_v9  ;;  %v5797_v11 = vpop.f32.mrf.mxu2 }
 0x6c8   : > { %v5958_v62 = vpop.f32.mrf.mxu3  ;;  %v6130_v19 = vrot.slane %v5797_v11, 1 }
 0x6c9   : > { %v5642_v40 = vpop.f32.mrf.mxu1  ;;  %v6322_v24 = vrot.slane %v5958_v62, 2 }
 0x6cb   : > { %v14349_v0 = vpop.f32.mrf.mxu0 }
 0x6cc   : > { %15826 = vst [vmem:[#allocation99_spill] sm:$0xff] %v14349_v0  ;;  %6537 = vmatmul.f32.gmra.mxu1 %v6410_v5  ;;  %v10067_v0 = vld [vmem:[#allocation3 + $0x78] sm:$0xff] }
 0x6cd   : > { %6684 = vmatmul.f32.gmra.mxu2 %v6410_v5  ;;  %6845 = vmatmul.f32.gmra.mxu3 %v6410_v5 }
 0x6ce   : > { %7563 = vmatmul.f32.gmra.mxu0 %v14351_v51 }
 0x6d0   : > { %v5800_v46 = vpop.f32.mrf.mxu2  ;;  %v5961_v45 = vpop.f32.mrf.mxu3 }
 0x6d1   : > { %v6131_v27 = vrot.slane %v5800_v46, 1  ;;  %v6323_v56 = vrot.slane %v5961_v45, 2  ;;  %v5645_v18 = vpop.f32.mrf.mxu1 }
 0x6d2   : > { %v14365_v18 = vld [vmem:[#allocation3 + $0x108] sm:$0xff] }
 0x6d3   : > { %v6132_v63 = vsel %vm1272_vm1, %v6130_v19, %v6131_v27  ;;  %v14355_v41 = vpop.f32.mrf.mxu0  ;;  %v6324_v7 = vsel %vm1525_vm2, %v6322_v24, %v6323_v56 }
 0x6d4   : > { %15827 = vst [vmem:[#allocation28_spill] sm:$0xff] %v14355_v41  ;;  %v6203_v37 = vadd.f32 %v6132_v63, %v5639_v36  ;;  %6539 = vmatmul.f32.gmra.mxu1 %v6411_v34  ;;  %v6412_v36 = vld [vmem:[#allocation3 + $0x68] sm:$0xff] }
 0x6d5   : > { %6687 = vmatmul.f32.gmra.mxu2 %v6411_v34  ;;  %6848 = vmatmul.f32.gmra.mxu3 %v6411_v34 }
 0x6d6   : > { %v14360_v49 = vadd.f32 %v6324_v7, %v6203_v37  ;;  %7566 = vmatmul.f32.gmra.mxu0 %v14358_v8 }
 0x6d8   : > { %15828 = vst [vmem:[#allocation110_spill] sm:$0xff] %v14360_v49  ;;  %v5803_v55 = vpop.f32.mrf.mxu2  ;;  %v5964_v62 = vpop.f32.mrf.mxu3 }
 0x6d9   : > { %v6133_v11 = vrot.slane %v5803_v55, 1  ;;  %v6325_v5 = vrot.slane %v5964_v62, 2  ;;  %v5647_v29 = vpop.f32.mrf.mxu1 }
 0x6db   : > { %v6134_v46 = vsel %vm1272_vm1, %v6131_v27, %v6133_v11  ;;  %v7527_v19 = vpop.f32.mrf.mxu0  ;;  %v6326_v24 = vsel %vm1525_vm2, %v6323_v56, %v6325_v5  ;;  %v10066_v27 = vld [vmem:[#allocation3 + $0x70] sm:$0xff] }
 0x6dc   : > { %v6204_v45 = vadd.f32 %v6134_v46, %v5642_v40  ;;  %6542 = vmatmul.f32.gmra.mxu1 %v6412_v36  ;;  %v14372_v40 = vld [vmem:[#allocation3 + $0x110] sm:$0xff] }
 0x6dd   : > { %6690 = vmatmul.f32.gmra.mxu2 %v6412_v36  ;;  %6851 = vmatmul.f32.gmra.mxu3 %v6412_v36  ;;  %v7464_v56 = vld [vmem:[#allocation6 + $0x400] sm:$0xff] }
 0x6de   : > { %v14367_v63 = vadd.f32 %v6326_v24, %v6204_v45  ;;  %7568 = vmatmul.f32.gmra.mxu0 %v14365_v18  ;;  %7791 = vmatpush.msra.mxu2 %v7464_v56 }
 0x6e0   : > { %15829 = vst [vmem:[#allocation109_spill] sm:$0xff] %v14367_v63  ;;  %v5806_v16 = vpop.f32.mrf.mxu2  ;;  %v5967_v34 = vpop.f32.mrf.mxu3 }
 0x6e1   : > { %v5650_v37 = vpop.f32.mrf.mxu1  ;;  %v6135_v11 = vrot.slane %v5806_v16, 1  ;;  %v6327_v46 = vrot.slane %v5967_v34, 2 }
 0x6e3   : > { %v14370_v7 = vpop.f32.mrf.mxu0 }
 0x6e4   : > { %15830 = vst [vmem:[#allocation36_spill] sm:$0xff] %v14370_v7  ;;  %6545 = vmatmul.f32.gmra.mxu1 %v10066_v27  ;;  %v7463_v7 = vld [vmem:[#allocation6 + $0x3f8] sm:$0xff] }
 0x6e5   : > { %6693 = vmatmul.f32.gmra.mxu2 %v10066_v27  ;;  %6854 = vmatmul.f32.gmra.mxu3 %v10066_v27 }
 0x6e6   : > { %7571 = vmatmul.f32.gmra.mxu0 %v14372_v40  ;;  %7630 = vmatpush.msra.mxu1 %v7463_v7 }
 0x6e8   : > { %v5809_v55 = vpop.f32.mrf.mxu2  ;;  %v5970_v5 = vpop.f32.mrf.mxu3  ;;  %7631 = vmatpush.msra.mxu1 %v7460_v1 }
 0x6e9   : > { %v6136_v62 = vrot.slane %v5809_v55, 1  ;;  %v6328_v19 = vrot.slane %v5970_v5, 2  ;;  %v5653_v36 = vpop.f32.mrf.mxu1 }
 0x6eb   : > { %v6137_v45 = vsel %vm1272_vm1, %v6135_v11, %v6136_v62  ;;  %v14376_v24 = vpop.f32.mrf.mxu0  ;;  %v6329_v27 = vsel %vm1525_vm2, %v6327_v46, %v6328_v19 }
 0x6ec   : > { %15831 = vst [vmem:[#allocation57_spill] sm:$0xff] %v14376_v24  ;;  %v6205_v41 = vadd.f32 %v6137_v45, %v5647_v29  ;;  %6547 = vmatmul.f32.gmra.mxu1 %v10067_v0  ;;  %v10068_v45 = vld [vmem:[#allocation3 + $0x80] sm:$0xff] }
 0x6ed   : > { %6696 = vmatmul.f32.gmra.mxu2 %v10067_v0  ;;  %6857 = vmatmul.f32.gmra.mxu3 %v10067_v0  ;;  %v14386_v24 = vld [vmem:[#allocation3 + $0x120] sm:$0xff] }
 0x6ee   : > { %v14381_v16 = vadd.f32 %v6329_v27, %v6205_v41  ;;  %7574 = vmatmul.f32.gmra.mxu0 %v14379_v39 }
 0x6f0   : > { %15832 = vst [vmem:[#allocation84_spill] sm:$0xff] %v14381_v16  ;;  %v5812_v34 = vpop.f32.mrf.mxu2  ;;  %v5973_v55 = vpop.f32.mrf.mxu3 }
 0x6f1   : > { %v6138_v56 = vrot.slane %v5812_v34, 1  ;;  %v6330_v11 = vrot.slane %v5973_v55, 2  ;;  %v5655_v5 = vpop.f32.mrf.mxu1 }
 0x6f3   : > { %v6139_v7 = vsel %vm1272_vm1, %v6136_v62, %v6138_v56  ;;  %v7535_v29 = vpop.f32.mrf.mxu0  ;;  %v6331_v46 = vsel %vm1525_vm2, %v6328_v19, %v6330_v11  ;;  %v10069_v62 = vld [vmem:[#allocation3 + $0x88] sm:$0xff]  ;;  %v7461_v19 = vld [vmem:[#allocation6 + $0x3e8] sm:$0xff] }
 0x6f4   : > { %v6206_v36 = vadd.f32 %v6139_v7, %v5650_v37  ;;  %6550 = vmatmul.f32.gmra.mxu1 %v10068_v45  ;;  %v14393_v37 = vld [vmem:[#allocation3 + $0x128] sm:$0xff]  ;;  %7792 = vmatpush.msra.mxu2 %v7461_v19 }
 0x6f5   : > { %6699 = vmatmul.f32.gmra.mxu2 %v10068_v45  ;;  %6860 = vmatmul.f32.gmra.mxu3 %v10068_v45 }
 0x6f6   : > { %v14388_v41 = vadd.f32 %v6331_v46, %v6206_v36  ;;  %7576 = vmatmul.f32.gmra.mxu0 %v14386_v24 }
 0x6f8   : > { %15833 = vst [vmem:[#allocation32_spill] sm:$0xff] %v14388_v41  ;;  %v5815_v0 = vpop.f32.mrf.mxu2  ;;  %v5976_v27 = vpop.f32.mrf.mxu3  ;;  %v15838_v41 = vld [vmem:[#allocation90_spill] sm:$0xff] }
 0x6f9   : > { %v5658_v34 = vpop.f32.mrf.mxu1  ;;  %v6140_v11 = vrot.slane %v5815_v0, 1  ;;  %v6332_v46 = vrot.slane %v5976_v27, 2  ;;  %v6066_v16 = vrot.slane %v15838_v41, 1  ;;  %v15841_v41 = vld [vmem:[#allocation94_spill] sm:$0xff] }
 0x6fb   : > { %v14391_v55 = vpop.f32.mrf.mxu0 }
 0x6fc   : > { %15834 = vst [vmem:[#allocation58_spill] sm:$0xff] %v14391_v55  ;;  %6553 = vmatmul.f32.gmra.mxu1 %v10069_v62 }
 0x6fd   : > { %6702 = vmatmul.f32.gmra.mxu2 %v10069_v62  ;;  %6863 = vmatmul.f32.gmra.mxu3 %v10069_v62 }
 0x6fe   : > { %7579 = vmatmul.f32.gmra.mxu0 %v14393_v37 }
 0x700   : > { %v5818_v56 = vpop.f32.mrf.mxu2  ;;  %v5979_v29 = vpop.f32.mrf.mxu3 }
 0x701   : > { %v6141_v7 = vrot.slane %v5818_v56, 1  ;;  %v5661_v36 = vpop.f32.mrf.mxu1  ;;  %v6333_v22 = vrot.slane %v5979_v29, 2 }
 0x703   : > { %v6142_v45 = vsel %vm1272_vm1, %v6140_v11, %v6141_v7  ;;  %v14397_v55 = vpop.f32.mrf.mxu0  ;;  %v6334_v62 = vsel %vm1525_vm2, %v6332_v46, %v6333_v22 }
 0x704   : > { %15835 = vst [vmem:[#allocation88_spill] sm:$0xff] %v14397_v55  ;;  %v6207_v50 = vadd.f32 %v6142_v45, %v5655_v5  ;;  %6555 = vmatmul.f32.gmra.mxu1 %v10070_v20  ;;  %v15837_v55 = vld [vmem:[#allocation82_spill] sm:$0xff] }
 0x705   : > { %6705 = vmatmul.f32.gmra.mxu2 %v10070_v20  ;;  %6866 = vmatmul.f32.gmra.mxu3 %v10070_v20  ;;  %v6065_v46 = vrot.slane %v15837_v55, 1 }
 0x706   : > { %v14402_v19 = vadd.f32 %v6334_v62, %v6207_v50  ;;  %7582 = vmatmul.f32.gmra.mxu0 %v14400_v26  ;;  %v14411_v50 = vld [vmem:[#allocation3 + $0x138] sm:$0xff] }
 0x707   : > { %v6067_v55 = vsel %vm1272_vm1, %v6065_v46, %v6066_v16  ;;  %v7458_v46 = vld [vmem:[#allocation6 + $0x3d0] sm:$0xff] }
 0x708   : > { %15836 = vst [vmem:[#allocation12_spill] sm:$0xff] %v14402_v19  ;;  %v5821_v0 = vpop.f32.mrf.mxu2  ;;  %v5982_v56 = vpop.f32.mrf.mxu3  ;;  %7793 = vmatpush.msra.mxu2 %v7458_v46 }
 0x709   : > { %v6143_v27 = vrot.slane %v5821_v0, 1  ;;  %v6516_v11 = vpop.f32.mrf.mxu1  ;;  %v6335_v29 = vrot.slane %v5982_v56, 2  ;;  %v6258_v0 = vrot.slane %v15841_v41, 2 }
 0x70b   : > { %v6144_v5 = vsel %vm1272_vm1, %v6141_v7, %v6143_v27  ;;  %v7543_v36 = vpop.f32.mrf.mxu0  ;;  %v6336_v20 = vsel %vm1525_vm2, %v6333_v22, %v6335_v29  ;;  %v15844_v29 = vld [vmem:[#allocation100_spill] sm:$0xff] }
 0x70c   : > { %v6208_v45 = vadd.f32 %v6144_v5, %v5658_v34  ;;  %6558 = vmatmul.f32.gmra.mxu1 %v14160_v53  ;;  %v15840_v34 = vld [vmem:[#allocation87_spill] sm:$0xff]  ;;  %v15842_v5 = vld [vmem:[#allocation85_spill] sm:$0xff] }
 0x70d   : > { %6708 = vmatmul.f32.gmra.mxu2 %v14160_v53  ;;  %6869 = vmatmul.f32.gmra.mxu3 %v14160_v53  ;;  %v6257_v62 = vrot.slane %v15840_v34, 2  ;;  %v6177_v36 = vadd.f32 %v6067_v55, %v15842_v5  ;;  %v14427_v53 = vld [vmem:[#allocation3 + $0x140] sm:$0xff]  ;;  %v15845_v5 = vld [vmem:[#allocation97_spill] sm:$0xff] }
 0x70e   : > { %v14413_v1 = vadd.f32 %v6336_v20, %v6208_v45  ;;  %7584 = vmatmul.f32.gmra.mxu0 %v14411_v50  ;;  %v6068_v45 = vrot.slane %v15844_v29, 1  ;;  %v6260_v29 = vrot.slane %v15845_v5, 2  ;;  %v7455_v5 = vld [vmem:[#allocation6 + $0x3b8] sm:$0xff] }
 0x70f   : > { %v6259_v20 = vsel %vm1525_vm2, %v6257_v62, %v6258_v0  ;;  %7794 = vmatpush.msra.mxu2 %v7455_v5 }
 0x710   : > { %15839 = vst [vmem:[#allocation92_spill] sm:$0xff] %v14413_v1  ;;  %v6661_v7 = vpop.f32.mrf.mxu2  ;;  %v6822_v27 = vpop.f32.mrf.mxu3  ;;  %v6369_v34 = vadd.f32 %v6259_v20, %v6177_v36  ;;  %v6069_v55 = vsel %vm1272_vm1, %v6066_v16, %v6068_v45  ;;  %v6261_v36 = vsel %vm1525_vm2, %v6258_v0, %v6260_v29 }
 0x711   : > { %v6519_v56 = vpop.f32.mrf.mxu1  ;;  %v7238_v49 = vrot.slane %v6822_v27, 2 }
 0x712   : > { %v6966_v1 = vadd.f32 %v6516_v11, %v6369_v34 }
 0x713   : > { %v14421_v22 = vpop.f32.mrf.mxu0 }
 0x714   : > { %15843 = vst [vmem:[#allocation59_spill] sm:$0xff] %v14421_v22  ;;  %6561 = vmatmul.f32.gmra.mxu1 %v14196_v38  ;;  %v7046_v22 = vrot.slane %v6661_v7, 1  ;;  %v7457_v7 = vld [vmem:[#allocation6 + $0x3c8] sm:$0xff] }
 0x715   : > { %6711 = vmatmul.f32.gmra.mxu2 %v14196_v38  ;;  %6872 = vmatmul.f32.gmra.mxu3 %v14196_v38  ;;  %v15846_v38 = vld [vmem:[#allocation91_spill] sm:$0xff] }
 0x716   : > { %7587 = vmatmul.f32.gmra.mxu0 %v14427_v53  ;;  %v6178_v17 = vadd.f32 %v6069_v55, %v15846_v38  ;;  %7632 = vmatpush.msra.mxu1 %v7457_v7  ;;  %v15847_v38 = vld [vmem:[#allocation103_spill] sm:$0xff] }
 0x718   : > { %v6664_v41 = vpop.f32.mrf.mxu2  ;;  %v6825_v19 = vpop.f32.mrf.mxu3 }
 0x719   : > { %v7047_v62 = vrot.slane %v6664_v41, 1  ;;  %v6522_v63 = vpop.f32.mrf.mxu1  ;;  %v7239_v6 = vrot.slane %v6825_v19, 2 }
 0x71a   : > { %v14443_v63 = vld [vmem:[#allocation3 + $0x148] sm:$0xff] }
 0x71b   : > { %v7048_v9 = vsel %vm1272_vm1, %v7046_v22, %v7047_v62  ;;  %v14435_v43 = vpop.f32.mrf.mxu0  ;;  %v7240_v16 = vsel %vm1525_vm2, %v7238_v49, %v7239_v6 }
 0x71c   : > { %v7158_v58 = vadd.f32 %v7048_v9, %v6966_v1  ;;  %6563 = vmatmul.f32.gmra.mxu1 %v14234_v4  ;;  %v6370_v9 = vadd.f32 %v6261_v36, %v6178_v17  ;;  %v14453_v17 = vld [vmem:[#allocation3 + $0x150] sm:$0xff] }
 0x71d   : > { %6714 = vmatmul.f32.gmra.mxu2 %v14234_v4  ;;  %6875 = vmatmul.f32.gmra.mxu3 %v14234_v4 }
 0x71e   : > { %v14441_v11 = vadd.f32 %v7240_v16, %v7158_v58  ;;  %7590 = vmatmul.f32.gmra.mxu0 %v14443_v63  ;;  %v6967_v0 = vadd.f32 %v6519_v56, %v6370_v9 }
 0x720   : > { %v6667_v19 = vpop.f32.mrf.mxu2  ;;  %v6828_v27 = vpop.f32.mrf.mxu3 }
 0x721   : > { %v7049_v1 = vrot.slane %v6667_v19, 1  ;;  %v6524_v49 = vpop.f32.mrf.mxu1  ;;  %v7241_v45 = vrot.slane %v6828_v27, 2 }
 0x722   : > { %v6968_v36 = vadd.f32 %v6524_v49, %v15847_v38  ;;  %v10071_v49 = vld [vmem:[#allocation3 + $0x160] sm:$0xff] }
 0x723   : > { %v7050_v22 = vsel %vm1272_vm1, %v7047_v62, %v7049_v1  ;;  %v7551_v58 = vpop.f32.mrf.mxu0  ;;  %v7242_v46 = vsel %vm1525_vm2, %v7239_v6, %v7241_v45  ;;  %v14461_v6 = vld [vmem:[#allocation3 + $0x158] sm:$0xff]  ;;  %v7454_v45 = vld [vmem:[#allocation6 + $0x3b0] sm:$0xff] }
 0x724   : > { %v7159_v20 = vadd.f32 %v7050_v22, %v6967_v0  ;;  %6566 = vmatmul.f32.gmra.mxu1 %v14278_v31 }
 0x725   : > { %6717 = vmatmul.f32.gmra.mxu2 %v14278_v31  ;;  %6878 = vmatmul.f32.gmra.mxu3 %v14278_v31 }
 0x726   : > { %v14451_v4 = vadd.f32 %v7242_v46, %v7159_v20  ;;  %7592 = vmatmul.f32.gmra.mxu0 %v14453_v17  ;;  %7633 = vmatpush.msra.mxu1 %v7454_v45  ;;  %v15848_v46 = vld [vmem:[#allocation106_spill] sm:$0xff] }
 0x728   : > { %v6670_v56 = vpop.f32.mrf.mxu2  ;;  %v6831_v34 = vpop.f32.mrf.mxu3 }
 0x729   : > { %v6527_v41 = vpop.f32.mrf.mxu1  ;;  %v7051_v31 = vrot.slane %v6670_v56, 1  ;;  %v7243_v9 = vrot.slane %v6831_v34, 2 }
 0x72a   : > { %v6969_v56 = vadd.f32 %v6527_v41, %v15848_v46 }
 0x72b   : > { %v14457_v55 = vpop.f32.mrf.mxu0 }
 0x72c   : > { %6569 = vmatmul.f32.gmra.mxu1 %v14296_v59 }
 0x72d   : > { %6720 = vmatmul.f32.gmra.mxu2 %v14296_v59  ;;  %6881 = vmatmul.f32.gmra.mxu3 %v14296_v59 }
 0x72e   : > { %7595 = vmatmul.f32.gmra.mxu0 %v14461_v6 }
 0x730   : > { %v6673_v29 = vpop.f32.mrf.mxu2  ;;  %v6834_v16 = vpop.f32.mrf.mxu3 }
 0x731   : > { %v7052_v62 = vrot.slane %v6673_v29, 1  ;;  %v6530_v7 = vpop.f32.mrf.mxu1  ;;  %v7244_v1 = vrot.slane %v6834_v16, 2 }
 0x732   : > { %v10072_v7 = vld [vmem:[#allocation3 + $0x168] sm:$0xff] }
 0x733   : > { %v7053_v19 = vsel %vm1272_vm1, %v7051_v31, %v7052_v62  ;;  %v14467_v27 = vpop.f32.mrf.mxu0  ;;  %v7245_v59 = vsel %vm1525_vm2, %v7243_v9, %v7244_v1 }
 0x734   : > { %v7160_v0 = vadd.f32 %v7053_v19, %v6968_v36  ;;  %6571 = vmatmul.f32.gmra.mxu1 %v14304_v13 }
 0x735   : > { %6723 = vmatmul.f32.gmra.mxu2 %v14304_v13  ;;  %6884 = vmatmul.f32.gmra.mxu3 %v14304_v13 }
 0x736   : > { %v14472_v22 = vadd.f32 %v7245_v59, %v7160_v0  ;;  %7598 = vmatmul.f32.gmra.mxu0 %v10071_v49  ;;  %v15849_v49 = vld [vmem:[#allocation89_spill] sm:$0xff] }
 0x738   : > { %v6676_v20 = vpop.f32.mrf.mxu2  ;;  %v6837_v34 = vpop.f32.mrf.mxu3 }
 0x739   : > { %v7054_v58 = vrot.slane %v6676_v20, 1  ;;  %v6532_v5 = vpop.f32.mrf.mxu1  ;;  %v7246_v31 = vrot.slane %v6837_v34, 2 }
 0x73a   : > { %v6970_v20 = vadd.f32 %v6532_v5, %v15849_v49 }
 0x73b   : > { %v7055_v29 = vsel %vm1272_vm1, %v7052_v62, %v7054_v58  ;;  %v7559_v36 = vpop.f32.mrf.mxu0  ;;  %v7247_v16 = vsel %vm1525_vm2, %v7244_v1, %v7246_v31  ;;  %v14487_v62 = vld [vmem:[#allocation3 + $0x170] sm:$0xff] }
 0x73c   : > { %v7161_v38 = vadd.f32 %v7055_v29, %v6969_v56  ;;  %6574 = vmatmul.f32.gmra.mxu1 %v14309_v60  ;;  %v7452_v1 = vld [vmem:[#allocation6 + $0x3a0] sm:$0xff] }
 0x73d   : > { %6726 = vmatmul.f32.gmra.mxu2 %v14309_v60  ;;  %6887 = vmatmul.f32.gmra.mxu3 %v14309_v60 }
 0x73e   : > { %v14480_v13 = vadd.f32 %v7247_v16, %v7161_v38  ;;  %7600 = vmatmul.f32.gmra.mxu0 %v10072_v7  ;;  %7795 = vmatpush.msra.mxu2 %v7452_v1  ;;  %v7451_v16 = vld [vmem:[#allocation6 + $0x398] sm:$0xff] }
 0x73f   : > { %7634 = vmatpush.msra.mxu1 %v7451_v16 }
 0x740   : > { %v6679_v41 = vpop.f32.mrf.mxu2  ;;  %v6840_v9 = vpop.f32.mrf.mxu3 }
 0x741   : > { %v6535_v19 = vpop.f32.mrf.mxu1  ;;  %v7056_v60 = vrot.slane %v6679_v41, 1  ;;  %v7248_v56 = vrot.slane %v6840_v9, 2 }
 0x742   : > { %v6971_v41 = vadd.f32 %v6535_v19, %v13053_v44 }
 0x743   : > { %v14483_v0 = vpop.f32.mrf.mxu0 }
 0x744   : > { %6577 = vmatmul.f32.gmra.mxu1 %v14318_v54 }
 0x745   : > { %6729 = vmatmul.f32.gmra.mxu2 %v14318_v54  ;;  %6890 = vmatmul.f32.gmra.mxu3 %v14318_v54 }
 0x746   : > { %7603 = vmatmul.f32.gmra.mxu0 %v14487_v62 }
 0x748   : > { %v6682_v59 = vpop.f32.mrf.mxu2  ;;  %v6843_v58 = vpop.f32.mrf.mxu3 }
 0x749   : > { %v7057_v45 = vrot.slane %v6682_v59, 1  ;;  %v6538_v46 = vpop.f32.mrf.mxu1  ;;  %v7249_v29 = vrot.slane %v6843_v58, 2 }
 0x74b   : > { %v7058_v34 = vsel %vm1272_vm1, %v7056_v60, %v7057_v45  ;;  %v14493_v38 = vpop.f32.mrf.mxu0  ;;  %v7250_v54 = vsel %vm1525_vm2, %v7248_v56, %v7249_v29  ;;  %v14517_v56 = vld [vmem:[#allocation3 + $0x188] sm:$0xff] }
 0x74c   : > { %v7162_v31 = vadd.f32 %v7058_v34, %v6970_v20  ;;  %6579 = vmatmul.f32.gmra.mxu1 %v14325_v52  ;;  %v7449_v34 = vld [vmem:[#allocation6 + $0x388] sm:$0xff] }
 0x74d   : > { %6732 = vmatmul.f32.gmra.mxu2 %v14325_v52  ;;  %6893 = vmatmul.f32.gmra.mxu3 %v14325_v52 }
 0x74e   : > { %v14498_v36 = vadd.f32 %v7250_v54, %v7162_v31  ;;  %7606 = vmatmul.f32.gmra.mxu0 %v14265_v32  ;;  %v14509_v32 = vld [vmem:[#allocation3 + $0x180] sm:$0xff]  ;;  %7796 = vmatpush.msra.mxu2 %v7449_v34 }
 0x750   : > { %v6685_v5 = vpop.f32.mrf.mxu2  ;;  %v6846_v9 = vpop.f32.mrf.mxu3 }
 0x751   : > { %v7059_v7 = vrot.slane %v6685_v5, 1  ;;  %v6540_v1 = vpop.f32.mrf.mxu1  ;;  %v7251_v60 = vrot.slane %v6846_v9, 2 }
 0x752   : > { %v6972_v54 = vadd.f32 %v6540_v1, %v13151_v12  ;;  %v7448_v12 = vld [vmem:[#allocation6 + $0x380] sm:$0xff] }
 0x753   : > { %v7060_v59 = vsel %vm1272_vm1, %v7057_v45, %v7059_v7  ;;  %v7567_v20 = vpop.f32.mrf.mxu0  ;;  %v7252_v58 = vsel %vm1525_vm2, %v7249_v29, %v7251_v60  ;;  %7635 = vmatpush.msra.mxu1 %v7448_v12 }
 0x754   : > { %v7163_v49 = vadd.f32 %v7060_v59, %v6971_v41  ;;  %6582 = vmatmul.f32.gmra.mxu1 %v14330_v33  ;;  %v14530_v20 = vld [vmem:[#allocation3 + $0x190] sm:$0xff] }
 0x755   : > { %6735 = vmatmul.f32.gmra.mxu2 %v14330_v33  ;;  %6896 = vmatmul.f32.gmra.mxu3 %v14330_v33 }
 0x756   : > { %v14507_v52 = vadd.f32 %v7252_v58, %v7163_v49  ;;  %7608 = vmatmul.f32.gmra.mxu0 %v14509_v32 }
 0x758   : > { %v6688_v44 = vpop.f32.mrf.mxu2  ;;  %v6849_v19 = vpop.f32.mrf.mxu3 }
 0x759   : > { %v6543_v45 = vpop.f32.mrf.mxu1  ;;  %v7061_v33 = vrot.slane %v6688_v44, 1  ;;  %v7253_v7 = vrot.slane %v6849_v19, 2 }
 0x75a   : > { %v6973_v44 = vadd.f32 %v6543_v45, %v13287_v21 }
 0x75b   : > { %v14513_v46 = vpop.f32.mrf.mxu0 }
 0x75c   : > { %6585 = vmatmul.f32.gmra.mxu1 %v14337_v25 }
 0x75d   : > { %6738 = vmatmul.f32.gmra.mxu2 %v14337_v25  ;;  %6899 = vmatmul.f32.gmra.mxu3 %v14337_v25 }
 0x75e   : > { %7611 = vmatmul.f32.gmra.mxu0 %v14517_v56 }
 0x760   : > { %v6691_v29 = vpop.f32.mrf.mxu2  ;;  %v6852_v16 = vpop.f32.mrf.mxu3 }
 0x761   : > { %v7062_v31 = vrot.slane %v6691_v29, 1  ;;  %v6546_v5 = vpop.f32.mrf.mxu1  ;;  %v7254_v9 = vrot.slane %v6852_v16, 2 }
 0x763   : > { %v7063_v41 = vsel %vm1272_vm1, %v7061_v33, %v7062_v31  ;;  %v14523_v60 = vpop.f32.mrf.mxu0  ;;  %v7255_v25 = vsel %vm1525_vm2, %v7253_v7, %v7254_v9  ;;  %v14542_v7 = vld [vmem:[#allocation2] sm:$0xff] }
 0x764   : > { %v7164_v59 = vadd.f32 %v7063_v41, %v6972_v54  ;;  %6587 = vmatmul.f32.gmra.mxu1 %v14344_v35 }
 0x765   : > { %6741 = vmatmul.f32.gmra.mxu2 %v14344_v35  ;;  %6902 = vmatmul.f32.gmra.mxu3 %v14344_v35 }
 0x766   : > { %v14528_v49 = vadd.f32 %v7255_v25, %v7164_v59  ;;  %7614 = vmatmul.f32.gmra.mxu0 %v14530_v20 }
 0x768   : > { %v6694_v1 = vpop.f32.mrf.mxu2  ;;  %v6855_v19 = vpop.f32.mrf.mxu3 }
 0x769   : > { %v7064_v58 = vrot.slane %v6694_v1, 1  ;;  %v6548_v34 = vpop.f32.mrf.mxu1  ;;  %v7256_v33 = vrot.slane %v6855_v19, 2 }
 0x76a   : > { %v6974_v12 = vadd.f32 %v6548_v34, %v13354_v61 }
 0x76b   : > { %v7065_v29 = vsel %vm1272_vm1, %v7062_v31, %v7064_v58  ;;  %v7575_v16 = vpop.f32.mrf.mxu0  ;;  %v7257_v5 = vsel %vm1525_vm2, %v7254_v9, %v7256_v33  ;;  %v7446_v9 = vld [vmem:[#allocation6 + $0x370] sm:$0xff] }
 0x76c   : > { %v7165_v54 = vadd.f32 %v7065_v29, %v6973_v44  ;;  %6590 = vmatmul.f32.gmra.mxu1 %v14351_v51  ;;  %7797 = vmatpush.msra.mxu2 %v7446_v9 }
 0x76d   : > { %6744 = vmatmul.f32.gmra.mxu2 %v14351_v51  ;;  %6905 = vmatmul.f32.gmra.mxu3 %v14351_v51 }
 0x76e   : > { %v14539_v35 = vadd.f32 %v7257_v5, %v7165_v54  ;;  %7616 = vmatmul.f32.gmra.mxu0 %v14542_v7  ;;  %v7445_v5 = vld [vmem:[#allocation6 + $0x368] sm:$0xff] }
 0x76f   : > { %7636 = vmatpush.msra.mxu1 %v7445_v5 }
 0x770   : > { %v6697_v21 = vpop.f32.mrf.mxu2  ;;  %v6858_v45 = vpop.f32.mrf.mxu3 }
 0x771   : > { %v6551_v31 = vpop.f32.mrf.mxu1  ;;  %v7066_v25 = vrot.slane %v6697_v21, 1  ;;  %v7258_v44 = vrot.slane %v6858_v45, 2 }
 0x772   : > { %v6975_v21 = vadd.f32 %v6551_v31, %v13446_v47 }
 0x773   : > { %v14545_v41 = vpop.f32.mrf.mxu0 }
 0x774   : > { %6593 = vmatmul.f32.gmra.mxu1 %v14358_v8 }
 0x775   : > { %6747 = vmatmul.f32.gmra.mxu2 %v14358_v8  ;;  %6908 = vmatmul.f32.gmra.mxu3 %v14358_v8 }
 0x778   : > { %v6700_v59 = vpop.f32.mrf.mxu2  ;;  %v6861_v1 = vpop.f32.mrf.mxu3 }
 0x779   : > { %v7067_v51 = vrot.slane %v6700_v59, 1  ;;  %v6554_v58 = vpop.f32.mrf.mxu1  ;;  %v7259_v29 = vrot.slane %v6861_v1, 2 }
 0x77b   : > { %v7068_v19 = vsel %vm1272_vm1, %v7066_v25, %v7067_v51  ;;  %v14552_v54 = vpop.f32.mrf.mxu0  ;;  %v7260_v16 = vsel %vm1525_vm2, %v7258_v44, %v7259_v29 }
 0x77c   : > { %v7166_v33 = vadd.f32 %v7068_v19, %v6974_v12  ;;  %6595 = vmatmul.f32.gmra.mxu1 %v14365_v18 }
 0x77d   : > { %6750 = vmatmul.f32.gmra.mxu2 %v14365_v18  ;;  %6911 = vmatmul.f32.gmra.mxu3 %v14365_v18 }
 0x77e   : > { %v14557_v8 = vadd.f32 %v7260_v16, %v7166_v33 }
 0x780   : > { %v6703_v61 = vpop.f32.mrf.mxu2  ;;  %v6864_v45 = vpop.f32.mrf.mxu3 }
 0x781   : > { %v7069_v34 = vrot.slane %v6703_v61, 1  ;;  %v6556_v9 = vpop.f32.mrf.mxu1  ;;  %v7261_v25 = vrot.slane %v6864_v45, 2 }
 0x782   : > { %v6976_v5 = vadd.f32 %v6556_v9, %v13556_v15 }
 0x783   : > { %v7070_v59 = vsel %vm1272_vm1, %v7067_v51, %v7069_v34  ;;  %v7583_v1 = vpop.f32.mrf.mxu0  ;;  %v7262_v58 = vsel %vm1525_vm2, %v7259_v29, %v7261_v25  ;;  %v7443_v51 = vld [vmem:[#allocation6 + $0x358] sm:$0xff] }
 0x784   : > { %v7167_v12 = vadd.f32 %v7070_v59, %v6975_v21  ;;  %6598 = vmatmul.f32.gmra.mxu1 %v14372_v40  ;;  %7798 = vmatpush.msra.mxu2 %v7443_v51  ;;  %v7442_v1 = vld [vmem:[#allocation6 + $0x350] sm:$0xff] }
 0x785   : > { %6753 = vmatmul.f32.gmra.mxu2 %v14372_v40  ;;  %6914 = vmatmul.f32.gmra.mxu3 %v14372_v40 }
 0x786   : > { %v14565_v44 = vadd.f32 %v7262_v58, %v7167_v12  ;;  %7637 = vmatpush.msra.mxu1 %v7442_v1 }
 0x788   : > { %v6706_v18 = vpop.f32.mrf.mxu2  ;;  %v6867_v19 = vpop.f32.mrf.mxu3 }
 0x789   : > { %v6559_v47 = vpop.f32.mrf.mxu1  ;;  %v7071_v33 = vrot.slane %v6706_v18, 1  ;;  %v7263_v34 = vrot.slane %v6867_v19, 2 }
 0x78a   : > { %v6977_v58 = vadd.f32 %v6559_v47, %v13652_v10 }
 0x78b   : > { %v14568_v31 = vpop.f32.mrf.mxu0 }
 0x78c   : > { %6601 = vmatmul.f32.gmra.mxu1 %v14379_v39 }
 0x78d   : > { %6756 = vmatmul.f32.gmra.mxu2 %v14379_v39  ;;  %6917 = vmatmul.f32.gmra.mxu3 %v14379_v39 }
 0x790   : > { %v6709_v29 = vpop.f32.mrf.mxu2  ;;  %v6870_v61 = vpop.f32.mrf.mxu3 }
 0x791   : > { %v7072_v16 = vrot.slane %v6709_v29, 1  ;;  %v6562_v40 = vpop.f32.mrf.mxu1  ;;  %v7264_v45 = vrot.slane %v6870_v61, 2 }
 0x793   : > { %v7073_v21 = vsel %vm1272_vm1, %v7071_v33, %v7072_v16  ;;  %v14575_v25 = vpop.f32.mrf.mxu0  ;;  %v7265_v12 = vsel %vm1525_vm2, %v7263_v34, %v7264_v45 }
 0x794   : > { %v7168_v59 = vadd.f32 %v7073_v21, %v6976_v5  ;;  %6603 = vmatmul.f32.gmra.mxu1 %v14386_v24 }
 0x795   : > { %6759 = vmatmul.f32.gmra.mxu2 %v14386_v24  ;;  %6920 = vmatmul.f32.gmra.mxu3 %v14386_v24 }
 0x796   : > { %v14580_v39 = vadd.f32 %v7265_v12, %v7168_v59 }
 0x798   : > { %v6712_v15 = vpop.f32.mrf.mxu2  ;;  %v6873_v18 = vpop.f32.mrf.mxu3 }
 0x799   : > { %v7074_v9 = vrot.slane %v6712_v15, 1  ;;  %v6564_v19 = vpop.f32.mrf.mxu1  ;;  %v7266_v29 = vrot.slane %v6873_v18, 2 }
 0x79a   : > { %v6978_v12 = vadd.f32 %v6564_v19, %v13720_v30 }
 0x79b   : > { %v7075_v51 = vsel %vm1272_vm1, %v7072_v16, %v7074_v9  ;;  %v7591_v5 = vpop.f32.mrf.mxu0  ;;  %v7267_v61 = vsel %vm1525_vm2, %v7264_v45, %v7266_v29  ;;  %v7440_v16 = vld [vmem:[#allocation6 + $0x340] sm:$0xff] }
 0x79c   : > { %v7169_v33 = vadd.f32 %v7075_v51, %v6977_v58  ;;  %6606 = vmatmul.f32.gmra.mxu1 %v14393_v37  ;;  %7799 = vmatpush.msra.mxu2 %v7440_v16 }
 0x79d   : > { %6762 = vmatmul.f32.gmra.mxu2 %v14393_v37  ;;  %6923 = vmatmul.f32.gmra.mxu3 %v14393_v37 }
 0x79e   : > { %v14588_v40 = vadd.f32 %v7267_v61, %v7169_v33  ;;  %v7439_v33 = vld [vmem:[#allocation6 + $0x338] sm:$0xff] }
 0x79f   : > { %7638 = vmatpush.msra.mxu1 %v7439_v33 }
 0x7a0   : > { %v6715_v24 = vpop.f32.mrf.mxu2  ;;  %v6876_v34 = vpop.f32.mrf.mxu3 }
 0x7a1   : > { %v6567_v10 = vpop.f32.mrf.mxu1  ;;  %v7076_v45 = vrot.slane %v6715_v24, 1  ;;  %v7268_v15 = vrot.slane %v6876_v34, 2 }
 0x7a2   : > { %v6979_v5 = vadd.f32 %v6567_v10, %v13804_v2 }
 0x7a3   : > { %v14591_v47 = vpop.f32.mrf.mxu0 }
 0x7a4   : > { %6609 = vmatmul.f32.gmra.mxu1 %v14400_v26 }
 0x7a5   : > { %6765 = vmatmul.f32.gmra.mxu2 %v14400_v26  ;;  %6926 = vmatmul.f32.gmra.mxu3 %v14400_v26 }
 0x7a8   : > { %v6718_v21 = vpop.f32.mrf.mxu2  ;;  %v6879_v1 = vpop.f32.mrf.mxu3 }
 0x7a9   : > { %v7077_v59 = vrot.slane %v6718_v21, 1  ;;  %v6570_v37 = vpop.f32.mrf.mxu1  ;;  %v7269_v58 = vrot.slane %v6879_v1, 2 }
 0x7ab   : > { %v7078_v9 = vsel %vm1272_vm1, %v7076_v45, %v7077_v59  ;;  %v14598_v51 = vpop.f32.mrf.mxu0  ;;  %v7270_v29 = vsel %vm1525_vm2, %v7268_v15, %v7269_v58 }
 0x7ac   : > { %v7170_v18 = vadd.f32 %v7078_v9, %v6978_v12  ;;  %6611 = vmatmul.f32.gmra.mxu1 %v14411_v50 }
 0x7ad   : > { %6768 = vmatmul.f32.gmra.mxu2 %v14411_v50  ;;  %6929 = vmatmul.f32.gmra.mxu3 %v14411_v50 }
 0x7ae   : > { %v14603_v26 = vadd.f32 %v7270_v29, %v7170_v18 }
 0x7b0   : > { %v6721_v30 = vpop.f32.mrf.mxu2  ;;  %v6882_v61 = vpop.f32.mrf.mxu3 }
 0x7b1   : > { %v7079_v19 = vrot.slane %v6721_v30, 1  ;;  %v6572_v24 = vpop.f32.mrf.mxu1  ;;  %v7271_v16 = vrot.slane %v6882_v61, 2 }
 0x7b2   : > { %v6980_v18 = vadd.f32 %v6572_v24, %v13892_v57 }
 0x7b3   : > { %v7080_v34 = vsel %vm1272_vm1, %v7077_v59, %v7079_v19  ;;  %v7599_v45 = vpop.f32.mrf.mxu0  ;;  %v7272_v12 = vsel %vm1525_vm2, %v7269_v58, %v7271_v16  ;;  %v7437_v59 = vld [vmem:[#allocation6 + $0x328] sm:$0xff]  ;;  %v7436_v16 = vld [vmem:[#allocation6 + $0x320] sm:$0xff] }
 0x7b4   : > { %v7171_v21 = vadd.f32 %v7080_v34, %v6979_v5  ;;  %6614 = vmatmul.f32.gmra.mxu1 %v14427_v53  ;;  %7800 = vmatpush.msra.mxu2 %v7437_v59 }
 0x7b5   : > { %6771 = vmatmul.f32.gmra.mxu2 %v14427_v53  ;;  %6932 = vmatmul.f32.gmra.mxu3 %v14427_v53 }
 0x7b6   : > { %v14611_v1 = vadd.f32 %v7272_v12, %v7171_v21  ;;  %7639 = vmatpush.msra.mxu1 %v7436_v16 }
 0x7b8   : > { %v6724_v50 = vpop.f32.mrf.mxu2  ;;  %v6885_v37 = vpop.f32.mrf.mxu3 }
 0x7b9   : > { %v6575_v2 = vpop.f32.mrf.mxu1  ;;  %v7081_v9 = vrot.slane %v6724_v50, 1  ;;  %v7273_v33 = vrot.slane %v6885_v37, 2 }
 0x7ba   : > { %v6981_v21 = vadd.f32 %v6575_v2, %v13967_v48 }
 0x7bb   : > { %v14614_v10 = vpop.f32.mrf.mxu0 }
 0x7bc   : > { %15850 = vst [vmem:[#allocation16_spill] sm:$0xff] %v14614_v10  ;;  %6617 = vmatmul.f32.gmra.mxu1 %v14443_v63 }
 0x7bd   : > { %6774 = vmatmul.f32.gmra.mxu2 %v14443_v63  ;;  %6935 = vmatmul.f32.gmra.mxu3 %v14443_v63 }
 0x7c0   : > { %v6727_v15 = vpop.f32.mrf.mxu2  ;;  %v6888_v29 = vpop.f32.mrf.mxu3 }
 0x7c1   : > { %v7082_v58 = vrot.slane %v6727_v15, 1  ;;  %v6578_v53 = vpop.f32.mrf.mxu1  ;;  %v7274_v19 = vrot.slane %v6888_v29, 2 }
 0x7c2   : > { %v6443_v53 = vld [vmem:[#allocation3 + $0x160] sm:$0xff] }
 0x7c3   : > { %v7083_v30 = vsel %vm1272_vm1, %v7081_v9, %v7082_v58  ;;  %v14621_v61 = vpop.f32.mrf.mxu0  ;;  %v7275_v34 = vsel %vm1525_vm2, %v7273_v33, %v7274_v19 }
 0x7c4   : > { %v7172_v5 = vadd.f32 %v7083_v30, %v6980_v18  ;;  %15851 = vst [vmem:[#allocation54_spill] sm:$0xff] %v14621_v61  ;;  %6619 = vmatmul.f32.gmra.mxu1 %v14453_v17 }
 0x7c5   : > { %6777 = vmatmul.f32.gmra.mxu2 %v14453_v17  ;;  %6938 = vmatmul.f32.gmra.mxu3 %v14453_v17 }
 0x7c6   : > { %v14626_v63 = vadd.f32 %v7275_v34, %v7172_v5 }
 0x7c8   : > { %v6730_v57 = vpop.f32.mrf.mxu2  ;;  %v6891_v45 = vpop.f32.mrf.mxu3 }
 0x7c9   : > { %v7084_v24 = vrot.slane %v6730_v57, 1  ;;  %v6580_v12 = vpop.f32.mrf.mxu1  ;;  %v7276_v37 = vrot.slane %v6891_v45, 2 }
 0x7ca   : > { %v6982_v5 = vadd.f32 %v6580_v12, %v14053_v3 }
 0x7cb   : > { %v7085_v50 = vsel %vm1272_vm1, %v7082_v58, %v7084_v24  ;;  %v7607_v15 = vpop.f32.mrf.mxu0  ;;  %v7277_v9 = vsel %vm1525_vm2, %v7274_v19, %v7276_v37  ;;  %v7434_v58 = vld [vmem:[#allocation6 + $0x310] sm:$0xff] }
 0x7cc   : > { %v7173_v59 = vadd.f32 %v7085_v50, %v6981_v21  ;;  %6622 = vmatmul.f32.gmra.mxu1 %v14461_v6  ;;  %7801 = vmatpush.msra.mxu2 %v7434_v58  ;;  %v6444_v50 = vld [vmem:[#allocation3 + $0x168] sm:$0xff]  ;;  %v7433_v15 = vld [vmem:[#allocation6 + $0x308] sm:$0xff] }
 0x7cd   : > { %6780 = vmatmul.f32.gmra.mxu2 %v14461_v6  ;;  %6941 = vmatmul.f32.gmra.mxu3 %v14461_v6 }
 0x7ce   : > { %v14634_v18 = vadd.f32 %v7277_v9, %v7173_v59  ;;  %7640 = vmatpush.msra.mxu1 %v7433_v15 }
 0x7d0   : > { %v6733_v17 = vpop.f32.mrf.mxu2  ;;  %v6894_v29 = vpop.f32.mrf.mxu3 }
 0x7d1   : > { %v6583_v48 = vpop.f32.mrf.mxu1  ;;  %v7086_v30 = vrot.slane %v6733_v17, 1  ;;  %v7278_v57 = vrot.slane %v6894_v29, 2 }
 0x7d2   : > { %v6983_v9 = vadd.f32 %v6583_v48, %v14126_v28  ;;  %v6446_v48 = vld [vmem:[#allocation3 + $0x178] sm:$0xff] }
 0x7d3   : > { %v14637_v2 = vpop.f32.mrf.mxu0 }
 0x7d4   : > { %15852 = vst [vmem:[#allocation31_spill] sm:$0xff] %v14637_v2  ;;  %6625 = vmatmul.f32.gmra.mxu1 %v6443_v53 }
 0x7d5   : > { %6783 = vmatmul.f32.gmra.mxu2 %v6443_v53  ;;  %6944 = vmatmul.f32.gmra.mxu3 %v6443_v53 }
 0x7d8   : > { %v6736_v33 = vpop.f32.mrf.mxu2  ;;  %v6897_v34 = vpop.f32.mrf.mxu3 }
 0x7d9   : > { %v7087_v19 = vrot.slane %v6736_v33, 1  ;;  %v6586_v16 = vpop.f32.mrf.mxu1  ;;  %v7279_v24 = vrot.slane %v6897_v34, 2 }
 0x7db   : > { %v7088_v6 = vsel %vm1272_vm1, %v7086_v30, %v7087_v19  ;;  %v14641_v45 = vpop.f32.mrf.mxu0  ;;  %v7280_v37 = vsel %vm1525_vm2, %v7278_v57, %v7279_v24 }
 0x7dc   : > { %v7174_v21 = vadd.f32 %v7088_v6, %v6982_v5  ;;  %15853 = vst [vmem:[#allocation38_spill] sm:$0xff] %v14641_v45  ;;  %6627 = vmatmul.f32.gmra.mxu1 %v6444_v50 }
 0x7dd   : > { %6786 = vmatmul.f32.gmra.mxu2 %v6444_v50  ;;  %6947 = vmatmul.f32.gmra.mxu3 %v6444_v50 }
 0x7de   : > { %v14644_v59 = vadd.f32 %v7280_v37, %v7174_v21 }
 0x7e0   : > { %v6739_v3 = vpop.f32.mrf.mxu2  ;;  %v6900_v17 = vpop.f32.mrf.mxu3 }
 0x7e1   : > { %v7089_v12 = vrot.slane %v6739_v3, 1  ;;  %v6588_v29 = vpop.f32.mrf.mxu1  ;;  %v7281_v58 = vrot.slane %v6900_v17, 2 }
 0x7e3   : > { %v7090_v53 = vsel %vm1272_vm1, %v7087_v19, %v7089_v12  ;;  %v7615_v30 = vpop.f32.mrf.mxu0  ;;  %v7282_v5 = vsel %vm1525_vm2, %v7279_v24, %v7281_v58  ;;  %v6984_v24 = vadd.f32 %v6588_v29, %v14203_v42 }
 0x7e4   : > { %v7175_v33 = vadd.f32 %v7090_v53, %v6983_v9  ;;  %6630 = vmatmul.f32.gmra.mxu1 %v14487_v62 }
 0x7e5   : > { %6789 = vmatmul.f32.gmra.mxu2 %v14487_v62  ;;  %6950 = vmatmul.f32.gmra.mxu3 %v14487_v62 }
 0x7e6   : > { %v14651_v34 = vadd.f32 %v7282_v5, %v7175_v33 }
 0x7e8   : > { %v6742_v16 = vpop.f32.mrf.mxu2  ;;  %v6903_v57 = vpop.f32.mrf.mxu3 }
 0x7e9   : > { %v6591_v28 = vpop.f32.mrf.mxu1  ;;  %v7091_v6 = vrot.slane %v6742_v16, 1  ;;  %v7283_v15 = vrot.slane %v6903_v57, 2 }
 0x7ea   : > { %v6985_v42 = vadd.f32 %v6591_v28, %v14230_v23 }
 0x7ec   : > { %6633 = vmatmul.f32.gmra.mxu1 %v6446_v48 }
 0x7ed   : > { %6792 = vmatmul.f32.gmra.mxu2 %v6446_v48  ;;  %6953 = vmatmul.f32.gmra.mxu3 %v6446_v48 }
 0x7f0   : > { %v6745_v19 = vpop.f32.mrf.mxu2  ;;  %v6906_v50 = vpop.f32.mrf.mxu3 }
 0x7f1   : > { %v7092_v21 = vrot.slane %v6745_v19, 1  ;;  %v6594_v37 = vpop.f32.mrf.mxu1  ;;  %v7284_v12 = vrot.slane %v6906_v50, 2 }
 0x7f3   : > { %v7093_v3 = vsel %vm1272_vm1, %v7091_v6, %v7092_v21  ;;  %v7285_v62 = vsel %vm1525_vm2, %v7283_v15, %v7284_v12 }
 0x7f4   : > { %v7176_v9 = vadd.f32 %v7093_v3, %v6984_v24  ;;  %6635 = vmatmul.f32.gmra.mxu1 %v14509_v32 }
 0x7f5   : > { %6795 = vmatmul.f32.gmra.mxu2 %v14509_v32  ;;  %6956 = vmatmul.f32.gmra.mxu3 %v14509_v32 }
 0x7f6   : > { %v14659_v17 = vadd.f32 %v7285_v62, %v7176_v9  ;;  %v10074_v62 = vld [vmem:[#allocation3 + $0x30] sm:$0xff] }
 0x7f8   : > { %v6748_v53 = vpop.f32.mrf.mxu2  ;;  %v6909_v29 = vpop.f32.mrf.mxu3 }
 0x7f9   : > { %v7094_v58 = vrot.slane %v6748_v53, 1  ;;  %v6596_v33 = vpop.f32.mrf.mxu1  ;;  %v7286_v5 = vrot.slane %v6909_v29, 2 }
 0x7fa   : > { %v6986_v24 = vadd.f32 %v6596_v33, %v14294_v14 }
 0x7fb   : > { %v7095_v30 = vsel %vm1272_vm1, %v7092_v21, %v7094_v58  ;;  %v7287_v57 = vsel %vm1525_vm2, %v7284_v12, %v7286_v5 }
 0x7fc   : > { %v7177_v16 = vadd.f32 %v7095_v30, %v6985_v42  ;;  %6638 = vmatmul.f32.gmra.mxu1 %v14517_v56  ;;  %v15854_v42 = vld [vmem:[#allocation107_spill] sm:$0xff] }
 0x7fd   : > { %6798 = vmatmul.f32.gmra.mxu2 %v14517_v56  ;;  %6959 = vmatmul.f32.gmra.mxu3 %v14517_v56 }
 0x7fe   : > { %v14667_v48 = vadd.f32 %v7287_v57, %v7177_v16 }
 0x800   : > { %v6751_v32 = vpop.f32.mrf.mxu2  ;;  %v6912_v19 = vpop.f32.mrf.mxu3 }
 0x801   : > { %v6599_v6 = vpop.f32.mrf.mxu1  ;;  %v7096_v28 = vrot.slane %v6751_v32, 1  ;;  %v7288_v15 = vrot.slane %v6912_v19, 2  ;;  %v10075_v32 = vld [vmem:[#allocation3 + $0x38] sm:$0xff] }
 0x802   : > { %v6987_v14 = vadd.f32 %v6599_v6, %v15854_v42  ;;  %v10077_v42 = vld [vmem:[#allocation3 + $0x48] sm:$0xff] }
 0x804   : > { %6641 = vmatmul.f32.gmra.mxu1 %v14530_v20 }
 0x805   : > { %6801 = vmatmul.f32.gmra.mxu2 %v14530_v20  ;;  %6962 = vmatmul.f32.gmra.mxu3 %v14530_v20 }
 0x808   : > { %v6754_v23 = vpop.f32.mrf.mxu2  ;;  %v6915_v50 = vpop.f32.mrf.mxu3 }
 0x809   : > { %v7097_v21 = vrot.slane %v6754_v23, 1  ;;  %v6602_v37 = vpop.f32.mrf.mxu1  ;;  %v7289_v56 = vrot.slane %v6915_v50, 2  ;;  %v10076_v50 = vld [vmem:[#allocation3 + $0x40] sm:$0xff] }
 0x80b   : > { %v7098_v3 = vsel %vm1272_vm1, %v7096_v28, %v7097_v21  ;;  %v7290_v9 = vsel %vm1525_vm2, %v7288_v15, %v7289_v56  ;;  %v15855_v15 = vld [vmem:[#allocation11_spill] sm:$0xff] }
 0x80c   : > { %v7178_v12 = vadd.f32 %v7098_v3, %v6986_v24  ;;  %7641 = vmatmul.f32.vlgmr.msra.gmra.mxu1 %v10074_v62 }
 0x80d   : > { %7802 = vmatmul.f32.vlgmr.msra.gmra.mxu2 %v10074_v62  ;;  %7619 = vmatmul.f32.vlgmr.msrb.gmra.mxu3 %v14542_v7 }
 0x80e   : > { %v14676_v53 = vadd.f32 %v7290_v9, %v7178_v12 }
 0x810   : > { %v6757_v20 = vpop.f32.mrf.mxu2  ;;  %v6918_v29 = vpop.f32.mrf.mxu3 }
 0x811   : > { %v7099_v58 = vrot.slane %v6757_v20, 1  ;;  %v6604_v33 = vpop.f32.mrf.mxu1  ;;  %v7291_v5 = vrot.slane %v6918_v29, 2 }
 0x812   : > { %v6988_v3 = vadd.f32 %v6604_v33, %v15855_v15 }
 0x813   : > { %v7100_v30 = vsel %vm1272_vm1, %v7097_v21, %v7099_v58  ;;  %v7292_v57 = vsel %vm1525_vm2, %v7289_v56, %v7291_v5  ;;  %v15856_v5 = vld [vmem:[#allocation83_spill] sm:$0xff] }
 0x814   : > { %v7179_v16 = vadd.f32 %v7100_v30, %v6987_v14  ;;  %7644 = vmatmul.f32.gmra.mxu1 %v10075_v32 }
 0x815   : > { %7805 = vmatmul.f32.gmra.mxu2 %v10075_v32  ;;  %7622 = vmatmul.f32.gmra.mxu3 %v14542_v7 }
 0x816   : > { %v14682_v19 = vadd.f32 %v7292_v57, %v7179_v16 }
 0x818   : > { %v6760_v23 = vpop.f32.mrf.mxu2  ;;  %v6921_v28 = vpop.f32.mrf.mxu3 }
 0x819   : > { %v6607_v24 = vpop.f32.mrf.mxu1  ;;  %v7101_v37 = vrot.slane %v6760_v23, 1  ;;  %v7293_v9 = vrot.slane %v6921_v28, 2 }
 0x81a   : > { %v6989_v16 = vadd.f32 %v6607_v24, %v15856_v5 }
 0x81c   : > { %7647 = vmatmul.f32.gmra.mxu1 %v10076_v50 }
 0x81d   : > { %7808 = vmatmul.f32.gmra.mxu2 %v10076_v50 }
 0x820   : > { %v6763_v6 = vpop.f32.mrf.mxu2  ;;  %v6924_v12 = vpop.f32.mrf.mxu3 }
 0x821   : > { %v7102_v21 = vrot.slane %v6763_v6, 1  ;;  %v6610_v56 = vpop.f32.mrf.mxu1  ;;  %v7294_v20 = vrot.slane %v6924_v12, 2  ;;  %v10078_v6 = vld [vmem:[#allocation3 + $0x50] sm:$0xff] }
 0x822   : > { %v10079_v56 = vld [vmem:[#allocation3 + $0x58] sm:$0xff] }
 0x823   : > { %v7103_v62 = vsel %vm1272_vm1, %v7101_v37, %v7102_v21  ;;  %v7295_v7 = vsel %vm1525_vm2, %v7293_v9, %v7294_v20 }
 0x824   : > { %v7180_v58 = vadd.f32 %v7103_v62, %v6988_v3  ;;  %7650 = vmatmul.f32.gmra.mxu1 %v10077_v42 }
 0x825   : > { %7811 = vmatmul.f32.gmra.mxu2 %v10077_v42 }
 0x826   : > { %v14688_v14 = vadd.f32 %v7295_v7, %v7180_v58  ;;  %v15857_v58 = vld [vmem:[#allocation108_spill] sm:$0xff] }
 0x828   : > { %v6766_v29 = vpop.f32.mrf.mxu2  ;;  %v6927_v57 = vpop.f32.mrf.mxu3 }
 0x829   : > { %v7104_v30 = vrot.slane %v6766_v29, 1  ;;  %v6612_v33 = vpop.f32.mrf.mxu1  ;;  %v7296_v23 = vrot.slane %v6927_v57, 2  ;;  %v10080_v57 = vld [vmem:[#allocation3 + $0x60] sm:$0xff] }
 0x82b   : > { %v7105_v32 = vsel %vm1272_vm1, %v7102_v21, %v7104_v30  ;;  %v7297_v50 = vsel %vm1525_vm2, %v7294_v20, %v7296_v23  ;;  %v6990_v21 = vadd.f32 %v6612_v33, %v15857_v58  ;;  %v10081_v58 = vld [vmem:[#allocation3 + $0x68] sm:$0xff] }
 0x82c   : > { %v7181_v28 = vadd.f32 %v7105_v32, %v6989_v16  ;;  %7653 = vmatmul.f32.gmra.mxu1 %v10078_v6 }
 0x82d   : > { %7814 = vmatmul.f32.gmra.mxu2 %v10078_v6 }
 0x82e   : > { %v14693_v37 = vadd.f32 %v7297_v50, %v7181_v28  ;;  %v15858_v50 = vld [vmem:[#allocation105_spill] sm:$0xff] }
 0x830   : > { %v6769_v15 = vpop.f32.mrf.mxu2  ;;  %v6930_v3 = vpop.f32.mrf.mxu3 }
 0x831   : > { %v6615_v12 = vpop.f32.mrf.mxu1  ;;  %v7106_v9 = vrot.slane %v6769_v15, 1  ;;  %v7298_v29 = vrot.slane %v6930_v3, 2 }
 0x832   : > { %v6991_v6 = vadd.f32 %v6615_v12, %v15858_v50 }
 0x834   : > { %7656 = vmatmul.f32.gmra.mxu1 %v10079_v56 }
 0x835   : > { %7817 = vmatmul.f32.gmra.mxu2 %v10079_v56 }
 0x838   : > { %v6772_v24 = vpop.f32.mrf.mxu2  ;;  %v6933_v7 = vpop.f32.mrf.mxu3 }
 0x839   : > { %v7107_v62 = vrot.slane %v6772_v24, 1  ;;  %v6618_v42 = vpop.f32.mrf.mxu1  ;;  %v7299_v30 = vrot.slane %v6933_v7, 2 }
 0x83b   : > { %v7108_v20 = vsel %vm1272_vm1, %v7106_v9, %v7107_v62  ;;  %v7300_v16 = vsel %vm1525_vm2, %v7298_v29, %v7299_v30 }
 0x83c   : > { %v7182_v5 = vadd.f32 %v7108_v20, %v6990_v21  ;;  %7659 = vmatmul.f32.gmra.mxu1 %v10080_v57  ;;  %v10082_v20 = vld [vmem:[#allocation3 + $0x70] sm:$0xff] }
 0x83d   : > { %7820 = vmatmul.f32.gmra.mxu2 %v10080_v57  ;;  %v15859_v57 = vld [vmem:[#allocation110_spill] sm:$0xff] }
 0x83e   : > { %v14698_v32 = vadd.f32 %v7300_v16, %v7182_v5 }
 0x840   : > { %v6775_v23 = vpop.f32.mrf.mxu2  ;;  %v6936_v15 = vpop.f32.mrf.mxu3 }
 0x841   : > { %v7109_v28 = vrot.slane %v6775_v23, 1  ;;  %v6620_v33 = vpop.f32.mrf.mxu1  ;;  %v7301_v3 = vrot.slane %v6936_v15, 2 }
 0x843   : > { %v7110_v56 = vsel %vm1272_vm1, %v7107_v62, %v7109_v28  ;;  %v7302_v9 = vsel %vm1525_vm2, %v7299_v30, %v7301_v3  ;;  %v6992_v62 = vadd.f32 %v6620_v33, %v15859_v57  ;;  %v10083_v3 = vld [vmem:[#allocation3 + $0x78] sm:$0xff] }
 0x844   : > { %v7183_v24 = vadd.f32 %v7110_v56, %v6991_v6  ;;  %7662 = vmatmul.f32.gmra.mxu1 %v10081_v58 }
 0x845   : > { %7823 = vmatmul.f32.gmra.mxu2 %v10081_v58 }
 0x846   : > { %v14703_v21 = vadd.f32 %v7302_v9, %v7183_v24 }
 0x848   : > { %v6778_v7 = vpop.f32.mrf.mxu2  ;;  %v6939_v42 = vpop.f32.mrf.mxu3 }
 0x849   : > { %v6623_v29 = vpop.f32.mrf.mxu1  ;;  %v7111_v5 = vrot.slane %v6778_v7, 1  ;;  %v7303_v50 = vrot.slane %v6939_v42, 2  ;;  %v15860_v7 = vld [vmem:[#allocation109_spill] sm:$0xff] }
 0x84c   : > { %7665 = vmatmul.f32.gmra.mxu1 %v10082_v20 }
 0x84d   : > { %7826 = vmatmul.f32.gmra.mxu2 %v10082_v20  ;;  %v6993_v20 = vadd.f32 %v6623_v29, %v15860_v7  ;;  %v15862_v7 = vld [vmem:[#allocation84_spill] sm:$0xff] }
 0x850   : > { %v6781_v12 = vpop.f32.mrf.mxu2  ;;  %v6942_v23 = vpop.f32.mrf.mxu3 }
 0x851   : > { %v7112_v16 = vrot.slane %v6781_v12, 1  ;;  %v6626_v28 = vpop.f32.mrf.mxu1  ;;  %v7304_v6 = vrot.slane %v6942_v23, 2 }
 0x853   : > { %v7113_v30 = vsel %vm1272_vm1, %v7111_v5, %v7112_v16  ;;  %v7305_v56 = vsel %vm1525_vm2, %v7303_v50, %v7304_v6 }
 0x854   : > { %v7184_v15 = vadd.f32 %v7113_v30, %v6992_v62  ;;  %7668 = vmatmul.f32.gmra.mxu1 %v10083_v3  ;;  %v10084_v62 = vld [vmem:[#allocation3 + $0x80] sm:$0xff] }
 0x855   : > { %7829 = vmatmul.f32.gmra.mxu2 %v10083_v3 }
 0x856   : > { %v14708_v24 = vadd.f32 %v7305_v56, %v7184_v15  ;;  %v10085_v56 = vld [vmem:[#allocation3 + $0x88] sm:$0xff] }
 0x858   : > { %v6784_v9 = vpop.f32.mrf.mxu2  ;;  %v6945_v12 = vpop.f32.mrf.mxu3 }
 0x859   : > { %v7114_v58 = vrot.slane %v6784_v9, 1  ;;  %v6628_v33 = vpop.f32.mrf.mxu1  ;;  %v7306_v42 = vrot.slane %v6945_v12, 2 }
 0x85b   : > { %v7115_v57 = vsel %vm1272_vm1, %v7112_v16, %v7114_v58  ;;  %v7307_v5 = vsel %vm1525_vm2, %v7304_v6, %v7306_v42  ;;  %v6994_v16 = vadd.f32 %v6628_v33, %v15862_v7 }
 0x85c   : > { %v7185_v28 = vadd.f32 %v7115_v57, %v6993_v20  ;;  %7671 = vmatmul.f32.gmra.mxu1 %v10084_v62 }
 0x85d   : > { %7832 = vmatmul.f32.gmra.mxu2 %v10084_v62 }
 0x85e   : > { %v14713_v23 = vadd.f32 %v7307_v5, %v7185_v28  ;;  %v10086_v5 = vld [vmem:[#allocation3 + $0x90] sm:$0xff] }
 0x860   : > { %15861 = vst [vmem:[#allocation37_spill] sm:$0xff] %v14713_v23  ;;  %v6787_v50 = vpop.f32.mrf.mxu2  ;;  %v6948_v30 = vpop.f32.mrf.mxu3 }
 0x861   : > { %v6631_v15 = vpop.f32.mrf.mxu1  ;;  %v7116_v3 = vrot.slane %v6787_v50, 1  ;;  %v7308_v12 = vrot.slane %v6948_v30, 2  ;;  %v15864_v50 = vld [vmem:[#allocation32_spill] sm:$0xff] }
 0x864   : > { %7674 = vmatmul.f32.gmra.mxu1 %v10085_v56 }
 0x865   : > { %7835 = vmatmul.f32.gmra.mxu2 %v10085_v56 }
 0x868   : > { %v6790_v29 = vpop.f32.mrf.mxu2  ;;  %v6951_v58 = vpop.f32.mrf.mxu3 }
 0x869   : > { %v7117_v9 = vrot.slane %v6790_v29, 1  ;;  %v6634_v20 = vpop.f32.mrf.mxu1  ;;  %v7309_v57 = vrot.slane %v6951_v58, 2  ;;  %v6995_v29 = vadd.f32 %v6631_v15, %v15864_v50  ;;  %v15866_v50 = vld [vmem:[#allocation12_spill] sm:$0xff] }
 0x86b   : > { %v7118_v6 = vsel %vm1272_vm1, %v7116_v3, %v7117_v9  ;;  %v7310_v28 = vsel %vm1525_vm2, %v7308_v12, %v7309_v57 }
 0x86c   : > { %v7186_v42 = vadd.f32 %v7118_v6, %v6994_v16  ;;  %7677 = vmatmul.f32.gmra.mxu1 %v10086_v5  ;;  %v10087_v16 = vld [vmem:[#allocation3 + $0x98] sm:$0xff] }
 0x86d   : > { %7838 = vmatmul.f32.gmra.mxu2 %v10086_v5 }
 0x86e   : > { %v14718_v62 = vadd.f32 %v7310_v28, %v7186_v42  ;;  %v10088_v28 = vld [vmem:[#allocation3 + $0xa0] sm:$0xff] }
 0x870   : > { %15863 = vst [vmem:[#allocation102_spill] sm:$0xff] %v14718_v62  ;;  %v6793_v56 = vpop.f32.mrf.mxu2  ;;  %v6954_v2 = vpop.f32.mrf.mxu3 }
 0x871   : > { %v7119_v45 = vrot.slane %v6793_v56, 1  ;;  %v6636_v33 = vpop.f32.mrf.mxu1  ;;  %v7311_v30 = vrot.slane %v6954_v2, 2 }
 0x873   : > { %v7120_v7 = vsel %vm1272_vm1, %v7117_v9, %v7119_v45  ;;  %v7312_v3 = vsel %vm1525_vm2, %v7309_v57, %v7311_v30  ;;  %v6996_v45 = vadd.f32 %v6636_v33, %v15866_v50 }
 0x874   : > { %v7187_v20 = vadd.f32 %v7120_v7, %v6995_v29  ;;  %7680 = vmatmul.f32.gmra.mxu1 %v10087_v16 }
 0x875   : > { %7841 = vmatmul.f32.gmra.mxu2 %v10087_v16 }
 0x876   : > { %v14723_v58 = vadd.f32 %v7312_v3, %v7187_v20  ;;  %v10089_v20 = vld [vmem:[#allocation3 + $0xa8] sm:$0xff] }
 0x878   : > { %15865 = vst [vmem:[#allocation86_spill] sm:$0xff] %v14723_v58  ;;  %v6796_v12 = vpop.f32.mrf.mxu2  ;;  %v6957_v6 = vpop.f32.mrf.mxu3 }
 0x879   : > { %v6639_v42 = vpop.f32.mrf.mxu1  ;;  %v7121_v5 = vrot.slane %v6796_v12, 1  ;;  %v7313_v29 = vrot.slane %v6957_v6, 2  ;;  %v15868_v12 = vld [vmem:[#allocation92_spill] sm:$0xff] }
 0x87c   : > { %7683 = vmatmul.f32.gmra.mxu1 %v10088_v28 }
 0x87d   : > { %7844 = vmatmul.f32.gmra.mxu2 %v10088_v28 }
 0x880   : > { %v6799_v15 = vpop.f32.mrf.mxu2  ;;  %v6960_v2 = vpop.f32.mrf.mxu3 }
 0x881   : > { %v7122_v56 = vrot.slane %v6799_v15, 1  ;;  %v6642_v9 = vpop.f32.mrf.mxu1  ;;  %v7314_v57 = vrot.slane %v6960_v2, 2  ;;  %v6997_v15 = vadd.f32 %v6639_v42, %v15868_v12  ;;  %v10091_v42 = vld [vmem:[#allocation3 + $0xb8] sm:$0xff] }
 0x882   : > { %v10090_v9 = vld [vmem:[#allocation3 + $0xb0] sm:$0xff] }
 0x883   : > { %v7123_v7 = vsel %vm1272_vm1, %v7121_v5, %v7122_v56  ;;  %v7315_v3 = vsel %vm1525_vm2, %v7313_v29, %v7314_v57 }
 0x884   : > { %v7188_v30 = vadd.f32 %v7123_v7, %v6996_v45  ;;  %7686 = vmatmul.f32.gmra.mxu1 %v10089_v20 }
 0x885   : > { %7847 = vmatmul.f32.gmra.mxu2 %v10089_v20 }
 0x886   : > { %v14728_v16 = vadd.f32 %v7315_v3, %v7188_v30 }
 0x888   : > { %15867 = vst [vmem:[#allocation95_spill] sm:$0xff] %v14728_v16  ;;  %v6802_v28 = vpop.f32.mrf.mxu2  ;;  %v6963_v62 = vpop.f32.mrf.mxu3 }
 0x889   : > { %v7124_v58 = vrot.slane %v6802_v28, 1  ;;  %v7642_v33 = vpop.f32.mrf.mxu1  ;;  %v7316_v50 = vrot.slane %v6963_v62, 2 }
 0x88a   : > { %v8027_v28 = vrot.slane %v7642_v33, 1 }
 0x88b   : > { %v7125_v6 = vsel %vm1272_vm1, %v7122_v56, %v7124_v58  ;;  %v7317_v5 = vsel %vm1525_vm2, %v7314_v57, %v7316_v50  ;;  %v15870_v58 = vld [vmem:[#allocation22_spill] sm:$0xff]  ;;  %v14741_v50 = vld [vmem:[%s15231_s5] ss:$0 sm:$0xff] }
 0x88c   : > { %v7189_v2 = vadd.f32 %v7125_v6, %v6997_v15  ;;  %7689 = vmatmul.f32.gmra.mxu1 %v10090_v9  ;;  %v7947_v56 = vadd.f32 %v15870_v58, %v14441_v11  ;;  %v10092_v11 = vld [vmem:[#allocation3 + $0xc0] sm:$0xff] }
 0x88d   : > { %7850 = vmatmul.f32.gmra.mxu2 %v10090_v9 }
 0x88e   : > { %v7381_v45 = vadd.f32 %v7317_v5, %v7189_v2 }
 0x890   : > { %v7803_v7 = vpop.f32.mrf.mxu2  ;;  %v7620_v29 = vpop.f32.mrf.mxu3 }
 0x891   : > { %v7645_v30 = vpop.f32.mrf.mxu1  ;;  %v14733_v20 = vadd.f32 %v7620_v29, %v7381_v45  ;;  %v8219_v15 = vrot.slane %v7803_v7, 2  ;;  %v14747_v29 = vld [vmem:[%s15232_s6] ss:$0 sm:$0xff] }
 0x892   : > { %v8028_v3 = vrot.slane %v7645_v30, 1 }
 0x893   : > { %15869 = vst [vmem:[#allocation70_spill] sm:$0xff] %v14733_v20 }
 0x894   : > { %7692 = vmatmul.f32.gmra.mxu1 %v10091_v42  ;;  %v8029_v62 = vsel %vm1272_vm1, %v8027_v28, %v8028_v3 }
 0x895   : > { %7853 = vmatmul.f32.gmra.mxu2 %v10091_v42  ;;  %v8139_v57 = vadd.f32 %v8029_v62, %v7947_v56  ;;  %v15871_v42 = vld [vmem:[#allocation26_spill] sm:$0xff] }
 0x896   : > { %v7948_v62 = vadd.f32 %v15871_v42, %v14451_v4 }
 0x898   : > { %v7806_v12 = vpop.f32.mrf.mxu2  ;;  %v7623_v9 = vpop.f32.mrf.mxu3 }
 0x899   : > { %v8220_v6 = vrot.slane %v7806_v12, 2  ;;  %v7648_v2 = vpop.f32.mrf.mxu1 }
 0x89a   : > { %v8030_v5 = vrot.slane %v7648_v2, 1 }
 0x89b   : > { %v8221_v33 = vsel %vm1525_vm2, %v8219_v15, %v8220_v6 }
 0x89c   : > { %v8331_v45 = vadd.f32 %v8221_v33, %v8139_v57  ;;  %7695 = vmatmul.f32.gmra.mxu1 %v10092_v11  ;;  %v8031_v30 = vsel %vm1272_vm1, %v8028_v3, %v8030_v5  ;;  %v10093_v33 = vld [vmem:[#allocation3 + $0xc8] sm:$0xff] }
 0x89d   : > { %7856 = vmatmul.f32.gmra.mxu2 %v10092_v11  ;;  %v8140_v15 = vadd.f32 %v8031_v30, %v7948_v62  ;;  %v10094_v62 = vld [vmem:[#allocation3 + $0xd0] sm:$0xff] }
 0x89e   : > { %v8367_v7 = vmul.f32 %v14741_v50, %v8331_v45 }
 0x8a0   : > { %v14752_v28 = vadd.f32 %v14747_v29, %v8367_v7  ;;  %v7809_v58 = vpop.f32.mrf.mxu2 }
 0x8a1   : > { %v8222_v56 = vrot.slane %v7809_v58, 2  ;;  %v7651_v57 = vpop.f32.mrf.mxu1 }
 0x8a2   : > { %v9470_v12 = vmul.f32 -1.442695, %v14752_v28 }
 0x8a3   : > { %v8223_v2 = vsel %vm1525_vm2, %v8220_v6, %v8222_v56  ;;  %v8032_v6 = vrot.slane %v7651_v57, 1  ;;  %v15872_v56 = vld [vmem:[#allocation29_spill] sm:$0xff] }
 0x8a4   : > { %9814 = vpow2.f32 %v9470_v12  ;;  %v8332_v9 = vadd.f32 %v8223_v2, %v8140_v15  ;;  %7698 = vmatmul.f32.gmra.mxu1 %v10093_v33  ;;  %v7949_v12 = vadd.f32 %v15872_v56, %v14472_v22 }
 0x8a5   : > { %7859 = vmatmul.f32.gmra.mxu2 %v10093_v33 }
 0x8a6   : > { %v8368_v3 = vmul.f32 %v14741_v50, %v8332_v9 }
 0x8a8   : > { %v14760_v5 = vadd.f32 %v14747_v29, %v8368_v3  ;;  %v7812_v45 = vpop.f32.mrf.mxu2 }
 0x8a9   : > { %v7654_v7 = vpop.f32.mrf.mxu1  ;;  %v8224_v2 = vrot.slane %v7812_v45, 2 }
 0x8aa   : > { %v9815_v4 = vpop.eup %9814  ;;  %v9471_v11 = vmul.f32 -1.442695, %v14760_v5  ;;  %v8033_v30 = vrot.slane %v7654_v7, 1 }
 0x8ab   : > { %v8531_v42 = vadd.f32 1.0, %v9815_v4 }
 0x8ac   : > { %9816 = vpow2.f32 %v9471_v11  ;;  %7701 = vmatmul.f32.gmra.mxu1 %v10094_v62  ;;  %v8034_v58 = vsel %vm1272_vm1, %v8032_v6, %v8033_v30 }
 0x8ad   : > { %9818 = vrcp.f32 %v8531_v42  ;;  %7862 = vmatmul.f32.gmra.mxu2 %v10094_v62  ;;  %v8141_v3 = vadd.f32 %v8034_v58, %v7949_v12  ;;  %v10095_v62 = vld [vmem:[#allocation3 + $0xd8] sm:$0xff]  ;;  %v8572_v56 = vand.u32 2147483647, %v8531_v42  ;;  %v8574_v45 = vand.u32 2147483648, %v8531_v42 }
 0x8ae   : > { %vm8568_vm14 = vweird.f32 %v8531_v42 }
 0x8af   : > { %vm8573_vm3 = vcmp.eq.f32.partialorder %v8572_v56, 8.507059e+37 }
 0x8b0   : > { %v7815_v15 = vpop.f32.mrf.mxu2 }
 0x8b1   : > { %v8225_v9 = vrot.slane %v7815_v15, 2  ;;  %v7657_v20 = vpop.f32.mrf.mxu1 }
 0x8b2   : > { %v9817_v33 = vpop.eup %9816  ;;  %v8035_v61 = vrot.slane %v7657_v20, 1 }
 0x8b3   : > { %v9819_v16 = vpop.eup %9818  ;;  %v8532_v4 = vadd.f32 1.0, %v9817_v33  ;;  %v8226_v11 = vsel %vm1525_vm2, %v8224_v2, %v8225_v9  ;;  %v15873_v33 = vld [vmem:[#allocation69_spill] sm:$0xff] }
 0x8b4   : > { %v8564_v7 = vmul.f32 %v9819_v16, %v8531_v42  ;;  %v8333_v57 = vadd.f32 %v8226_v11, %v8141_v3  ;;  %7704 = vmatmul.f32.gmra.mxu1 %v10095_v62  ;;  %vm8569_vm13 = vweird.f32 %v9819_v16  ;;  %v8036_v12 = vsel %vm1272_vm1, %v8033_v30, %v8035_v61 }
 0x8b5   : > { %9820 = vrcp.f32 %v8532_v4  ;;  %7865 = vmatmul.f32.gmra.mxu2 %v10095_v62  ;;  %v7950_v20 = vadd.f32 %v15873_v33, %v14480_v13  ;;  %vm8570_vm15 = vmor %vm8568_vm14, %vm8569_vm13  ;;  %v9077_v13 = vld [vmem:[%s10391_s23] sm:$0xff]  ;;  %vm8583_vm5 = vweird.f32 %v8532_v4 }
 0x8b6   : > { %v8565_v6 = vsub.f32 1.0, %v8564_v7  ;;  %v8369_v22 = vmul.f32 %v14741_v50, %v8333_v57 }
 0x8b7   : > { %v8142_v23 = vadd.f32 %v8036_v12, %v7950_v20 }
 0x8b8   : > { %v8566_v15 = vmul.f32 %v9819_v16, %v8565_v6  ;;  %v14769_v58 = vadd.f32 %v14747_v29, %v8369_v22  ;;  %v7818_v2 = vpop.f32.mrf.mxu2  ;;  %v8575_v6 = vor.u32 1.1754944e-38, %v8574_v45 }
 0x8b9   : > { %v8227_v3 = vrot.slane %v7818_v2, 2  ;;  %v7660_v57 = vpop.f32.mrf.mxu1  ;;  %v10096_v2 = vld [vmem:[#allocation3 + $0xe0] sm:$0xff] }
 0x8ba   : > { %v8567_v11 = vadd.f32 %v9819_v16, %v8566_v15  ;;  %v9472_v7 = vmul.f32 -1.442695, %v14769_v58 }
 0x8bb   : > { %v9821_v62 = vpop.eup %9820  ;;  %v8228_v22 = vsel %vm1525_vm2, %v8225_v9, %v8227_v3 }
 0x8bc   : > { %v8571_v10 = vsel %vm8570_vm15, %v9819_v16, %v8567_v11  ;;  %v8579_v61 = vmul.f32 %v9821_v62, %v8532_v4  ;;  %9822 = vpow2.f32 %v9472_v7  ;;  %v8334_v33 = vadd.f32 %v8228_v22, %v8142_v23  ;;  %7707 = vmatmul.f32.gmra.mxu1 %v10096_v2 }
 0x8bd   : > { %v8576_v30 = vsel %vm8573_vm3, %v8575_v6, %v8571_v10  ;;  %7868 = vmatmul.f32.gmra.mxu2 %v10096_v2  ;;  %v8589_v16 = vand.u32 2147483648, %v8532_v4  ;;  %vm8584_vm4 = vweird.f32 %v9821_v62  ;;  %v8587_v23 = vand.u32 2147483647, %v8532_v4  ;;  %v10097_v2 = vld [vmem:[#allocation3 + $0xe8] sm:$0xff] }
 0x8be   : > { %v9043_v42 = vmul.f32 %v8576_v30, %v14752_v28  ;;  %v8580_v15 = vsub.f32 1.0, %v8579_v61  ;;  %v8370_v9 = vmul.f32 %v14741_v50, %v8334_v33  ;;  %vm8585_vm6 = vmor %vm8583_vm5, %vm8584_vm4  ;;  %v8037_v33 = vrot.slane %v7660_v57, 1 }
 0x8bf   : > { %v8590_v11 = vor.u32 1.1754944e-38, %v8589_v16  ;;  %vm8588_vm7 = vcmp.eq.f32.partialorder %v8587_v23, 8.507059e+37  ;;  %v15874_v16 = vld [vmem:[#allocation53_spill] sm:$0xff] }
 0x8c0   : > { %v9109_v56 = vadd.f32 %v9077_v13, %v9043_v42  ;;  %v8581_v10 = vmul.f32 %v9821_v62, %v8580_v15  ;;  %v7821_v45 = vpop.f32.mrf.mxu2  ;;  %v14787_v12 = vadd.f32 %v14747_v29, %v8370_v9  ;;  %v9078_v13 = vld [vmem:[%s10391_s23 + $0x8] sm:$0xff]  ;;  %v7951_v9 = vadd.f32 %v15874_v16, %v14498_v36 }
 0x8c1   : > { %v7663_v3 = vpop.f32.mrf.mxu1 }
 0x8c2   : > { %v9823_v28 = vpop.eup %9822  ;;  %9142 = vst.msk [vmem:[%s14783_s10] sm:$0xff] %vm489_vm0, %v9109_v56  ;;  %v8582_v20 = vadd.f32 %v9821_v62, %v8581_v10  ;;  %v9473_v6 = vmul.f32 -1.442695, %v14787_v12  ;;  %v8038_v22 = vrot.slane %v7663_v3, 1 }
 0x8c3   : > { %v8533_v7 = vadd.f32 1.0, %v9823_v28 }
 0x8c4   : > { %v8586_v61 = vsel %vm8585_vm6, %v9821_v62, %v8582_v20  ;;  %7710 = vmatmul.f32.gmra.mxu1 %v10097_v2  ;;  %v8039_v4 = vsel %vm1272_vm1, %v8037_v33, %v8038_v22  ;;  %v8229_v62 = vrot.slane %v7821_v45, 2  ;;  %v15875_v33 = vld [vmem:[#allocation23_spill] sm:$0xff] }
 0x8c5   : > { %v8591_v30 = vsel %vm8588_vm7, %v8590_v11, %v8586_v61  ;;  %9824 = vrcp.f32 %v8533_v7  ;;  %7871 = vmatmul.f32.gmra.mxu2 %v10097_v2  ;;  %v8143_v23 = vadd.f32 %v8039_v4, %v7951_v9  ;;  %v7952_v2 = vadd.f32 %v15875_v33, %v14507_v52 }
 0x8c6   : > { %v9044_v42 = vmul.f32 %v8591_v30, %v14760_v5  ;;  %9826 = vpow2.f32 %v9473_v6  ;;  %v10098_v30 = vld [vmem:[#allocation3 + $0xf0] sm:$0xff]  ;;  %vm8598_vm9 = vweird.f32 %v8533_v7 }
 0x8c8   : > { %v9110_v15 = vadd.f32 %v9078_v13, %v9044_v42  ;;  %v7824_v56 = vpop.f32.mrf.mxu2  ;;  %v8604_v13 = vand.u32 2147483648, %v8533_v7 }
 0x8c9   : > { %v8230_v10 = vrot.slane %v7824_v56, 2  ;;  %v7666_v28 = vpop.f32.mrf.mxu1 }
 0x8ca   : > { %9143 = vst.msk [vmem:[%s14783_s10 + $0x8] sm:$0xff] %vm489_vm0, %v9110_v15  ;;  %v8040_v3 = vrot.slane %v7666_v28, 1  ;;  %v8602_v15 = vand.u32 2147483647, %v8533_v7 }
 0x8cb   : > { %v9825_v57 = vpop.eup %9824  ;;  %v8231_v20 = vsel %vm1525_vm2, %v8229_v62, %v8230_v10 }
 0x8cc   : > { %v9827_v11 = vpop.eup %9826  ;;  %v8594_v5 = vmul.f32 %v9825_v57, %v8533_v7  ;;  %v8335_v6 = vadd.f32 %v8231_v20, %v8143_v23  ;;  %7713 = vmatmul.f32.gmra.mxu1 %v10098_v30  ;;  %v8041_v42 = vsel %vm1272_vm1, %v8038_v22, %v8040_v3  ;;  %vm8599_vm8 = vweird.f32 %v9825_v57 }
 0x8cd   : > { %v14800_v61 = vadd.f32 1.0, %v9827_v11  ;;  %7874 = vmatmul.f32.gmra.mxu2 %v10098_v30  ;;  %v8144_v28 = vadd.f32 %v8041_v42, %v7952_v2  ;;  %vm8600_vm10 = vmor %vm8598_vm9, %vm8599_vm8  ;;  %v8605_v11 = vor.u32 1.1754944e-38, %v8604_v13  ;;  %vm8603_vm11 = vcmp.eq.f32.partialorder %v8602_v15, 8.507059e+37  ;;  %v9079_v30 = vld [vmem:[%s10391_s23 + $0x10] sm:$0xff] }
 0x8ce   : > { %v8595_v36 = vsub.f32 1.0, %v8594_v5  ;;  %v8371_v45 = vmul.f32 %v14741_v50, %v8335_v6 }
 0x8cf   : > { %9828 = vrcp.f32 %v14800_v61  ;;  %v8619_v42 = vand.u32 2147483648, %v14800_v61  ;;  %vm8613_vm13 = vweird.f32 %v14800_v61 }
 0x8d0   : > { %v8596_v4 = vmul.f32 %v9825_v57, %v8595_v36  ;;  %v14808_v16 = vadd.f32 %v14747_v29, %v8371_v45  ;;  %v7827_v9 = vpop.f32.mrf.mxu2  ;;  %v10099_v36 = vld [vmem:[#allocation3 + $0xf8] sm:$0xff] }
 0x8d1   : > { %v8232_v56 = vrot.slane %v7827_v9, 2  ;;  %v7669_v20 = vpop.f32.mrf.mxu1  ;;  %v8617_v9 = vand.u32 2147483647, %v14800_v61 }
 0x8d2   : > { %v8597_v62 = vadd.f32 %v9825_v57, %v8596_v4  ;;  %v9474_v23 = vmul.f32 -1.442695, %v14808_v16 }
 0x8d3   : > { %v8233_v52 = vsel %vm1525_vm2, %v8230_v10, %v8232_v56  ;;  %vm8618_vm15 = vcmp.eq.f32.partialorder %v8617_v9, 8.507059e+37 }
 0x8d4   : > { %v8601_v22 = vsel %vm8600_vm10, %v9825_v57, %v8597_v62  ;;  %9830 = vpow2.f32 %v9474_v23  ;;  %v8336_v3 = vadd.f32 %v8233_v52, %v8144_v28  ;;  %7716 = vmatmul.f32.gmra.mxu1 %v10099_v36  ;;  %v8042_v52 = vrot.slane %v7669_v20, 1 }
 0x8d5   : > { %v9829_v5 = vpop.eup %9828  ;;  %v8606_v6 = vsel %vm8603_vm11, %v8605_v11, %v8601_v22  ;;  %7877 = vmatmul.f32.gmra.mxu2 %v10099_v36  ;;  %v8620_v11 = vor.u32 1.1754944e-38, %v8619_v42  ;;  %v10100_v22 = vld [vmem:[#allocation3 + $0x100] sm:$0xff] }
 0x8d6   : > { %v9045_v7 = vmul.f32 %v8606_v6, %v14769_v58  ;;  %v8609_v45 = vmul.f32 %v9829_v5, %v14800_v61  ;;  %v8372_v33 = vmul.f32 %v14741_v50, %v8336_v3  ;;  %vm8614_vm12 = vweird.f32 %v9829_v5 }
 0x8d7   : > { %vm8615_vm14 = vmor %vm8613_vm13, %vm8614_vm12 }
 0x8d8   : > { %v9111_v13 = vadd.f32 %v9079_v30, %v9045_v7  ;;  %v8610_v2 = vsub.f32 1.0, %v8609_v45  ;;  %v14817_v10 = vadd.f32 %v14747_v29, %v8372_v33  ;;  %v7830_v57 = vpop.f32.mrf.mxu2  ;;  %v9080_v30 = vld [vmem:[%s10391_s23 + $0x18] sm:$0xff] }
 0x8d9   : > { %v7672_v56 = vpop.f32.mrf.mxu1  ;;  %v15876_v45 = vld [vmem:[#allocation99_spill] sm:$0xff] }
 0x8da   : > { %v9831_v4 = vpop.eup %9830  ;;  %9144 = vst.msk [vmem:[%s14783_s10 + $0x10] sm:$0xff] %vm489_vm0, %v9111_v13  ;;  %v8611_v15 = vmul.f32 %v9829_v5, %v8610_v2  ;;  %v9475_v58 = vmul.f32 -1.442695, %v14817_v10  ;;  %v8043_v23 = vrot.slane %v7672_v56, 1  ;;  %v7953_v61 = vadd.f32 %v15876_v45, %v14528_v49 }
 0x8db   : > { %v8535_v62 = vadd.f32 1.0, %v9831_v4  ;;  %v8234_v13 = vrot.slane %v7830_v57, 2 }
 0x8dc   : > { %v8612_v28 = vadd.f32 %v9829_v5, %v8611_v15  ;;  %9832 = vpow2.f32 %v9475_v58  ;;  %7719 = vmatmul.f32.gmra.mxu1 %v10100_v22  ;;  %v8044_v36 = vsel %vm1272_vm1, %v8042_v52, %v8043_v23 }
 0x8dd   : > { %9834 = vrcp.f32 %v8535_v62  ;;  %7880 = vmatmul.f32.gmra.mxu2 %v10100_v22  ;;  %v8145_v4 = vadd.f32 %v8044_v36, %v7953_v61  ;;  %v8632_v52 = vand.u32 2147483647, %v8535_v62  ;;  %v8634_v22 = vand.u32 2147483648, %v8535_v62 }
 0x8de   : > { %v8616_v3 = vsel %vm8615_vm14, %v9829_v5, %v8612_v28  ;;  %vm8628_vm4 = vweird.f32 %v8535_v62 }
 0x8df   : > { %v8621_v6 = vsel %vm8618_vm15, %v8620_v11, %v8616_v3  ;;  %vm8633_vm6 = vcmp.eq.f32.partialorder %v8632_v52, 8.507059e+37 }
 0x8e0   : > { %v9046_v7 = vmul.f32 %v8621_v6, %v14787_v12  ;;  %v7833_v33 = vpop.f32.mrf.mxu2  ;;  %v10101_v12 = vld [vmem:[#allocation3 + $0x108] sm:$0xff] }
 0x8e1   : > { %v8235_v2 = vrot.slane %v7833_v33, 2  ;;  %v7675_v15 = vpop.f32.mrf.mxu1 }
 0x8e2   : > { %v9833_v42 = vpop.eup %9832  ;;  %v9112_v20 = vadd.f32 %v9080_v30, %v9046_v7  ;;  %v8045_v11 = vrot.slane %v7675_v15, 1  ;;  %v15877_v7 = vld [vmem:[#allocation28_spill] sm:$0xff] }
 0x8e3   : > { %v9835_v58 = vpop.eup %9834  ;;  %v8536_v5 = vadd.f32 1.0, %v9833_v42  ;;  %v8236_v9 = vsel %vm1525_vm2, %v8234_v13, %v8235_v2  ;;  %v7954_v45 = vadd.f32 %v15877_v7, %v14539_v35 }
 0x8e4   : > { %9145 = vst.msk [vmem:[%s14783_s10 + $0x18] sm:$0xff] %vm489_vm0, %v9112_v20  ;;  %v8624_v56 = vmul.f32 %v9835_v58, %v8535_v62  ;;  %v8337_v28 = vadd.f32 %v8236_v9, %v8145_v4  ;;  %7722 = vmatmul.f32.gmra.mxu1 %v10101_v12  ;;  %vm8629_vm3 = vweird.f32 %v9835_v58  ;;  %v8046_v30 = vsel %vm1272_vm1, %v8043_v23, %v8045_v11  ;;  %v9081_v11 = vld [vmem:[%s10391_s23 + $0x20] sm:$0xff] }
 0x8e5   : > { %9836 = vrcp.f32 %v8536_v5  ;;  %7883 = vmatmul.f32.gmra.mxu2 %v10101_v12  ;;  %vm8630_vm5 = vmor %vm8628_vm4, %vm8629_vm3  ;;  %v8635_v4 = vor.u32 1.1754944e-38, %v8634_v22  ;;  %v8146_v15 = vadd.f32 %v8046_v30, %v7954_v45  ;;  %v10102_v12 = vld [vmem:[#allocation3 + $0x110] sm:$0xff]  ;;  %vm8643_vm8 = vweird.f32 %v8536_v5 }
 0x8e6   : > { %v8625_v49 = vsub.f32 1.0, %v8624_v56  ;;  %v8373_v57 = vmul.f32 %v14741_v50, %v8337_v28 }
 0x8e8   : > { %v8626_v3 = vmul.f32 %v9835_v58, %v8625_v49  ;;  %v14835_v6 = vadd.f32 %v14747_v29, %v8373_v57  ;;  %v7836_v36 = vpop.f32.mrf.mxu2  ;;  %v8649_v57 = vand.u32 2147483648, %v8536_v5 }
 0x8e9   : > { %v8237_v61 = vrot.slane %v7836_v36, 2  ;;  %v7678_v42 = vpop.f32.mrf.mxu1 }
 0x8ea   : > { %v8627_v33 = vadd.f32 %v9835_v58, %v8626_v3  ;;  %v9476_v13 = vmul.f32 -1.442695, %v14835_v6 }
 0x8eb   : > { %v9837_v20 = vpop.eup %9836  ;;  %v8238_v9 = vsel %vm1525_vm2, %v8235_v2, %v8237_v61  ;;  %v8647_v2 = vand.u32 2147483647, %v8536_v5 }
 0x8ec   : > { %v8631_v56 = vsel %vm8630_vm5, %v9835_v58, %v8627_v33  ;;  %v8639_v23 = vmul.f32 %v9837_v20, %v8536_v5  ;;  %9838 = vpow2.f32 %v9476_v13  ;;  %v8338_v35 = vadd.f32 %v8238_v9, %v8146_v15  ;;  %7725 = vmatmul.f32.gmra.mxu1 %v10102_v12  ;;  %v9082_v9 = vld [vmem:[%s10391_s23 + $0x28] sm:$0xff] }
 0x8ed   : > { %v8636_v28 = vsel %vm8633_vm6, %v8635_v4, %v8631_v56  ;;  %7886 = vmatmul.f32.gmra.mxu2 %v10102_v12  ;;  %vm8644_vm7 = vweird.f32 %v9837_v20  ;;  %vm8648_vm10 = vcmp.eq.f32.partialorder %v8647_v2, 8.507059e+37  ;;  %v8047_v56 = vrot.slane %v7678_v42, 1 }
 0x8ee   : > { %v9047_v62 = vmul.f32 %v8636_v28, %v14808_v16  ;;  %v8640_v49 = vsub.f32 1.0, %v8639_v23  ;;  %v8374_v22 = vmul.f32 %v14741_v50, %v8338_v35  ;;  %vm8645_vm9 = vmor %vm8643_vm8, %vm8644_vm7  ;;  %v8650_v16 = vor.u32 1.1754944e-38, %v8649_v57  ;;  %v10103_v23 = vld [vmem:[#allocation3 + $0x118] sm:$0xff]  ;;  %v15878_v35 = vld [vmem:[#allocation36_spill] sm:$0xff] }
 0x8ef   : > { %v7955_v12 = vadd.f32 %v15878_v35, %v14557_v8 }
 0x8f0   : > { %v9113_v3 = vadd.f32 %v9081_v11, %v9047_v62  ;;  %v8641_v30 = vmul.f32 %v9837_v20, %v8640_v49  ;;  %v7839_v58 = vpop.f32.mrf.mxu2  ;;  %v14846_v52 = vadd.f32 %v14747_v29, %v8374_v22 }
 0x8f1   : > { %v7681_v45 = vpop.f32.mrf.mxu1 }
 0x8f2   : > { %v9839_v36 = vpop.eup %9838  ;;  %9146 = vst.msk [vmem:[%s14783_s10 + $0x20] sm:$0xff] %vm489_vm0, %v9113_v3  ;;  %v8642_v7 = vadd.f32 %v9837_v20, %v8641_v30  ;;  %v9477_v33 = vmul.f32 -1.442695, %v14846_v52  ;;  %v8048_v13 = vrot.slane %v7681_v45, 1  ;;  %v10104_v45 = vld [vmem:[#allocation3 + $0x120] sm:$0xff] }
 0x8f3   : > { %v8537_v61 = vadd.f32 1.0, %v9839_v36 }
 0x8f4   : > { %v8646_v4 = vsel %vm8645_vm9, %v9837_v20, %v8642_v7  ;;  %7728 = vmatmul.f32.gmra.mxu1 %v10103_v23  ;;  %v8049_v5 = vsel %vm1272_vm1, %v8047_v56, %v8048_v13  ;;  %v8239_v20 = vrot.slane %v7839_v58, 2 }
 0x8f5   : > { %v8651_v15 = vsel %vm8648_vm10, %v8650_v16, %v8646_v4  ;;  %9840 = vrcp.f32 %v8537_v61  ;;  %7889 = vmatmul.f32.gmra.mxu2 %v10103_v23  ;;  %v8147_v57 = vadd.f32 %v8049_v5, %v7955_v12  ;;  %v8664_v16 = vand.u32 2147483648, %v8537_v61 }
 0x8f6   : > { %v9048_v28 = vmul.f32 %v8651_v15, %v14817_v10  ;;  %9842 = vpow2.f32 %v9477_v33  ;;  %v15879_v33 = vld [vmem:[#allocation57_spill] sm:$0xff]  ;;  %v8662_v56 = vand.u32 2147483647, %v8537_v61  ;;  %vm8658_vm12 = vweird.f32 %v8537_v61 }
 0x8f7   : > { %v7956_v4 = vadd.f32 %v15879_v33, %v14565_v44 }
 0x8f8   : > { %v9114_v11 = vadd.f32 %v9082_v9, %v9048_v28  ;;  %v7842_v62 = vpop.f32.mrf.mxu2  ;;  %vm8663_vm14 = vcmp.eq.f32.partialorder %v8662_v56, 8.507059e+37 }
 0x8f9   : > { %v8240_v49 = vrot.slane %v7842_v62, 2  ;;  %v7684_v22 = vpop.f32.mrf.mxu1 }
 0x8fa   : > { %9147 = vst.msk [vmem:[%s14783_s10 + $0x28] sm:$0xff] %vm489_vm0, %v9114_v11  ;;  %v8050_v30 = vrot.slane %v7684_v22, 1 }
 0x8fb   : > { %v9841_v42 = vpop.eup %9840  ;;  %v8241_v3 = vsel %vm1525_vm2, %v8239_v20, %v8240_v49  ;;  %v8665_v20 = vor.u32 1.1754944e-38, %v8664_v16 }
 0x8fc   : > { %v9843_v2 = vpop.eup %9842  ;;  %v8654_v10 = vmul.f32 %v9841_v42, %v8537_v61  ;;  %v8339_v36 = vadd.f32 %v8241_v3, %v8147_v57  ;;  %7731 = vmatmul.f32.gmra.mxu1 %v10104_v45  ;;  %v8051_v15 = vsel %vm1272_vm1, %v8048_v13, %v8050_v30  ;;  %vm8659_vm11 = vweird.f32 %v9841_v42  ;;  %v9083_v30 = vld [vmem:[%s10391_s23 + $0x30] sm:$0xff] }
 0x8fd   : > { %v14859_v7 = vadd.f32 1.0, %v9843_v2  ;;  %7892 = vmatmul.f32.gmra.mxu2 %v10104_v45  ;;  %v8148_v12 = vadd.f32 %v8051_v15, %v7956_v4  ;;  %vm8660_vm13 = vmor %vm8658_vm12, %vm8659_vm11  ;;  %v10105_v2 = vld [vmem:[#allocation3 + $0x128] sm:$0xff] }
 0x8fe   : > { %v8655_v8 = vsub.f32 1.0, %v8654_v10  ;;  %v8375_v58 = vmul.f32 %v14741_v50, %v8339_v36 }
 0x8ff   : > { %9844 = vrcp.f32 %v14859_v7  ;;  %v8677_v4 = vand.u32 2147483647, %v14859_v7  ;;  %vm8673_vm3 = vweird.f32 %v14859_v7 }
 0x900   : > { %v8656_v9 = vmul.f32 %v9841_v42, %v8655_v8  ;;  %v14867_v23 = vadd.f32 %v14747_v29, %v8375_v58  ;;  %v7845_v28 = vpop.f32.mrf.mxu2  ;;  %v8679_v58 = vand.u32 2147483648, %v14859_v7 }
 0x901   : > { %v8242_v5 = vrot.slane %v7845_v28, 2  ;;  %v7687_v62 = vpop.f32.mrf.mxu1  ;;  %vm8678_vm5 = vcmp.eq.f32.partialorder %v8677_v4, 8.507059e+37 }
 0x902   : > { %v8657_v11 = vadd.f32 %v9841_v42, %v8656_v9  ;;  %v9478_v35 = vmul.f32 -1.442695, %v14867_v23 }
 0x903   : > { %v8243_v44 = vsel %vm1525_vm2, %v8240_v49, %v8242_v5  ;;  %v8680_v5 = vor.u32 1.1754944e-38, %v8679_v58 }
 0x904   : > { %v8661_v13 = vsel %vm8660_vm13, %v9841_v42, %v8657_v11  ;;  %9846 = vpow2.f32 %v9478_v35  ;;  %v8340_v57 = vadd.f32 %v8243_v44, %v8148_v12  ;;  %7734 = vmatmul.f32.gmra.mxu1 %v10105_v2  ;;  %v8052_v11 = vrot.slane %v7687_v62, 1  ;;  %v10106_v35 = vld [vmem:[#allocation3 + $0x130] sm:$0xff]  ;;  %v9084_v44 = vld [vmem:[%s10391_s23 + $0x38] sm:$0xff] }
 0x905   : > { %v9845_v22 = vpop.eup %9844  ;;  %v8666_v3 = vsel %vm8663_vm14, %v8665_v20, %v8661_v13  ;;  %7895 = vmatmul.f32.gmra.mxu2 %v10105_v2 }
 0x906   : > { %v9049_v61 = vmul.f32 %v8666_v3, %v14835_v6  ;;  %v8669_v10 = vmul.f32 %v9845_v22, %v14859_v7  ;;  %v8376_v36 = vmul.f32 %v14741_v50, %v8340_v57  ;;  %vm8674_vm15 = vweird.f32 %v9845_v22  ;;  %v15880_v3 = vld [vmem:[#allocation58_spill] sm:$0xff] }
 0x907   : > { %vm8675_vm4 = vmor %vm8673_vm3, %vm8674_vm15  ;;  %v7957_v7 = vadd.f32 %v15880_v3, %v14580_v39 }
 0x908   : > { %v9115_v45 = vadd.f32 %v9083_v30, %v9049_v61  ;;  %v8670_v8 = vsub.f32 1.0, %v8669_v10  ;;  %v14876_v49 = vadd.f32 %v14747_v29, %v8376_v36  ;;  %v7848_v42 = vpop.f32.mrf.mxu2 }
 0x909   : > { %v7690_v15 = vpop.f32.mrf.mxu1  ;;  %v8244_v2 = vrot.slane %v7848_v42, 2 }
 0x90a   : > { %v9847_v16 = vpop.eup %9846  ;;  %9148 = vst.msk [vmem:[%s14783_s10 + $0x30] sm:$0xff] %vm489_vm0, %v9115_v45  ;;  %v8671_v33 = vmul.f32 %v9845_v22, %v8670_v8  ;;  %v9479_v6 = vmul.f32 -1.442695, %v14876_v49  ;;  %v8053_v56 = vrot.slane %v7690_v15, 1 }
 0x90b   : > { %v8539_v9 = vadd.f32 1.0, %v9847_v16 }
 0x90c   : > { %v8672_v28 = vadd.f32 %v9845_v22, %v8671_v33  ;;  %9848 = vpow2.f32 %v9479_v6  ;;  %7737 = vmatmul.f32.gmra.mxu1 %v10106_v35  ;;  %v8054_v13 = vsel %vm1272_vm1, %v8052_v11, %v8053_v56 }
 0x90d   : > { %9850 = vrcp.f32 %v8539_v9  ;;  %7898 = vmatmul.f32.gmra.mxu2 %v10106_v35  ;;  %v8149_v36 = vadd.f32 %v8054_v13, %v7957_v7  ;;  %v8692_v6 = vand.u32 2147483647, %v8539_v9  ;;  %v8694_v15 = vand.u32 2147483648, %v8539_v9 }
 0x90e   : > { %v8676_v12 = vsel %vm8675_vm4, %v9845_v22, %v8672_v28  ;;  %vm8688_vm7 = vweird.f32 %v8539_v9 }
 0x90f   : > { %v8681_v20 = vsel %vm8678_vm5, %v8680_v5, %v8676_v12  ;;  %v15881_v12 = vld [vmem:[#allocation88_spill] sm:$0xff]  ;;  %vm8693_vm9 = vcmp.eq.f32.partialorder %v8692_v6, 8.507059e+37 }
 0x910   : > { %v9050_v57 = vmul.f32 %v8681_v20, %v14846_v52  ;;  %v7851_v30 = vpop.f32.mrf.mxu2  ;;  %v10107_v52 = vld [vmem:[#allocation3 + $0x138] sm:$0xff]  ;;  %v7958_v20 = vadd.f32 %v15881_v12, %v14588_v40 }
 0x911   : > { %v8245_v61 = vrot.slane %v7851_v30, 2  ;;  %v7693_v45 = vpop.f32.mrf.mxu1  ;;  %v8695_v30 = vor.u32 1.1754944e-38, %v8694_v15 }
 0x912   : > { %v9849_v10 = vpop.eup %9848  ;;  %v9116_v62 = vadd.f32 %v9084_v44, %v9050_v57  ;;  %v8055_v4 = vrot.slane %v7693_v45, 1  ;;  %v9085_v45 = vld [vmem:[%s10391_s23 + $0x40] sm:$0xff] }
 0x913   : > { %v9851_v8 = vpop.eup %9850  ;;  %v8540_v22 = vadd.f32 1.0, %v9849_v10  ;;  %v8246_v58 = vsel %vm1525_vm2, %v8244_v2, %v8245_v61 }
 0x914   : > { %9149 = vst.msk [vmem:[%s14783_s10 + $0x38] sm:$0xff] %vm489_vm0, %v9116_v62  ;;  %v8684_v16 = vmul.f32 %v9851_v8, %v8539_v9  ;;  %v8341_v33 = vadd.f32 %v8246_v58, %v8149_v36  ;;  %7740 = vmatmul.f32.gmra.mxu1 %v10107_v52  ;;  %vm8689_vm6 = vweird.f32 %v9851_v8  ;;  %v8056_v11 = vsel %vm1272_vm1, %v8053_v56, %v8055_v4  ;;  %v10108_v58 = vld [vmem:[#allocation3 + $0x140] sm:$0xff] }
 0x915   : > { %9852 = vrcp.f32 %v8540_v22  ;;  %7901 = vmatmul.f32.gmra.mxu2 %v10107_v52  ;;  %vm8690_vm8 = vmor %vm8688_vm7, %vm8689_vm6  ;;  %v8150_v2 = vadd.f32 %v8056_v11, %v7958_v20  ;;  %vm8703_vm11 = vweird.f32 %v8540_v22 }
 0x916   : > { %v8685_v39 = vsub.f32 1.0, %v8684_v16  ;;  %v8377_v42 = vmul.f32 %v14741_v50, %v8341_v33  ;;  %v8709_v33 = vand.u32 2147483648, %v8540_v22 }
 0x918   : > { %v8686_v28 = vmul.f32 %v9851_v8, %v8685_v39  ;;  %v14894_v5 = vadd.f32 %v14747_v29, %v8377_v42  ;;  %v7854_v35 = vpop.f32.mrf.mxu2 }
 0x919   : > { %v8247_v44 = vrot.slane %v7854_v35, 2  ;;  %v7696_v3 = vpop.f32.mrf.mxu1 }
 0x91a   : > { %v8687_v13 = vadd.f32 %v9851_v8, %v8686_v28  ;;  %v9480_v57 = vmul.f32 -1.442695, %v14894_v5 }
 0x91b   : > { %v9853_v7 = vpop.eup %9852  ;;  %v8248_v10 = vsel %vm1525_vm2, %v8245_v61, %v8247_v44  ;;  %v8707_v61 = vand.u32 2147483647, %v8540_v22 }
 0x91c   : > { %v8691_v62 = vsel %vm8690_vm8, %v9851_v8, %v8687_v13  ;;  %v8699_v56 = vmul.f32 %v9853_v7, %v8540_v22  ;;  %9854 = vpow2.f32 %v9480_v57  ;;  %v8342_v40 = vadd.f32 %v8248_v10, %v8150_v2  ;;  %7743 = vmatmul.f32.gmra.mxu1 %v10108_v58  ;;  %v9086_v13 = vld [vmem:[%s10391_s23 + $0x48] sm:$0xff] }
 0x91d   : > { %v8696_v36 = vsel %vm8693_vm9, %v8695_v30, %v8691_v62  ;;  %7904 = vmatmul.f32.gmra.mxu2 %v10108_v58  ;;  %vm8704_vm10 = vweird.f32 %v9853_v7  ;;  %vm8708_vm13 = vcmp.eq.f32.partialorder %v8707_v61, 8.507059e+37  ;;  %v8057_v57 = vrot.slane %v7696_v3, 1  ;;  %v10109_v30 = vld [vmem:[#allocation3 + $0x148] sm:$0xff]  ;;  %v15882_v62 = vld [vmem:[#allocation59_spill] sm:$0xff] }
 0x91e   : > { %v9051_v9 = vmul.f32 %v8696_v36, %v14867_v23  ;;  %v8700_v16 = vsub.f32 1.0, %v8699_v56  ;;  %v8378_v4 = vmul.f32 %v14741_v50, %v8342_v40  ;;  %vm8705_vm12 = vmor %vm8703_vm11, %vm8704_vm10  ;;  %v8710_v23 = vor.u32 1.1754944e-38, %v8709_v33 }
 0x91f   : > { %v7959_v56 = vadd.f32 %v15882_v62, %v14603_v26 }
 0x920   : > { %v9117_v52 = vadd.f32 %v9085_v45, %v9051_v9  ;;  %v8701_v39 = vmul.f32 %v9853_v7, %v8700_v16  ;;  %v7857_v8 = vpop.f32.mrf.mxu2  ;;  %v14905_v42 = vadd.f32 %v14747_v29, %v8378_v4 }
 0x921   : > { %v7699_v28 = vpop.f32.mrf.mxu1 }
 0x922   : > { %v9855_v6 = vpop.eup %9854  ;;  %9150 = vst.msk [vmem:[%s14783_s10 + $0x40] sm:$0xff] %vm489_vm0, %v9117_v52  ;;  %v8702_v15 = vadd.f32 %v9853_v7, %v8701_v39  ;;  %v9481_v35 = vmul.f32 -1.442695, %v14905_v42  ;;  %v8058_v12 = vrot.slane %v7699_v28, 1  ;;  %v10110_v39 = vld [vmem:[#allocation3 + $0x150] sm:$0xff] }
 0x923   : > { %v8541_v11 = vadd.f32 1.0, %v9855_v6  ;;  %v7960_v6 = vadd.f32 %v14435_v43, %v14611_v1 }
 0x924   : > { %v8706_v20 = vsel %vm8705_vm12, %v9853_v7, %v8702_v15  ;;  %7746 = vmatmul.f32.gmra.mxu1 %v10109_v30  ;;  %v8059_v22 = vsel %vm1272_vm1, %v8057_v57, %v8058_v12  ;;  %v8249_v7 = vrot.slane %v7857_v8, 2 }
 0x925   : > { %v8711_v44 = vsel %vm8708_vm13, %v8710_v23, %v8706_v20  ;;  %9856 = vrcp.f32 %v8541_v11  ;;  %7907 = vmatmul.f32.gmra.mxu2 %v10109_v30  ;;  %v8151_v40 = vadd.f32 %v8059_v22, %v7959_v56  ;;  %v8724_v8 = vand.u32 2147483648, %v8541_v11  ;;  %v9087_v56 = vld [vmem:[%s10391_s23 + $0x50] sm:$0xff] }
 0x926   : > { %v9052_v2 = vmul.f32 %v8711_v44, %v14876_v49  ;;  %9858 = vpow2.f32 %v9481_v35  ;;  %v8722_v23 = vand.u32 2147483647, %v8541_v11  ;;  %vm8718_vm15 = vweird.f32 %v8541_v11 }
 0x927   : > { %v8725_v22 = vor.u32 1.1754944e-38, %v8724_v8 }
 0x928   : > { %v9118_v10 = vadd.f32 %v9086_v13, %v9052_v2  ;;  %v7860_v36 = vpop.f32.mrf.mxu2  ;;  %vm8723_vm4 = vcmp.eq.f32.partialorder %v8722_v23, 8.507059e+37  ;;  %v9088_v23 = vld [vmem:[%s10391_s23 + $0x58] sm:$0xff] }
 0x929   : > { %v8250_v45 = vrot.slane %v7860_v36, 2  ;;  %v7702_v58 = vpop.f32.mrf.mxu1  ;;  %v10111_v36 = vld [vmem:[#allocation3 + $0x158] sm:$0xff] }
 0x92a   : > { %9151 = vst.msk [vmem:[%s14783_s10 + $0x48] sm:$0xff] %vm489_vm0, %v9118_v10  ;;  %v8060_v16 = vrot.slane %v7702_v58, 1 }
 0x92b   : > { %v9857_v3 = vpop.eup %9856  ;;  %v8251_v9 = vsel %vm1525_vm2, %v8249_v7, %v8250_v45 }
 0x92c   : > { %v9859_v33 = vpop.eup %9858  ;;  %v8714_v49 = vmul.f32 %v9857_v3, %v8541_v11  ;;  %v8343_v4 = vadd.f32 %v8251_v9, %v8151_v40  ;;  %7749 = vmatmul.f32.gmra.mxu1 %v10110_v39  ;;  %v8061_v15 = vsel %vm1272_vm1, %v8058_v12, %v8060_v16  ;;  %vm8719_vm14 = vweird.f32 %v9857_v3 }
 0x92d   : > { %v14918_v52 = vadd.f32 1.0, %v9859_v33  ;;  %7910 = vmatmul.f32.gmra.mxu2 %v10110_v39  ;;  %v8152_v30 = vadd.f32 %v8061_v15, %v7960_v6  ;;  %vm8720_vm3 = vmor %vm8718_vm15, %vm8719_vm14  ;;  %v10112_v6 = vld [vmem:[#allocation3 + $0x160] sm:$0xff] }
 0x92e   : > { %v8715_v26 = vsub.f32 1.0, %v8714_v49  ;;  %v8379_v61 = vmul.f32 %v14741_v50, %v8343_v4 }
 0x92f   : > { %9860 = vrcp.f32 %v14918_v52  ;;  %v8739_v16 = vand.u32 2147483648, %v14918_v52  ;;  %v8737_v4 = vand.u32 2147483647, %v14918_v52  ;;  %vm8733_vm6 = vweird.f32 %v14918_v52 }
 0x930   : > { %v8716_v28 = vmul.f32 %v9857_v3, %v8715_v26  ;;  %v14926_v35 = vadd.f32 %v14747_v29, %v8379_v61  ;;  %v7863_v20 = vpop.f32.mrf.mxu2 }
 0x931   : > { %v8252_v44 = vrot.slane %v7863_v20, 2  ;;  %v7705_v2 = vpop.f32.mrf.mxu1  ;;  %vm8738_vm8 = vcmp.eq.f32.partialorder %v8737_v4, 8.507059e+37  ;;  %v7962_v4 = vadd.f32 %v14467_v27, %v14634_v18  ;;  %v9089_v27 = vld [vmem:[%s10391_s23 + $0x60] sm:$0xff] }
 0x932   : > { %v8717_v13 = vadd.f32 %v9857_v3, %v8716_v28  ;;  %v9482_v57 = vmul.f32 -1.442695, %v14926_v35  ;;  %v8062_v8 = vrot.slane %v7705_v2, 1 }
 0x933   : > { %v8253_v43 = vsel %vm1525_vm2, %v8250_v45, %v8252_v44 }
 0x934   : > { %v8721_v1 = vsel %vm8720_vm3, %v9857_v3, %v8717_v13  ;;  %9862 = vpow2.f32 %v9482_v57  ;;  %v8344_v12 = vadd.f32 %v8253_v43, %v8152_v30  ;;  %7752 = vmatmul.f32.gmra.mxu1 %v10111_v36 }
 0x935   : > { %v9861_v10 = vpop.eup %9860  ;;  %v8726_v62 = vsel %vm8723_vm4, %v8725_v22, %v8721_v1  ;;  %7913 = vmatmul.f32.gmra.mxu2 %v10111_v36 }
 0x936   : > { %v9053_v11 = vmul.f32 %v8726_v62, %v14894_v5  ;;  %v8729_v7 = vmul.f32 %v9861_v10, %v14918_v52  ;;  %v8380_v40 = vmul.f32 %v14741_v50, %v8344_v12  ;;  %vm8734_vm5 = vweird.f32 %v9861_v10 }
 0x937   : > { %vm8735_vm7 = vmor %vm8733_vm6, %vm8734_vm5  ;;  %v7961_v52 = vadd.f32 %v14457_v55, %v14626_v63  ;;  %v10113_v55 = vld [vmem:[#allocation3 + $0x168] sm:$0xff] }
 0x938   : > { %v9119_v58 = vadd.f32 %v9087_v56, %v9053_v11  ;;  %v8730_v9 = vsub.f32 1.0, %v8729_v7  ;;  %v14935_v45 = vadd.f32 %v14747_v29, %v8380_v40  ;;  %v7866_v3 = vpop.f32.mrf.mxu2  ;;  %v8740_v29 = vor.u32 1.1754944e-38, %v8739_v16  ;;  %v14957_v11 = vld [vmem:[%s15231_s5] ss:$0 sm:$0xff] }
 0x939   : > { %v7708_v39 = vpop.f32.mrf.mxu1  ;;  %v8254_v57 = vrot.slane %v7866_v3, 2  ;;  %v14963_v3 = vld [vmem:[%s15232_s6] ss:$0 sm:$0xff] }
 0x93a   : > { %v9863_v33 = vpop.eup %9862  ;;  %9152 = vst.msk [vmem:[%s14783_s10 + $0x50] sm:$0xff] %vm489_vm0, %v9119_v58  ;;  %v8731_v49 = vmul.f32 %v9861_v10, %v8730_v9  ;;  %v9483_v5 = vmul.f32 -1.442695, %v14935_v45  ;;  %v8063_v26 = vrot.slane %v7708_v39, 1 }
 0x93b   : > { %v8543_v50 = vadd.f32 1.0, %v9863_v33 }
 0x93c   : > { %v8732_v61 = vadd.f32 %v9861_v10, %v8731_v49  ;;  %9864 = vpow2.f32 %v9483_v5  ;;  %7755 = vmatmul.f32.gmra.mxu1 %v10112_v6  ;;  %v8064_v20 = vsel %vm1272_vm1, %v8062_v8, %v8063_v26 }
 0x93d   : > { %9866 = vrcp.f32 %v8543_v50  ;;  %7916 = vmatmul.f32.gmra.mxu2 %v10112_v6  ;;  %v8153_v43 = vadd.f32 %v8064_v20, %v7961_v52  ;;  %v8752_v40 = vand.u32 2147483647, %v8543_v50  ;;  %v8754_v58 = vand.u32 2147483648, %v8543_v50 }
 0x93e   : > { %v8736_v15 = vsel %vm8735_vm7, %v9861_v10, %v8732_v61  ;;  %vm8748_vm10 = vweird.f32 %v8543_v50 }
 0x93f   : > { %v8741_v28 = vsel %vm8738_vm8, %v8740_v29, %v8736_v15  ;;  %v8755_v6 = vor.u32 1.1754944e-38, %v8754_v58  ;;  %vm8753_vm12 = vcmp.eq.f32.partialorder %v8752_v40, 8.507059e+37  ;;  %v9090_v40 = vld [vmem:[%s10391_s23 + $0x68] sm:$0xff] }
 0x940   : > { %v9054_v44 = vmul.f32 %v8741_v28, %v14905_v42  ;;  %v7869_v13 = vpop.f32.mrf.mxu2 }
 0x941   : > { %v8255_v30 = vrot.slane %v7869_v13, 2  ;;  %v7711_v1 = vpop.f32.mrf.mxu1 }
 0x942   : > { %v9865_v22 = vpop.eup %9864  ;;  %v9120_v2 = vadd.f32 %v9088_v23, %v9054_v44  ;;  %v8065_v42 = vrot.slane %v7711_v1, 1  ;;  %v10116_v44 = vld [vmem:[#allocation3 + $0x170] sm:$0xff] }
 0x943   : > { %v9867_v12 = vpop.eup %9866  ;;  %v14948_v10 = vadd.f32 1.0, %v9865_v22  ;;  %v8256_v62 = vsel %vm1525_vm2, %v8254_v57, %v8255_v30 }
 0x944   : > { %9153 = vst.msk [vmem:[%s14783_s10 + $0x58] sm:$0xff] %vm489_vm0, %v9120_v2  ;;  %v8744_v56 = vmul.f32 %v9867_v12, %v8543_v50  ;;  %v8345_v36 = vadd.f32 %v8256_v62, %v8153_v43  ;;  %7758 = vmatmul.f32.gmra.mxu1 %v10113_v55  ;;  %vm8749_vm9 = vweird.f32 %v9867_v12  ;;  %v8066_v33 = vsel %vm1272_vm1, %v8063_v26, %v8065_v42 }
 0x945   : > { %9868 = vrcp.f32 %v14948_v10  ;;  %7919 = vmatmul.f32.gmra.mxu2 %v10113_v55  ;;  %vm8750_vm11 = vmor %vm8748_vm10, %vm8749_vm9  ;;  %v8154_v15 = vadd.f32 %v8066_v33, %v7962_v4  ;;  %v8769_v13 = vand.u32 2147483648, %v14948_v10  ;;  %v8767_v2 = vand.u32 2147483647, %v14948_v10 }
 0x946   : > { %v8745_v63 = vsub.f32 1.0, %v8744_v56  ;;  %v8381_v7 = vmul.f32 %v14957_v11, %v8345_v36  ;;  %vm8763_vm14 = vweird.f32 %v14948_v10  ;;  %v7963_v4 = vadd.f32 %v14483_v0, %v14644_v59 }
 0x947   : > { %v8770_v56 = vor.u32 1.1754944e-38, %v8769_v13  ;;  %vm8768_vm3 = vcmp.eq.f32.partialorder %v8767_v2, 8.507059e+37 }
 0x948   : > { %v8746_v9 = vmul.f32 %v9867_v12, %v8745_v63  ;;  %v14966_v16 = vadd.f32 %v14963_v3, %v8381_v7  ;;  %v7872_v49 = vpop.f32.mrf.mxu2 }
 0x949   : > { %v8257_v5 = vrot.slane %v7872_v49, 2  ;;  %v7714_v29 = vpop.f32.mrf.mxu1 }
 0x94a   : > { %v8747_v39 = vadd.f32 %v9867_v12, %v8746_v9  ;;  %v9484_v61 = vmul.f32 -1.442695, %v14966_v16  ;;  %v8067_v58 = vrot.slane %v7714_v29, 1  ;;  %v10117_v9 = vld [vmem:[#allocation3 + $0x178] sm:$0xff] }
 0x94b   : > { %v9869_v8 = vpop.eup %9868  ;;  %v8258_v28 = vsel %vm1525_vm2, %v8255_v30, %v8257_v5 }
 0x94c   : > { %v8751_v23 = vsel %vm8750_vm11, %v9867_v12, %v8747_v39  ;;  %v8759_v26 = vmul.f32 %v9869_v8, %v14948_v10  ;;  %9870 = vpow2.f32 %v9484_v61  ;;  %v8346_v18 = vadd.f32 %v8258_v28, %v8154_v15  ;;  %7761 = vmatmul.f32.gmra.mxu1 %v10116_v44 }
 0x94d   : > { %v8756_v20 = vsel %vm8753_vm12, %v8755_v6, %v8751_v23  ;;  %7922 = vmatmul.f32.gmra.mxu2 %v10116_v44  ;;  %vm8764_vm13 = vweird.f32 %v9869_v8  ;;  %v7964_v44 = vadd.f32 %v14493_v38, %v14651_v34 }
 0x94e   : > { %v9055_v50 = vmul.f32 %v8756_v20, %v14926_v35  ;;  %v8760_v52 = vsub.f32 1.0, %v8759_v26  ;;  %v8382_v57 = vmul.f32 %v14957_v11, %v8346_v18  ;;  %vm8765_vm15 = vmor %vm8763_vm14, %vm8764_vm13 }
 0x950   : > { %v9121_v30 = vadd.f32 %v9089_v27, %v9055_v50  ;;  %v8761_v22 = vmul.f32 %v9869_v8, %v8760_v52  ;;  %v7875_v43 = vpop.f32.mrf.mxu2  ;;  %v14980_v1 = vadd.f32 %v14963_v3, %v8382_v57  ;;  %v10118_v27 = vld [vmem:[#allocation3 + $0x180] sm:$0xff] }
 0x951   : > { %v7717_v35 = vpop.f32.mrf.mxu1  ;;  %v8259_v39 = vrot.slane %v7875_v43, 2 }
 0x952   : > { %v9871_v12 = vpop.eup %9870  ;;  %9154 = vst.msk [vmem:[%s14783_s10 + $0x60] sm:$0xff] %vm489_vm0, %v9121_v30  ;;  %v8762_v62 = vadd.f32 %v9869_v8, %v8761_v22  ;;  %v9485_v42 = vmul.f32 -1.442695, %v14980_v1  ;;  %v8068_v55 = vrot.slane %v7717_v35, 1 }
 0x953   : > { %v8545_v36 = vadd.f32 1.0, %v9871_v12 }
 0x954   : > { %v8766_v63 = vsel %vm8765_vm15, %v9869_v8, %v8762_v62  ;;  %7764 = vmatmul.f32.gmra.mxu1 %v10117_v9  ;;  %v8069_v10 = vsel %vm1272_vm1, %v8067_v58, %v8068_v55 }
 0x955   : > { %v8771_v7 = vsel %vm8768_vm3, %v8770_v56, %v8766_v63  ;;  %9872 = vrcp.f32 %v8545_v36  ;;  %7925 = vmatmul.f32.gmra.mxu2 %v10117_v9  ;;  %v8155_v8 = vadd.f32 %v8069_v10, %v7963_v4  ;;  %v8784_v18 = vand.u32 2147483648, %v8545_v36  ;;  %v9091_v63 = vld [vmem:[%s10391_s23 + $0x70] sm:$0xff] }
 0x956   : > { %v9056_v33 = vmul.f32 %v8771_v7, %v14935_v45  ;;  %9874 = vpow2.f32 %v9485_v42  ;;  %v8782_v13 = vand.u32 2147483647, %v8545_v36  ;;  %vm8778_vm5 = vweird.f32 %v8545_v36  ;;  %v10119_v7 = vld [vmem:[#allocation3 + $0x188] sm:$0xff] }
 0x957   : > { %v8785_v35 = vor.u32 1.1754944e-38, %v8784_v18 }
 0x958   : > { %v9122_v49 = vadd.f32 %v9090_v40, %v9056_v33  ;;  %v7878_v5 = vpop.f32.mrf.mxu2  ;;  %vm8783_vm7 = vcmp.eq.f32.partialorder %v8782_v13, 8.507059e+37 }
 0x959   : > { %v8260_v61 = vrot.slane %v7878_v5, 2  ;;  %v7720_v6 = vpop.f32.mrf.mxu1 }
 0x95a   : > { %9155 = vst.msk [vmem:[%s14783_s10 + $0x68] sm:$0xff] %vm489_vm0, %v9122_v49  ;;  %v8070_v28 = vrot.slane %v7720_v6, 1 }
 0x95b   : > { %v9873_v29 = vpop.eup %9872  ;;  %v8261_v15 = vsel %vm1525_vm2, %v8259_v39, %v8260_v61 }
 0x95c   : > { %v9875_v23 = vpop.eup %9874  ;;  %v8774_v45 = vmul.f32 %v9873_v29, %v8545_v36  ;;  %v8347_v26 = vadd.f32 %v8261_v15, %v8155_v8  ;;  %7767 = vmatmul.f32.gmra.mxu1 %v10118_v27  ;;  %v8071_v50 = vsel %vm1272_vm1, %v8068_v55, %v8070_v28  ;;  %vm8779_vm4 = vweird.f32 %v9873_v29 }
 0x95d   : > { %v14994_v20 = vadd.f32 1.0, %v9875_v23  ;;  %7928 = vmatmul.f32.gmra.mxu2 %v10118_v27  ;;  %v8156_v12 = vadd.f32 %v8071_v50, %v7964_v44  ;;  %vm8780_vm6 = vmor %vm8778_vm5, %vm8779_vm4 }
 0x95e   : > { %v8775_v0 = vsub.f32 1.0, %v8774_v45  ;;  %v8383_v59 = vmul.f32 %v14957_v11, %v8347_v26  ;;  %v10120_v45 = vld [vmem:[#allocation3 + $0x190] sm:$0xff] }
 0x95f   : > { %9876 = vrcp.f32 %v14994_v20  ;;  %v8799_v4 = vand.u32 2147483648, %v14994_v20  ;;  %vm8793_vm9 = vweird.f32 %v14994_v20 }
 0x960   : > { %v8776_v52 = vmul.f32 %v9873_v29, %v8775_v0  ;;  %v15002_v57 = vadd.f32 %v14963_v3, %v8383_v59  ;;  %v7881_v30 = vpop.f32.mrf.mxu2  ;;  %v9092_v0 = vld [vmem:[%s10391_s23 + $0x78] sm:$0xff] }
 0x961   : > { %v8262_v22 = vrot.slane %v7881_v30, 2  ;;  %v7723_v62 = vpop.f32.mrf.mxu1  ;;  %v8800_v28 = vor.u32 1.1754944e-38, %v8799_v4 }
 0x962   : > { %v8777_v2 = vadd.f32 %v9873_v29, %v8776_v52  ;;  %v9486_v43 = vmul.f32 -1.442695, %v15002_v57  ;;  %v8072_v23 = vrot.slane %v7723_v62, 1 }
 0x963   : > { %v8263_v38 = vsel %vm1525_vm2, %v8260_v61, %v8262_v22  ;;  %v8797_v61 = vand.u32 2147483647, %v14994_v20 }
 0x964   : > { %v8781_v34 = vsel %vm8780_vm6, %v9873_v29, %v8777_v2  ;;  %9878 = vpow2.f32 %v9486_v43  ;;  %v8348_v56 = vadd.f32 %v8263_v38, %v8156_v12  ;;  %7770 = vmatmul.f32.gmra.mxu1 %v10119_v7 }
 0x965   : > { %v9877_v42 = vpop.eup %9876  ;;  %v8786_v55 = vsel %vm8783_vm7, %v8785_v35, %v8781_v34  ;;  %7931 = vmatmul.f32.gmra.mxu2 %v10119_v7  ;;  %vm8798_vm11 = vcmp.eq.f32.partialorder %v8797_v61, 8.507059e+37 }
 0x966   : > { %v9057_v36 = vmul.f32 %v8786_v55, %v14966_v16  ;;  %v8789_v40 = vmul.f32 %v9877_v42, %v14994_v20  ;;  %v8384_v58 = vmul.f32 %v14957_v11, %v8348_v56  ;;  %vm8794_vm8 = vweird.f32 %v9877_v42 }
 0x967   : > { %vm8795_vm10 = vmor %vm8793_vm9, %vm8794_vm8  ;;  %v7965_v20 = vadd.f32 %v14513_v46, %v14659_v17 }
 0x968   : > { %v9123_v9 = vadd.f32 %v9091_v63, %v9057_v36  ;;  %v8790_v33 = vsub.f32 1.0, %v8789_v40  ;;  %v15011_v10 = vadd.f32 %v14963_v3, %v8384_v58  ;;  %v7884_v49 = vpop.f32.mrf.mxu2  ;;  %v7966_v40 = vadd.f32 %v14523_v60, %v14667_v48  ;;  %v9093_v60 = vld [vmem:[%s10391_s23 + $0x80] sm:$0xff] }
 0x969   : > { %v7726_v8 = vpop.f32.mrf.mxu1  ;;  %v8264_v50 = vrot.slane %v7884_v49, 2 }
 0x96a   : > { %v9879_v5 = vpop.eup %9878  ;;  %9156 = vst.msk [vmem:[%s14783_s10 + $0x70] sm:$0xff] %vm489_vm0, %v9123_v9  ;;  %v8791_v39 = vmul.f32 %v9877_v42, %v8790_v33  ;;  %v9487_v16 = vmul.f32 -1.442695, %v15011_v10  ;;  %v8073_v29 = vrot.slane %v7726_v8, 1 }
 0x96b   : > { %v8547_v6 = vadd.f32 1.0, %v9879_v5 }
 0x96c   : > { %v8792_v15 = vadd.f32 %v9877_v42, %v8791_v39  ;;  %9880 = vpow2.f32 %v9487_v16  ;;  %7773 = vmatmul.f32.gmra.mxu1 %v10120_v45  ;;  %v8074_v59 = vsel %vm1272_vm1, %v8072_v23, %v8073_v29 }
 0x96d   : > { %9882 = vrcp.f32 %v8547_v6  ;;  %7934 = vmatmul.f32.gmra.mxu2 %v10120_v45  ;;  %v8157_v22 = vadd.f32 %v8074_v59, %v7965_v20  ;;  %v8812_v56 = vand.u32 2147483647, %v8547_v6  ;;  %vm8808_vm13 = vweird.f32 %v8547_v6 }
 0x96e   : > { %v8796_v26 = vsel %vm8795_vm10, %v9877_v42, %v8792_v15  ;;  %v8814_v42 = vand.u32 2147483648, %v8547_v6 }
 0x96f   : > { %v8801_v27 = vsel %vm8798_vm11, %v8800_v28, %v8796_v26  ;;  %vm8813_vm15 = vcmp.eq.f32.partialorder %v8812_v56, 8.507059e+37 }
 0x970   : > { %v9058_v18 = vmul.f32 %v8801_v27, %v14980_v1  ;;  %v7887_v44 = vpop.f32.mrf.mxu2  ;;  %v10121_v1 = vld [vmem:[#allocation2] sm:$0xff]  ;;  %v8815_v5 = vor.u32 1.1754944e-38, %v8814_v42 }
 0x971   : > { %v8265_v52 = vrot.slane %v7887_v44, 2  ;;  %v7729_v2 = vpop.f32.mrf.mxu1 }
 0x972   : > { %v9881_v13 = vpop.eup %9880  ;;  %v9124_v30 = vadd.f32 %v9092_v0, %v9058_v18  ;;  %v8075_v34 = vrot.slane %v7729_v2, 1  ;;  %v9094_v2 = vld [vmem:[%s10391_s23 + $0x88] sm:$0xff] }
 0x973   : > { %v9883_v43 = vpop.eup %9882  ;;  %v8548_v12 = vadd.f32 1.0, %v9881_v13  ;;  %v8266_v62 = vsel %vm1525_vm2, %v8264_v50, %v8265_v52 }
 0x974   : > { %9157 = vst.msk [vmem:[%s14783_s10 + $0x78] sm:$0xff] %vm489_vm0, %v9124_v30  ;;  %v8804_v35 = vmul.f32 %v9883_v43, %v8547_v6  ;;  %v8349_v38 = vadd.f32 %v8266_v62, %v8157_v22  ;;  %7776 = vmatmul.f32.gmra.mxu1 %v10121_v1  ;;  %vm8809_vm12 = vweird.f32 %v9883_v43  ;;  %v8076_v7 = vsel %vm1272_vm1, %v8073_v29, %v8075_v34 }
 0x975   : > { %9884 = vrcp.f32 %v8548_v12  ;;  %7937 = vmatmul.f32.gmra.mxu2 %v10121_v1  ;;  %vm8810_vm14 = vmor %vm8808_vm13, %vm8809_vm12  ;;  %v8158_v39 = vadd.f32 %v8076_v7, %v7966_v40  ;;  %v8829_v28 = vand.u32 2147483648, %v8548_v12  ;;  %v8827_v27 = vand.u32 2147483647, %v8548_v12 }
 0x976   : > { %v8805_v46 = vsub.f32 1.0, %v8804_v35  ;;  %v8385_v17 = vmul.f32 %v14957_v11, %v8349_v38  ;;  %vm8823_vm4 = vweird.f32 %v8548_v12  ;;  %v7967_v38 = vadd.f32 %v14545_v41, %v14676_v53 }
 0x977   : > { %vm8828_vm6 = vcmp.eq.f32.partialorder %v8827_v27, 8.507059e+37  ;;  %v7968_v41 = vadd.f32 %v14552_v54, %v14682_v19 }
 0x978   : > { %v8806_v55 = vmul.f32 %v9883_v43, %v8805_v46  ;;  %v15029_v63 = vadd.f32 %v14963_v3, %v8385_v17  ;;  %v7890_v36 = vpop.f32.mrf.mxu2 }
 0x979   : > { %v8267_v58 = vrot.slane %v7890_v36, 2  ;;  %v7732_v49 = vpop.f32.mrf.mxu1 }
 0x97a   : > { %v8807_v9 = vadd.f32 %v9883_v43, %v8806_v55  ;;  %v9488_v33 = vmul.f32 -1.442695, %v15029_v63 }
 0x97b   : > { %v9885_v4 = vpop.eup %9884  ;;  %v8268_v61 = vsel %vm1525_vm2, %v8265_v52, %v8267_v58 }
 0x97c   : > { %v8811_v16 = vsel %vm8810_vm14, %v9883_v43, %v8807_v9  ;;  %v8819_v8 = vmul.f32 %v9885_v4, %v8548_v12  ;;  %9886 = vpow2.f32 %v9488_v33  ;;  %v8350_v48 = vadd.f32 %v8268_v61, %v8158_v39  ;;  %7779 = vmatmul.f32.gmra.mxu1 %v10121_v1 }
 0x97d   : > { %v8816_v29 = vsel %vm8813_vm15, %v8815_v5, %v8811_v16  ;;  %7940 = vmatmul.f32.gmra.mxu2 %v10121_v1  ;;  %vm8824_vm3 = vweird.f32 %v9885_v4  ;;  %v8077_v43 = vrot.slane %v7732_v49, 1 }
 0x97e   : > { %v9059_v6 = vmul.f32 %v8816_v29, %v15002_v57  ;;  %v8820_v15 = vsub.f32 1.0, %v8819_v8  ;;  %v8386_v23 = vmul.f32 %v14957_v11, %v8350_v48  ;;  %vm8825_vm5 = vmor %vm8823_vm4, %vm8824_vm3  ;;  %v8830_v57 = vor.u32 1.1754944e-38, %v8829_v28 }
 0x980   : > { %v9125_v45 = vadd.f32 %v9093_v60, %v9059_v6  ;;  %v8821_v26 = vmul.f32 %v9885_v4, %v8820_v15  ;;  %v7893_v0 = vpop.f32.mrf.mxu2  ;;  %v15040_v59 = vadd.f32 %v14963_v3, %v8386_v23 }
 0x981   : > { %v7735_v44 = vpop.f32.mrf.mxu1  ;;  %v8269_v46 = vrot.slane %v7893_v0, 2 }
 0x982   : > { %v9887_v18 = vpop.eup %9886  ;;  %9158 = vst.msk [vmem:[%s14783_s10 + $0x80] sm:$0xff] %vm489_vm0, %v9125_v45  ;;  %v8822_v20 = vadd.f32 %v9885_v4, %v8821_v26  ;;  %v9489_v52 = vmul.f32 -1.442695, %v15040_v59  ;;  %v8078_v13 = vrot.slane %v7735_v44, 1  ;;  %v9095_v45 = vld [vmem:[%s10391_s23 + $0x90] sm:$0xff] }
 0x983   : > { %v8549_v50 = vadd.f32 1.0, %v9887_v18 }
 0x984   : > { %v8826_v30 = vsel %vm8825_vm5, %v9885_v4, %v8822_v20  ;;  %7782 = vmatmul.f32.gmra.mxu1 %v10121_v1  ;;  %v8079_v12 = vsel %vm1272_vm1, %v8077_v43, %v8078_v13 }
 0x985   : > { %v8831_v22 = vsel %vm8828_vm6, %v8830_v57, %v8826_v30  ;;  %9888 = vrcp.f32 %v8549_v50  ;;  %7943 = vmatmul.f32.gmra.mxu2 %v10121_v1  ;;  %v8159_v56 = vadd.f32 %v8079_v12, %v7967_v38  ;;  %v8844_v49 = vand.u32 2147483648, %v8549_v50 }
 0x986   : > { %v9060_v62 = vmul.f32 %v8831_v22, %v15011_v10  ;;  %9890 = vpow2.f32 %v9489_v52  ;;  %v8842_v5 = vand.u32 2147483647, %v8549_v50  ;;  %vm8838_vm8 = vweird.f32 %v8549_v50 }
 0x987   : > { %v8845_v6 = vor.u32 1.1754944e-38, %v8844_v49 }
 0x988   : > { %v9126_v35 = vadd.f32 %v9094_v2, %v9060_v62  ;;  %v7896_v34 = vpop.f32.mrf.mxu2  ;;  %vm8843_vm10 = vcmp.eq.f32.partialorder %v8842_v5, 8.507059e+37 }
 0x989   : > { %v8270_v17 = vrot.slane %v7896_v34, 2  ;;  %v7738_v42 = vpop.f32.mrf.mxu1 }
 0x98a   : > { %9159 = vst.msk [vmem:[%s14783_s10 + $0x88] sm:$0xff] %vm489_vm0, %v9126_v35  ;;  %v8080_v1 = vrot.slane %v7738_v42, 1  ;;  %v7969_v42 = vadd.f32 %v14568_v31, %v14688_v14 }
 0x98b   : > { %v9889_v55 = vpop.eup %9888  ;;  %v8271_v7 = vsel %vm1525_vm2, %v8269_v46, %v8270_v17  ;;  %v9096_v46 = vld [vmem:[%s10391_s23 + $0x98] sm:$0xff] }
 0x98c   : > { %v9891_v36 = vpop.eup %9890  ;;  %v8834_v10 = vmul.f32 %v9889_v55, %v8549_v50  ;;  %v8351_v40 = vadd.f32 %v8271_v7, %v8159_v56  ;;  %v8081_v53 = vsel %vm1272_vm1, %v8078_v13, %v8080_v1  ;;  %vm8839_vm7 = vweird.f32 %v9889_v55 }
 0x98d   : > { %v8550_v58 = vadd.f32 1.0, %v9891_v36  ;;  %v8160_v60 = vadd.f32 %v8081_v53, %v7968_v41  ;;  %vm8840_vm9 = vmor %vm8838_vm8, %vm8839_vm7 }
 0x98e   : > { %v8835_v9 = vsub.f32 1.0, %v8834_v10  ;;  %v8387_v33 = vmul.f32 %v14957_v11, %v8351_v40 }
 0x98f   : > { %9892 = vrcp.f32 %v8550_v58  ;;  %v8859_v50 = vand.u32 2147483648, %v8550_v58  ;;  %v8857_v30 = vand.u32 2147483647, %v8550_v58  ;;  %vm8853_vm12 = vweird.f32 %v8550_v58 }
 0x990   : > { %v8836_v4 = vmul.f32 %v9889_v55, %v8835_v9  ;;  %v15058_v39 = vadd.f32 %v14963_v3, %v8387_v33  ;;  %v7899_v61 = vpop.f32.mrf.mxu2 }
 0x991   : > { %v8272_v16 = vrot.slane %v7899_v61, 2  ;;  %v7741_v48 = vpop.f32.mrf.mxu1  ;;  %v8860_v12 = vor.u32 1.1754944e-38, %v8859_v50  ;;  %vm8858_vm14 = vcmp.eq.f32.partialorder %v8857_v30, 8.507059e+37 }
 0x992   : > { %v8837_v8 = vadd.f32 %v9889_v55, %v8836_v4  ;;  %v9490_v29 = vmul.f32 -1.442695, %v15058_v39  ;;  %v8082_v35 = vrot.slane %v7741_v48, 1 }
 0x993   : > { %v8273_v54 = vsel %vm1525_vm2, %v8270_v17, %v8272_v16 }
 0x994   : > { %v8841_v19 = vsel %vm8840_vm9, %v9889_v55, %v8837_v8  ;;  %9894 = vpow2.f32 %v9490_v29  ;;  %v8352_v15 = vadd.f32 %v8273_v54, %v8160_v60  ;;  %v7970_v60 = vadd.f32 %v14575_v25, %v14693_v37  ;;  %v9097_v25 = vld [vmem:[%s10391_s23 + $0xa0] sm:$0xff] }
 0x995   : > { %v9893_v28 = vpop.eup %9892  ;;  %v8846_v23 = vsel %vm8843_vm10, %v8845_v6, %v8841_v19 }
 0x996   : > { %v9061_v26 = vmul.f32 %v8846_v23, %v15029_v63  ;;  %v8849_v27 = vmul.f32 %v9893_v28, %v8550_v58  ;;  %v8388_v0 = vmul.f32 %v14957_v11, %v8352_v15  ;;  %vm8854_vm11 = vweird.f32 %v9893_v28 }
 0x997   : > { %vm8855_vm13 = vmor %vm8853_vm12, %vm8854_vm11 }
 0x998   : > { %v9127_v18 = vadd.f32 %v9095_v45, %v9061_v26  ;;  %v8850_v20 = vsub.f32 1.0, %v8849_v27  ;;  %v15066_v44 = vadd.f32 %v14963_v3, %v8388_v0  ;;  %v7902_v57 = vpop.f32.mrf.mxu2 }
 0x999   : > { %v7744_v63 = vpop.f32.mrf.mxu1  ;;  %v8274_v7 = vrot.slane %v7902_v57, 2 }
 0x99a   : > { %v9895_v52 = vpop.eup %9894  ;;  %9160 = vst.msk [vmem:[%s14783_s10 + $0x90] sm:$0xff] %vm489_vm0, %v9127_v18  ;;  %v8851_v13 = vmul.f32 %v9893_v28, %v8850_v20  ;;  %v9491_v22 = vmul.f32 -1.442695, %v15066_v44  ;;  %v8083_v43 = vrot.slane %v7744_v63, 1 }
 0x99b   : > { %v8551_v2 = vadd.f32 1.0, %v9895_v52 }
 0x99c   : > { %v8852_v62 = vadd.f32 %v9893_v28, %v8851_v13  ;;  %9896 = vpow2.f32 %v9491_v22  ;;  %v8084_v17 = vsel %vm1272_vm1, %v8082_v35, %v8083_v43 }
 0x99d   : > { %9898 = vrcp.f32 %v8551_v2  ;;  %v8161_v40 = vadd.f32 %v8084_v17, %v7969_v42  ;;  %v8872_v14 = vand.u32 2147483647, %v8551_v2  ;;  %v8874_v5 = vand.u32 2147483648, %v8551_v2  ;;  %v9098_v17 = vld [vmem:[%s10391_s23 + $0xa8] sm:$0xff] }
 0x99e   : > { %v8856_v38 = vsel %vm8855_vm13, %v9893_v28, %v8852_v62  ;;  %vm8868_vm3 = vweird.f32 %v8551_v2 }
 0x99f   : > { %v8861_v34 = vsel %vm8858_vm14, %v8860_v12, %v8856_v38  ;;  %v8875_v28 = vor.u32 1.1754944e-38, %v8874_v5  ;;  %vm8873_vm5 = vcmp.eq.f32.partialorder %v8872_v14, 8.507059e+37 }
 0x9a0   : > { %v9062_v56 = vmul.f32 %v8861_v34, %v15040_v59  ;;  %v7905_v55 = vpop.f32.mrf.mxu2 }
 0x9a1   : > { %v8275_v1 = vrot.slane %v7905_v55, 2  ;;  %v7747_v58 = vpop.f32.mrf.mxu1 }
 0x9a2   : > { %v9897_v36 = vpop.eup %9896  ;;  %v9128_v10 = vadd.f32 %v9096_v46, %v9062_v56  ;;  %v8085_v4 = vrot.slane %v7747_v58, 1 }
 0x9a3   : > { %v9899_v9 = vpop.eup %9898  ;;  %v8552_v33 = vadd.f32 1.0, %v9897_v36  ;;  %v8276_v49 = vsel %vm1525_vm2, %v8274_v7, %v8275_v1 }
 0x9a4   : > { %9161 = vst.msk [vmem:[%s14783_s10 + $0x98] sm:$0xff] %vm489_vm0, %v9128_v10  ;;  %v8864_v41 = vmul.f32 %v9899_v9, %v8551_v2  ;;  %v8353_v53 = vadd.f32 %v8276_v49, %v8161_v40  ;;  %vm8869_vm15 = vweird.f32 %v9899_v9  ;;  %v8086_v8 = vsel %vm1272_vm1, %v8083_v43, %v8085_v4 }
 0x9a5   : > { %9900 = vrcp.f32 %v8552_v33  ;;  %vm8870_vm4 = vmor %vm8868_vm3, %vm8869_vm15  ;;  %v8162_v23 = vadd.f32 %v8086_v8, %v7970_v60  ;;  %v8889_v57 = vand.u32 2147483648, %v8552_v33  ;;  %v8887_v30 = vand.u32 2147483647, %v8552_v33 }
 0x9a6   : > { %v8865_v59 = vsub.f32 1.0, %v8864_v41  ;;  %v8389_v31 = vmul.f32 %v14957_v11, %v8353_v53  ;;  %vm8883_vm7 = vweird.f32 %v8552_v33 }
 0x9a7   : > { %vm8888_vm9 = vcmp.eq.f32.partialorder %v8887_v30, 8.507059e+37 }
 0x9a8   : > { %v8866_v61 = vmul.f32 %v9899_v9, %v8865_v59  ;;  %v15081_v16 = vadd.f32 %v14963_v3, %v8389_v31  ;;  %v7908_v29 = vpop.f32.mrf.mxu2 }
 0x9a9   : > { %v8277_v48 = vrot.slane %v7908_v29, 2  ;;  %v7750_v19 = vpop.f32.mrf.mxu1 }
 0x9aa   : > { %v8867_v6 = vadd.f32 %v9899_v9, %v8866_v61  ;;  %v9492_v54 = vmul.f32 -1.442695, %v15081_v16  ;;  %v8087_v56 = vrot.slane %v7750_v19, 1 }
 0x9ab   : > { %v9901_v15 = vpop.eup %9900  ;;  %v8278_v45 = vsel %vm1525_vm2, %v8275_v1, %v8277_v48  ;;  %v7971_v1 = vadd.f32 %v14591_v47, %v14698_v32  ;;  %v7972_v47 = vadd.f32 %v14598_v51, %v14703_v21 }
 0x9ac   : > { %v8871_v26 = vsel %vm8870_vm4, %v9899_v9, %v8867_v6  ;;  %v8879_v27 = vmul.f32 %v9901_v15, %v8552_v33  ;;  %9902 = vpow2.f32 %v9492_v54  ;;  %v8354_v37 = vadd.f32 %v8278_v45, %v8162_v23 }
 0x9ad   : > { %v8876_v0 = vsel %vm8873_vm5, %v8875_v28, %v8871_v26  ;;  %vm8884_vm6 = vweird.f32 %v9901_v15 }
 0x9ae   : > { %v9063_v18 = vmul.f32 %v8876_v0, %v15058_v39  ;;  %v8880_v20 = vsub.f32 1.0, %v8879_v27  ;;  %v8390_v50 = vmul.f32 %v14957_v11, %v8354_v37  ;;  %vm8885_vm8 = vmor %vm8883_vm7, %vm8884_vm6  ;;  %v8890_v39 = vor.u32 1.1754944e-38, %v8889_v57  ;;  %v9099_v27 = vld [vmem:[%s10391_s23 + $0xb0] sm:$0xff] }
 0x9b0   : > { %v9129_v52 = vadd.f32 %v9097_v25, %v9063_v18  ;;  %v8881_v13 = vmul.f32 %v9901_v15, %v8880_v20  ;;  %v7911_v22 = vpop.f32.mrf.mxu2  ;;  %v15092_v63 = vadd.f32 %v14963_v3, %v8390_v50 }
 0x9b1   : > { %v7753_v62 = vpop.f32.mrf.mxu1  ;;  %v8279_v10 = vrot.slane %v7911_v22, 2 }
 0x9b2   : > { %v9903_v2 = vpop.eup %9902  ;;  %9162 = vst.msk [vmem:[%s14783_s10 + $0xa0] sm:$0xff] %vm489_vm0, %v9129_v52  ;;  %v8882_v43 = vadd.f32 %v9901_v15, %v8881_v13  ;;  %v9493_v35 = vmul.f32 -1.442695, %v15092_v63  ;;  %v8088_v38 = vrot.slane %v7753_v62, 1 }
 0x9b3   : > { %v8553_v12 = vadd.f32 1.0, %v9903_v2 }
 0x9b4   : > { %v8886_v34 = vsel %vm8885_vm8, %v9901_v15, %v8882_v43  ;;  %v8089_v55 = vsel %vm1272_vm1, %v8087_v56, %v8088_v38 }
 0x9b5   : > { %v8891_v46 = vsel %vm8888_vm9, %v8890_v39, %v8886_v34  ;;  %9904 = vrcp.f32 %v8553_v12  ;;  %v8163_v58 = vadd.f32 %v8089_v55, %v7971_v1  ;;  %v8904_v5 = vand.u32 2147483648, %v8553_v12 }
 0x9b6   : > { %v9064_v42 = vmul.f32 %v8891_v46, %v15066_v44  ;;  %9906 = vpow2.f32 %v9493_v35  ;;  %v8902_v8 = vand.u32 2147483647, %v8553_v12  ;;  %vm8898_vm11 = vweird.f32 %v8553_v12  ;;  %v9100_v46 = vld [vmem:[%s10391_s23 + $0xb8] sm:$0xff] }
 0x9b7   : > { %v8905_v28 = vor.u32 1.1754944e-38, %v8904_v5 }
 0x9b8   : > { %v9130_v7 = vadd.f32 %v9098_v17, %v9064_v42  ;;  %v7914_v36 = vpop.f32.mrf.mxu2  ;;  %vm8903_vm13 = vcmp.eq.f32.partialorder %v8902_v8, 8.507059e+37  ;;  %v15883_v42 = vld [vmem:[#allocation16_spill] sm:$0xff]  ;;  %v15885_v8 = vld [vmem:[#allocation54_spill] sm:$0xff] }
 0x9b9   : > { %v8280_v40 = vrot.slane %v7914_v36, 2  ;;  %v7756_v9 = vpop.f32.mrf.mxu1  ;;  %v7973_v55 = vadd.f32 %v15883_v42, %v14708_v24  ;;  %v15887_v42 = vld [vmem:[#allocation31_spill] sm:$0xff] }
 0x9ba   : > { %9163 = vst.msk [vmem:[%s14783_s10 + $0xa8] sm:$0xff] %vm489_vm0, %v9130_v7  ;;  %v8090_v41 = vrot.slane %v7756_v9, 1 }
 0x9bb   : > { %v9905_v33 = vpop.eup %9904  ;;  %v8281_v49 = vsel %vm1525_vm2, %v8279_v10, %v8280_v40 }
 0x9bc   : > { %v9907_v53 = vpop.eup %9906  ;;  %v8894_v44 = vmul.f32 %v9905_v33, %v8553_v12  ;;  %v8355_v4 = vadd.f32 %v8281_v49, %v8163_v58  ;;  %v8091_v32 = vsel %vm1272_vm1, %v8088_v38, %v8090_v41  ;;  %vm8899_vm10 = vweird.f32 %v9905_v33 }
 0x9bd   : > { %v8554_v59 = vadd.f32 1.0, %v9907_v53  ;;  %v8164_v19 = vadd.f32 %v8091_v32, %v7972_v47  ;;  %vm8900_vm12 = vmor %vm8898_vm11, %vm8899_vm10 }
 0x9be   : > { %v8895_v31 = vsub.f32 1.0, %v8894_v44  ;;  %v8391_v14 = vmul.f32 %v14957_v11, %v8355_v4 }
 0x9bf   : > { %9908 = vrcp.f32 %v8554_v59  ;;  %v8919_v52 = vand.u32 2147483648, %v8554_v59  ;;  %v8917_v22 = vand.u32 2147483647, %v8554_v59  ;;  %vm8913_vm15 = vweird.f32 %v8554_v59 }
 0x9c0   : > { %v8896_v61 = vmul.f32 %v9905_v33, %v8895_v31  ;;  %v15110_v29 = vadd.f32 %v14963_v3, %v8391_v14  ;;  %v7917_v60 = vpop.f32.mrf.mxu2 }
 0x9c1   : > { %v8282_v48 = vrot.slane %v7917_v60, 2  ;;  %v7759_v15 = vpop.f32.mrf.mxu1  ;;  %v8920_v12 = vor.u32 1.1754944e-38, %v8919_v52  ;;  %vm8918_vm4 = vcmp.eq.f32.partialorder %v8917_v22, 8.507059e+37 }
 0x9c2   : > { %v8897_v6 = vadd.f32 %v9905_v33, %v8896_v61  ;;  %v9494_v54 = vmul.f32 -1.442695, %v15110_v29  ;;  %v8092_v35 = vrot.slane %v7759_v15, 1  ;;  %v15884_v61 = vld [vmem:[#allocation37_spill] sm:$0xff] }
 0x9c3   : > { %v8283_v51 = vsel %vm1525_vm2, %v8280_v40, %v8282_v48  ;;  %v7974_v60 = vadd.f32 %v15885_v8, %v15884_v61  ;;  %v15169_v8 = vld [vmem:[%s15232_s6] ss:$0 sm:$0xff] }
 0x9c4   : > { %v8901_v21 = vsel %vm8900_vm12, %v9905_v33, %v8897_v6  ;;  %9910 = vpow2.f32 %v9494_v54  ;;  %v8356_v23 = vadd.f32 %v8283_v51, %v8164_v19 }
 0x9c5   : > { %v9909_v45 = vpop.eup %9908  ;;  %v8906_v26 = vsel %vm8903_vm13, %v8905_v28, %v8901_v21 }
 0x9c6   : > { %v9065_v0 = vmul.f32 %v8906_v26, %v15081_v16  ;;  %v8909_v25 = vmul.f32 %v9909_v45, %v8554_v59  ;;  %v8392_v37 = vmul.f32 %v14957_v11, %v8356_v23  ;;  %vm8914_vm14 = vweird.f32 %v9909_v45 }
 0x9c7   : > { %vm8915_vm3 = vmor %vm8913_vm15, %vm8914_vm14 }
 0x9c8   : > { %v9131_v18 = vadd.f32 %v9099_v27, %v9065_v0  ;;  %v8910_v20 = vsub.f32 1.0, %v8909_v25  ;;  %v15118_v57 = vadd.f32 %v14963_v3, %v8392_v37  ;;  %v7920_v50 = vpop.f32.mrf.mxu2  ;;  %v9101_v27 = vld [vmem:[%s10391_s23 + $0xc0] sm:$0xff] }
 0x9c9   : > { %v7762_v16 = vpop.f32.mrf.mxu1  ;;  %v8284_v1 = vrot.slane %v7920_v50, 2 }
 0x9ca   : > { %v9911_v13 = vpop.eup %9910  ;;  %9164 = vst.msk [vmem:[%s14783_s10 + $0xb0] sm:$0xff] %vm489_vm0, %v9131_v18  ;;  %v8911_v30 = vmul.f32 %v9909_v45, %v8910_v20  ;;  %v9495_v2 = vmul.f32 -1.442695, %v15118_v57  ;;  %v8093_v62 = vrot.slane %v7762_v16, 1 }
 0x9cb   : > { %v8555_v43 = vadd.f32 1.0, %v9911_v13 }
 0x9cc   : > { %v8912_v39 = vadd.f32 %v9909_v45, %v8911_v30  ;;  %9912 = vpow2.f32 %v9495_v2  ;;  %v8094_v17 = vsel %vm1272_vm1, %v8092_v35, %v8093_v62 }
 0x9cd   : > { %9914 = vrcp.f32 %v8555_v43  ;;  %v8165_v58 = vadd.f32 %v8094_v17, %v7973_v55  ;;  %v8932_v59 = vand.u32 2147483647, %v8555_v43  ;;  %v8934_v31 = vand.u32 2147483648, %v8555_v43 }
 0x9ce   : > { %v8916_v38 = vsel %vm8915_vm3, %v9909_v45, %v8912_v39  ;;  %vm8928_vm6 = vweird.f32 %v8555_v43 }
 0x9cf   : > { %v8921_v34 = vsel %vm8918_vm4, %v8920_v12, %v8916_v38  ;;  %v8935_v28 = vor.u32 1.1754944e-38, %v8934_v31  ;;  %vm8933_vm8 = vcmp.eq.f32.partialorder %v8932_v59, 8.507059e+37  ;;  %v9102_v38 = vld [vmem:[%s10391_s23 + $0xc8] sm:$0xff]  ;;  %v15888_v59 = vld [vmem:[#allocation86_spill] sm:$0xff] }
 0x9d0   : > { %v9066_v56 = vmul.f32 %v8921_v34, %v15092_v63  ;;  %v7923_v7 = vpop.f32.mrf.mxu2  ;;  %v15889_v31 = vld [vmem:[#allocation38_spill] sm:$0xff] }
 0x9d1   : > { %v8285_v36 = vrot.slane %v7923_v7, 2  ;;  %v7765_v9 = vpop.f32.mrf.mxu1 }
 0x9d2   : > { %v9913_v10 = vpop.eup %9912  ;;  %v9132_v40 = vadd.f32 %v9100_v46, %v9066_v56  ;;  %v8095_v4 = vrot.slane %v7765_v9, 1  ;;  %v15886_v56 = vld [vmem:[#allocation102_spill] sm:$0xff] }
 0x9d3   : > { %v9915_v33 = vpop.eup %9914  ;;  %v8556_v49 = vadd.f32 1.0, %v9913_v10  ;;  %v8286_v41 = vsel %vm1525_vm2, %v8284_v1, %v8285_v36  ;;  %v7975_v55 = vadd.f32 %v15887_v42, %v15886_v56  ;;  %v15890_v56 = vld [vmem:[#allocation95_spill] sm:$0xff] }
 0x9d4   : > { %9165 = vst.msk [vmem:[%s14783_s10 + $0xb8] sm:$0xff] %vm489_vm0, %v9132_v40  ;;  %v8924_v53 = vmul.f32 %v9915_v33, %v8555_v43  ;;  %v8357_v44 = vadd.f32 %v8286_v41, %v8165_v58  ;;  %vm8929_vm5 = vweird.f32 %v9915_v33  ;;  %v8096_v47 = vsel %vm1272_vm1, %v8093_v62, %v8095_v4  ;;  %v15160_v4 = vld [vmem:[%s15231_s5] ss:$0 sm:$0xff] }
 0x9d5   : > { %9916 = vrcp.f32 %v8556_v49  ;;  %vm8930_vm7 = vmor %vm8928_vm6, %vm8929_vm5  ;;  %v8166_v51 = vadd.f32 %v8096_v47, %v7974_v60  ;;  %v8949_v18 = vand.u32 2147483648, %v8556_v49  ;;  %v8947_v13 = vand.u32 2147483647, %v8556_v49 }
 0x9d6   : > { %v8925_v63 = vsub.f32 1.0, %v8924_v53  ;;  %v8393_v24 = vmul.f32 %v14957_v11, %v8357_v44  ;;  %vm8943_vm10 = vweird.f32 %v8556_v49 }
 0x9d7   : > { %vm8948_vm12 = vcmp.eq.f32.partialorder %v8947_v13, 8.507059e+37 }
 0x9d8   : > { %v8926_v14 = vmul.f32 %v9915_v33, %v8925_v63  ;;  %v15133_v5 = vadd.f32 %v14963_v3, %v8393_v24  ;;  %v7926_v32 = vpop.f32.mrf.mxu2 }
 0x9d9   : > { %v8287_v48 = vrot.slane %v7926_v32, 2  ;;  %v7768_v19 = vpop.f32.mrf.mxu1 }
 0x9da   : > { %v8927_v6 = vadd.f32 %v9915_v33, %v8926_v14  ;;  %v9496_v54 = vmul.f32 -1.442695, %v15133_v5  ;;  %v7976_v14 = vadd.f32 %v15889_v31, %v15888_v59 }
 0x9db   : > { %v9917_v15 = vpop.eup %9916  ;;  %v8288_v21 = vsel %vm1525_vm2, %v8285_v36, %v8287_v48 }
 0x9dc   : > { %v8931_v23 = vsel %vm8930_vm7, %v9915_v33, %v8927_v6  ;;  %v8939_v45 = vmul.f32 %v9917_v15, %v8556_v49  ;;  %9918 = vpow2.f32 %v9496_v54  ;;  %v8358_v0 = vadd.f32 %v8288_v21, %v8166_v51 }
 0x9dd   : > { %v8936_v26 = vsel %vm8933_vm8, %v8935_v28, %v8931_v23  ;;  %vm8944_vm9 = vweird.f32 %v9917_v15 }
 0x9de   : > { %v9067_v25 = vmul.f32 %v8936_v26, %v15110_v29  ;;  %v8940_v37 = vsub.f32 1.0, %v8939_v45  ;;  %v8394_v20 = vmul.f32 %v14957_v11, %v8358_v0  ;;  %vm8945_vm11 = vmor %vm8943_vm10, %vm8944_vm9  ;;  %v8950_v29 = vor.u32 1.1754944e-38, %v8949_v18  ;;  %v9103_v0 = vld [vmem:[%s10391_s23 + $0xd0] sm:$0xff] }
 0x9e0   : > { %v9133_v50 = vadd.f32 %v9101_v27, %v9067_v25  ;;  %v8941_v52 = vmul.f32 %v9917_v15, %v8940_v37  ;;  %v7929_v30 = vpop.f32.mrf.mxu2  ;;  %v15144_v22 = vadd.f32 %v14963_v3, %v8394_v20  ;;  %v8097_v3 = vrot.slane %v7768_v19, 1 }
 0x9e1   : > { %v7771_v43 = vpop.f32.mrf.mxu1  ;;  %v8289_v1 = vrot.slane %v7929_v30, 2 }
 0x9e2   : > { %v9919_v2 = vpop.eup %9918  ;;  %9166 = vst.msk [vmem:[%s14783_s10 + $0xc0] sm:$0xff] %vm489_vm0, %v9133_v50  ;;  %v8942_v16 = vadd.f32 %v9917_v15, %v8941_v52  ;;  %v9497_v11 = vmul.f32 -1.442695, %v15144_v22  ;;  %v8098_v39 = vrot.slane %v7771_v43, 1 }
 0x9e3   : > { %v8557_v62 = vadd.f32 1.0, %v9919_v2 }
 0x9e4   : > { %v8946_v12 = vsel %vm8945_vm11, %v9917_v15, %v8942_v16  ;;  %v8099_v46 = vsel %vm1272_vm1, %v8097_v3, %v8098_v39 }
 0x9e5   : > { %v8951_v35 = vsel %vm8948_vm12, %v8950_v29, %v8946_v12  ;;  %9920 = vrcp.f32 %v8557_v62  ;;  %v8167_v10 = vadd.f32 %v8099_v46, %v7975_v55  ;;  %v8964_v24 = vand.u32 2147483648, %v8557_v62  ;;  %v7617_v12 = vpop.f32.mrf.mxu0  ;;  %v9104_v46 = vld [vmem:[%s10391_s23 + $0xd8] sm:$0xff] }
 0x9e6   : > { %v9068_v34 = vmul.f32 %v8951_v35, %v15118_v57  ;;  %9922 = vpow2.f32 %v9497_v11  ;;  %v8962_v61 = vand.u32 2147483647, %v8557_v62  ;;  %vm8958_vm14 = vweird.f32 %v8557_v62 }
 0x9e7   : > { %v8965_v51 = vor.u32 1.1754944e-38, %v8964_v24  ;;  %v7977_v42 = vadd.f32 %v7617_v12, %v15890_v56 }
 0x9e8   : > { %v9134_v17 = vadd.f32 %v9102_v38, %v9068_v34  ;;  %v7932_v7 = vpop.f32.mrf.mxu2  ;;  %vm8963_vm3 = vcmp.eq.f32.partialorder %v8962_v61, 8.507059e+37 }
 0x9e9   : > { %v8290_v36 = vrot.slane %v7932_v7, 2  ;;  %v7774_v40 = vpop.f32.mrf.mxu1 }
 0x9ea   : > { %9167 = vst.msk [vmem:[%s14783_s10 + $0xc8] sm:$0xff] %vm489_vm0, %v9134_v17  ;;  %v8100_v33 = vrot.slane %v7774_v40, 1 }
 0x9eb   : > { %v9921_v58 = vpop.eup %9920  ;;  %v8291_v9 = vsel %vm1525_vm2, %v8289_v1, %v8290_v36 }
 0x9ec   : > { %v9923_v49 = vpop.eup %9922  ;;  %v8954_v57 = vmul.f32 %v9921_v58, %v8557_v62  ;;  %v8359_v41 = vadd.f32 %v8291_v9, %v8167_v10  ;;  %v8101_v47 = vsel %vm1272_vm1, %v8098_v39, %v8100_v33  ;;  %vm8959_vm13 = vweird.f32 %v9921_v58 }
 0x9ed   : > { %v8558_v53 = vadd.f32 1.0, %v9923_v49  ;;  %v8168_v15 = vadd.f32 %v8101_v47, %v7976_v14  ;;  %vm8960_vm15 = vmor %vm8958_vm14, %vm8959_vm13 }
 0x9ee   : > { %v8955_v44 = vsub.f32 1.0, %v8954_v57  ;;  %v8395_v63 = vmul.f32 %v15160_v4, %v8359_v41 }
 0x9ef   : > { %9924 = vrcp.f32 %v8558_v53  ;;  %v8979_v30 = vand.u32 2147483648, %v8558_v53  ;;  %v8977_v43 = vand.u32 2147483647, %v8558_v53  ;;  %vm8973_vm5 = vweird.f32 %v8558_v53 }
 0x9f0   : > { %v8956_v32 = vmul.f32 %v9921_v58, %v8955_v44  ;;  %v15172_v60 = vadd.f32 %v15169_v8, %v8395_v63  ;;  %v7935_v48 = vpop.f32.mrf.mxu2 }
 0x9f1   : > { %v8292_v6 = vrot.slane %v7935_v48, 2  ;;  %v7777_v28 = vpop.f32.mrf.mxu1  ;;  %v8980_v35 = vor.u32 1.1754944e-38, %v8979_v30  ;;  %vm8978_vm7 = vcmp.eq.f32.partialorder %v8977_v43, 8.507059e+37 }
 0x9f2   : > { %v8957_v54 = vadd.f32 %v9921_v58, %v8956_v32  ;;  %v9498_v19 = vmul.f32 -1.442695, %v15172_v60  ;;  %v8102_v38 = vrot.slane %v7777_v28, 1 }
 0x9f3   : > { %v8293_v21 = vsel %vm1525_vm2, %v8290_v36, %v8292_v6 }
 0x9f4   : > { %v8961_v23 = vsel %vm8960_vm15, %v9921_v58, %v8957_v54  ;;  %9926 = vpow2.f32 %v9498_v19  ;;  %v8360_v45 = vadd.f32 %v8293_v21, %v8168_v15  ;;  %v15891_v15 = vld [vmem:[#allocation70_spill] sm:$0xff] }
 0x9f5   : > { %v9925_v26 = vpop.eup %9924  ;;  %v8966_v27 = vsel %vm8963_vm3, %v8965_v51, %v8961_v23 }
 0x9f6   : > { %v9069_v25 = vmul.f32 %v8966_v27, %v15133_v5  ;;  %v8969_v37 = vmul.f32 %v9925_v26, %v8558_v53  ;;  %v8396_v18 = vmul.f32 %v15160_v4, %v8360_v45  ;;  %vm8974_vm4 = vweird.f32 %v9925_v26 }
 0x9f7   : > { %vm8975_vm6 = vmor %vm8973_vm5, %vm8974_vm4 }
 0x9f8   : > { %v9135_v20 = vadd.f32 %v9103_v0, %v9069_v25  ;;  %v8970_v50 = vsub.f32 1.0, %v8969_v37  ;;  %v15180_v52 = vadd.f32 %v15169_v8, %v8396_v18  ;;  %v7938_v13 = vpop.f32.mrf.mxu2 }
 0x9f9   : > { %v7780_v5 = vpop.f32.mrf.mxu1  ;;  %v8294_v1 = vrot.slane %v7938_v13, 2 }
 0x9fa   : > { %v9927_v2 = vpop.eup %9926  ;;  %9168 = vst.msk [vmem:[%s14783_s10 + $0xd0] sm:$0xff] %vm489_vm0, %v9135_v20  ;;  %v8971_v16 = vmul.f32 %v9925_v26, %v8970_v50  ;;  %v9499_v29 = vmul.f32 -1.442695, %v15180_v52  ;;  %v8103_v11 = vrot.slane %v7780_v5, 1 }
 0x9fb   : > { %v8559_v62 = vadd.f32 1.0, %v9927_v2 }
 0x9fc   : > { %v8972_v39 = vadd.f32 %v9925_v26, %v8971_v16  ;;  %9928 = vpow2.f32 %v9499_v29  ;;  %v8104_v17 = vsel %vm1272_vm1, %v8102_v38, %v8103_v11 }
 0x9fd   : > { %9930 = vrcp.f32 %v8559_v62  ;;  %v8169_v58 = vadd.f32 %v8104_v17, %v7977_v42  ;;  %v8992_v24 = vand.u32 2147483647, %v8559_v62  ;;  %v8994_v59 = vand.u32 2147483648, %v8559_v62 }
 0x9fe   : > { %v8976_v3 = vsel %vm8975_vm6, %v9925_v26, %v8972_v39  ;;  %vm8988_vm9 = vweird.f32 %v8559_v62  ;;  %v9105_v26 = vld [vmem:[%s10391_s23 + $0xe0] sm:$0xff] }
 0x9ff   : > { %v8981_v34 = vsel %vm8978_vm7, %v8980_v35, %v8976_v3  ;;  %v8995_v19 = vor.u32 1.1754944e-38, %v8994_v59  ;;  %vm8993_vm11 = vcmp.eq.f32.partialorder %v8992_v24, 8.507059e+37 }
 0xa00   : > { %v9070_v55 = vmul.f32 %v8981_v34, %v15144_v22  ;;  %v7941_v7 = vpop.f32.mrf.mxu2 }
 0xa01   : > { %v8295_v36 = vrot.slane %v7941_v7, 2  ;;  %v7783_v9 = vpop.f32.mrf.mxu1 }
 0xa02   : > { %v9929_v10 = vpop.eup %9928  ;;  %v9136_v40 = vadd.f32 %v9104_v46, %v9070_v55  ;;  %v8105_v44 = vrot.slane %v7783_v9, 1 }
 0xa03   : > { %v9931_v33 = vpop.eup %9930  ;;  %v8560_v49 = vadd.f32 1.0, %v9929_v10  ;;  %v8296_v57 = vsel %vm1525_vm2, %v8294_v1, %v8295_v36  ;;  %v9107_v1 = vld [vmem:[%s10391_s23 + $0xf0] sm:$0xff] }
 0xa04   : > { %9169 = vst.msk [vmem:[%s14783_s10 + $0xd8] sm:$0xff] %vm489_vm0, %v9136_v40  ;;  %v8984_v41 = vmul.f32 %v9931_v33, %v8559_v62  ;;  %v8361_v53 = vadd.f32 %v8296_v57, %v8169_v58  ;;  %vm8989_vm8 = vweird.f32 %v9931_v33  ;;  %v8106_v47 = vsel %vm1272_vm1, %v8103_v11, %v8105_v44  ;;  %v9106_v62 = vld [vmem:[%s10391_s23 + $0xe8] sm:$0xff] }
 0xa05   : > { %9932 = vrcp.f32 %v8560_v49  ;;  %vm8990_vm10 = vmor %vm8988_vm9, %vm8989_vm8  ;;  %v8170_v28 = vadd.f32 %v8106_v47, %v15891_v15  ;;  %v9009_v37 = vand.u32 2147483648, %v8560_v49  ;;  %v9007_v13 = vand.u32 2147483647, %v8560_v49 }
 0xa06   : > { %v8985_v63 = vsub.f32 1.0, %v8984_v41  ;;  %v8397_v22 = vmul.f32 %v15160_v4, %v8361_v53 }
 0xa07   : > { %v9010_v43 = vor.u32 1.1754944e-38, %v9009_v37  ;;  %vm9008_vm13 = vcmp.eq.f32.partialorder %v9007_v13, 8.507059e+37 }
 0xa08   : > { %v8986_v31 = vmul.f32 %v9931_v33, %v8985_v63  ;;  %v15194_v14 = vadd.f32 %v15169_v8, %v8397_v22  ;;  %v7944_v32 = vpop.f32.mrf.mxu2  ;;  %v9108_v63 = vld [vmem:[%s10391_s23 + $0xf8] sm:$0xff] }
 0xa09   : > { %v8297_v61 = vrot.slane %v7944_v32, 2 }
 0xa0a   : > { %v8987_v48 = vadd.f32 %v9931_v33, %v8986_v31  ;;  %v9500_v6 = vmul.f32 -1.442695, %v15194_v14 }
 0xa0b   : > { %v9933_v54 = vpop.eup %9932  ;;  %v8298_v51 = vsel %vm1525_vm2, %v8295_v36, %v8297_v61  ;;  %vm9003_vm2 = vweird.f32 %v8560_v49 }
 0xa0c   : > { %v8991_v21 = vsel %vm8990_vm10, %v9931_v33, %v8987_v48  ;;  %v8999_v23 = vmul.f32 %v9933_v54, %v8560_v49  ;;  %9934 = vpow2.f32 %v9500_v6  ;;  %v8362_v27 = vadd.f32 %v8298_v51, %v8170_v28 }
 0xa0d   : > { %v8996_v45 = vsel %vm8993_vm11, %v8995_v19, %v8991_v21  ;;  %vm9004_vm1 = vweird.f32 %v9933_v54 }
 0xa0e   : > { %v9071_v0 = vmul.f32 %v8996_v45, %v15172_v60  ;;  %v9000_v25 = vsub.f32 1.0, %v8999_v23  ;;  %v8398_v18 = vmul.f32 %v15160_v4, %v8362_v27  ;;  %vm9005_vm12 = vmor %vm9003_vm2, %vm9004_vm1 }
 0xa10   : > { %v9137_v20 = vadd.f32 %v9105_v26, %v9071_v0  ;;  %v9001_v50 = vmul.f32 %v9933_v54, %v9000_v25  ;;  %v8434_v30 = vadd.f32 %v15169_v8, %v8398_v18 }
 0xa12   : > { %v9935_v2 = vpop.eup %9934  ;;  %9170 = vst.msk [vmem:[%s14783_s10 + $0xe0] sm:$0xff] %vm489_vm0, %v9137_v20  ;;  %v9002_v16 = vadd.f32 %v9933_v54, %v9001_v50  ;;  %v9501_v29 = vmul.f32 -1.442695, %v8434_v30 }
 0xa13   : > { %v8561_v60 = vadd.f32 1.0, %v9935_v2 }
 0xa14   : > { %v9006_v5 = vsel %vm9005_vm12, %v9933_v54, %v9002_v16 }
 0xa15   : > { %v9011_v4 = vsel %vm9008_vm13, %v9010_v43, %v9006_v5  ;;  %9936 = vrcp.f32 %v8561_v60  ;;  %v9024_v34 = vand.u32 2147483648, %v8561_v60  ;;  %v9022_v17 = vand.u32 2147483647, %v8561_v60 }
 0xa16   : > { %v9072_v11 = vmul.f32 %v9011_v4, %v15180_v52  ;;  %9938 = vpow2.f32 %v9501_v29  ;;  %vm9018_vm15 = vweird.f32 %v8561_v60 }
 0xa17   : > { %v9025_v52 = vor.u32 1.1754944e-38, %v9024_v34  ;;  %vm9023_vm4 = vcmp.eq.f32.partialorder %v9022_v17, 8.507059e+37 }
 0xa18   : > { %v9138_v39 = vadd.f32 %v9106_v62, %v9072_v11 }
 0xa1a   : > { %9171 = vst.msk [vmem:[%s14783_s10 + $0xe8] sm:$0xff] %vm489_vm0, %v9138_v39 }
 0xa1b   : > { %v9937_v8 = vpop.eup %9936 }
 0xa1c   : > { %v9939_v12 = vpop.eup %9938  ;;  %v9014_v35 = vmul.f32 %v9937_v8, %v8561_v60  ;;  %vm9019_vm14 = vweird.f32 %v9937_v8 }
 0xa1d   : > { %v8562_v38 = vadd.f32 1.0, %v9939_v12  ;;  %vm9020_vm3 = vmor %vm9018_vm15, %vm9019_vm14 }
 0xa1e   : > { %v9015_v3 = vsub.f32 1.0, %v9014_v35 }
 0xa1f   : > { %9940 = vrcp.f32 %v8562_v38  ;;  %v9039_v9 = vand.u32 2147483648, %v8562_v38  ;;  %v9037_v49 = vand.u32 2147483647, %v8562_v38  ;;  %vm9033_vm6 = vweird.f32 %v8562_v38 }
 0xa20   : > { %v9016_v46 = vmul.f32 %v9937_v8, %v9015_v3 }
 0xa21   : > { %v9040_v41 = vor.u32 1.1754944e-38, %v9039_v9  ;;  %vm9038_vm8 = vcmp.eq.f32.partialorder %v9037_v49, 8.507059e+37 }
 0xa22   : > { %v9017_v56 = vadd.f32 %v9937_v8, %v9016_v46 }
 0xa24   : > { %v9021_v42 = vsel %vm9020_vm3, %v9937_v8, %v9017_v56 }
 0xa25   : > { %v9941_v55 = vpop.eup %9940  ;;  %v9026_v7 = vsel %vm9023_vm4, %v9025_v52, %v9021_v42 }
 0xa26   : > { %v9073_v36 = vmul.f32 %v9026_v7, %v15194_v14  ;;  %v9029_v10 = vmul.f32 %v9941_v55, %v8562_v38  ;;  %vm9034_vm5 = vweird.f32 %v9941_v55 }
 0xa27   : > { %vm9035_vm7 = vmor %vm9033_vm6, %vm9034_vm5 }
 0xa28   : > { %v9139_v40 = vadd.f32 %v9107_v1, %v9073_v36  ;;  %v9030_v58 = vsub.f32 1.0, %v9029_v10 }
 0xa2a   : > { %9172 = vst.msk [vmem:[%s14783_s10 + $0xf0] sm:$0xff] %vm489_vm0, %v9139_v40  ;;  %v9031_v33 = vmul.f32 %v9941_v55, %v9030_v58 }
 0xa2c   : > { %v9032_v57 = vadd.f32 %v9941_v55, %v9031_v33 }
 0xa2e   : > { %v9036_v53 = vsel %vm9035_vm7, %v9941_v55, %v9032_v57 }
 0xa2f   : > { %v9041_v44 = vsel %vm9038_vm8, %v9040_v41, %v9036_v53 }
 0xa30   : > { %v9074_v22 = vmul.f32 %v9041_v44, %v8434_v30 }
 0xa32   : > { %v9140_v24 = vadd.f32 %v9108_v63, %v9074_v22 }
 0xa34   : > { %9173 = vst.msk [vmem:[%s14783_s10 + $0xf8] sm:$0xff] %vm489_vm0, %v9140_v24 }
 0xa35 PF: > { %s19_s26 = sadd.s32 1, %s10214_s26   ;;  %s15892_s24 = smov %s10210_s25 }
 0xa36   : > { %p16_p8 = scmp.ge.s32.totalorder %s19_s26, 4   ;;  %s15893_s25 = smov %s15895_s28 }
 0xa38   :  { %18 = sbr.rel (!%p16_p8) target bundleno = 3 (0x3), region = 107 }
 0xa3d   :  { %9206 = vsyncpa [#allocation5], 1 }
 0xa3e   :  { %9208 = vsyncpa [#allocation5 + $0x1], 1 }
 0xa3f   :  { %9209 = vsyncpa [#allocation7], 1 }

</bundles_post_ra>
